<compile_context>
chip_gen: v5e
topology: v5e:2x2
jax: 0.10.0
libtpu: 0.0.40
codegen_flags: <defaults>
</compile_context>

<pallas_src>
import functools
import math

import jax
import jax.numpy as jnp
from jax.experimental import pallas as pl
from jax.experimental.pallas import tpu as pltpu


_VMEM_LIMIT = 48 * 1024 * 1024  # safe on v5e/v6e (128 MiB) and v7x (64 MiB)


def _cparams(dim_sem):
    return pltpu.CompilerParams(dimension_semantics=dim_sem,
                                vmem_limit_bytes=_VMEM_LIMIT)


# ----------------------------------------------------------------------------
# RMSNorm (row-tiled, f32 stats, bf16 output for the MXU)
# ----------------------------------------------------------------------------
def _rmsnorm_kernel(x_ref, w_ref, o_ref, *, eps):
    x = x_ref[...]                                    # [tm, H] f32
    var = jnp.mean(x * x, axis=-1, keepdims=True)
    o_ref[...] = (x * jax.lax.rsqrt(var + eps) * w_ref[...]).astype(o_ref.dtype)


def _rmsnorm(x, w, *, eps, out_dtype=jnp.bfloat16, tm=128):
    M, H = x.shape
    tm = min(tm, M)
    assert M % tm == 0
    return pl.pallas_call(
        functools.partial(_rmsnorm_kernel, eps=eps),
        out_shape=jax.ShapeDtypeStruct((M, H), out_dtype),
        grid=(M // tm,),
        in_specs=[pl.BlockSpec((tm, H), lambda i: (i, 0)),
                  pl.BlockSpec((1, H), lambda i: (0, 0))],
        out_specs=pl.BlockSpec((tm, H), lambda i: (i, 0)),
        compiler_params=_cparams(("parallel",)),
    )(x, w)


# ----------------------------------------------------------------------------
# Streamed / tiled matmul (bf16 in, f32 accumulate), optional fused residual.
# Weights are pre-transposed to [K, N] by the wrapper (no in-kernel .T).
# ----------------------------------------------------------------------------
def _matmul_kernel(x_ref, w_ref, o_ref, acc_ref):
    @pl.when(pl.program_id(2) == 0)
    def _():
        acc_ref[...] = jnp.zeros(acc_ref.shape, jnp.float32)

    acc_ref[...] += jnp.dot(x_ref[...], w_ref[...],
                            preferred_element_type=jnp.float32)

    @pl.when(pl.program_id(2) == pl.num_programs(2) - 1)
    def _():
        o_ref[...] = acc_ref[...].astype(o_ref.dtype)


def _matmul_res_kernel(x_ref, w_ref, r_ref, o_ref, acc_ref):
    @pl.when(pl.program_id(2) == 0)
    def _():
        acc_ref[...] = jnp.zeros(acc_ref.shape, jnp.float32)

    acc_ref[...] += jnp.dot(x_ref[...], w_ref[...],
                            preferred_element_type=jnp.float32)

    @pl.when(pl.program_id(2) == pl.num_programs(2) - 1)
    def _():
        o_ref[...] = (acc_ref[...] + r_ref[...].astype(jnp.float32)).astype(o_ref.dtype)


def _tiled_matmul(x, w, residual=None, *, out_dtype, tm=128, tn=256, tk=128):
    # NOTE: at real Baichuan2 sizes (H=4096/5120, I~11008) use 256/512-wide
    # N/K tiles on v6e/v7x; keep the working set < ~48 MiB on v7x.
    M, K = x.shape
    K2, N = w.shape
    assert K == K2
    tm, tn, tk = min(tm, M), min(tn, N), min(tk, K)
    assert M % tm == 0 and N % tn == 0 and K % tk == 0
    grid = (M // tm, N // tn, K // tk)
    x_spec = pl.BlockSpec((tm, tk), lambda i, j, k: (i, k))
    w_spec = pl.BlockSpec((tk, tn), lambda i, j, k: (k, j))
    o_spec = pl.BlockSpec((tm, tn), lambda i, j, k: (i, j))
    scratch = [pltpu.VMEM((tm, tn), jnp.float32)]
    cp = _cparams(("parallel", "parallel", "arbitrary"))
    if residual is None:
        return pl.pallas_call(
            _matmul_kernel,
            out_shape=jax.ShapeDtypeStruct((M, N), out_dtype),
            grid=grid, in_specs=[x_spec, w_spec], out_specs=o_spec,
            scratch_shapes=scratch, compiler_params=cp,
        )(x, w)
    r_spec = pl.BlockSpec((tm, tn), lambda i, j, k: (i, j))
    return pl.pallas_call(
        _matmul_res_kernel,
        out_shape=jax.ShapeDtypeStruct((M, N), out_dtype),
        grid=grid, in_specs=[x_spec, w_spec, r_spec], out_specs=o_spec,
        scratch_shapes=scratch, compiler_params=cp,
    )(x, w, residual)


# ----------------------------------------------------------------------------
# Fused gate/up projection + SiLU gating (two f32 accumulators).
# ----------------------------------------------------------------------------
def _gated_mlp_kernel(x_ref, wg_ref, wu_ref, o_ref, accg_ref, accu_ref):
    @pl.when(pl.program_id(2) == 0)
    def _():
        accg_ref[...] = jnp.zeros(accg_ref.shape, jnp.float32)
        accu_ref[...] = jnp.zeros(accu_ref.shape, jnp.float32)

    xv = x_ref[...]
    accg_ref[...] += jnp.dot(xv, wg_ref[...], preferred_element_type=jnp.float32)
    accu_ref[...] += jnp.dot(xv, wu_ref[...], preferred_element_type=jnp.float32)

    @pl.when(pl.program_id(2) == pl.num_programs(2) - 1)
    def _():
        g = accg_ref[...]
        u = accu_ref[...]
        o_ref[...] = (g * jax.nn.sigmoid(g) * u).astype(o_ref.dtype)


def _gated_mlp(x, wg, wu, *, out_dtype=jnp.bfloat16, tm=128, tn=256, tk=128):
    M, K = x.shape
    K2, N = wg.shape
    assert wg.shape == wu.shape and K2 == K
    tm, tn, tk = min(tm, M), min(tn, N), min(tk, K)
    assert M % tm == 0 and N % tn == 0 and K % tk == 0
    grid = (M // tm, N // tn, K // tk)
    return pl.pallas_call(
        _gated_mlp_kernel,
        out_shape=jax.ShapeDtypeStruct((M, N), out_dtype),
        grid=grid,
        in_specs=[pl.BlockSpec((tm, tk), lambda i, j, k: (i, k)),
                  pl.BlockSpec((tk, tn), lambda i, j, k: (k, j)),
                  pl.BlockSpec((tk, tn), lambda i, j, k: (k, j))],
        out_specs=pl.BlockSpec((tm, tn), lambda i, j, k: (i, j)),
        scratch_shapes=[pltpu.VMEM((tm, tn), jnp.float32),
                        pltpu.VMEM((tm, tn), jnp.float32)],
        compiler_params=_cparams(("parallel", "parallel", "arbitrary")),
    )(x, wg, wu)


# ----------------------------------------------------------------------------
# Flash attention: grid (B*NH, q tiles, kv tiles), online softmax, in-kernel
# RoPE (pltpu.roll + sign-folded sin) and iota-based causal masking.
# ----------------------------------------------------------------------------
def _flash_attn_kernel(q_ref, k_ref, v_ref, cq_ref, sq_ref, ck_ref, sk_ref,
                       o_ref, m_ref, l_ref, acc_ref, *, blk_q, blk_k, scale):
    qi = pl.program_id(1)
    ki = pl.program_id(2)

    @pl.when(ki == 0)
    def _():
        m_ref[...] = jnp.full(m_ref.shape, -1e30, jnp.float32)
        l_ref[...] = jnp.zeros(l_ref.shape, jnp.float32)
        acc_ref[...] = jnp.zeros(acc_ref.shape, jnp.float32)

    # Skip kv tiles that lie entirely above the causal diagonal.
    @pl.when(ki * blk_k < (qi + 1) * blk_q)
    def _():
        q = q_ref[0].astype(jnp.float32)              # [blk_q, D]
        k = k_ref[0].astype(jnp.float32)              # [blk_k, D]
        d = q.shape[-1]

        # RoPE in f32: rotate_half(x) == roll(x, D/2) * sign; sign is folded
        # into the sin table, so the rotation is a single lane-roll (XLU).
        q = q * cq_ref[...] + pltpu.roll(q, d // 2, 1) * sq_ref[...]
        k = k * ck_ref[...] + pltpu.roll(k, d // 2, 1) * sk_ref[...]

        s = jax.lax.dot_general(
            q.astype(jnp.bfloat16), k.astype(jnp.bfloat16),
            dimension_numbers=(((1,), (1,)), ((), ())),
            preferred_element_type=jnp.float32) * scale      # [blk_q, blk_k]

        row = qi * blk_q + jax.lax.broadcasted_iota(jnp.int32, s.shape, 0)
        col = ki * blk_k + jax.lax.broadcasted_iota(jnp.int32, s.shape, 1)
        s = jnp.where(col <= row, s, -1e30)

        m_prev = m_ref[...]
        m_new = jnp.maximum(m_prev, jnp.max(s, axis=-1, keepdims=True))
        alpha = jnp.exp(m_prev - m_new)
        p = jnp.exp(s - m_new)
        l_ref[...] = alpha * l_ref[...] + jnp.sum(p, axis=-1, keepdims=True)
        acc_ref[...] = alpha * acc_ref[...] + jnp.dot(
            p.astype(jnp.bfloat16), v_ref[0].astype(jnp.bfloat16),
            preferred_element_type=jnp.float32)
        m_ref[...] = m_new

    @pl.when(ki == pl.num_programs(2) - 1)
    def _():
        o_ref[0] = (acc_ref[...] * pl.reciprocal(l_ref[...], approx=True)
                    ).astype(o_ref.dtype)


def _flash_attention(q, k, v, cos, sin_signed, *, scale,
                     blk_q=64, blk_k=64, out_dtype=jnp.bfloat16):
    BH, S, D = q.shape
    blk_q, blk_k = min(blk_q, S), min(blk_k, S)
    assert S % blk_q == 0 and S % blk_k == 0
    grid = (BH, S // blk_q, S // blk_k)
    kernel = functools.partial(_flash_attn_kernel,
                               blk_q=blk_q, blk_k=blk_k, scale=scale)
    q_spec = pl.BlockSpec((1, blk_q, D), lambda h, i, j: (h, i, 0))
    kv_spec = pl.BlockSpec((1, blk_k, D), lambda h, i, j: (h, j, 0))
    cq_spec = pl.BlockSpec((blk_q, D), lambda h, i, j: (i, 0))
    ck_spec = pl.BlockSpec((blk_k, D), lambda h, i, j: (j, 0))
    return pl.pallas_call(
        kernel,
        out_shape=jax.ShapeDtypeStruct((BH, S, D), out_dtype),
        grid=grid,
        in_specs=[q_spec, kv_spec, kv_spec, cq_spec, cq_spec, ck_spec, ck_spec],
        out_specs=pl.BlockSpec((1, blk_q, D), lambda h, i, j: (h, i, 0)),
        scratch_shapes=[pltpu.VMEM((blk_q, 1), jnp.float32),
                        pltpu.VMEM((blk_q, 1), jnp.float32),
                        pltpu.VMEM((blk_q, D), jnp.float32)],
        compiler_params=_cparams(("parallel", "parallel", "arbitrary")),
    )(q, k, v, cos, sin_signed, cos, sin_signed)


# ----------------------------------------------------------------------------
# Full decoder layer.
# ----------------------------------------------------------------------------
def decoder_layer(x, params, *, num_heads, eps=1e-6):
    B, S, H = x.shape
    D = H // num_heads
    M = B * S

    # --- one-time weight prep (in practice folded into checkpoint loading) ---
    wpack_t = params["w_pack"].T.astype(jnp.bfloat16)   # [H, 3H]
    wo_t = params["w_o"].T.astype(jnp.bfloat16)         # [H, H]
    wg_t = params["w_gate"].T.astype(jnp.bfloat16)      # [H, I]
    wu_t = params["w_up"].T.astype(jnp.bfloat16)        # [H, I]
    wd_t = params["w_down"].T.astype(jnp.bfloat16)      # [I, H]
    ln1 = params["ln1"].reshape(1, H).astype(jnp.float32)
    ln2 = params["ln2"].reshape(1, H).astype(jnp.float32)

    # --- RoPE tables; fold rotate_half's sign into sin so the kernel rolls ---
    inv_freq = 1.0 / (10000.0 ** (jnp.arange(0, D, 2, dtype=jnp.float32) / D))
    t = jnp.arange(S, dtype=jnp.float32)
    freqs = jnp.outer(t, inv_freq)
    emb = jnp.concatenate([freqs, freqs], axis=-1)
    cos = jnp.cos(emb)                                   # [S, D]
    sign = jnp.concatenate([-jnp.ones((1, D // 2), jnp.float32),
                            jnp.ones((1, D // 2), jnp.float32)], axis=-1)
    sin_signed = jnp.sin(emb) * sign                     # [S, D]

    x2 = x.astype(jnp.float32).reshape(M, H)             # residual 1 (f32)

    # 1) input RMSNorm (bf16 out for the MXU)
    xn = _rmsnorm(x2, ln1, eps=eps)
    # 2) packed QKV projection (streamed/tiled, bf16 MXU, f32 accum)
    qkv = _tiled_matmul(xn, wpack_t, out_dtype=jnp.float32)   # [M, 3H] f32

    def to_heads(a):                                     # [M, H] -> [B*NH, S, D]
        return (a.reshape(B, S, num_heads, D)
                 .transpose(0, 2, 1, 3)
                 .reshape(B * num_heads, S, D))

    q = to_heads(qkv[:, 0:H])
    k = to_heads(qkv[:, H:2 * H])
    v = to_heads(qkv[:, 2 * H:3 * H])

    # 3) flash attention with in-kernel RoPE + iota causal mask
    attn = _flash_attention(q, k, v, cos, sin_signed, scale=1.0 / math.sqrt(D))
    attn2d = (attn.reshape(B, num_heads, S, D)
                  .transpose(0, 2, 1, 3)
                  .reshape(M, H))                        # [M, H] bf16

    # 4) o_proj with fused residual add
    h1 = _tiled_matmul(attn2d, wo_t, residual=x2, out_dtype=jnp.float32)
    # 5) post-attention RMSNorm
    h2 = _rmsnorm(h1, ln2, eps=eps)
    # 6) fused gate/up + SiLU gating
    act = _gated_mlp(h2, wg_t, wu_t)                     # [M, I] bf16
    # 7) down_proj with fused residual add
    out = _tiled_matmul(act, wd_t, residual=h1, out_dtype=jnp.float32)
    return out.reshape(B, S, H)


# ----------------------------------------------------------------------------
# Pure-JAX f32 reference (mirrors the PyTorch forward) for a sanity check.
# ----------------------------------------------------------------------------
def decoder_layer_ref(x, params, *, num_heads, eps=1e-6):
    B, S, H = x.shape
    D = H // num_heads

    inv_freq = 1.0 / (10000.0 ** (jnp.arange(0, D, 2, dtype=jnp.float32) / D))
    t = jnp.arange(S, dtype=jnp.float32)
    freqs = jnp.outer(t, inv_freq)
    emb = jnp.concatenate([freqs, freqs], axis=-1)
    cos, sin = jnp.cos(emb), jnp.sin(emb)                # [S, D]

    def rmsnorm(h, w):
        var = jnp.mean(h * h, axis=-1, keepdims=True)
        return h * jax.lax.rsqrt(var + eps) * w

    h = rmsnorm(x, params["ln1"])
    proj = jnp.einsum("bsh,oh->bso", h, params["w_pack"])
    q, k, v = jnp.split(proj, 3, axis=-1)

    def split_heads(a):                                  # [B,S,H] -> [B,NH,S,D]
        return a.reshape(B, S, num_heads, D).transpose(0, 2, 1, 3)

    q, k, v = split_heads(q), split_heads(k), split_heads(v)

    def rope(a):
        a1, a2 = a[..., : D // 2], a[..., D // 2:]
        rot = jnp.concatenate([-a2, a1], axis=-1)
        return a * cos[None, None] + rot * sin[None, None]

    q, k = rope(q), rope(k)
    scores = jnp.einsum("bhqd,bhkd->bhqk", q, k) / jnp.sqrt(jnp.float32(D))
    causal = jnp.tril(jnp.ones((S, S), dtype=bool))
    scores = jnp.where(causal[None, None], scores, -1e9)
    p = jax.nn.softmax(scores, axis=-1)
    attn = jnp.einsum("bhqk,bhkd->bhqd", p, v)
    attn = attn.transpose(0, 2, 1, 3).reshape(B, S, H)
    attn = jnp.einsum("bsh,oh->bso", attn, params["w_o"])

    h1 = x + attn
    h2 = rmsnorm(h1, params["ln2"])
    g = jnp.einsum("bsh,ih->bsi", h2, params["w_gate"])
    u = jnp.einsum("bsh,ih->bsi", h2, params["w_up"])
    d = jnp.einsum("bsi,hi->bsh", g * jax.nn.sigmoid(g) * u, params["w_down"])
    return h1 + d


# ----------------------------------------------------------------------------
if __name__ == "__main__":
    # Small but tile-aligned shapes: head_dim = 128 (as in real Baichuan2),
    # seq 128, hidden 256, intermediate 512.
    B, S, H = 2, 128, 256
    NUM_HEADS = 2
    INTERMEDIATE = 512

    key = jax.random.PRNGKey(0)
    kx, k1, k2, k3, k4, k5 = jax.random.split(key, 6)

    x = jax.random.normal(kx, (B, S, H), dtype=jnp.float32)
    params = {
        "w_pack": 0.02 * jax.random.normal(k1, (3 * H, H), dtype=jnp.float32),
        "w_o":    0.02 * jax.random.normal(k2, (H, H), dtype=jnp.float32),
        "w_gate": 0.02 * jax.random.normal(k3, (INTERMEDIATE, H), dtype=jnp.float32),
        "w_up":   0.02 * jax.random.normal(k4, (INTERMEDIATE, H), dtype=jnp.float32),
        "w_down": 0.02 * jax.random.normal(k5, (H, INTERMEDIATE), dtype=jnp.float32),
        "ln1":    jnp.ones((H,), dtype=jnp.float32),
        "ln2":    jnp.ones((H,), dtype=jnp.float32),
    }

    fwd = jax.jit(functools.partial(decoder_layer, num_heads=NUM_HEADS))
    out = jax.block_until_ready(fwd(x, params))

    ref = jax.block_until_ready(
        decoder_layer_ref(x, params, num_heads=NUM_HEADS))

    assert out.shape == (B, S, H)
    assert bool(jnp.all(jnp.isfinite(out)))
    max_err = float(jnp.max(jnp.abs(out.astype(jnp.float32) - ref)))
    assert bool(jnp.allclose(out.astype(jnp.float32), ref,
                             atol=5e-2, rtol=5e-2)), max_err

    print("KERNEL_OK")
</pallas_src>

<mosaic_0001>
module attributes {stable_mosaic.version = 11 : i64} {
  func.func @_matmul_kernel(%arg0: i32, %arg1: i32, %arg2: i32, %arg3: memref<128x128xbf16, #tpu.memory_space<vmem>>, %arg4: memref<128x256xbf16, #tpu.memory_space<vmem>>, %arg5: memref<128x256xf32, #tpu.memory_space<vmem>>, %arg6: memref<128x256xf32, #tpu.memory_space<vmem>>) attributes {dimension_semantics = [#tpu.dimension_semantics<parallel>, #tpu.dimension_semantics<parallel>, #tpu.dimension_semantics<arbitrary>], iteration_bounds = array<i64: 2, 3, 2>, scalar_prefetch = 0 : i64, scratch_operands = 1 : i64, tpu.core_type = #tpu.core_type<tc>, window_params = [{transform_indices = @transform_0, window_bounds = array<i64: 128, 128>}, {transform_indices = @transform_1, window_bounds = array<i64: 128, 256>}, {transform_indices = @transform_2, window_bounds = array<i64: 128, 256>}]} {
    %c0_i32 = arith.constant 0 : i32
    %0 = arith.cmpi eq, %arg2, %c0_i32 : i32
    %1 = arith.extui %0 : i1 to i32
    %c0_i32_0 = arith.constant 0 : i32
    %2 = arith.cmpi ne, %1, %c0_i32_0 : i32
    scf.if %2 {
      %cst_9 = arith.constant 0.000000e+00 : f32
      %12 = vector.broadcast %cst_9 : f32 to vector<128x256xf32>
      %c0_10 = arith.constant 0 : index
      %c0_11 = arith.constant 0 : index
      %13 = vector.load %arg6[%c0_10, %c0_11] : memref<128x256xf32, #tpu.memory_space<vmem>>, vector<128x256xf32>
      tpu.vector_store %arg6[%c0_10, %c0_11], %12 {strides = array<i32>} : memref<128x256xf32, #tpu.memory_space<vmem>>, vector<128x256xf32>,
    } else {
    }
    %c0 = arith.constant 0 : index
    %c0_1 = arith.constant 0 : index
    %3 = vector.load %arg6[%c0, %c0_1] : memref<128x256xf32, #tpu.memory_space<vmem>>, vector<128x256xf32>
    %c0_2 = arith.constant 0 : index
    %c0_3 = arith.constant 0 : index
    %4 = vector.load %arg3[%c0_2, %c0_3] : memref<128x128xbf16, #tpu.memory_space<vmem>>, vector<128x128xbf16>
    %c0_4 = arith.constant 0 : index
    %c0_5 = arith.constant 0 : index
    %5 = vector.load %arg4[%c0_4, %c0_5] : memref<128x256xbf16, #tpu.memory_space<vmem>>, vector<128x256xbf16>
    %cst = arith.constant dense<0.000000e+00> : vector<128x256xf32>
    %6 = tpu.matmul %4, %5, %cst {dimension_numbers = #tpu.dot_dimension_numbers<[1], [0], [0], [1], [0, 0, 1, 1], [], []>} : vector<128x128xbf16>, vector<128x256xbf16>, vector<128x256xf32> -> vector<128x256xf32>
    %7 = arith.addf %3, %6 : vector<128x256xf32>
    %c0_6 = arith.constant 0 : index
    %c0_7 = arith.constant 0 : index
    %8 = vector.load %arg6[%c0_6, %c0_7] : memref<128x256xf32, #tpu.memory_space<vmem>>, vector<128x256xf32>
    tpu.vector_store %arg6[%c0_6, %c0_7], %7 {strides = array<i32>} : memref<128x256xf32, #tpu.memory_space<vmem>>, vector<128x256xf32>,
    %c1_i32 = arith.constant 1 : i32
    %9 = arith.cmpi eq, %arg2, %c1_i32 : i32
    %10 = arith.extui %9 : i1 to i32
    %c0_i32_8 = arith.constant 0 : i32
    %11 = arith.cmpi ne, %10, %c0_i32_8 : i32
    scf.if %11 {
      %c0_9 = arith.constant 0 : index
      %c0_10 = arith.constant 0 : index
      %12 = vector.load %arg6[%c0_9, %c0_10] : memref<128x256xf32, #tpu.memory_space<vmem>>, vector<128x256xf32>
      %c0_11 = arith.constant 0 : index
      %c0_12 = arith.constant 0 : index
      %13 = vector.load %arg5[%c0_11, %c0_12] : memref<128x256xf32, #tpu.memory_space<vmem>>, vector<128x256xf32>
      tpu.vector_store %arg5[%c0_11, %c0_12], %12 {strides = array<i32>} : memref<128x256xf32, #tpu.memory_space<vmem>>, vector<128x256xf32>,
    } else {
    }
    return
  }
  func.func @transform_0(%arg0: i32, %arg1: i32, %arg2: i32) -> (i32, i32) {
    %c0_i32 = arith.constant 0 : i32
    return %arg0, %arg2 : i32, i32
  }
  func.func @transform_1(%arg0: i32, %arg1: i32, %arg2: i32) -> (i32, i32) {
    %c0_i32 = arith.constant 0 : i32
    return %arg2, %arg1 : i32, i32
  }
  func.func @transform_2(%arg0: i32, %arg1: i32, %arg2: i32) -> (i32, i32) {
    %c0_i32 = arith.constant 0 : i32
    return %arg0, %arg1 : i32, i32
  }
}

module attributes {stable_mosaic.version = 11 : i64} {
  func.func @_rmsnorm_kernel(%arg0: i32, %arg1: memref<128x256xf32, #tpu.memory_space<vmem>>, %arg2: memref<1x256xf32, #tpu.memory_space<vmem>>, %arg3: memref<128x256xbf16, #tpu.memory_space<vmem>>) attributes {dimension_semantics = [#tpu.dimension_semantics<parallel>], iteration_bounds = array<i64: 2>, scalar_prefetch = 0 : i64, scratch_operands = 0 : i64, tpu.core_type = #tpu.core_type<tc>, window_params = [{transform_indices = @transform_0, window_bounds = array<i64: 128, 256>}, {pipeline_mode = #tpu.pipeline_mode<synchronous>, transform_indices = @transform_1, window_bounds = array<i64: 1, 256>}, {transform_indices = @transform_2, window_bounds = array<i64: 128, 256>}]} {
    %c0 = arith.constant 0 : index
    %c0_0 = arith.constant 0 : index
    %0 = vector.load %arg1[%c0, %c0_0] : memref<128x256xf32, #tpu.memory_space<vmem>>, vector<128x256xf32>
    %1 = arith.mulf %0, %0 : vector<128x256xf32>
    %cst = arith.constant dense<0.000000e+00> : vector<128xf32>
    %2 = vector.multi_reduction <add>, %1, %cst [1] : vector<128x256xf32> to vector<128xf32>
    %3 = vector.shape_cast %2 : vector<128xf32> to vector<128x1xf32>
    %cst_1 = arith.constant 2.560000e+02 : f32
    %4 = vector.broadcast %cst_1 : f32 to vector<128x1xf32>
    %5 = arith.divf %3, %4 : vector<128x1xf32>
    %cst_2 = arith.constant 9.99999997E-7 : f32
    %6 = vector.broadcast %cst_2 : f32 to vector<128x1xf32>
    %7 = arith.addf %5, %6 : vector<128x1xf32>
    %8 = math.rsqrt %7 : vector<128x1xf32>
    %9 = vector.broadcast %8 : vector<128x1xf32> to vector<128x256xf32>
    %10 = arith.mulf %0, %9 : vector<128x256xf32>
    %c0_3 = arith.constant 0 : index
    %c0_4 = arith.constant 0 : index
    %11 = vector.load %arg2[%c0_3, %c0_4] : memref<1x256xf32, #tpu.memory_space<vmem>>, vector<1x256xf32>
    %12 = vector.broadcast %11 : vector<1x256xf32> to vector<128x256xf32>
    %13 = arith.mulf %10, %12 : vector<128x256xf32>
    %14 = arith.truncf %13 : vector<128x256xf32> to vector<128x256xbf16>
    %c0_5 = arith.constant 0 : index
    %c0_6 = arith.constant 0 : index
    %15 = vector.load %arg3[%c0_5, %c0_6] : memref<128x256xbf16, #tpu.memory_space<vmem>>, vector<128x256xbf16>
    tpu.vector_store %arg3[%c0_5, %c0_6], %14 {strides = array<i32>} : memref<128x256xbf16, #tpu.memory_space<vmem>>, vector<128x256xbf16>,
    return
  }
  func.func @transform_0(%arg0: i32) -> (i32, i32) {
    %c0_i32 = arith.constant 0 : i32
    %c0_i32_0 = arith.constant 0 : i32
    return %arg0, %c0_i32 : i32, i32
  }
  func.func @transform_1(%arg0: i32) -> (i32, i32) {
    %c0_i32 = arith.constant 0 : i32
    %c0_i32_0 = arith.constant 0 : i32
    %c0_i32_1 = arith.constant 0 : i32
    return %c0_i32, %c0_i32_0 : i32, i32
  }
  func.func @transform_2(%arg0: i32) -> (i32, i32) {
    %c0_i32 = arith.constant 0 : i32
    %c0_i32_0 = arith.constant 0 : i32
    return %arg0, %c0_i32 : i32, i32
  }
}

module attributes {stable_mosaic.version = 11 : i64} {
  func.func @_flash_attn_kernel(%arg0: i32, %arg1: i32, %arg2: i32, %arg3: memref<1x64x128xf32, #tpu.memory_space<vmem>>, %arg4: memref<1x64x128xf32, #tpu.memory_space<vmem>>, %arg5: memref<1x64x128xf32, #tpu.memory_space<vmem>>, %arg6: memref<64x128xf32, #tpu.memory_space<vmem>>, %arg7: memref<64x128xf32, #tpu.memory_space<vmem>>, %arg8: memref<64x128xf32, #tpu.memory_space<vmem>>, %arg9: memref<64x128xf32, #tpu.memory_space<vmem>>, %arg10: memref<1x64x128xbf16, #tpu.memory_space<vmem>>, %arg11: memref<64x1xf32, #tpu.memory_space<vmem>>, %arg12: memref<64x1xf32, #tpu.memory_space<vmem>>, %arg13: memref<64x128xf32, #tpu.memory_space<vmem>>) attributes {dimension_semantics = [#tpu.dimension_semantics<parallel>, #tpu.dimension_semantics<parallel>, #tpu.dimension_semantics<arbitrary>], iteration_bounds = array<i64: 4, 2, 2>, scalar_prefetch = 0 : i64, scratch_operands = 3 : i64, tpu.core_type = #tpu.core_type<tc>, window_params = [{transform_indices = @transform_0, window_bounds = array<i64: 1, 64, 128>}, {transform_indices = @transform_1, window_bounds = array<i64: 1, 64, 128>}, {transform_indices = @transform_2, window_bounds = array<i64: 1, 64, 128>}, {transform_indices = @transform_3, window_bounds = array<i64: 64, 128>}, {transform_indices = @transform_4, window_bounds = array<i64: 64, 128>}, {transform_indices = @transform_5, window_bounds = array<i64: 64, 128>}, {transform_indices = @transform_6, window_bounds = array<i64: 64, 128>}, {transform_indices = @transform_7, window_bounds = array<i64: 1, 64, 128>}]} {
    %c0_i32 = arith.constant 0 : i32
    %0 = arith.cmpi eq, %arg2, %c0_i32 : i32
    %1 = arith.extui %0 : i1 to i32
    %c0_i32_0 = arith.constant 0 : i32
    %2 = arith.cmpi ne, %1, %c0_i32_0 : i32
    scf.if %2 {
      %cst = arith.constant -1.000000e+30 : f32
      %12 = vector.broadcast %cst : f32 to vector<64x1xf32>
      %c0 = arith.constant 0 : index
      %c0_5 = arith.constant 0 : index
      %13 = vector.load %arg11[%c0, %c0_5] : memref<64x1xf32, #tpu.memory_space<vmem>>, vector<64x1xf32>
      tpu.vector_store %arg11[%c0, %c0_5], %12 {strides = array<i32>} : memref<64x1xf32, #tpu.memory_space<vmem>>, vector<64x1xf32>,
      %cst_6 = arith.constant 0.000000e+00 : f32
      %14 = vector.broadcast %cst_6 : f32 to vector<64x1xf32>
      %c0_7 = arith.constant 0 : index
      %c0_8 = arith.constant 0 : index
      %15 = vector.load %arg12[%c0_7, %c0_8] : memref<64x1xf32, #tpu.memory_space<vmem>>, vector<64x1xf32>
      tpu.vector_store %arg12[%c0_7, %c0_8], %14 {strides = array<i32>} : memref<64x1xf32, #tpu.memory_space<vmem>>, vector<64x1xf32>,
      %cst_9 = arith.constant 0.000000e+00 : f32
      %16 = vector.broadcast %cst_9 : f32 to vector<64x128xf32>
      %c0_10 = arith.constant 0 : index
      %c0_11 = arith.constant 0 : index
      %17 = vector.load %arg13[%c0_10, %c0_11] : memref<64x128xf32, #tpu.memory_space<vmem>>, vector<64x128xf32>
      tpu.vector_store %arg13[%c0_10, %c0_11], %16 {strides = array<i32>} : memref<64x128xf32, #tpu.memory_space<vmem>>, vector<64x128xf32>,
    } else {
    }
    %c64_i32 = arith.constant 64 : i32
    %3 = arith.muli %arg2, %c64_i32 : i32
    %c1_i32 = arith.constant 1 : i32
    %4 = arith.addi %arg1, %c1_i32 : i32
    %c64_i32_1 = arith.constant 64 : i32
    %5 = arith.muli %4, %c64_i32_1 : i32
    %6 = arith.cmpi slt, %3, %5 : i32
    %7 = arith.extui %6 : i1 to i32
    %c0_i32_2 = arith.constant 0 : i32
    %8 = arith.cmpi ne, %7, %c0_i32_2 : i32
    scf.if %8 {
      %c0 = arith.constant 0 : index
      %c0_5 = arith.constant 0 : index
      %c0_6 = arith.constant 0 : index
      %12 = vector.load %arg3[%c0, %c0_5, %c0_6] : memref<1x64x128xf32, #tpu.memory_space<vmem>>, vector<1x64x128xf32>
      %13 = vector.shape_cast %12 : vector<1x64x128xf32> to vector<64x128xf32>
      %c0_7 = arith.constant 0 : index
      %c0_8 = arith.constant 0 : index
      %c0_9 = arith.constant 0 : index
      %14 = vector.load %arg4[%c0_7, %c0_8, %c0_9] : memref<1x64x128xf32, #tpu.memory_space<vmem>>, vector<1x64x128xf32>
      %15 = vector.shape_cast %14 : vector<1x64x128xf32> to vector<64x128xf32>
      %c0_10 = arith.constant 0 : index
      %c0_11 = arith.constant 0 : index
      %16 = vector.load %arg6[%c0_10, %c0_11] : memref<64x128xf32, #tpu.memory_space<vmem>>, vector<64x128xf32>
      %17 = arith.mulf %13, %16 : vector<64x128xf32>
      %c64_i32_12 = arith.constant 64 : i32
      %18 = tpu.dynamic_rotate %13 by %c64_i32_12 dim 1 : vector<64x128xf32>, i32 -> vector<64x128xf32>
      %c0_13 = arith.constant 0 : index
      %c0_14 = arith.constant 0 : index
      %19 = vector.load %arg7[%c0_13, %c0_14] : memref<64x128xf32, #tpu.memory_space<vmem>>, vector<64x128xf32>
      %20 = arith.mulf %18, %19 : vector<64x128xf32>
      %21 = arith.addf %17, %20 : vector<64x128xf32>
      %c0_15 = arith.constant 0 : index
      %c0_16 = arith.constant 0 : index
      %22 = vector.load %arg8[%c0_15, %c0_16] : memref<64x128xf32, #tpu.memory_space<vmem>>, vector<64x128xf32>
      %23 = arith.mulf %15, %22 : vector<64x128xf32>
      %c64_i32_17 = arith.constant 64 : i32
      %24 = tpu.dynamic_rotate %15 by %c64_i32_17 dim 1 : vector<64x128xf32>, i32 -> vector<64x128xf32>
      %c0_18 = arith.constant 0 : index
      %c0_19 = arith.constant 0 : index
      %25 = vector.load %arg9[%c0_18, %c0_19] : memref<64x128xf32, #tpu.memory_space<vmem>>, vector<64x128xf32>
      %26 = arith.mulf %24, %25 : vector<64x128xf32>
      %27 = arith.addf %23, %26 : vector<64x128xf32>
      %28 = arith.truncf %21 : vector<64x128xf32> to vector<64x128xbf16>
      %29 = arith.truncf %27 : vector<64x128xf32> to vector<64x128xbf16>
      %cst = arith.constant dense<0.000000e+00> : vector<64x64xf32>
      %30 = tpu.matmul %28, %29, %cst {dimension_numbers = #tpu.dot_dimension_numbers<[1], [1], [0], [0], [0, 0, 1, 0], [], []>} : vector<64x128xbf16>, vector<64x128xbf16>, vector<64x64xf32> -> vector<64x64xf32>
      %cst_20 = arith.constant 0.0883883461 : f32
      %31 = vector.broadcast %cst_20 : f32 to vector<64x64xf32>
      %32 = arith.mulf %30, %31 : vector<64x64xf32>
      %c64_i32_21 = arith.constant 64 : i32
      %33 = arith.muli %arg1, %c64_i32_21 : i32
      %34 = tpu.iota {dimensions = array<i32: 0>} : vector<64x64xi32>
      %35 = vector.broadcast %33 : i32 to vector<64x64xi32>
      %36 = arith.addi %35, %34 : vector<64x64xi32>
      %c64_i32_22 = arith.constant 64 : i32
      %37 = arith.muli %arg2, %c64_i32_22 : i32
      %38 = tpu.iota {dimensions = array<i32: 1>} : vector<64x64xi32>
      %39 = vector.broadcast %37 : i32 to vector<64x64xi32>
      %40 = arith.addi %39, %38 : vector<64x64xi32>
      %41 = arith.cmpi sle, %40, %36 : vector<64x64xi32>
      %cst_23 = arith.constant -1.000000e+30 : f32
      %42 = vector.broadcast %cst_23 : f32 to vector<64x64xf32>
      %43 = arith.select %41, %32, %42 : vector<64x64xi1>, vector<64x64xf32>
      %c0_24 = arith.constant 0 : index
      %c0_25 = arith.constant 0 : index
      %44 = vector.load %arg11[%c0_24, %c0_25] : memref<64x1xf32, #tpu.memory_space<vmem>>, vector<64x1xf32>
      %cst_26 = arith.constant dense<0xFF800000> : vector<64xf32>
      %45 = vector.multi_reduction <maximumf>, %43, %cst_26 [1] : vector<64x64xf32> to vector<64xf32>
      %46 = vector.shape_cast %45 : vector<64xf32> to vector<64x1xf32>
      %47 = arith.maximumf %44, %46 : vector<64x1xf32>
      %48 = arith.subf %44, %47 : vector<64x1xf32>
      %49 = math.exp %48 : vector<64x1xf32>
      %50 = vector.broadcast %47 : vector<64x1xf32> to vector<64x64xf32>
      %51 = arith.subf %43, %50 : vector<64x64xf32>
      %52 = math.exp %51 : vector<64x64xf32>
      %c0_27 = arith.constant 0 : index
      %c0_28 = arith.constant 0 : index
      %53 = vector.load %arg12[%c0_27, %c0_28] : memref<64x1xf32, #tpu.memory_space<vmem>>, vector<64x1xf32>
      %54 = arith.mulf %49, %53 : vector<64x1xf32>
      %cst_29 = arith.constant dense<0.000000e+00> : vector<64xf32>
      %55 = vector.multi_reduction <add>, %52, %cst_29 [1] : vector<64x64xf32> to vector<64xf32>
      %56 = vector.shape_cast %55 : vector<64xf32> to vector<64x1xf32>
      %57 = arith.addf %54, %56 : vector<64x1xf32>
      %c0_30 = arith.constant 0 : index
      %c0_31 = arith.constant 0 : index
      %58 = vector.load %arg12[%c0_30, %c0_31] : memref<64x1xf32, #tpu.memory_space<vmem>>, vector<64x1xf32>
      tpu.vector_store %arg12[%c0_30, %c0_31], %57 {strides = array<i32>} : memref<64x1xf32, #tpu.memory_space<vmem>>, vector<64x1xf32>,
      %c0_32 = arith.constant 0 : index
      %c0_33 = arith.constant 0 : index
      %59 = vector.load %arg13[%c0_32, %c0_33] : memref<64x128xf32, #tpu.memory_space<vmem>>, vector<64x128xf32>
      %60 = vector.broadcast %49 : vector<64x1xf32> to vector<64x128xf32>
      %61 = arith.mulf %60, %59 : vector<64x128xf32>
      %62 = arith.truncf %52 : vector<64x64xf32> to vector<64x64xbf16>
      %c0_34 = arith.constant 0 : index
      %c0_35 = arith.constant 0 : index
      %c0_36 = arith.constant 0 : index
      %63 = vector.load %arg5[%c0_34, %c0_35, %c0_36] : memref<1x64x128xf32, #tpu.memory_space<vmem>>, vector<1x64x128xf32>
      %64 = vector.shape_cast %63 : vector<1x64x128xf32> to vector<64x128xf32>
      %65 = arith.truncf %64 : vector<64x128xf32> to vector<64x128xbf16>
      %cst_37 = arith.constant dense<0.000000e+00> : vector<64x128xf32>
      %66 = tpu.matmul %62, %65, %cst_37 {dimension_numbers = #tpu.dot_dimension_numbers<[1], [0], [0], [1], [0, 0, 1, 1], [], []>} : vector<64x64xbf16>, vector<64x128xbf16>, vector<64x128xf32> -> vector<64x128xf32>
      %67 = arith.addf %61, %66 : vector<64x128xf32>
      %c0_38 = arith.constant 0 : index
      %c0_39 = arith.constant 0 : index
      %68 = vector.load %arg13[%c0_38, %c0_39] : memref<64x128xf32, #tpu.memory_space<vmem>>, vector<64x128xf32>
      tpu.vector_store %arg13[%c0_38, %c0_39], %67 {strides = array<i32>} : memref<64x128xf32, #tpu.memory_space<vmem>>, vector<64x128xf32>,
      %c0_40 = arith.constant 0 : index
      %c0_41 = arith.constant 0 : index
      %69 = vector.load %arg11[%c0_40, %c0_41] : memref<64x1xf32, #tpu.memory_space<vmem>>, vector<64x1xf32>
      tpu.vector_store %arg11[%c0_40, %c0_41], %47 {strides = array<i32>} : memref<64x1xf32, #tpu.memory_space<vmem>>, vector<64x1xf32>,
    } else {
    }
    %c1_i32_3 = arith.constant 1 : i32
    %9 = arith.cmpi eq, %arg2, %c1_i32_3 : i32
    %10 = arith.extui %9 : i1 to i32
    %c0_i32_4 = arith.constant 0 : i32
    %11 = arith.cmpi ne, %10, %c0_i32_4 : i32
    scf.if %11 {
      %c0 = arith.constant 0 : index
      %c0_5 = arith.constant 0 : index
      %12 = vector.load %arg13[%c0, %c0_5] : memref<64x128xf32, #tpu.memory_space<vmem>>, vector<64x128xf32>
      %c0_6 = arith.constant 0 : index
      %c0_7 = arith.constant 0 : index
      %13 = vector.load %arg12[%c0_6, %c0_7] : memref<64x1xf32, #tpu.memory_space<vmem>>, vector<64x1xf32>
      %14 = tpu.reciprocal %13 {approx = true} : vector<64x1xf32> -> vector<64x1xf32>
      %15 = vector.broadcast %14 : vector<64x1xf32> to vector<64x128xf32>
      %16 = arith.mulf %12, %15 : vector<64x128xf32>
      %17 = arith.truncf %16 : vector<64x128xf32> to vector<64x128xbf16>
      %c0_8 = arith.constant 0 : index
      %c0_9 = arith.constant 0 : index
      %c0_10 = arith.constant 0 : index
      %18 = vector.load %arg10[%c0_8, %c0_9, %c0_10] : memref<1x64x128xbf16, #tpu.memory_space<vmem>>, vector<1x64x128xbf16>
      %19 = vector.shape_cast %18 : vector<1x64x128xbf16> to vector<64x128xbf16>
      %20 = vector.shape_cast %17 : vector<64x128xbf16> to vector<1x64x128xbf16>
      tpu.vector_store %arg10[%c0_8, %c0_9, %c0_10], %20 {strides = array<i32>} : memref<1x64x128xbf16, #tpu.memory_space<vmem>>, vector<1x64x128xbf16>,
    } else {
    }
    return
  }
  func.func @transform_0(%arg0: i32, %arg1: i32, %arg2: i32) -> (i32, i32, i32) {
    %c0_i32 = arith.constant 0 : i32
    %c0_i32_0 = arith.constant 0 : i32
    return %arg0, %arg1, %c0_i32 : i32, i32, i32
  }
  func.func @transform_1(%arg0: i32, %arg1: i32, %arg2: i32) -> (i32, i32, i32) {
    %c0_i32 = arith.constant 0 : i32
    %c0_i32_0 = arith.constant 0 : i32
    return %arg0, %arg2, %c0_i32 : i32, i32, i32
  }
  func.func @transform_2(%arg0: i32, %arg1: i32, %arg2: i32) -> (i32, i32, i32) {
    %c0_i32 = arith.constant 0 : i32
    %c0_i32_0 = arith.constant 0 : i32
    return %arg0, %arg2, %c0_i32 : i32, i32, i32
  }
  func.func @transform_3(%arg0: i32, %arg1: i32, %arg2: i32) -> (i32, i32) {
    %c0_i32 = arith.constant 0 : i32
    %c0_i32_0 = arith.constant 0 : i32
    return %arg1, %c0_i32 : i32, i32
  }
  func.func @transform_4(%arg0: i32, %arg1: i32, %arg2: i32) -> (i32, i32) {
    %c0_i32 = arith.constant 0 : i32
    %c0_i32_0 = arith.constant 0 : i32
    return %arg1, %c0_i32 : i32, i32
  }
  func.func @transform_5(%arg0: i32, %arg1: i32, %arg2: i32) -> (i32, i32) {
    %c0_i32 = arith.constant 0 : i32
    %c0_i32_0 = arith.constant 0 : i32
    return %arg2, %c0_i32 : i32, i32
  }
  func.func @transform_6(%arg0: i32, %arg1: i32, %arg2: i32) -> (i32, i32) {
    %c0_i32 = arith.constant 0 : i32
    %c0_i32_0 = arith.constant 0 : i32
    return %arg2, %c0_i32 : i32, i32
  }
  func.func @transform_7(%arg0: i32, %arg1: i32, %arg2: i32) -> (i32, i32, i32) {
    %c0_i32 = arith.constant 0 : i32
    %c0_i32_0 = arith.constant 0 : i32
    return %arg0, %arg1, %c0_i32 : i32, i32, i32
  }
}

module attributes {stable_mosaic.version = 11 : i64} {
  func.func @_matmul_res_kernel(%arg0: i32, %arg1: i32, %arg2: i32, %arg3: memref<128x128xbf16, #tpu.memory_space<vmem>>, %arg4: memref<128x256xbf16, #tpu.memory_space<vmem>>, %arg5: memref<128x256xf32, #tpu.memory_space<vmem>>, %arg6: memref<128x256xf32, #tpu.memory_space<vmem>>, %arg7: memref<128x256xf32, #tpu.memory_space<vmem>>) attributes {dimension_semantics = [#tpu.dimension_semantics<parallel>, #tpu.dimension_semantics<parallel>, #tpu.dimension_semantics<arbitrary>], iteration_bounds = array<i64: 2, 1, 2>, scalar_prefetch = 0 : i64, scratch_operands = 1 : i64, tpu.core_type = #tpu.core_type<tc>, window_params = [{transform_indices = @transform_0, window_bounds = array<i64: 128, 128>}, {transform_indices = @transform_1, window_bounds = array<i64: 128, 256>}, {transform_indices = @transform_2, window_bounds = array<i64: 128, 256>}, {transform_indices = @transform_3, window_bounds = array<i64: 128, 256>}]} {
    %c0_i32 = arith.constant 0 : i32
    %0 = arith.cmpi eq, %arg2, %c0_i32 : i32
    %1 = arith.extui %0 : i1 to i32
    %c0_i32_0 = arith.constant 0 : i32
    %2 = arith.cmpi ne, %1, %c0_i32_0 : i32
    scf.if %2 {
      %cst_9 = arith.constant 0.000000e+00 : f32
      %12 = vector.broadcast %cst_9 : f32 to vector<128x256xf32>
      %c0_10 = arith.constant 0 : index
      %c0_11 = arith.constant 0 : index
      %13 = vector.load %arg7[%c0_10, %c0_11] : memref<128x256xf32, #tpu.memory_space<vmem>>, vector<128x256xf32>
      tpu.vector_store %arg7[%c0_10, %c0_11], %12 {strides = array<i32>} : memref<128x256xf32, #tpu.memory_space<vmem>>, vector<128x256xf32>,
    } else {
    }
    %c0 = arith.constant 0 : index
    %c0_1 = arith.constant 0 : index
    %3 = vector.load %arg7[%c0, %c0_1] : memref<128x256xf32, #tpu.memory_space<vmem>>, vector<128x256xf32>
    %c0_2 = arith.constant 0 : index
    %c0_3 = arith.constant 0 : index
    %4 = vector.load %arg3[%c0_2, %c0_3] : memref<128x128xbf16, #tpu.memory_space<vmem>>, vector<128x128xbf16>
    %c0_4 = arith.constant 0 : index
    %c0_5 = arith.constant 0 : index
    %5 = vector.load %arg4[%c0_4, %c0_5] : memref<128x256xbf16, #tpu.memory_space<vmem>>, vector<128x256xbf16>
    %cst = arith.constant dense<0.000000e+00> : vector<128x256xf32>
    %6 = tpu.matmul %4, %5, %cst {dimension_numbers = #tpu.dot_dimension_numbers<[1], [0], [0], [1], [0, 0, 1, 1], [], []>} : vector<128x128xbf16>, vector<128x256xbf16>, vector<128x256xf32> -> vector<128x256xf32>
    %7 = arith.addf %3, %6 : vector<128x256xf32>
    %c0_6 = arith.constant 0 : index
    %c0_7 = arith.constant 0 : index
    %8 = vector.load %arg7[%c0_6, %c0_7] : memref<128x256xf32, #tpu.memory_space<vmem>>, vector<128x256xf32>
    tpu.vector_store %arg7[%c0_6, %c0_7], %7 {strides = array<i32>} : memref<128x256xf32, #tpu.memory_space<vmem>>, vector<128x256xf32>,
    %c1_i32 = arith.constant 1 : i32
    %9 = arith.cmpi eq, %arg2, %c1_i32 : i32
    %10 = arith.extui %9 : i1 to i32
    %c0_i32_8 = arith.constant 0 : i32
    %11 = arith.cmpi ne, %10, %c0_i32_8 : i32
    scf.if %11 {
      %c0_9 = arith.constant 0 : index
      %c0_10 = arith.constant 0 : index
      %12 = vector.load %arg7[%c0_9, %c0_10] : memref<128x256xf32, #tpu.memory_space<vmem>>, vector<128x256xf32>
      %c0_11 = arith.constant 0 : index
      %c0_12 = arith.constant 0 : index
      %13 = vector.load %arg5[%c0_11, %c0_12] : memref<128x256xf32, #tpu.memory_space<vmem>>, vector<128x256xf32>
      %14 = arith.addf %12, %13 : vector<128x256xf32>
      %c0_13 = arith.constant 0 : index
      %c0_14 = arith.constant 0 : index
      %15 = vector.load %arg6[%c0_13, %c0_14] : memref<128x256xf32, #tpu.memory_space<vmem>>, vector<128x256xf32>
      tpu.vector_store %arg6[%c0_13, %c0_14], %14 {strides = array<i32>} : memref<128x256xf32, #tpu.memory_space<vmem>>, vector<128x256xf32>,
    } else {
    }
    return
  }
  func.func @transform_0(%arg0: i32, %arg1: i32, %arg2: i32) -> (i32, i32) {
    %c0_i32 = arith.constant 0 : i32
    return %arg0, %arg2 : i32, i32
  }
  func.func @transform_1(%arg0: i32, %arg1: i32, %arg2: i32) -> (i32, i32) {
    %c0_i32 = arith.constant 0 : i32
    return %arg2, %arg1 : i32, i32
  }
  func.func @transform_2(%arg0: i32, %arg1: i32, %arg2: i32) -> (i32, i32) {
    %c0_i32 = arith.constant 0 : i32
    return %arg0, %arg1 : i32, i32
  }
  func.func @transform_3(%arg0: i32, %arg1: i32, %arg2: i32) -> (i32, i32) {
    %c0_i32 = arith.constant 0 : i32
    return %arg0, %arg1 : i32, i32
  }
}

module attributes {stable_mosaic.version = 11 : i64} {
  func.func @_rmsnorm_kernel(%arg0: i32, %arg1: memref<128x256xf32, #tpu.memory_space<vmem>>, %arg2: memref<1x256xf32, #tpu.memory_space<vmem>>, %arg3: memref<128x256xbf16, #tpu.memory_space<vmem>>) attributes {dimension_semantics = [#tpu.dimension_semantics<parallel>], iteration_bounds = array<i64: 2>, scalar_prefetch = 0 : i64, scratch_operands = 0 : i64, tpu.core_type = #tpu.core_type<tc>, window_params = [{transform_indices = @transform_0, window_bounds = array<i64: 128, 256>}, {pipeline_mode = #tpu.pipeline_mode<synchronous>, transform_indices = @transform_1, window_bounds = array<i64: 1, 256>}, {transform_indices = @transform_2, window_bounds = array<i64: 128, 256>}]} {
    %c0 = arith.constant 0 : index
    %c0_0 = arith.constant 0 : index
    %0 = vector.load %arg1[%c0, %c0_0] : memref<128x256xf32, #tpu.memory_space<vmem>>, vector<128x256xf32>
    %1 = arith.mulf %0, %0 : vector<128x256xf32>
    %cst = arith.constant dense<0.000000e+00> : vector<128xf32>
    %2 = vector.multi_reduction <add>, %1, %cst [1] : vector<128x256xf32> to vector<128xf32>
    %3 = vector.shape_cast %2 : vector<128xf32> to vector<128x1xf32>
    %cst_1 = arith.constant 2.560000e+02 : f32
    %4 = vector.broadcast %cst_1 : f32 to vector<128x1xf32>
    %5 = arith.divf %3, %4 : vector<128x1xf32>
    %cst_2 = arith.constant 9.99999997E-7 : f32
    %6 = vector.broadcast %cst_2 : f32 to vector<128x1xf32>
    %7 = arith.addf %5, %6 : vector<128x1xf32>
    %8 = math.rsqrt %7 : vector<128x1xf32>
    %9 = vector.broadcast %8 : vector<128x1xf32> to vector<128x256xf32>
    %10 = arith.mulf %0, %9 : vector<128x256xf32>
    %c0_3 = arith.constant 0 : index
    %c0_4 = arith.constant 0 : index
    %11 = vector.load %arg2[%c0_3, %c0_4] : memref<1x256xf32, #tpu.memory_space<vmem>>, vector<1x256xf32>
    %12 = vector.broadcast %11 : vector<1x256xf32> to vector<128x256xf32>
    %13 = arith.mulf %10, %12 : vector<128x256xf32>
    %14 = arith.truncf %13 : vector<128x256xf32> to vector<128x256xbf16>
    %c0_5 = arith.constant 0 : index
    %c0_6 = arith.constant 0 : index
    %15 = vector.load %arg3[%c0_5, %c0_6] : memref<128x256xbf16, #tpu.memory_space<vmem>>, vector<128x256xbf16>
    tpu.vector_store %arg3[%c0_5, %c0_6], %14 {strides = array<i32>} : memref<128x256xbf16, #tpu.memory_space<vmem>>, vector<128x256xbf16>,
    return
  }
  func.func @transform_0(%arg0: i32) -> (i32, i32) {
    %c0_i32 = arith.constant 0 : i32
    %c0_i32_0 = arith.constant 0 : i32
    return %arg0, %c0_i32 : i32, i32
  }
  func.func @transform_1(%arg0: i32) -> (i32, i32) {
    %c0_i32 = arith.constant 0 : i32
    %c0_i32_0 = arith.constant 0 : i32
    %c0_i32_1 = arith.constant 0 : i32
    return %c0_i32, %c0_i32_0 : i32, i32
  }
  func.func @transform_2(%arg0: i32) -> (i32, i32) {
    %c0_i32 = arith.constant 0 : i32
    %c0_i32_0 = arith.constant 0 : i32
    return %arg0, %c0_i32 : i32, i32
  }
}

module attributes {stable_mosaic.version = 11 : i64} {
  func.func @_gated_mlp_kernel(%arg0: i32, %arg1: i32, %arg2: i32, %arg3: memref<128x128xbf16, #tpu.memory_space<vmem>>, %arg4: memref<128x256xbf16, #tpu.memory_space<vmem>>, %arg5: memref<128x256xbf16, #tpu.memory_space<vmem>>, %arg6: memref<128x256xbf16, #tpu.memory_space<vmem>>, %arg7: memref<128x256xf32, #tpu.memory_space<vmem>>, %arg8: memref<128x256xf32, #tpu.memory_space<vmem>>) attributes {dimension_semantics = [#tpu.dimension_semantics<parallel>, #tpu.dimension_semantics<parallel>, #tpu.dimension_semantics<arbitrary>], iteration_bounds = array<i64: 2, 2, 2>, scalar_prefetch = 0 : i64, scratch_operands = 2 : i64, tpu.core_type = #tpu.core_type<tc>, window_params = [{transform_indices = @transform_0, window_bounds = array<i64: 128, 128>}, {transform_indices = @transform_1, window_bounds = array<i64: 128, 256>}, {transform_indices = @transform_2, window_bounds = array<i64: 128, 256>}, {transform_indices = @transform_3, window_bounds = array<i64: 128, 256>}]} {
    %c0_i32 = arith.constant 0 : i32
    %0 = arith.cmpi eq, %arg2, %c0_i32 : i32
    %1 = arith.extui %0 : i1 to i32
    %c0_i32_0 = arith.constant 0 : i32
    %2 = arith.cmpi ne, %1, %c0_i32_0 : i32
    scf.if %2 {
      %cst_16 = arith.constant 0.000000e+00 : f32
      %17 = vector.broadcast %cst_16 : f32 to vector<128x256xf32>
      %c0_17 = arith.constant 0 : index
      %c0_18 = arith.constant 0 : index
      %18 = vector.load %arg7[%c0_17, %c0_18] : memref<128x256xf32, #tpu.memory_space<vmem>>, vector<128x256xf32>
      tpu.vector_store %arg7[%c0_17, %c0_18], %17 {strides = array<i32>} : memref<128x256xf32, #tpu.memory_space<vmem>>, vector<128x256xf32>,
      %cst_19 = arith.constant 0.000000e+00 : f32
      %19 = vector.broadcast %cst_19 : f32 to vector<128x256xf32>
      %c0_20 = arith.constant 0 : index
      %c0_21 = arith.constant 0 : index
      %20 = vector.load %arg8[%c0_20, %c0_21] : memref<128x256xf32, #tpu.memory_space<vmem>>, vector<128x256xf32>
      tpu.vector_store %arg8[%c0_20, %c0_21], %19 {strides = array<i32>} : memref<128x256xf32, #tpu.memory_space<vmem>>, vector<128x256xf32>,
    } else {
    }
    %c0 = arith.constant 0 : index
    %c0_1 = arith.constant 0 : index
    %3 = vector.load %arg3[%c0, %c0_1] : memref<128x128xbf16, #tpu.memory_space<vmem>>, vector<128x128xbf16>
    %c0_2 = arith.constant 0 : index
    %c0_3 = arith.constant 0 : index
    %4 = vector.load %arg7[%c0_2, %c0_3] : memref<128x256xf32, #tpu.memory_space<vmem>>, vector<128x256xf32>
    %c0_4 = arith.constant 0 : index
    %c0_5 = arith.constant 0 : index
    %5 = vector.load %arg4[%c0_4, %c0_5] : memref<128x256xbf16, #tpu.memory_space<vmem>>, vector<128x256xbf16>
    %cst = arith.constant dense<0.000000e+00> : vector<128x256xf32>
    %6 = tpu.matmul %3, %5, %cst {dimension_numbers = #tpu.dot_dimension_numbers<[1], [0], [0], [1], [0, 0, 1, 1], [], []>} : vector<128x128xbf16>, vector<128x256xbf16>, vector<128x256xf32> -> vector<128x256xf32>
    %7 = arith.addf %4, %6 : vector<128x256xf32>
    %c0_6 = arith.constant 0 : index
    %c0_7 = arith.constant 0 : index
    %8 = vector.load %arg7[%c0_6, %c0_7] : memref<128x256xf32, #tpu.memory_space<vmem>>, vector<128x256xf32>
    tpu.vector_store %arg7[%c0_6, %c0_7], %7 {strides = array<i32>} : memref<128x256xf32, #tpu.memory_space<vmem>>, vector<128x256xf32>,
    %c0_8 = arith.constant 0 : index
    %c0_9 = arith.constant 0 : index
    %9 = vector.load %arg8[%c0_8, %c0_9] : memref<128x256xf32, #tpu.memory_space<vmem>>, vector<128x256xf32>
    %c0_10 = arith.constant 0 : index
    %c0_11 = arith.constant 0 : index
    %10 = vector.load %arg5[%c0_10, %c0_11] : memref<128x256xbf16, #tpu.memory_space<vmem>>, vector<128x256xbf16>
    %cst_12 = arith.constant dense<0.000000e+00> : vector<128x256xf32>
    %11 = tpu.matmul %3, %10, %cst_12 {dimension_numbers = #tpu.dot_dimension_numbers<[1], [0], [0], [1], [0, 0, 1, 1], [], []>} : vector<128x128xbf16>, vector<128x256xbf16>, vector<128x256xf32> -> vector<128x256xf32>
    %12 = arith.addf %9, %11 : vector<128x256xf32>
    %c0_13 = arith.constant 0 : index
    %c0_14 = arith.constant 0 : index
    %13 = vector.load %arg8[%c0_13, %c0_14] : memref<128x256xf32, #tpu.memory_space<vmem>>, vector<128x256xf32>
    tpu.vector_store %arg8[%c0_13, %c0_14], %12 {strides = array<i32>} : memref<128x256xf32, #tpu.memory_space<vmem>>, vector<128x256xf32>,
    %c1_i32 = arith.constant 1 : i32
    %14 = arith.cmpi eq, %arg2, %c1_i32 : i32
    %15 = arith.extui %14 : i1 to i32
    %c0_i32_15 = arith.constant 0 : i32
    %16 = arith.cmpi ne, %15, %c0_i32_15 : i32
    scf.if %16 {
      %c0_16 = arith.constant 0 : index
      %c0_17 = arith.constant 0 : index
      %17 = vector.load %arg7[%c0_16, %c0_17] : memref<128x256xf32, #tpu.memory_space<vmem>>, vector<128x256xf32>
      %c0_18 = arith.constant 0 : index
      %c0_19 = arith.constant 0 : index
      %18 = vector.load %arg8[%c0_18, %c0_19] : memref<128x256xf32, #tpu.memory_space<vmem>>, vector<128x256xf32>
      %19 = arith.negf %17 : vector<128x256xf32>
      %20 = math.exp %19 : vector<128x256xf32>
      %cst_20 = arith.constant 1.000000e+00 : f32
      %21 = vector.broadcast %cst_20 : f32 to vector<128x256xf32>
      %22 = arith.addf %21, %20 : vector<128x256xf32>
      %23 = arith.divf %21, %22 : vector<128x256xf32>
      %24 = arith.mulf %17, %23 : vector<128x256xf32>
      %25 = arith.mulf %24, %18 : vector<128x256xf32>
      %26 = arith.truncf %25 : vector<128x256xf32> to vector<128x256xbf16>
      %c0_21 = arith.constant 0 : index
      %c0_22 = arith.constant 0 : index
      %27 = vector.load %arg6[%c0_21, %c0_22] : memref<128x256xbf16, #tpu.memory_space<vmem>>, vector<128x256xbf16>
      tpu.vector_store %arg6[%c0_21, %c0_22], %26 {strides = array<i32>} : memref<128x256xbf16, #tpu.memory_space<vmem>>, vector<128x256xbf16>,
    } else {
    }
    return
  }
  func.func @transform_0(%arg0: i32, %arg1: i32, %arg2: i32) -> (i32, i32) {
    %c0_i32 = arith.constant 0 : i32
    return %arg0, %arg2 : i32, i32
  }
  func.func @transform_1(%arg0: i32, %arg1: i32, %arg2: i32) -> (i32, i32) {
    %c0_i32 = arith.constant 0 : i32
    return %arg2, %arg1 : i32, i32
  }
  func.func @transform_2(%arg0: i32, %arg1: i32, %arg2: i32) -> (i32, i32) {
    %c0_i32 = arith.constant 0 : i32
    return %arg2, %arg1 : i32, i32
  }
  func.func @transform_3(%arg0: i32, %arg1: i32, %arg2: i32) -> (i32, i32) {
    %c0_i32 = arith.constant 0 : i32
    return %arg0, %arg1 : i32, i32
  }
}

module attributes {stable_mosaic.version = 11 : i64} {
  func.func @_matmul_res_kernel(%arg0: i32, %arg1: i32, %arg2: i32, %arg3: memref<128x128xbf16, #tpu.memory_space<vmem>>, %arg4: memref<128x256xbf16, #tpu.memory_space<vmem>>, %arg5: memref<128x256xf32, #tpu.memory_space<vmem>>, %arg6: memref<128x256xf32, #tpu.memory_space<vmem>>, %arg7: memref<128x256xf32, #tpu.memory_space<vmem>>) attributes {dimension_semantics = [#tpu.dimension_semantics<parallel>, #tpu.dimension_semantics<parallel>, #tpu.dimension_semantics<arbitrary>], iteration_bounds = array<i64: 2, 1, 4>, scalar_prefetch = 0 : i64, scratch_operands = 1 : i64, tpu.core_type = #tpu.core_type<tc>, window_params = [{transform_indices = @transform_0, window_bounds = array<i64: 128, 128>}, {transform_indices = @transform_1, window_bounds = array<i64: 128, 256>}, {transform_indices = @transform_2, window_bounds = array<i64: 128, 256>}, {transform_indices = @transform_3, window_bounds = array<i64: 128, 256>}]} {
    %c0_i32 = arith.constant 0 : i32
    %0 = arith.cmpi eq, %arg2, %c0_i32 : i32
    %1 = arith.extui %0 : i1 to i32
    %c0_i32_0 = arith.constant 0 : i32
    %2 = arith.cmpi ne, %1, %c0_i32_0 : i32
    scf.if %2 {
      %cst_9 = arith.constant 0.000000e+00 : f32
      %12 = vector.broadcast %cst_9 : f32 to vector<128x256xf32>
      %c0_10 = arith.constant 0 : index
      %c0_11 = arith.constant 0 : index
      %13 = vector.load %arg7[%c0_10, %c0_11] : memref<128x256xf32, #tpu.memory_space<vmem>>, vector<128x256xf32>
      tpu.vector_store %arg7[%c0_10, %c0_11], %12 {strides = array<i32>} : memref<128x256xf32, #tpu.memory_space<vmem>>, vector<128x256xf32>,
    } else {
    }
    %c0 = arith.constant 0 : index
    %c0_1 = arith.constant 0 : index
    %3 = vector.load %arg7[%c0, %c0_1] : memref<128x256xf32, #tpu.memory_space<vmem>>, vector<128x256xf32>
    %c0_2 = arith.constant 0 : index
    %c0_3 = arith.constant 0 : index
    %4 = vector.load %arg3[%c0_2, %c0_3] : memref<128x128xbf16, #tpu.memory_space<vmem>>, vector<128x128xbf16>
    %c0_4 = arith.constant 0 : index
    %c0_5 = arith.constant 0 : index
    %5 = vector.load %arg4[%c0_4, %c0_5] : memref<128x256xbf16, #tpu.memory_space<vmem>>, vector<128x256xbf16>
    %cst = arith.constant dense<0.000000e+00> : vector<128x256xf32>
    %6 = tpu.matmul %4, %5, %cst {dimension_numbers = #tpu.dot_dimension_numbers<[1], [0], [0], [1], [0, 0, 1, 1], [], []>} : vector<128x128xbf16>, vector<128x256xbf16>, vector<128x256xf32> -> vector<128x256xf32>
    %7 = arith.addf %3, %6 : vector<128x256xf32>
    %c0_6 = arith.constant 0 : index
    %c0_7 = arith.constant 0 : index
    %8 = vector.load %arg7[%c0_6, %c0_7] : memref<128x256xf32, #tpu.memory_space<vmem>>, vector<128x256xf32>
    tpu.vector_store %arg7[%c0_6, %c0_7], %7 {strides = array<i32>} : memref<128x256xf32, #tpu.memory_space<vmem>>, vector<128x256xf32>,
    %c3_i32 = arith.constant 3 : i32
    %9 = arith.cmpi eq, %arg2, %c3_i32 : i32
    %10 = arith.extui %9 : i1 to i32
    %c0_i32_8 = arith.constant 0 : i32
    %11 = arith.cmpi ne, %10, %c0_i32_8 : i32
    scf.if %11 {
      %c0_9 = arith.constant 0 : index
      %c0_10 = arith.constant 0 : index
      %12 = vector.load %arg7[%c0_9, %c0_10] : memref<128x256xf32, #tpu.memory_space<vmem>>, vector<128x256xf32>
      %c0_11 = arith.constant 0 : index
      %c0_12 = arith.constant 0 : index
      %13 = vector.load %arg5[%c0_11, %c0_12] : memref<128x256xf32, #tpu.memory_space<vmem>>, vector<128x256xf32>
      %14 = arith.addf %12, %13 : vector<128x256xf32>
      %c0_13 = arith.constant 0 : index
      %c0_14 = arith.constant 0 : index
      %15 = vector.load %arg6[%c0_13, %c0_14] : memref<128x256xf32, #tpu.memory_space<vmem>>, vector<128x256xf32>
      tpu.vector_store %arg6[%c0_13, %c0_14], %14 {strides = array<i32>} : memref<128x256xf32, #tpu.memory_space<vmem>>, vector<128x256xf32>,
    } else {
    }
    return
  }
  func.func @transform_0(%arg0: i32, %arg1: i32, %arg2: i32) -> (i32, i32) {
    %c0_i32 = arith.constant 0 : i32
    return %arg0, %arg2 : i32, i32
  }
  func.func @transform_1(%arg0: i32, %arg1: i32, %arg2: i32) -> (i32, i32) {
    %c0_i32 = arith.constant 0 : i32
    return %arg2, %arg1 : i32, i32
  }
  func.func @transform_2(%arg0: i32, %arg1: i32, %arg2: i32) -> (i32, i32) {
    %c0_i32 = arith.constant 0 : i32
    return %arg0, %arg1 : i32, i32
  }
  func.func @transform_3(%arg0: i32, %arg1: i32, %arg2: i32) -> (i32, i32) {
    %c0_i32 = arith.constant 0 : i32
    return %arg0, %arg1 : i32, i32
  }
}

</mosaic_0001>

<bundles_post_ra>
// kernel: decoder_layer.7
= control target key start
LH: loop header
LB: loop body
LE: loop exit
PB: predicated region body
PF: predicated region fallthrough
CT: control target
= control target key end

     0   :  { %7 = vsyncpa [#allocation3], 0  ;;  %s1355_s0 = inlined_call_operand.hbm [shape: f32[256,256], index: 0, kind: input, shape index: {}]   ;;  %s1356_s1 = inlined_call_operand.vmem [shape: f32[1,256], index: 1, kind: input, shape index: {}]   ;;  %s1357_s2 = inlined_call_operand.vmem [shape: bf16[256,256], index: 2, kind: output, shape index: {}]  }
   0x1   :  { %9 = vsyncpa [#allocation3 + $0x1], 0  ;;  %s831_s9 = smov 0   ;;  %s833_s10 = smov 0  }
   0x2   :  { %s835_s11 = smov 0   ;;  %s837_s12 = smov 0  }
   0x3 LB: > { %s653_s13 = sadd.s32 4294967295, %s811_s12   ;;  %s851_s14 = sadd.s32 1, %s811_s12   ;;  %s811_s12 = sphi %s837_s12, %s1364_s12   ;;  %s807_s11 = sphi %s835_s11, %s1363_s11   ;;  %s803_s10 = sphi %s833_s10, %s1362_s10   ;;  %s799_s9 = sphi %s831_s9, %s1361_s9  }
   0x4   : > { %s19_s15 = ssub.s32 %s811_s12, %s851_s14  ;;  %s22_s16 = sadd.s32 1, %s807_s11 }
   0x5   : > { %p20_p0 = scmp.eq.s32.totalorder %s19_s15, 0  ;;  %p29_p1 = scmp.ne.s32.totalorder %s807_s11, %s803_s10 }
   0x6   : > { %p30_p2 = scmp.eq.s32.totalorder %s811_s12, 0  ;;  %p35_p3 = scmp.ne.s32.totalorder %s803_s10, %s799_s9 }
   0x7   : > { %s861_s17 = scalar_select %p20_p0, %s807_s11, %s22_s16  }
   0x8   : > { %p863_p4 = por %p30_p2, %p29_p1  ;;  %p36_p5 = scmp.eq.s32.totalorder %s653_s13, 0 }
   0x9   : > { %p677_p6 = scmp.lt.s32.totalorder %s811_s12, 2  ;;  %s109_s20 = sand.u32 1, %s807_s11  }
   0xa   : > { %p870_p7 = por %p36_p5, %p35_p3  ;;  %s657_s21 = sshll.u32 %s109_s20, 8 }
   0xb   : > { %s669_s22 = sshll.u32 %s811_s12, 8  ;;  %s113_s26 = scalar_lea.vmem [#allocation2], %s657_s21 }
   0xc   : > { %s119_s25 = scalar_lea.hbm %s1355_s0, %s669_s22  ;;  %s122_s27 = sshll.u32 %s113_s26, 4  ;;  %s123_s27 = int_to_ptr.vmem [resolvable:$true] %s122_s27 }
   0xd   : > { %s120_s28 = sshll.u32 %s119_s25, 4  ;;  %p881_p8 = pnand %p677_p6, %p863_p4  ;;  %s121_s28 = int_to_ptr.hbm [resolvable:$true] %s120_s28 }
   0xe   : > { %p661_p9 = scmp.ge.s32.totalorder %s811_s12, 1  ;;  %s110_s30 = scalar_lea.sflag [#allocation3], %s109_s20 }
   0xf   : > { %s747_s3 = sshra.s32 %s121_s28, 4  ;;  %p751_p11 = pneg %p881_p8  ;;  %s748_s3 = int_to_ptr.hbm [resolvable:$true] %s747_s3 }
  0x10   : > { %s749_s4 = scalar_lea.hbm %s748_s3, 256  ;;  %s754_s7 = scalar_lea.hbm %s1355_s0, 512 }
  0x11   : > { %p750_p10 = scmp.ne.s32.totalorder %s748_s3, %s749_s4  ;;  %p755_p0 = scmp.lt.s32.totalorder %s748_s3, %s1355_s0 }
  0x12   : > { %p756_p1 = scmp.lt.s32.totalorder %s754_s7, %s749_s4 }
  0x13   : > { %p752_p12 = pnand %p751_p11, %p750_p10 }
  0x14   : > { %p757_p2 = por %p756_p1, %p755_p0 }
  0x15   : > { %p753_p13 = pneg %p752_p12 }
  0x17   : > { %p758_p3 = pnand %p757_p2, %p753_p13 }
  0x19   : > { %761 = shalt.err (!%p758_p3)
}
  0x1a   : > { %s813_s15 = smov 256   ;;  %s814_s16 = smov 16  }
  0x1b   : > { %676 = dma.hbm_to_vmem [thread:$0]  (!%p881_p8), %s121_s28, 4096, %s123_s27, %s110_s30, %s813_s15, %s813_s15, %s814_s16  }
  0x1c   : > { %p130_p4 = scmp.lt.s32.totalorder %s811_s12, 3 }
  0x1e   : > { %p131_p5 = pnand %p661_p9, %p130_p4 }
  0x1f   : > { %s136_s18 = sand.u32 (!%p131_p5), 1, %s803_s10  }
  0x20   : > { %134 = sbr.rel (%p131_p5) target bundleno = 246 (0xf6), region = 28  ;;  %s662_s20 = sshll.u32 (!%p131_p5), %s136_s18, 8 }
  0x21   : > { %s137_s21 = scalar_lea.sflag (!%p131_p5), [#allocation3], %s136_s18  ;;  %s900_s22 = scalar_lea.vmem (!%p131_p5), [#allocation2], %s662_s20 }
  0x25   : > { %794 = dma.done.wait (%p870_p7), %s137_s21, 4096  }
  0x26   : > { %796 = vsyncadd (%p870_p7), %s137_s21, 4294963200  ;;  %v907_v0 = vld [vmem:[%s900_s22 + $0x40] sm:$0xff]  ;;  %v910_v1 = vld [vmem:[%s900_s22 + $0x48] sm:$0xff]  ;;  %s1082_s19 = sshll.u32 %s653_s13, 4 }
  0x27   : > { %v913_v2 = vld [vmem:[%s900_s22 + $0x20] sm:$0xff]  ;;  %v211_v3 = vmul.f32 %v907_v0, %v907_v0  ;;  %v212_v4 = vmul.f32 %v910_v1, %v910_v1  ;;  %v920_v5 = vld [vmem:[%s900_s22 + $0x28] sm:$0xff]  ;;  %v937_v12 = vld [vmem:[%s900_s22 + $0x50] sm:$0xff]  ;;  %p165_p6 = scmp.lt.s32.totalorder %s1082_s19, 31 }
  0x28   : > { %v207_v6 = vmul.f32 %v913_v2, %v913_v2  ;;  %v925_v7 = vld [vmem:[%s900_s22] sm:$0xff]  ;;  %v928_v8 = vld [vmem:[%s900_s22 + $0x8] sm:$0xff]  ;;  %v208_v9 = vmul.f32 %v920_v5, %v920_v5  ;;  %v940_v13 = vld [vmem:[%s900_s22 + $0x58] sm:$0xff]  ;;  %v213_v21 = vmul.f32 %v937_v12, %v937_v12 }
  0x29   : > { %v203_v10 = vmul.f32 %v925_v7, %v925_v7  ;;  %v204_v11 = vmul.f32 %v928_v8, %v928_v8  ;;  %v943_v14 = vld [vmem:[%s900_s22 + $0x30] sm:$0xff]  ;;  %v247_v15 = vadd.f32 %v212_v4, %v211_v3  ;;  %v946_v16 = vld [vmem:[%s900_s22 + $0x38] sm:$0xff]  ;;  %v214_v22 = vmul.f32 %v940_v13, %v940_v13  ;;  %v967_v30 = vld [vmem:[%s900_s22 + $0x80] sm:$0xff]  ;;  %s1366_s19 = smov (!%p165_p6, %s1082_s19), 31 }
  0x2a   : > { %v949_v17 = vld [vmem:[%s900_s22 + $0x10] sm:$0xff]  ;;  %v952_v18 = vld [vmem:[%s900_s22 + $0x18] sm:$0xff]  ;;  %v241_v19 = vadd.f32 %v208_v9, %v207_v6  ;;  %v209_v23 = vmul.f32 %v943_v14, %v943_v14  ;;  %v210_v24 = vmul.f32 %v946_v16, %v946_v16  ;;  %v970_v31 = vld [vmem:[%s900_s22 + $0x88] sm:$0xff]  ;;  %v219_v36 = vmul.f32 %v967_v30, %v967_v30  ;;  %s670_s12 = sshll.u32 %s1366_s19, 3 }
  0x2b   : > { %v235_v20 = vadd.f32 %v204_v11, %v203_v10  ;;  %248 = vadd.xlane.f32.xlu2 %v247_v15  ;;  %v205_v25 = vmul.f32 %v949_v17, %v949_v17  ;;  %v206_v26 = vmul.f32 %v952_v18, %v952_v18  ;;  %v250_v27 = vadd.f32 %v214_v22, %v213_v21  ;;  %v973_v32 = vld [vmem:[%s900_s22 + $0x70] sm:$0xff]  ;;  %v976_v33 = vld [vmem:[%s900_s22 + $0x78] sm:$0xff]  ;;  %v979_v34 = vld [vmem:[%s900_s22 + $0x60] sm:$0xff]  ;;  %s1148_s26 = scalar_lea.vmem %s1357_s2, %s670_s12 }
  0x2c   : > { %242 = vadd.xlane.f32.xlu1 %v241_v19  ;;  %v244_v28 = vadd.f32 %v210_v24, %v209_v23  ;;  %v982_v35 = vld [vmem:[%s900_s22 + $0x68] sm:$0xff]  ;;  %v220_v37 = vmul.f32 %v970_v31, %v970_v31  ;;  %v217_v38 = vmul.f32 %v973_v32, %v973_v32  ;;  %v218_v39 = vmul.f32 %v976_v33, %v976_v33  ;;  %v997_v45 = vld [vmem:[%s900_s22 + $0xb0] sm:$0xff]  ;;  %v1000_v46 = vld [vmem:[%s900_s22 + $0xb8] sm:$0xff] }
  0x2d   : > { %236 = vadd.xlane.f32.xlu0 %v235_v20  ;;  %v238_v29 = vadd.f32 %v206_v26, %v205_v25  ;;  %v215_v40 = vmul.f32 %v979_v34, %v979_v34  ;;  %v216_v41 = vmul.f32 %v982_v35, %v982_v35  ;;  %v1003_v47 = vld [vmem:[%s900_s22 + $0xa0] sm:$0xff]  ;;  %v1006_v48 = vld [vmem:[%s900_s22 + $0xa8] sm:$0xff]  ;;  %v1009_v49 = vld [vmem:[%s900_s22 + $0x90] sm:$0xff]  ;;  %v225_v51 = vmul.f32 %v997_v45, %v997_v45 }
  0x2e   : > { %v259_v42 = vadd.f32 %v220_v37, %v219_v36  ;;  %v256_v43 = vadd.f32 %v218_v39, %v217_v38  ;;  %v1012_v50 = vld [vmem:[%s900_s22 + $0x98] sm:$0xff]  ;;  %v226_v52 = vmul.f32 %v1000_v46, %v1000_v46  ;;  %v223_v53 = vmul.f32 %v1003_v47, %v1003_v47  ;;  %v1027_v60 = vld [vmem:[%s900_s22 + $0xe0] sm:$0xff]  ;;  %v1030_v61 = vld [vmem:[%s900_s22 + $0xe8] sm:$0xff] }
  0x2f   : > { %v253_v44 = vadd.f32 %v216_v41, %v215_v40  ;;  %v224_v54 = vmul.f32 %v1006_v48, %v1006_v48  ;;  %v221_v55 = vmul.f32 %v1009_v49, %v1009_v49  ;;  %v222_v56 = vmul.f32 %v1012_v50, %v1012_v50  ;;  %v1033_v62 = vld [vmem:[%s900_s22 + $0xd0] sm:$0xff]  ;;  %v1036_v63 = vld [vmem:[%s900_s22 + $0xd8] sm:$0xff]  ;;  %v1039_v3 = vld [vmem:[%s900_s22 + $0xc0] sm:$0xff] }
  0x30   : > { %v268_v57 = vadd.f32 %v226_v52, %v225_v51  ;;  %v1042_v4 = vld [vmem:[%s900_s22 + $0xc8] sm:$0xff]  ;;  %v231_v6 = vmul.f32 %v1027_v60, %v1027_v60  ;;  %v232_v9 = vmul.f32 %v1030_v61, %v1030_v61  ;;  %v229_v10 = vmul.f32 %v1033_v62, %v1033_v62  ;;  %v1057_v23 = vld [vmem:[%s900_s22 + $0xf0] sm:$0xff]  ;;  %v1060_v24 = vld [vmem:[%s900_s22 + $0xf8] sm:$0xff] }
  0x31   : > { %v265_v58 = vadd.f32 %v224_v54, %v223_v53  ;;  %v262_v59 = vadd.f32 %v222_v56, %v221_v55  ;;  %v230_v11 = vmul.f32 %v1036_v63, %v1036_v63  ;;  %v227_v15 = vmul.f32 %v1039_v3, %v1039_v3 }
  0x32   : > { %v228_v19 = vmul.f32 %v1042_v4, %v1042_v4  ;;  %v277_v20 = vadd.f32 %v232_v9, %v231_v6  ;;  %v233_v25 = vmul.f32 %v1057_v23, %v1057_v23  ;;  %v234_v26 = vmul.f32 %v1060_v24, %v1060_v24 }
  0x33   : > { %251 = vadd.xlane.f32.xlu2 %v250_v27  ;;  %v274_v21 = vadd.f32 %v230_v11, %v229_v10 }
  0x34   : > { %245 = vadd.xlane.f32.xlu1 %v244_v28  ;;  %v271_v22 = vadd.f32 %v228_v19, %v227_v15  ;;  %v280_v27 = vadd.f32 %v234_v26, %v233_v25  ;;  %v815_v28 = vmov 256.0   ;;  %v514_v19 = vld [vmem:[%s1356_s1] sm:$0x3] }
  0x35   : > { %239 = vadd.xlane.f32.xlu0 %v238_v29  ;;  %713 = vrcp.f32 %v815_v28 }
  0x3b   : > { %260 = vadd.xlane.f32.xlu2 %v259_v42  ;;  %v714_v29 = vpop.eup %713 }
  0x3c   : > { %257 = vadd.xlane.f32.xlu1 %v256_v43  ;;  %v284_v36 = vmul.f32 256.0, %v714_v29  ;;  %vm288_vm0 = vweird.f32 %v714_v29 }
  0x3d   : > { %254 = vadd.xlane.f32.xlu0 %v253_v44 }
  0x3e   : > { %v285_v37 = vsub.f32 1.0, %v284_v36  ;;  %v1100_v36 = vperm.slane %v514_v19, 1 }
  0x40   : > { %v286_v38 = vmul.f32 %v714_v29, %v285_v37 }
  0x42   : > { %v287_v39 = vadd.f32 %v714_v29, %v286_v38 }
  0x43   : > { %269 = vadd.xlane.f32.xlu2 %v268_v57 }
  0x44   : > { %266 = vadd.xlane.f32.xlu1 %v265_v58  ;;  %v1066_v40 = vsel %vm288_vm0, %v714_v29, %v287_v39  ;;  %v1098_v29 = vperm.slane %v514_v19, 0 }
  0x45   : > { %263 = vadd.xlane.f32.xlu0 %v262_v59 }
  0x4b   : > { %278 = vadd.xlane.f32.xlu2 %v277_v20 }
  0x4c   : > { %275 = vadd.xlane.f32.xlu1 %v274_v21 }
  0x4d   : > { %272 = vadd.xlane.f32.xlu0 %v271_v22 }
  0x55   : > { %281 = vadd.xlane.f32.xlu0 %v280_v27 }
  0x9e   : > { %v249_v41 = vpop.xlane.xlu2 %248 }
  0x9f   : > { %v294_v42 = vmul.f32 %v1066_v40, %v249_v41  ;;  %v243_v43 = vpop.xlane.xlu1 %242 }
  0xa0   : > { %v237_v44 = vpop.xlane.xlu0 %236  ;;  %v292_v51 = vmul.f32 %v1066_v40, %v243_v43 }
  0xa1   : > { %v290_v52 = vmul.f32 %v1066_v40, %v237_v44  ;;  %v310_v53 = vadd.f32 1e-06, %v294_v42 }
  0xa2   : > { %v1071_v54 = vadd.f32 1e-06, %v292_v51 }
  0xa3   : > { %v1073_v55 = vadd.f32 1e-06, %v290_v52  ;;  %715 = vrsqrt.f32 %v310_v53  ;;  %vm368_vm1 = vweird.f32 %v310_v53 }
  0xa4   : > { %717 = vrsqrt.f32 %v1071_v54  ;;  %vm348_vm2 = vweird.f32 %v1071_v54 }
  0xa5   : > { %719 = vrsqrt.f32 %v1073_v55  ;;  %vm328_vm4 = vweird.f32 %v1073_v55 }
  0xa6   : > { %v252_v56 = vpop.xlane.xlu2 %251 }
  0xa7   : > { %v295_v57 = vmul.f32 %v1066_v40, %v252_v56  ;;  %v246_v58 = vpop.xlane.xlu1 %245 }
  0xa8   : > { %v240_v59 = vpop.xlane.xlu0 %239  ;;  %v293_v6 = vmul.f32 %v1066_v40, %v246_v58 }
  0xa9   : > { %v291_v9 = vmul.f32 %v1066_v40, %v240_v59  ;;  %v716_v10 = vpop.eup %715  ;;  %v1084_v11 = vadd.f32 1e-06, %v295_v57 }
  0xaa   : > { %v718_v15 = vpop.eup %717  ;;  %v363_v20 = vmul.f32 %v716_v10, %v310_v53  ;;  %v1089_v21 = vadd.f32 1e-06, %v293_v6  ;;  %vm369_vm3 = vweird.f32 %v716_v10 }
  0xab   : > { %v1091_v22 = vadd.f32 1e-06, %v291_v9  ;;  %v720_v25 = vpop.eup %719  ;;  %v343_v26 = vmul.f32 %v718_v15, %v1071_v54  ;;  %721 = vrsqrt.f32 %v1084_v11  ;;  %vm349_vm5 = vweird.f32 %v718_v15  ;;  %vm370_vm9 = vmor %vm368_vm1, %vm369_vm3 }
  0xac   : > { %v364_v27 = vmul.f32 %v716_v10, %v363_v20  ;;  %v323_v28 = vmul.f32 %v720_v25, %v1073_v55  ;;  %723 = vrsqrt.f32 %v1089_v21  ;;  %vm378_vm6 = vweird.f32 %v1084_v11  ;;  %vm350_vm11 = vmor %vm348_vm2, %vm349_vm5 }
  0xad   : > { %v344_v37 = vmul.f32 %v718_v15, %v343_v26  ;;  %725 = vrsqrt.f32 %v1091_v22  ;;  %vm329_vm7 = vweird.f32 %v720_v25  ;;  %vm358_vm8 = vweird.f32 %v1089_v21 }
  0xae   : > { %v365_v38 = vmul.f32 0.5, %v364_v27  ;;  %v324_v39 = vmul.f32 %v720_v25, %v323_v28  ;;  %v261_v41 = vpop.xlane.xlu2 %260  ;;  %vm330_vm12 = vmor %vm328_vm4, %vm329_vm7  ;;  %vm338_vm15 = vweird.f32 %v1091_v22 }
  0xaf   : > { %v345_v42 = vmul.f32 0.5, %v344_v37  ;;  %v298_v43 = vmul.f32 %v1066_v40, %v261_v41  ;;  %v258_v44 = vpop.xlane.xlu1 %257 }
  0xb0   : > { %v255_v51 = vpop.xlane.xlu0 %254  ;;  %v366_v52 = vsub.f32 1.5, %v365_v38  ;;  %v325_v56 = vmul.f32 0.5, %v324_v39  ;;  %v297_v6 = vmul.f32 %v1066_v40, %v258_v44 }
  0xb1   : > { %v722_v57 = vpop.eup %721  ;;  %v346_v58 = vsub.f32 1.5, %v345_v42  ;;  %v1112_v59 = vadd.f32 1e-06, %v298_v43  ;;  %v296_v27 = vmul.f32 %v1066_v40, %v255_v51 }
  0xb2   : > { %v1115_v9 = vpop.eup %723  ;;  %v367_v19 = vmul.f32 %v716_v10, %v366_v52  ;;  %v326_v20 = vsub.f32 1.5, %v325_v56  ;;  %v373_v26 = vmul.f32 %v722_v57, %v1084_v11  ;;  %vm379_vm10 = vweird.f32 %v722_v57 }
  0xb3   : > { %v1120_v28 = vpop.eup %725  ;;  %v347_v37 = vmul.f32 %v718_v15, %v346_v58  ;;  %v353_v38 = vmul.f32 %v1115_v9, %v1089_v21  ;;  %727 = vrsqrt.f32 %v1112_v59  ;;  %vm359_vm13 = vweird.f32 %v1115_v9  ;;  %vm380_vm14 = vmor %vm378_vm6, %vm379_vm10 }
  0xb4   : > { %v371_v39 = vsel %vm370_vm9, %v716_v10, %v367_v19  ;;  %v327_v41 = vmul.f32 %v720_v25, %v326_v20  ;;  %v374_v42 = vmul.f32 %v722_v57, %v373_v26  ;;  %v333_v43 = vmul.f32 %v1120_v28, %v1091_v22  ;;  %vm360_vm1 = vmor %vm358_vm8, %vm359_vm13 }
  0xb5   : > { %v490_v53 = vmul.f32 %v371_v39, %v907_v0  ;;  %v491_v44 = vmul.f32 %v371_v39, %v910_v1  ;;  %v351_v51 = vsel %vm350_vm11, %v718_v15, %v347_v37  ;;  %v354_v10 = vmul.f32 %v1115_v9, %v353_v38 }
  0xb6   : > { %v486_v54 = vmul.f32 %v351_v51, %v913_v2  ;;  %v487_v52 = vmul.f32 %v351_v51, %v920_v5  ;;  %v331_v56 = vsel %vm330_vm12, %v720_v25, %v327_v41  ;;  %v375_v58 = vmul.f32 0.5, %v374_v42  ;;  %v270_v39 = vpop.xlane.xlu2 %269 }
  0xb7   : > { %v528_v19 = vmul.f32 %v1098_v29, %v490_v53  ;;  %v529_v20 = vmul.f32 %v1100_v36, %v491_v44  ;;  %v482_v0 = vmul.f32 %v331_v56, %v925_v7  ;;  %v483_v1 = vmul.f32 %v331_v56, %v928_v8 }
  0xb8   : > { %v264_v15 = vpop.xlane.xlu0 %263  ;;  %v524_v2 = vmul.f32 %v1098_v29, %v486_v54  ;;  %v525_v5 = vmul.f32 %v1100_v36, %v487_v52  ;;  %v376_v55 = vsub.f32 1.5, %v375_v58  ;;  %v355_v25 = vmul.f32 0.5, %v354_v10 }
  0xb9   : > { %v1152_v26 = vpop.eup %727  ;;  %v556_v37 = vpack.c.bf16 %v529_v20, %v528_v19  ;;  %v520_v7 = vmul.f32 %v1098_v29, %v482_v0  ;;  %v521_v8 = vmul.f32 %v1100_v36, %v483_v1  ;;  %v334_v38 = vmul.f32 %v1120_v28, %v333_v43 }
  0xba   : > { %v554_v41 = vpack.c.bf16 %v525_v5, %v524_v2  ;;  %v377_v42 = vmul.f32 %v722_v57, %v376_v55  ;;  %v356_v53 = vsub.f32 1.5, %v355_v25  ;;  %v403_v10 = vmul.f32 %v1152_v26, %v1112_v59 }
  0xbb   : > { %572 = vst [vmem:[%s1148_s26 + $0x20] sm:$0xff] %v556_v37  ;;  %v552_v44 = vpack.c.bf16 %v521_v8, %v520_v7  ;;  %v335_v51 = vmul.f32 0.5, %v334_v38  ;;  %vm339_vm0 = vweird.f32 %v1120_v28  ;;  %v1168_v52 = vadd.f32 1e-06, %v297_v6 }
  0xbc   : > { %570 = vst [vmem:[%s1148_s26 + $0x10] sm:$0xff] %v554_v41  ;;  %v381_v43 = vsel %vm380_vm14, %v722_v57, %v377_v42  ;;  %v357_v54 = vmul.f32 %v1115_v9, %v356_v53  ;;  %v404_v19 = vmul.f32 %v1152_v26, %v403_v10  ;;  %v267_v57 = vpop.xlane.xlu1 %266  ;;  %vm408_vm2 = vweird.f32 %v1112_v59  ;;  %vm340_vm4 = vmor %vm338_vm15, %vm339_vm0 }
  0xbd   : > { %568 = vst [vmem:[%s1148_s26] sm:$0xff] %v552_v44  ;;  %v492_v56 = vmul.f32 %v381_v43, %v937_v12  ;;  %v493_v11 = vmul.f32 %v381_v43, %v940_v13  ;;  %v336_v58 = vsub.f32 1.5, %v335_v51  ;;  %729 = vrsqrt.f32 %v1168_v52 }
  0xbe   : > { %v361_v20 = vsel %vm360_vm1, %v1115_v9, %v357_v54  ;;  %v1181_v6 = vadd.f32 1e-06, %v296_v27  ;;  %v405_v2 = vmul.f32 0.5, %v404_v19  ;;  %vm409_vm3 = vweird.f32 %v1152_v26  ;;  %v279_v22 = vpop.xlane.xlu2 %278 }
  0xbf   : > { %v530_v12 = vmul.f32 %v1098_v29, %v492_v56  ;;  %v531_v13 = vmul.f32 %v1100_v36, %v493_v11  ;;  %v488_v0 = vmul.f32 %v361_v20, %v943_v14  ;;  %v489_v21 = vmul.f32 %v361_v20, %v946_v16  ;;  %vm410_vm5 = vmor %vm408_vm2, %vm409_vm3 }
  0xc0   : > { %v337_v1 = vmul.f32 %v1120_v28, %v336_v58  ;;  %731 = vrsqrt.f32 %v1181_v6  ;;  %v273_v9 = vpop.xlane.xlu0 %272  ;;  %v301_v14 = vmul.f32 %v1066_v40, %v270_v39  ;;  %v406_v25 = vsub.f32 1.5, %v405_v2 }
  0xc1   : > { %v557_v5 = vpack.c.bf16 %v531_v13, %v530_v12  ;;  %v526_v27 = vmul.f32 %v1098_v29, %v488_v0  ;;  %v527_v55 = vmul.f32 %v1100_v36, %v489_v21  ;;  %v300_v37 = vmul.f32 %v1066_v40, %v267_v57 }
  0xc2   : > { %v341_v16 = vsel %vm340_vm4, %v1120_v28, %v337_v1  ;;  %v299_v7 = vmul.f32 %v1066_v40, %v264_v15  ;;  %v1203_v42 = vadd.f32 1e-06, %v301_v14  ;;  %v407_v44 = vmul.f32 %v1152_v26, %v406_v25 }
  0xc3   : > { %573 = vst [vmem:[%s1148_s26 + $0x28] sm:$0xff] %v557_v5  ;;  %v555_v8 = vpack.c.bf16 %v527_v55, %v526_v27  ;;  %v484_v38 = vmul.f32 %v341_v16, %v949_v17  ;;  %v485_v41 = vmul.f32 %v341_v16, %v952_v18  ;;  %v730_v53 = vpop.eup %729  ;;  %v1206_v39 = vadd.f32 1e-06, %v300_v37 }
  0xc4   : > { %v393_v17 = vmul.f32 %v730_v53, %v1168_v52  ;;  %v1216_v18 = vadd.f32 1e-06, %v299_v7  ;;  %v411_v10 = vsel %vm410_vm5, %v1152_v26, %v407_v44  ;;  %733 = vrsqrt.f32 %v1203_v42  ;;  %v276_v59 = vpop.xlane.xlu1 %275 }
  0xc5   : > { %571 = vst [vmem:[%s1148_s26 + $0x18] sm:$0xff] %v555_v8  ;;  %v522_v28 = vmul.f32 %v1098_v29, %v484_v38  ;;  %v523_v51 = vmul.f32 %v1100_v36, %v485_v41  ;;  %v304_v43 = vmul.f32 %v1066_v40, %v279_v22  ;;  %v498_v56 = vmul.f32 %v411_v10, %v967_v30 }
  0xc6   : > { %v732_v15 = vpop.eup %731  ;;  %v499_v11 = vmul.f32 %v411_v10, %v970_v31  ;;  %v394_v58 = vmul.f32 %v730_v53, %v393_v17  ;;  %vm398_vm6 = vweird.f32 %v1168_v52  ;;  %735 = vrsqrt.f32 %v1206_v39 }
  0xc7   : > { %v553_v54 = vpack.c.bf16 %v523_v51, %v522_v28  ;;  %v383_v19 = vmul.f32 %v732_v15, %v1181_v6  ;;  %v536_v26 = vmul.f32 %v1098_v29, %v498_v56  ;;  %737 = vrsqrt.f32 %v1216_v18 }
  0xc8   : > { %v537_v57 = vmul.f32 %v1100_v36, %v499_v11  ;;  %v395_v20 = vmul.f32 0.5, %v394_v58  ;;  %v1230_v12 = vadd.f32 1e-06, %v304_v43  ;;  %v303_v31 = vmul.f32 %v1066_v40, %v276_v59  ;;  %v282_v0 = vpop.xlane.xlu0 %281 }
  0xc9   : > { %569 = vst [vmem:[%s1148_s26 + $0x8] sm:$0xff] %v553_v54  ;;  %v384_v30 = vmul.f32 %v732_v15, %v383_v19  ;;  %v302_v13 = vmul.f32 %v1066_v40, %v273_v9  ;;  %vm399_vm7 = vweird.f32 %v730_v53  ;;  %vm388_vm8 = vweird.f32 %v1181_v6 }
  0xca   : > { %v560_v21 = vpack.c.bf16 %v537_v57, %v536_v26  ;;  %v396_v1 = vsub.f32 1.5, %v395_v20  ;;  %v734_v2 = vpop.eup %733  ;;  %vm438_vm9 = vweird.f32 %v1203_v42  ;;  %739 = vrsqrt.f32 %v1230_v12  ;;  %vm400_vm10 = vmor %vm398_vm6, %vm399_vm7 }
  0xcb   : > { %v385_v5 = vmul.f32 0.5, %v384_v30  ;;  %v1237_v27 = vadd.f32 1e-06, %v303_v31  ;;  %v433_v14 = vmul.f32 %v734_v2, %v1203_v42  ;;  %v1241_v16 = vadd.f32 1e-06, %v302_v13 }
  0xcc   : > { %576 = vst [vmem:[%s1148_s26 + $0x40] sm:$0xff] %v560_v21  ;;  %v397_v55 = vmul.f32 %v730_v53, %v396_v1  ;;  %v305_v9 = vmul.f32 %v1066_v40, %v282_v0  ;;  %v736_v25 = vpop.eup %735  ;;  %vm389_vm11 = vweird.f32 %v732_v15  ;;  %vm428_vm12 = vweird.f32 %v1206_v39 }
  0xcd   : > { %v386_v37 = vsub.f32 1.5, %v385_v5  ;;  %741 = vrsqrt.f32 %v1237_v27  ;;  %v738_v7 = vpop.eup %737  ;;  %v434_v38 = vmul.f32 %v734_v2, %v433_v14  ;;  %vm439_vm13 = vweird.f32 %v734_v2  ;;  %vm390_vm14 = vmor %vm388_vm8, %vm389_vm11 }
  0xce   : > { %v401_v8 = vsel %vm400_vm10, %v730_v53, %v397_v55  ;;  %v423_v41 = vmul.f32 %v736_v25, %v1206_v39  ;;  %v413_v52 = vmul.f32 %v738_v7, %v1216_v18  ;;  %vm418_vm15 = vweird.f32 %v1216_v18  ;;  %vm440_vm3 = vmor %vm438_vm9, %vm439_vm13 }
  0xcf   : > { %v496_v22 = vmul.f32 %v401_v8, %v973_v32  ;;  %v497_v40 = vmul.f32 %v401_v8, %v976_v33  ;;  %v387_v44 = vmul.f32 %v732_v15, %v386_v37  ;;  %v435_v28 = vmul.f32 0.5, %v434_v38 }
  0xd0   : > { %v424_v51 = vmul.f32 %v736_v25, %v423_v41  ;;  %743 = vrsqrt.f32 %v1241_v16  ;;  %v1256_v53 = vadd.f32 1e-06, %v305_v9  ;;  %v1258_v17 = vpop.eup %739  ;;  %v414_v43 = vmul.f32 %v738_v7, %v413_v52 }
  0xd1   : > { %v534_v32 = vmul.f32 %v1098_v29, %v496_v22  ;;  %v535_v33 = vmul.f32 %v1100_v36, %v497_v40  ;;  %v391_v10 = vsel %vm390_vm14, %v732_v15, %v387_v44  ;;  %v436_v56 = vsub.f32 1.5, %v435_v28 }
  0xd2   : > { %v494_v6 = vmul.f32 %v391_v10, %v979_v34  ;;  %v495_v54 = vmul.f32 %v391_v10, %v982_v35  ;;  %v425_v11 = vmul.f32 0.5, %v424_v51  ;;  %vm468_vm0 = vweird.f32 %v1230_v12 }
  0xd3   : > { %v1265_v58 = vpop.eup %741  ;;  %v559_v59 = vpack.c.bf16 %v535_v33, %v534_v32  ;;  %vm429_vm1 = vweird.f32 %v736_v25  ;;  %v415_v19 = vmul.f32 0.5, %v414_v43  ;;  %v463_v26 = vmul.f32 %v1258_v17, %v1230_v12 }
  0xd4   : > { %v532_v15 = vmul.f32 %v1098_v29, %v494_v6  ;;  %v533_v57 = vmul.f32 %v1100_v36, %v495_v54  ;;  %v437_v20 = vmul.f32 %v734_v2, %v436_v56  ;;  %v426_v34 = vsub.f32 1.5, %v425_v11  ;;  %vm430_vm6 = vmor %vm428_vm12, %vm429_vm1 }
  0xd5   : > { %vm458_vm2 = vweird.f32 %v1237_v27  ;;  %575 = vst [vmem:[%s1148_s26 + $0x38] sm:$0xff] %v559_v59  ;;  %v416_v35 = vsub.f32 1.5, %v415_v19  ;;  %vm419_vm4 = vweird.f32 %v738_v7  ;;  %v464_v30 = vmul.f32 %v1258_v17, %v463_v26 }
  0xd6   : > { %v453_v31 = vmul.f32 %v1265_v58, %v1237_v27  ;;  %v744_v13 = vpop.eup %743  ;;  %v558_v0 = vpack.c.bf16 %v533_v57, %v532_v15  ;;  %v441_v21 = vsel %vm440_vm3, %v734_v2, %v437_v20  ;;  %v427_v1 = vmul.f32 %v736_v25, %v426_v34  ;;  %vm420_vm8 = vmor %vm418_vm15, %vm419_vm4 }
  0xd7   : > { %vm469_vm5 = vweird.f32 %v1258_v17  ;;  %v504_v5 = vmul.f32 %v441_v21, %v997_v45  ;;  %v505_v55 = vmul.f32 %v441_v21, %v1000_v46  ;;  %v417_v42 = vmul.f32 %v738_v7, %v416_v35 }
  0xd8   : > { %v465_v14 = vmul.f32 0.5, %v464_v30  ;;  %574 = vst [vmem:[%s1148_s26 + $0x30] sm:$0xff] %v558_v0  ;;  %v431_v9 = vsel %vm430_vm6, %v736_v25, %v427_v1  ;;  %v454_v37 = vmul.f32 %v1265_v58, %v453_v31  ;;  %vm459_vm7 = vweird.f32 %v1265_v58  ;;  %vm470_vm9 = vmor %vm468_vm0, %vm469_vm5 }
  0xd9   : > { %v443_v2 = vmul.f32 %v744_v13, %v1241_v16  ;;  %v542_v8 = vmul.f32 %v1098_v29, %v504_v5  ;;  %v543_v45 = vmul.f32 %v1100_v36, %v505_v55  ;;  %v502_v46 = vmul.f32 %v431_v9, %v1003_v47  ;;  %vm460_vm11 = vmor %vm458_vm2, %vm459_vm7 }
  0xda   : > { %v503_v39 = vmul.f32 %v431_v9, %v1006_v48  ;;  %v421_v25 = vsel %vm420_vm8, %v738_v7, %v417_v42  ;;  %v466_v38 = vsub.f32 1.5, %v465_v14  ;;  %v455_v41 = vmul.f32 0.5, %v454_v37 }
  0xdb   : > { %v444_v22 = vmul.f32 %v744_v13, %v443_v2  ;;  %v563_v40 = vpack.c.bf16 %v543_v45, %v542_v8  ;;  %v540_v44 = vmul.f32 %v1098_v29, %v502_v46  ;;  %v500_v28 = vmul.f32 %v421_v25, %v1009_v49 }
  0xdc   : > { %v541_v52 = vmul.f32 %v1100_v36, %v503_v39  ;;  %v501_v47 = vmul.f32 %v421_v25, %v1012_v50  ;;  %v467_v48 = vmul.f32 %v1258_v17, %v466_v38  ;;  %v456_v51 = vsub.f32 1.5, %v455_v41 }
  0xdd   : > { %v445_v32 = vmul.f32 0.5, %v444_v22  ;;  %579 = vst [vmem:[%s1148_s26 + $0x58] sm:$0xff] %v563_v40  ;;  %v538_v7 = vmul.f32 %v1098_v29, %v500_v28  ;;  %vm449_vm10 = vweird.f32 %v744_v13  ;;  %745 = vrsqrt.f32 %v1256_v53 }
  0xde   : > { %v562_v18 = vpack.c.bf16 %v541_v52, %v540_v44  ;;  %v539_v49 = vmul.f32 %v1100_v36, %v501_v47  ;;  %v471_v50 = vsel %vm470_vm9, %v1258_v17, %v467_v48  ;;  %v457_v33 = vmul.f32 %v1265_v58, %v456_v51 }
  0xdf   : > { %v446_v10 = vsub.f32 1.5, %v445_v32  ;;  %v510_v43 = vmul.f32 %v471_v50, %v1027_v60  ;;  %v511_v6 = vmul.f32 %v471_v50, %v1030_v61  ;;  %vm448_vm12 = vweird.f32 %v1241_v16 }
  0xe0   : > { %578 = vst [vmem:[%s1148_s26 + $0x50] sm:$0xff] %v562_v18  ;;  %v561_v12 = vpack.c.bf16 %v539_v49, %v538_v7  ;;  %v461_v54 = vsel %vm460_vm11, %v1265_v58, %v457_v33  ;;  %vm450_vm13 = vmor %vm448_vm12, %vm449_vm10  ;;  %vm478_vm15 = vweird.f32 %v1256_v53 }
  0xe1   : > { %v447_v56 = vmul.f32 %v744_v13, %v446_v10  ;;  %v548_v17 = vmul.f32 %v1098_v29, %v510_v43  ;;  %v549_v11 = vmul.f32 %v1100_v36, %v511_v6  ;;  %v508_v60 = vmul.f32 %v461_v54, %v1033_v62 }
  0xe2   : > { %v509_v61 = vmul.f32 %v461_v54, %v1036_v63  ;;  %577 = vst [vmem:[%s1148_s26 + $0x48] sm:$0xff] %v561_v12 }
  0xe3   : > { %v451_v27 = vsel %vm450_vm13, %v744_v13, %v447_v56  ;;  %v746_v59 = vpop.eup %745  ;;  %v566_v58 = vpack.c.bf16 %v549_v11, %v548_v17  ;;  %v546_v19 = vmul.f32 %v1098_v29, %v508_v60 }
  0xe4   : > { %v547_v16 = vmul.f32 %v1100_v36, %v509_v61  ;;  %v506_v26 = vmul.f32 %v451_v27, %v1039_v3  ;;  %v507_v15 = vmul.f32 %v451_v27, %v1042_v4  ;;  %v473_v62 = vmul.f32 %v746_v59, %v1256_v53 }
  0xe5   : > { %582 = vst [vmem:[%s1148_s26 + $0x70] sm:$0xff] %v566_v58  ;;  %vm479_vm14 = vweird.f32 %v746_v59 }
  0xe6   : > { %v565_v63 = vpack.c.bf16 %v547_v16, %v546_v19  ;;  %v544_v57 = vmul.f32 %v1098_v29, %v506_v26  ;;  %v545_v20 = vmul.f32 %v1100_v36, %v507_v15  ;;  %v474_v34 = vmul.f32 %v746_v59, %v473_v62  ;;  %vm480_vm0 = vmor %vm478_vm15, %vm479_vm14 }
  0xe8   : > { %581 = vst [vmem:[%s1148_s26 + $0x68] sm:$0xff] %v565_v63  ;;  %v564_v35 = vpack.c.bf16 %v545_v20, %v544_v57  ;;  %v475_v30 = vmul.f32 0.5, %v474_v34 }
  0xea   : > { %580 = vst [vmem:[%s1148_s26 + $0x60] sm:$0xff] %v564_v35  ;;  %v476_v31 = vsub.f32 1.5, %v475_v30 }
  0xec   : > { %v477_v13 = vmul.f32 %v746_v59, %v476_v31 }
  0xee   : > { %v481_v3 = vsel %vm480_vm0, %v746_v59, %v477_v13 }
  0xef   : > { %v512_v4 = vmul.f32 %v481_v3, %v1057_v23  ;;  %v513_v0 = vmul.f32 %v481_v3, %v1060_v24 }
  0xf1   : > { %v550_v21 = vmul.f32 %v1098_v29, %v512_v4  ;;  %v551_v1 = vmul.f32 %v1100_v36, %v513_v0 }
  0xf3   : > { %v567_v5 = vpack.c.bf16 %v551_v1, %v550_v21 }
  0xf5   : > { %583 = vst [vmem:[%s1148_s26 + $0x78] sm:$0xff] %v567_v5 }
  0xf6 PF: > { %p12_p7 = scmp.ge.s32.totalorder %s851_s14, 4   ;;  %s1361_s9 = smov %s803_s10 }
  0xf7   : > { %s1362_s10 = smov %s807_s11  ;;  %s1363_s11 = smov %s861_s17 }
  0xf8   : > { %s1364_s12 = smov %s851_s14  ;;  %14 = sbr.rel (!%p12_p7) target bundleno = 3 (0x3), region = 68 }
  0xfd   :  { %608 = vsyncpa [#allocation3], 1 }
  0xfe   :  { %610 = vsyncpa [#allocation3 + $0x1], 1 }

// kernel: decoder_layer.8
= control target key start
LH: loop header
LB: loop body
LE: loop exit
PB: predicated region body
PF: predicated region fallthrough
CT: control target
= control target key end

     0   :  { %s1805_s0 = inlined_call_operand.vmem [shape: bf16[256,256], index: 0, kind: input, shape index: {}]   ;;  %s1806_s1 = inlined_call_operand.vmem [shape: bf16[256,768], index: 1, kind: input, shape index: {}]   ;;  %s1807_s2 = inlined_call_operand.vmem [shape: f32[256,768], index: 2, kind: output, shape index: {}]  }
   0x1   :  { %1810 = sst [smem:[#allocation8_spill]] %s1807_s2 }
   0x2   :  { %s1433_s9 = smov 0   ;;  %s1435_s10 = smov 0  }
   0x3   :  { %s1437_s11 = smov 0   ;;  %s1439_s12 = smov 0  }
   0x4   :  { %s1441_s13 = smov 0   ;;  %s1443_s14 = smov 0  }
   0x5   :  { %s1445_s15 = smov 0   ;;  %s1447_s16 = smov 0  }
   0x6   :  { %s1449_s17 = smov 0   ;;  %s1451_s18 = smov 0  }
   0x7   :  { %s1453_s19 = smov 0   ;;  %s1455_s20 = smov 0  }
   0x8   :  { %s1457_s21 = smov 0  }
   0x9 LB: > { %s24_s23 = sadd.s32 1, %s1403_s18  ;;  %s27_s24 = sadd.s32 1, %s1407_s19  ;;  %s1415_s21 = sphi %s1457_s21, %s12_s21   ;;  %s1411_s20 = sphi %s1455_s20, %s1833_s20   ;;  %s1407_s19 = sphi %s1453_s19, %s1832_s19   ;;  %s1403_s18 = sphi %s1451_s18, %s1831_s18   ;;  %s1399_s17 = sphi %s1449_s17, %s1830_s17   ;;  %s1395_s16 = sphi %s1447_s16, %s1829_s16   ;;  %s1391_s15 = sphi %s1445_s15, %s1828_s15   ;;  %s1387_s14 = sphi %s1443_s14, %s1827_s14   ;;  %s1383_s13 = sphi %s1441_s13, %s1826_s13   ;;  %s1379_s12 = sphi %s1439_s12, %s1825_s12   ;;  %s1375_s11 = sphi %s1437_s11, %s1824_s11   ;;  %s1371_s10 = sphi %s1435_s10, %s1823_s10   ;;  %s1367_s9 = sphi %s1433_s9, %s1822_s9  }
   0xa   : > { %p25_p0 = scmp.ge.s32.totalorder %s24_s23, 2  ;;  %s31_s25 = sadd.s32 1, %s1411_s20 }
   0xb   : > { %s40_s26 = sadd.s32 1, %s1387_s14  ;;  %p47_p1 = scmp.ne.s32.totalorder %s1387_s14, %s1383_s13 }
   0xc   : > { %s1835_s23 = smov (%p25_p0, %s24_s23), 0  ;;  %s1837_s24 = smov (!%p25_p0, %s27_s24), %s1407_s19 }
   0xd   : > { %1811 = sst [smem:[#allocation6_spill]] %s1835_s23  ;;  %s36_s27 = ssub.s32 %s1403_s18, %s1835_s23 }
   0xe   : > { %p29_p2 = scmp.ge.s32.totalorder %s1837_s24, 3  ;;  %p48_p3 = scmp.eq.s32.totalorder %s1415_s21, 0 }
   0xf   : > { %s68_s28 = sadd.s32 1, %s1379_s12  ;;  %p75_p4 = scmp.ne.s32.totalorder %s1379_s12, %s1375_s11 }
  0x10   : > { %s1839_s24 = smov (%p29_p2, %s1837_s24), 0  ;;  %s1841_s25 = smov (!%p29_p2, %s31_s25), %s1411_s20 }
  0x11   : > { %1812 = sst [smem:[#allocation7_spill]] %s1839_s24  ;;  %p1517_p5 = por %p48_p3, %p47_p1 }
  0x12   : > { %s64_s30 = ssub.s32 %s1407_s19, %s1839_s24  ;;  %p33_p6 = scmp.ge.s32.totalorder %s1841_s25, 2 }
  0x13   : > { %s65_s3 = sor.u32 %s64_s30, %s36_s27  ;;  %p1523_p8 = por %p75_p4, %p48_p3 }
  0x14   : > { %p66_p7 = scmp.eq.s32.totalorder %s65_s3, 0  ;;  %s1843_s25 = smov (%p33_p6, %s1841_s25), 0 }
  0x15   : > { %s35_s6 = ssub.s32 %s1411_s20, %s1843_s25  ;;  %s96_s7 = sadd.s32 1, %s1371_s10 }
  0x16   : > { %s1530_s5 = scalar_select %p66_p7, %s1379_s12, %s68_s28  }
  0x17   : > { %s37_s8 = sor.u32 %s36_s27, %s35_s6  ;;  %s93_s22 = sor.u32 %s64_s30, %s35_s6 }
  0x18   : > { %p38_p9 = scmp.eq.s32.totalorder %s37_s8, 0  ;;  %p94_p10 = scmp.eq.s32.totalorder %s93_s22, 0 }
  0x19   : > { %p106_p11 = scmp.ne.s32.totalorder %s1371_s10, %s1367_s9  ;;  %s1815_s24 = sadd.s32 4294967295, %s1415_s21  }
  0x1a   : > { %p107_p12 = scmp.eq.s32.totalorder %s1815_s24, 11  ;;  %p1046_p0 = scmp.ge.s32.totalorder %s1415_s21, 12 }
  0x1b   : > { %s1540_s23 = scalar_select %p38_p9, %s1387_s14, %s40_s26  }
  0x1c   : > { %s1543_s3 = scalar_select %p94_p10, %s1371_s10, %s96_s7  }
  0x1d   : > { %p1545_p13 = por %p107_p12, %p106_p11  ;;  %129 = sbr.rel (%p1046_p0) target bundleno = 80 (0x50), region = 16 }
  0x22   : > { %132 = sbr.rel (!%p1517_p5) target bundleno = 56 (0x38), region = 20  ;;  %s134_s22 = sand.u32 (%p1517_p5), 1, %s1387_s14  }
  0x23   : > { %s1165_s27 = sshll.u32 (%p1517_p5), %s1411_s20, 5  ;;  %s1047_s24 = sshll.u32 (%p1517_p5), %s134_s22, 6 }
  0x24   : > { %s139_s26 = sadd.s32 (%p1517_p5), %s1403_s18, %s1165_s27  ;;  %s136_s29 = scalar_lea.vmem (%p1517_p5), [#allocation3], %s1047_s24 }
  0x25   : > { %s1050_s28 = sshll.u32 (%p1517_p5), %s139_s26, 2 }
  0x26   : > { %s1558_s7 = scalar_lea.vmem (%p1517_p5), %s1805_s0, %s1050_s28 }
  0x27   : > { %v158_v0 = vld [vmem:[%s1558_s7] sm:$0xf]  ;;  %v160_v1 = vld [vmem:[%s1558_s7 + $0x8] sm:$0xf]  ;;  %v162_v2 = vld [vmem:[%s1558_s7 + $0x10] sm:$0xf] }
  0x28   : > { %159 = vst [vmem:[%s136_s29] sm:$0xf] %v158_v0  ;;  %v164_v3 = vld [vmem:[%s1558_s7 + $0x18] sm:$0xf]  ;;  %v166_v4 = vld [vmem:[%s1558_s7 + $0x20] sm:$0xf] }
  0x29   : > { %161 = vst [vmem:[%s136_s29 + $0x4] sm:$0xf] %v160_v1  ;;  %v168_v5 = vld [vmem:[%s1558_s7 + $0x28] sm:$0xf]  ;;  %v170_v6 = vld [vmem:[%s1558_s7 + $0x30] sm:$0xf] }
  0x2a   : > { %163 = vst [vmem:[%s136_s29 + $0x8] sm:$0xf] %v162_v2  ;;  %v172_v7 = vld [vmem:[%s1558_s7 + $0x38] sm:$0xf]  ;;  %v174_v8 = vld [vmem:[%s1558_s7 + $0x40] sm:$0xf] }
  0x2b   : > { %165 = vst [vmem:[%s136_s29 + $0xc] sm:$0xf] %v164_v3  ;;  %v176_v9 = vld [vmem:[%s1558_s7 + $0x48] sm:$0xf]  ;;  %v178_v10 = vld [vmem:[%s1558_s7 + $0x50] sm:$0xf] }
  0x2c   : > { %167 = vst [vmem:[%s136_s29 + $0x10] sm:$0xf] %v166_v4  ;;  %v180_v11 = vld [vmem:[%s1558_s7 + $0x58] sm:$0xf]  ;;  %v182_v12 = vld [vmem:[%s1558_s7 + $0x60] sm:$0xf] }
  0x2d   : > { %169 = vst [vmem:[%s136_s29 + $0x14] sm:$0xf] %v168_v5  ;;  %v184_v13 = vld [vmem:[%s1558_s7 + $0x68] sm:$0xf]  ;;  %v186_v14 = vld [vmem:[%s1558_s7 + $0x70] sm:$0xf] }
  0x2e   : > { %171 = vst [vmem:[%s136_s29 + $0x18] sm:$0xf] %v170_v6  ;;  %v188_v15 = vld [vmem:[%s1558_s7 + $0x78] sm:$0xf] }
  0x2f   : > { %173 = vst [vmem:[%s136_s29 + $0x1c] sm:$0xf] %v172_v7 }
  0x30   : > { %175 = vst [vmem:[%s136_s29 + $0x20] sm:$0xf] %v174_v8 }
  0x31   : > { %177 = vst [vmem:[%s136_s29 + $0x24] sm:$0xf] %v176_v9 }
  0x32   : > { %179 = vst [vmem:[%s136_s29 + $0x28] sm:$0xf] %v178_v10 }
  0x33   : > { %181 = vst [vmem:[%s136_s29 + $0x2c] sm:$0xf] %v180_v11 }
  0x34   : > { %183 = vst [vmem:[%s136_s29 + $0x30] sm:$0xf] %v182_v12 }
  0x35   : > { %185 = vst [vmem:[%s136_s29 + $0x34] sm:$0xf] %v184_v13 }
  0x36   : > { %187 = vst [vmem:[%s136_s29 + $0x38] sm:$0xf] %v186_v14 }
  0x37   : > { %189 = vst [vmem:[%s136_s29 + $0x3c] sm:$0xf] %v188_v15 }
  0x38 PF: > { %245 = sbr.rel (!%p1523_p8) target bundleno = 80 (0x50), region = 61  ;;  %s247_s8 = sand.u32 (%p1523_p8), 1, %s1379_s12  }
  0x39   : > { %s1053_s22 = sshll.u32 (%p1523_p8), %s1407_s19, 1  ;;  %s1051_s27 = sshll.u32 (%p1523_p8), %s247_s8, 7 }
  0x3a   : > { %s1206_s24 = smul.u32 (%p1523_p8), 96, %s1403_s18  ;;  %s249_s4 = scalar_lea.vmem (%p1523_p8), [#allocation4], %s1051_s27 }
  0x3c   : > { %s253_s26 = sadd.s32 (%p1523_p8), %s1206_s24, %s1053_s22 }
  0x3d   : > { %s1055_s28 = sshll.u32 %s253_s26, 2 }
  0x3e   : > { %s1584_s7 = scalar_lea.vmem %s1806_s1, %s1055_s28 }
  0x3f   : > { %v314_v16 = vld [vmem:[%s1584_s7] sm:$0xff]  ;;  %v316_v17 = vld [vmem:[%s1584_s7 + $0x18] sm:$0xff]  ;;  %v318_v18 = vld [vmem:[%s1584_s7 + $0x30] sm:$0xff] }
  0x40   : > { %315 = vst [vmem:[%s249_s4] sm:$0xff] %v314_v16  ;;  %v320_v19 = vld [vmem:[%s1584_s7 + $0x48] sm:$0xff]  ;;  %v322_v20 = vld [vmem:[%s1584_s7 + $0x60] sm:$0xff]  ;;  %v324_v21 = vld [vmem:[%s1584_s7 + $0x78] sm:$0xff] }
  0x41   : > { %317 = vst [vmem:[%s249_s4 + $0x8] sm:$0xff] %v316_v17  ;;  %v326_v22 = vld [vmem:[%s1584_s7 + $0x90] sm:$0xff]  ;;  %v328_v23 = vld [vmem:[%s1584_s7 + $0xa8] sm:$0xff]  ;;  %v330_v24 = vld [vmem:[%s1584_s7 + $0xc0] sm:$0xff] }
  0x42   : > { %319 = vst [vmem:[%s249_s4 + $0x10] sm:$0xff] %v318_v18  ;;  %v332_v25 = vld [vmem:[%s1584_s7 + $0xd8] sm:$0xff]  ;;  %v334_v26 = vld [vmem:[%s1584_s7 + $0xf0] sm:$0xff]  ;;  %v336_v27 = vld [vmem:[%s1584_s7 + $0x108] sm:$0xff] }
  0x43   : > { %321 = vst [vmem:[%s249_s4 + $0x18] sm:$0xff] %v320_v19  ;;  %v338_v28 = vld [vmem:[%s1584_s7 + $0x120] sm:$0xff]  ;;  %v340_v29 = vld [vmem:[%s1584_s7 + $0x138] sm:$0xff]  ;;  %v342_v30 = vld [vmem:[%s1584_s7 + $0x150] sm:$0xff] }
  0x44   : > { %323 = vst [vmem:[%s249_s4 + $0x20] sm:$0xff] %v322_v20  ;;  %v344_v31 = vld [vmem:[%s1584_s7 + $0x168] sm:$0xff] }
  0x45   : > { %325 = vst [vmem:[%s249_s4 + $0x28] sm:$0xff] %v324_v21 }
  0x46   : > { %327 = vst [vmem:[%s249_s4 + $0x30] sm:$0xff] %v326_v22 }
  0x47   : > { %329 = vst [vmem:[%s249_s4 + $0x38] sm:$0xff] %v328_v23 }
  0x48   : > { %331 = vst [vmem:[%s249_s4 + $0x40] sm:$0xff] %v330_v24 }
  0x49   : > { %333 = vst [vmem:[%s249_s4 + $0x48] sm:$0xff] %v332_v25 }
  0x4a   : > { %335 = vst [vmem:[%s249_s4 + $0x50] sm:$0xff] %v334_v26 }
  0x4b   : > { %337 = vst [vmem:[%s249_s4 + $0x58] sm:$0xff] %v336_v27 }
  0x4c   : > { %339 = vst [vmem:[%s249_s4 + $0x60] sm:$0xff] %v338_v28 }
  0x4d   : > { %341 = vst [vmem:[%s249_s4 + $0x68] sm:$0xff] %v340_v29 }
  0x4e   : > { %343 = vst [vmem:[%s249_s4 + $0x70] sm:$0xff] %v342_v30 }
  0x4f   : > { %345 = vst [vmem:[%s249_s4 + $0x78] sm:$0xff] %v344_v31 }
  0x50 PF: > { %p1056_p1 = scmp.ge.s32.totalorder %s1415_s21, 1  ;;  %p350_p2 = scmp.lt.s32.totalorder %s1415_s21, 13 }
  0x52   : > { %p351_p3 = pnand %p1056_p1, %p350_p2 }
  0x53   : > { %s357_s29 = sand.u32 (!%p351_p3), 1, %s1383_s13   ;;  %s364_s8 = sand.u32 (!%p351_p3), 1, %s1375_s11  }
  0x54   : > { %354 = sbr.rel (%p351_p3) target bundleno = 427 (0x1ab), region = 99  ;;  %s1057_s22 = sshll.u32 (!%p351_p3), %s357_s29, 6 }
  0x55   : > { %s1058_s27 = sshll.u32 (!%p351_p3), %s364_s8, 7  ;;  %s385_s24 = sand.u32 (!%p351_p3), 1, %s1367_s9  }
  0x56   : > { %s1059_s26 = sshll.u32 (!%p351_p3), %s385_s24, 8  ;;  %s1607_s28 = scalar_lea.vmem (!%p351_p3), [#allocation3], %s1057_s22 }
  0x57   : > { %s1609_s30 = scalar_lea.vmem (!%p351_p3), [#allocation4], %s1058_s27  ;;  %s1611_s6 = scalar_lea.vmem (!%p351_p3), [#allocation5], %s1059_s26 }
  0x58   : > { %p1060_p4 = scmp.ne.s32.totalorder (!%p351_p3), %s1391_s15, 0 }
  0x5a   : > { %396 = sbr.rel (%p1060_p4) target bundleno = 128 (0x80), region = 111 }
  0x5f   : > { %v1417_v32 = vmov 0.0  }
  0x60   : > { %397 = vst [vmem:[#allocation2 + $0xb0] sm:$0xff] %v1417_v32 }
  0x61   : > { %398 = vst [vmem:[#allocation2] sm:$0xff] %v1417_v32 }
  0x62   : > { %399 = vst [vmem:[#allocation2 + $0xd8] sm:$0xff] %v1417_v32 }
  0x63   : > { %400 = vst [vmem:[#allocation2 + $0x18] sm:$0xff] %v1417_v32 }
  0x64   : > { %401 = vst [vmem:[#allocation2 + $0x50] sm:$0xff] %v1417_v32 }
  0x65   : > { %402 = vst [vmem:[#allocation2 + $0x68] sm:$0xff] %v1417_v32 }
  0x66   : > { %403 = vst [vmem:[#allocation2 + $0x30] sm:$0xff] %v1417_v32 }
  0x67   : > { %404 = vst [vmem:[#allocation2 + $0x48] sm:$0xff] %v1417_v32 }
  0x68   : > { %405 = vst [vmem:[#allocation2 + $0x80] sm:$0xff] %v1417_v32 }
  0x69   : > { %406 = vst [vmem:[#allocation2 + $0x88] sm:$0xff] %v1417_v32 }
  0x6a   : > { %407 = vst [vmem:[#allocation2 + $0xe8] sm:$0xff] %v1417_v32 }
  0x6b   : > { %408 = vst [vmem:[#allocation2 + $0xb8] sm:$0xff] %v1417_v32 }
  0x6c   : > { %409 = vst [vmem:[#allocation2 + $0x60] sm:$0xff] %v1417_v32 }
  0x6d   : > { %410 = vst [vmem:[#allocation2 + $0xf0] sm:$0xff] %v1417_v32 }
  0x6e   : > { %411 = vst [vmem:[#allocation2 + $0x8] sm:$0xff] %v1417_v32 }
  0x6f   : > { %412 = vst [vmem:[#allocation2 + $0x78] sm:$0xff] %v1417_v32 }
  0x70   : > { %413 = vst [vmem:[#allocation2 + $0x38] sm:$0xff] %v1417_v32 }
  0x71   : > { %414 = vst [vmem:[#allocation2 + $0x58] sm:$0xff] %v1417_v32 }
  0x72   : > { %415 = vst [vmem:[#allocation2 + $0x40] sm:$0xff] %v1417_v32 }
  0x73   : > { %416 = vst [vmem:[#allocation2 + $0xc8] sm:$0xff] %v1417_v32 }
  0x74   : > { %417 = vst [vmem:[#allocation2 + $0xe0] sm:$0xff] %v1417_v32 }
  0x75   : > { %418 = vst [vmem:[#allocation2 + $0x90] sm:$0xff] %v1417_v32 }
  0x76   : > { %419 = vst [vmem:[#allocation2 + $0x70] sm:$0xff] %v1417_v32 }
  0x77   : > { %420 = vst [vmem:[#allocation2 + $0xc0] sm:$0xff] %v1417_v32 }
  0x78   : > { %421 = vst [vmem:[#allocation2 + $0xa8] sm:$0xff] %v1417_v32 }
  0x79   : > { %422 = vst [vmem:[#allocation2 + $0xd0] sm:$0xff] %v1417_v32 }
  0x7a   : > { %423 = vst [vmem:[#allocation2 + $0x10] sm:$0xff] %v1417_v32 }
  0x7b   : > { %424 = vst [vmem:[#allocation2 + $0x28] sm:$0xff] %v1417_v32 }
  0x7c   : > { %425 = vst [vmem:[#allocation2 + $0xa0] sm:$0xff] %v1417_v32 }
  0x7d   : > { %426 = vst [vmem:[#allocation2 + $0xf8] sm:$0xff] %v1417_v32 }
  0x7e   : > { %427 = vst [vmem:[#allocation2 + $0x20] sm:$0xff] %v1417_v32 }
  0x7f   : > { %428 = vst [vmem:[#allocation2 + $0x98] sm:$0xff] %v1417_v32 }
  0x80 PF: > { %v1151_v33 = vld [vmem:[%s1609_s30 + $0x70] sm:$0xf]  ;;  %v1189_v34 = vld [vmem:[%s1609_s30 + $0x74] sm:$0xf0]  ;;  %v1188_v35 = vld [vmem:[%s1609_s30 + $0x74] sm:$0xf] }
  0x81   : > { %v1152_v36 = vor.u32 %v1189_v34, %v1151_v33  ;;  %v1153_v37 = vld [vmem:[%s1609_s30 + $0x78] sm:$0xf0]  ;;  %v1143_v38 = vld [vmem:[%s1609_s30 + $0x60] sm:$0xf]  ;;  %v1187_v39 = vld [vmem:[%s1609_s30 + $0x64] sm:$0xf0] }
  0x82   : > { %v1156_v40 = vor.u32 %v1188_v35, %v1153_v37  ;;  %v1186_v41 = vld [vmem:[%s1609_s30 + $0x64] sm:$0xf]  ;;  %v1145_v42 = vld [vmem:[%s1609_s30 + $0x68] sm:$0xf0]  ;;  %v1144_v43 = vor.u32 %v1187_v39, %v1143_v38  ;;  %v1135_v45 = vld [vmem:[%s1609_s30 + $0x50] sm:$0xf] }
  0x83   : > { %621 = vmatpush.bf16.msra.mxu0 %v1152_v36  ;;  %1190 = vmatpush.bf16.msra.mxu2 %v1152_v36  ;;  %v1148_v44 = vor.u32 %v1186_v41, %v1145_v42  ;;  %v1185_v46 = vld [vmem:[%s1609_s30 + $0x54] sm:$0xf0]  ;;  %v1184_v47 = vld [vmem:[%s1609_s30 + $0x54] sm:$0xf]  ;;  %v1137_v48 = vld [vmem:[%s1609_s30 + $0x58] sm:$0xf0] }
  0x84   : > { %670 = vmatpush.bf16.msra.mxu1 %v1156_v40  ;;  %1198 = vmatpush.bf16.msra.mxu3 %v1156_v40  ;;  %v1136_v49 = vor.u32 %v1185_v46, %v1135_v45  ;;  %v1140_v50 = vor.u32 %v1184_v47, %v1137_v48  ;;  %v1127_v51 = vld [vmem:[%s1609_s30 + $0x40] sm:$0xf]  ;;  %v1183_v52 = vld [vmem:[%s1609_s30 + $0x44] sm:$0xf0]  ;;  %v1182_v53 = vld [vmem:[%s1609_s30 + $0x44] sm:$0xf] }
  0x85   : > { %v1129_v54 = vld [vmem:[%s1609_s30 + $0x48] sm:$0xf0]  ;;  %v1128_v55 = vor.u32 %v1183_v52, %v1127_v51  ;;  %v1119_v57 = vld [vmem:[%s1609_s30 + $0x30] sm:$0xf]  ;;  %v1181_v58 = vld [vmem:[%s1609_s30 + $0x34] sm:$0xf0] }
  0x86   : > { %v1132_v56 = vor.u32 %v1182_v53, %v1129_v54  ;;  %v1180_v59 = vld [vmem:[%s1609_s30 + $0x34] sm:$0xf]  ;;  %v1121_v60 = vld [vmem:[%s1609_s30 + $0x38] sm:$0xf0]  ;;  %v1120_v61 = vor.u32 %v1181_v58, %v1119_v57  ;;  %v1111_v63 = vld [vmem:[%s1609_s30 + $0x20] sm:$0xf] }
  0x87   : > { %622 = vmatpush.bf16.msra.mxu0 %v1144_v43  ;;  %1191 = vmatpush.bf16.msra.mxu2 %v1144_v43  ;;  %v1124_v62 = vor.u32 %v1180_v59, %v1121_v60  ;;  %v1179_v0 = vld [vmem:[%s1609_s30 + $0x24] sm:$0xf0]  ;;  %v1178_v1 = vld [vmem:[%s1609_s30 + $0x24] sm:$0xf]  ;;  %v1113_v2 = vld [vmem:[%s1609_s30 + $0x28] sm:$0xf0] }
  0x88   : > { %671 = vmatpush.bf16.msra.mxu1 %v1148_v44  ;;  %1199 = vmatpush.bf16.msra.mxu3 %v1148_v44  ;;  %v1112_v3 = vor.u32 %v1179_v0, %v1111_v63  ;;  %v1116_v4 = vor.u32 %v1178_v1, %v1113_v2  ;;  %v1103_v5 = vld [vmem:[%s1609_s30 + $0x10] sm:$0xf]  ;;  %v1177_v6 = vld [vmem:[%s1609_s30 + $0x14] sm:$0xf0]  ;;  %v1176_v7 = vld [vmem:[%s1609_s30 + $0x14] sm:$0xf] }
  0x89   : > { %v1105_v8 = vld [vmem:[%s1609_s30 + $0x18] sm:$0xf0]  ;;  %v1104_v9 = vor.u32 %v1177_v6, %v1103_v5  ;;  %v1095_v11 = vld [vmem:[%s1609_s30] sm:$0xf]  ;;  %v1175_v12 = vld [vmem:[%s1609_s30 + $0x4] sm:$0xf0] }
  0x8a   : > { %v1108_v10 = vor.u32 %v1176_v7, %v1105_v8  ;;  %v1174_v13 = vld [vmem:[%s1609_s30 + $0x4] sm:$0xf]  ;;  %v1097_v14 = vld [vmem:[%s1609_s30 + $0x8] sm:$0xf0]  ;;  %v1096_v15 = vor.u32 %v1175_v12, %v1095_v11  ;;  %v1168_v21 = vld [vmem:[%s1607_s28 + $0x10] sm:$0xff]  ;;  %p1157_p5 = scmp.ne.s32.totalorder %s1391_s15, 1 }
  0x8b   : > { %623 = vmatpush.bf16.msra.mxu0 %v1136_v49  ;;  %1192 = vmatpush.bf16.msra.mxu2 %v1136_v49  ;;  %v1100_v16 = vor.u32 %v1174_v13, %v1097_v14  ;;  %v1166_v17 = vld [vmem:[%s1607_s28] sm:$0xff]  ;;  %v1167_v19 = vld [vmem:[%s1607_s28 + $0x8] sm:$0xff]  ;;  %v1172_v22 = vld [vmem:[%s1607_s28 + $0x30] sm:$0xff] }
  0x8c   : > { %672 = vmatpush.bf16.msra.mxu1 %v1140_v50  ;;  %1200 = vmatpush.bf16.msra.mxu3 %v1140_v50  ;;  %v1170_v18 = vld [vmem:[%s1607_s28 + $0x20] sm:$0xff]  ;;  %v1171_v20 = vld [vmem:[%s1607_s28 + $0x28] sm:$0xff]  ;;  %v1169_v23 = vld [vmem:[%s1607_s28 + $0x18] sm:$0xff] }
  0x8d   : > { %v1173_v24 = vld [vmem:[%s1607_s28 + $0x38] sm:$0xff]  ;;  %v429_v25 = vld [vmem:[#allocation2 + $0xb0] sm:$0xff]  ;;  %v430_v26 = vld [vmem:[#allocation2] sm:$0xff] }
  0x8e   : > { %v445_v31 = vld [vmem:[#allocation2 + $0x38] sm:$0xff]  ;;  %v447_v43 = vld [vmem:[#allocation2 + $0x40] sm:$0xff]  ;;  %v448_v44 = vld [vmem:[#allocation2 + $0xc8] sm:$0xff] }
  0x8f   : > { %624 = vmatpush.bf16.msra.mxu0 %v1128_v55  ;;  %1193 = vmatpush.bf16.msra.mxu2 %v1128_v55  ;;  %v446_v32 = vld [vmem:[#allocation2 + $0x58] sm:$0xff]  ;;  %v433_v46 = vld [vmem:[#allocation2 + $0x50] sm:$0xff]  ;;  %v434_v49 = vld [vmem:[#allocation2 + $0x68] sm:$0xff] }
  0x90   : > { %673 = vmatpush.bf16.msra.mxu1 %v1132_v56  ;;  %1201 = vmatpush.bf16.msra.mxu3 %v1132_v56  ;;  %v431_v34 = vld [vmem:[#allocation2 + $0xd8] sm:$0xff]  ;;  %v449_v55 = vld [vmem:[#allocation2 + $0xe0] sm:$0xff]  ;;  %v450_v56 = vld [vmem:[#allocation2 + $0x90] sm:$0xff] }
  0x91   : > { %v432_v37 = vld [vmem:[#allocation2 + $0x18] sm:$0xff]  ;;  %v435_v58 = vld [vmem:[#allocation2 + $0x30] sm:$0xff]  ;;  %v437_v6 = vld [vmem:[#allocation2 + $0x80] sm:$0xff] }
  0x93   : > { %625 = vmatpush.bf16.msra.mxu0 %v1120_v61  ;;  %1194 = vmatpush.bf16.msra.mxu2 %v1120_v61  ;;  %v436_v61 = vld [vmem:[#allocation2 + $0x48] sm:$0xff] }
  0x94   : > { %674 = vmatpush.bf16.msra.mxu1 %v1124_v62  ;;  %1202 = vmatpush.bf16.msra.mxu3 %v1124_v62 }
  0x97   : > { %626 = vmatpush.bf16.msra.mxu0 %v1112_v3  ;;  %1195 = vmatpush.bf16.msra.mxu2 %v1112_v3  ;;  %v451_v3 = vld [vmem:[#allocation2 + $0x70] sm:$0xff] }
  0x98   : > { %675 = vmatpush.bf16.msra.mxu1 %v1116_v4  ;;  %1203 = vmatpush.bf16.msra.mxu3 %v1116_v4  ;;  %v452_v4 = vld [vmem:[#allocation2 + $0xc0] sm:$0xff] }
  0x9b   : > { %627 = vmatpush.bf16.msra.mxu0 %v1104_v9  ;;  %1196 = vmatpush.bf16.msra.mxu2 %v1104_v9  ;;  %v438_v9 = vld [vmem:[#allocation2 + $0x88] sm:$0xff] }
  0x9c   : > { %676 = vmatpush.bf16.msra.mxu1 %v1108_v10  ;;  %1204 = vmatpush.bf16.msra.mxu3 %v1108_v10 }
  0x9f   : > { %628 = vmatpush.bf16.msra.mxu0 %v1096_v15  ;;  %1197 = vmatpush.bf16.msra.mxu2 %v1096_v15  ;;  %v453_v15 = vld [vmem:[#allocation2 + $0xa8] sm:$0xff] }
  0xa0   : > { %677 = vmatpush.bf16.msra.mxu1 %v1100_v16  ;;  %1205 = vmatpush.bf16.msra.mxu3 %v1100_v16  ;;  %v454_v16 = vld [vmem:[#allocation2 + $0xd0] sm:$0xff] }
  0xa2   : > { %629 = vmatmul.bf16.vlgmr.msra.gmra.mxu0 %v1166_v17  ;;  %649 = vmatmul.bf16.vlgmr.msra.gmra.mxu2 %v1170_v18 }
  0xa3   : > { %678 = vmatmul.bf16.vlgmr.msra.gmra.mxu1 %v1166_v17  ;;  %698 = vmatmul.bf16.vlgmr.msra.gmra.mxu3 %v1170_v18  ;;  %v439_v18 = vld [vmem:[#allocation2 + $0xe8] sm:$0xff] }
  0xb2   : > { %634 = vmatmul.bf16.gmra.mxu0 %v1167_v19  ;;  %654 = vmatmul.bf16.gmra.mxu2 %v1171_v20 }
  0xb3   : > { %683 = vmatmul.bf16.gmra.mxu1 %v1167_v19  ;;  %703 = vmatmul.bf16.gmra.mxu3 %v1171_v20 }
  0xc2   : > { %639 = vmatmul.bf16.gmra.mxu0 %v1168_v21  ;;  %659 = vmatmul.bf16.gmra.mxu2 %v1172_v22 }
  0xc3   : > { %688 = vmatmul.bf16.gmra.mxu1 %v1168_v21  ;;  %708 = vmatmul.bf16.gmra.mxu3 %v1172_v22  ;;  %v440_v21 = vld [vmem:[#allocation2 + $0xb8] sm:$0xff] }
  0xd2   : > { %644 = vmatmul.bf16.gmra.mxu0 %v1169_v23  ;;  %664 = vmatmul.bf16.gmra.mxu2 %v1173_v24 }
  0xd3   : > { %693 = vmatmul.bf16.gmra.mxu1 %v1169_v23  ;;  %713 = vmatmul.bf16.gmra.mxu3 %v1173_v24 }
 0x11f   : > { %v630_v27 = vpop.f32.mrf.mxu0 }
 0x120   : > { %v719_v28 = vadd.f32 %v630_v27, %v429_v25  ;;  %v679_v29 = vpop.f32.mrf.mxu1  ;;  %v455_v27 = vld [vmem:[#allocation2 + $0x10] sm:$0xff] }
 0x121   : > { %v720_v30 = vadd.f32 %v679_v29, %v430_v26 }
 0x122   : > { %751 = vst [vmem:[#allocation2 + $0xb0] sm:$0xff] %v719_v28  ;;  %v456_v28 = vld [vmem:[#allocation2 + $0x28] sm:$0xff] }
 0x123   : > { %752 = vst [vmem:[#allocation2] sm:$0xff] %v720_v30  ;;  %v441_v30 = vld [vmem:[#allocation2 + $0x60] sm:$0xff] }
 0x125   : > { %v650_v33 = vpop.f32.mrf.mxu2 }
 0x126   : > { %v735_v35 = vadd.f32 %v650_v33, %v445_v31  ;;  %v699_v36 = vpop.f32.mrf.mxu3  ;;  %v442_v33 = vld [vmem:[#allocation2 + $0xf0] sm:$0xff] }
 0x127   : > { %v736_v38 = vadd.f32 %v699_v36, %v446_v32  ;;  %v632_v39 = vpop.f32.mrf.mxu0 }
 0x128   : > { %767 = vst [vmem:[#allocation2 + $0x38] sm:$0xff] %v735_v35  ;;  %v721_v40 = vadd.f32 %v632_v39, %v431_v34  ;;  %v681_v41 = vpop.f32.mrf.mxu1  ;;  %v457_v39 = vld [vmem:[#allocation2 + $0xa0] sm:$0xff] }
 0x129   : > { %768 = vst [vmem:[#allocation2 + $0x58] sm:$0xff] %v736_v38  ;;  %v722_v42 = vadd.f32 %v681_v41, %v432_v37 }
 0x12a   : > { %753 = vst [vmem:[#allocation2 + $0xd8] sm:$0xff] %v721_v40  ;;  %v458_v40 = vld [vmem:[#allocation2 + $0xf8] sm:$0xff] }
 0x12b   : > { %754 = vst [vmem:[#allocation2 + $0x18] sm:$0xff] %v722_v42  ;;  %v443_v42 = vld [vmem:[#allocation2 + $0x8] sm:$0xff] }
 0x12d   : > { %v652_v45 = vpop.f32.mrf.mxu2 }
 0x12e   : > { %v737_v47 = vadd.f32 %v652_v45, %v447_v43  ;;  %v701_v48 = vpop.f32.mrf.mxu3  ;;  %v444_v45 = vld [vmem:[#allocation2 + $0x78] sm:$0xff] }
 0x12f   : > { %v738_v50 = vadd.f32 %v701_v48, %v448_v44  ;;  %v635_v51 = vpop.f32.mrf.mxu0 }
 0x130   : > { %769 = vst [vmem:[#allocation2 + $0x40] sm:$0xff] %v737_v47  ;;  %v723_v52 = vadd.f32 %v635_v51, %v433_v46  ;;  %v684_v53 = vpop.f32.mrf.mxu1  ;;  %v459_v51 = vld [vmem:[#allocation2 + $0x20] sm:$0xff] }
 0x131   : > { %770 = vst [vmem:[#allocation2 + $0xc8] sm:$0xff] %v738_v50  ;;  %v724_v54 = vadd.f32 %v684_v53, %v434_v49 }
 0x132   : > { %755 = vst [vmem:[#allocation2 + $0x50] sm:$0xff] %v723_v52  ;;  %v460_v52 = vld [vmem:[#allocation2 + $0x98] sm:$0xff] }
 0x133   : > { %756 = vst [vmem:[#allocation2 + $0x68] sm:$0xff] %v724_v54 }
 0x135   : > { %v655_v57 = vpop.f32.mrf.mxu2 }
 0x136   : > { %v739_v59 = vadd.f32 %v655_v57, %v449_v55  ;;  %v704_v60 = vpop.f32.mrf.mxu3 }
 0x137   : > { %v740_v62 = vadd.f32 %v704_v60, %v450_v56  ;;  %v637_v63 = vpop.f32.mrf.mxu0 }
 0x138   : > { %771 = vst [vmem:[#allocation2 + $0xe0] sm:$0xff] %v739_v59  ;;  %v725_v0 = vadd.f32 %v637_v63, %v435_v58  ;;  %v686_v1 = vpop.f32.mrf.mxu1 }
 0x139   : > { %772 = vst [vmem:[#allocation2 + $0x90] sm:$0xff] %v740_v62  ;;  %v726_v2 = vadd.f32 %v686_v1, %v436_v61 }
 0x13a   : > { %757 = vst [vmem:[#allocation2 + $0x30] sm:$0xff] %v725_v0 }
 0x13b   : > { %758 = vst [vmem:[#allocation2 + $0x48] sm:$0xff] %v726_v2 }
 0x13d   : > { %v657_v5 = vpop.f32.mrf.mxu2 }
 0x13e   : > { %v741_v7 = vadd.f32 %v657_v5, %v451_v3  ;;  %v706_v8 = vpop.f32.mrf.mxu3 }
 0x13f   : > { %v742_v10 = vadd.f32 %v706_v8, %v452_v4  ;;  %v640_v11 = vpop.f32.mrf.mxu0 }
 0x140   : > { %773 = vst [vmem:[#allocation2 + $0x70] sm:$0xff] %v741_v7  ;;  %v727_v12 = vadd.f32 %v640_v11, %v437_v6  ;;  %v689_v13 = vpop.f32.mrf.mxu1 }
 0x141   : > { %774 = vst [vmem:[#allocation2 + $0xc0] sm:$0xff] %v742_v10  ;;  %v728_v14 = vadd.f32 %v689_v13, %v438_v9 }
 0x142   : > { %759 = vst [vmem:[#allocation2 + $0x80] sm:$0xff] %v727_v12 }
 0x143   : > { %760 = vst [vmem:[#allocation2 + $0x88] sm:$0xff] %v728_v14 }
 0x145   : > { %v660_v17 = vpop.f32.mrf.mxu2 }
 0x146   : > { %v743_v19 = vadd.f32 %v660_v17, %v453_v15  ;;  %v709_v20 = vpop.f32.mrf.mxu3 }
 0x147   : > { %v744_v22 = vadd.f32 %v709_v20, %v454_v16  ;;  %v642_v23 = vpop.f32.mrf.mxu0 }
 0x148   : > { %775 = vst [vmem:[#allocation2 + $0xa8] sm:$0xff] %v743_v19  ;;  %v729_v24 = vadd.f32 %v642_v23, %v439_v18  ;;  %v691_v25 = vpop.f32.mrf.mxu1 }
 0x149   : > { %776 = vst [vmem:[#allocation2 + $0xd0] sm:$0xff] %v744_v22  ;;  %v730_v26 = vadd.f32 %v691_v25, %v440_v21 }
 0x14a   : > { %761 = vst [vmem:[#allocation2 + $0xe8] sm:$0xff] %v729_v24 }
 0x14b   : > { %762 = vst [vmem:[#allocation2 + $0xb8] sm:$0xff] %v730_v26 }
 0x14d   : > { %v662_v29 = vpop.f32.mrf.mxu2 }
 0x14e   : > { %v745_v31 = vadd.f32 %v662_v29, %v455_v27  ;;  %v711_v32 = vpop.f32.mrf.mxu3 }
 0x14f   : > { %v746_v34 = vadd.f32 %v711_v32, %v456_v28  ;;  %v645_v35 = vpop.f32.mrf.mxu0 }
 0x150   : > { %777 = vst [vmem:[#allocation2 + $0x10] sm:$0xff] %v745_v31  ;;  %v731_v36 = vadd.f32 %v645_v35, %v441_v30  ;;  %v694_v37 = vpop.f32.mrf.mxu1 }
 0x151   : > { %778 = vst [vmem:[#allocation2 + $0x28] sm:$0xff] %v746_v34  ;;  %v732_v38 = vadd.f32 %v694_v37, %v442_v33 }
 0x152   : > { %763 = vst [vmem:[#allocation2 + $0x60] sm:$0xff] %v731_v36 }
 0x153   : > { %764 = vst [vmem:[#allocation2 + $0xf0] sm:$0xff] %v732_v38 }
 0x155   : > { %v665_v41 = vpop.f32.mrf.mxu2 }
 0x156   : > { %v747_v43 = vadd.f32 %v665_v41, %v457_v39  ;;  %v714_v44 = vpop.f32.mrf.mxu3 }
 0x157   : > { %v748_v46 = vadd.f32 %v714_v44, %v458_v40  ;;  %v647_v47 = vpop.f32.mrf.mxu0 }
 0x158   : > { %779 = vst [vmem:[#allocation2 + $0xa0] sm:$0xff] %v747_v43  ;;  %v733_v48 = vadd.f32 %v647_v47, %v443_v42  ;;  %v696_v49 = vpop.f32.mrf.mxu1 }
 0x159   : > { %780 = vst [vmem:[#allocation2 + $0xf8] sm:$0xff] %v748_v46  ;;  %v734_v50 = vadd.f32 %v696_v49, %v444_v45 }
 0x15a   : > { %765 = vst [vmem:[#allocation2 + $0x8] sm:$0xff] %v733_v48 }
 0x15b   : > { %766 = vst [vmem:[#allocation2 + $0x78] sm:$0xff] %v734_v50 }
 0x15d   : > { %v667_v53 = vpop.f32.mrf.mxu2  ;;  %786 = sbr.rel (%p1157_p5) target bundleno = 387 (0x183), region = 115 }
 0x15e   : > { %v749_v54 = vadd.f32 %v667_v53, %v459_v51  ;;  %v716_v55 = vpop.f32.mrf.mxu3 }
 0x15f   : > { %v750_v56 = vadd.f32 %v716_v55, %v460_v52 }
 0x160   : > { %781 = vst [vmem:[#allocation2 + $0x20] sm:$0xff] %v749_v54 }
 0x161   : > { %782 = vst [vmem:[#allocation2 + $0x98] sm:$0xff] %v750_v56 }
 0x162   : > { %v787_v57 = vld [vmem:[#allocation2 + $0xb0] sm:$0xff]  ;;  %v788_v58 = vld [vmem:[#allocation2] sm:$0xff]  ;;  %v789_v59 = vld [vmem:[#allocation2 + $0xd8] sm:$0xff] }
 0x163   : > { %819 = vst [vmem:[%s1611_s6] sm:$0xff] %v787_v57  ;;  %v790_v60 = vld [vmem:[#allocation2 + $0x18] sm:$0xff]  ;;  %v791_v61 = vld [vmem:[#allocation2 + $0x50] sm:$0xff]  ;;  %v792_v62 = vld [vmem:[#allocation2 + $0x68] sm:$0xff] }
 0x164   : > { %820 = vst [vmem:[%s1611_s6 + $0x8] sm:$0xff] %v788_v58  ;;  %v793_v63 = vld [vmem:[#allocation2 + $0x30] sm:$0xff]  ;;  %v794_v0 = vld [vmem:[#allocation2 + $0x48] sm:$0xff]  ;;  %v795_v1 = vld [vmem:[#allocation2 + $0x80] sm:$0xff] }
 0x165   : > { %821 = vst [vmem:[%s1611_s6 + $0x10] sm:$0xff] %v789_v59  ;;  %v796_v2 = vld [vmem:[#allocation2 + $0x88] sm:$0xff]  ;;  %v798_v4 = vld [vmem:[#allocation2 + $0xb8] sm:$0xff]  ;;  %v799_v5 = vld [vmem:[#allocation2 + $0x60] sm:$0xff] }
 0x166   : > { %822 = vst [vmem:[%s1611_s6 + $0x18] sm:$0xff] %v790_v60  ;;  %v797_v3 = vld [vmem:[#allocation2 + $0xe8] sm:$0xff]  ;;  %v800_v6 = vld [vmem:[#allocation2 + $0xf0] sm:$0xff]  ;;  %v802_v8 = vld [vmem:[#allocation2 + $0x78] sm:$0xff] }
 0x167   : > { %823 = vst [vmem:[%s1611_s6 + $0x20] sm:$0xff] %v791_v61  ;;  %v801_v7 = vld [vmem:[#allocation2 + $0x8] sm:$0xff]  ;;  %v803_v9 = vld [vmem:[#allocation2 + $0x38] sm:$0xff]  ;;  %v805_v11 = vld [vmem:[#allocation2 + $0x40] sm:$0xff] }
 0x168   : > { %824 = vst [vmem:[%s1611_s6 + $0x28] sm:$0xff] %v792_v62  ;;  %v804_v10 = vld [vmem:[#allocation2 + $0x58] sm:$0xff]  ;;  %v806_v12 = vld [vmem:[#allocation2 + $0xc8] sm:$0xff]  ;;  %v807_v13 = vld [vmem:[#allocation2 + $0xe0] sm:$0xff] }
 0x169   : > { %825 = vst [vmem:[%s1611_s6 + $0x30] sm:$0xff] %v793_v63  ;;  %v808_v14 = vld [vmem:[#allocation2 + $0x90] sm:$0xff]  ;;  %v810_v16 = vld [vmem:[#allocation2 + $0xc0] sm:$0xff]  ;;  %v811_v17 = vld [vmem:[#allocation2 + $0xa8] sm:$0xff] }
 0x16a   : > { %826 = vst [vmem:[%s1611_s6 + $0x38] sm:$0xff] %v794_v0  ;;  %v809_v15 = vld [vmem:[#allocation2 + $0x70] sm:$0xff]  ;;  %v814_v20 = vld [vmem:[#allocation2 + $0x28] sm:$0xff]  ;;  %v815_v21 = vld [vmem:[#allocation2 + $0xa0] sm:$0xff] }
 0x16b   : > { %827 = vst [vmem:[%s1611_s6 + $0x40] sm:$0xff] %v795_v1  ;;  %v812_v18 = vld [vmem:[#allocation2 + $0xd0] sm:$0xff]  ;;  %v816_v22 = vld [vmem:[#allocation2 + $0xf8] sm:$0xff]  ;;  %v817_v23 = vld [vmem:[#allocation2 + $0x20] sm:$0xff] }
 0x16c   : > { %828 = vst [vmem:[%s1611_s6 + $0x48] sm:$0xff] %v796_v2  ;;  %v813_v19 = vld [vmem:[#allocation2 + $0x10] sm:$0xff]  ;;  %v818_v24 = vld [vmem:[#allocation2 + $0x98] sm:$0xff] }
 0x16d   : > { %829 = vst [vmem:[%s1611_s6 + $0x50] sm:$0xff] %v797_v3 }
 0x16e   : > { %830 = vst [vmem:[%s1611_s6 + $0x58] sm:$0xff] %v798_v4 }
 0x16f   : > { %831 = vst [vmem:[%s1611_s6 + $0x60] sm:$0xff] %v799_v5 }
 0x170   : > { %832 = vst [vmem:[%s1611_s6 + $0x68] sm:$0xff] %v800_v6 }
 0x171   : > { %833 = vst [vmem:[%s1611_s6 + $0x70] sm:$0xff] %v801_v7 }
 0x172   : > { %834 = vst [vmem:[%s1611_s6 + $0x78] sm:$0xff] %v802_v8 }
 0x173   : > { %835 = vst [vmem:[%s1611_s6 + $0x80] sm:$0xff] %v803_v9 }
 0x174   : > { %836 = vst [vmem:[%s1611_s6 + $0x88] sm:$0xff] %v804_v10 }
 0x175   : > { %837 = vst [vmem:[%s1611_s6 + $0x90] sm:$0xff] %v805_v11 }
 0x176   : > { %838 = vst [vmem:[%s1611_s6 + $0x98] sm:$0xff] %v806_v12 }
 0x177   : > { %839 = vst [vmem:[%s1611_s6 + $0xa0] sm:$0xff] %v807_v13 }
 0x178   : > { %840 = vst [vmem:[%s1611_s6 + $0xa8] sm:$0xff] %v808_v14 }
 0x179   : > { %841 = vst [vmem:[%s1611_s6 + $0xb0] sm:$0xff] %v809_v15 }
 0x17a   : > { %842 = vst [vmem:[%s1611_s6 + $0xb8] sm:$0xff] %v810_v16 }
 0x17b   : > { %843 = vst [vmem:[%s1611_s6 + $0xc0] sm:$0xff] %v811_v17 }
 0x17c   : > { %844 = vst [vmem:[%s1611_s6 + $0xc8] sm:$0xff] %v812_v18 }
 0x17d   : > { %845 = vst [vmem:[%s1611_s6 + $0xd0] sm:$0xff] %v813_v19 }
 0x17e   : > { %846 = vst [vmem:[%s1611_s6 + $0xd8] sm:$0xff] %v814_v20 }
 0x17f   : > { %847 = vst [vmem:[%s1611_s6 + $0xe0] sm:$0xff] %v815_v21 }
 0x180   : > { %848 = vst [vmem:[%s1611_s6 + $0xe8] sm:$0xff] %v816_v22 }
 0x181   : > { %849 = vst [vmem:[%s1611_s6 + $0xf0] sm:$0xff] %v817_v23 }
 0x182   : > { %850 = vst [vmem:[%s1611_s6 + $0xf8] sm:$0xff] %v818_v24 }
 0x183 PF: > { %857 = sbr.rel (!%p1545_p13) target bundleno = 427 (0x1ab), region = 119  ;;  %s1160_s9 = sshll.u32 (%p1545_p13), %s1395_s16, 1  ;;  %v876_v25 = vld [vmem:[%s1611_s6] sm:$0xff] (%p1545_p13)  ;;  %v878_v26 = vld [vmem:[%s1611_s6 + $0x8] sm:$0xff] (%p1545_p13)  ;;  %v880_v27 = vld [vmem:[%s1611_s6 + $0x10] sm:$0xff] (%p1545_p13) }
 0x184   : > { %s1207_s11 = smul.u32 (%p1545_p13), 96, %s1399_s17  ;;  %s1817_s4 = sld [smem:[#allocation8_spill]] (%p1545_p13)  ;;  %v882_v28 = vld [vmem:[%s1611_s6 + $0x18] sm:$0xff] (%p1545_p13)  ;;  %v884_v29 = vld [vmem:[%s1611_s6 + $0x20] sm:$0xff] (%p1545_p13)  ;;  %v886_v30 = vld [vmem:[%s1611_s6 + $0x28] sm:$0xff] (%p1545_p13) }
 0x185   : > { %v888_v31 = vld [vmem:[%s1611_s6 + $0x30] sm:$0xff] (%p1545_p13)  ;;  %v890_v32 = vld [vmem:[%s1611_s6 + $0x38] sm:$0xff] (%p1545_p13)  ;;  %v892_v33 = vld [vmem:[%s1611_s6 + $0x40] sm:$0xff] (%p1545_p13) }
 0x186   : > { %s861_s13 = sadd.s32 (%p1545_p13), %s1207_s11, %s1160_s9  ;;  %v894_v34 = vld [vmem:[%s1611_s6 + $0x48] sm:$0xff] (%p1545_p13)  ;;  %v896_v35 = vld [vmem:[%s1611_s6 + $0x50] sm:$0xff] (%p1545_p13)  ;;  %v898_v36 = vld [vmem:[%s1611_s6 + $0x58] sm:$0xff] (%p1545_p13) }
 0x187   : > { %s1162_s15 = sshll.u32 (%p1545_p13), %s861_s13, 3  ;;  %v900_v37 = vld [vmem:[%s1611_s6 + $0x60] sm:$0xff] (%p1545_p13)  ;;  %v902_v38 = vld [vmem:[%s1611_s6 + $0x68] sm:$0xff] (%p1545_p13)  ;;  %v904_v39 = vld [vmem:[%s1611_s6 + $0x70] sm:$0xff] (%p1545_p13) }
 0x188   : > { %v906_v40 = vld [vmem:[%s1611_s6 + $0x78] sm:$0xff]  ;;  %v908_v41 = vld [vmem:[%s1611_s6 + $0x80] sm:$0xff]  ;;  %v910_v42 = vld [vmem:[%s1611_s6 + $0x88] sm:$0xff] }
 0x189   : > { %v912_v43 = vld [vmem:[%s1611_s6 + $0x90] sm:$0xff]  ;;  %v914_v44 = vld [vmem:[%s1611_s6 + $0x98] sm:$0xff]  ;;  %v916_v45 = vld [vmem:[%s1611_s6 + $0xa0] sm:$0xff] }
 0x18a   : > { %s1696_s29 = scalar_lea.vmem %s1817_s4, %s1162_s15  ;;  %v918_v46 = vld [vmem:[%s1611_s6 + $0xa8] sm:$0xff]  ;;  %v920_v47 = vld [vmem:[%s1611_s6 + $0xb0] sm:$0xff]  ;;  %v922_v48 = vld [vmem:[%s1611_s6 + $0xb8] sm:$0xff] }
 0x18b   : > { %877 = vst [vmem:[%s1696_s29] sm:$0xff] %v876_v25  ;;  %v924_v49 = vld [vmem:[%s1611_s6 + $0xc0] sm:$0xff]  ;;  %v926_v50 = vld [vmem:[%s1611_s6 + $0xc8] sm:$0xff]  ;;  %v928_v51 = vld [vmem:[%s1611_s6 + $0xd0] sm:$0xff] }
 0x18c   : > { %879 = vst [vmem:[%s1696_s29 + $0x8] sm:$0xff] %v878_v26  ;;  %v930_v52 = vld [vmem:[%s1611_s6 + $0xd8] sm:$0xff]  ;;  %v932_v53 = vld [vmem:[%s1611_s6 + $0xe0] sm:$0xff]  ;;  %v934_v54 = vld [vmem:[%s1611_s6 + $0xe8] sm:$0xff] }
 0x18d   : > { %881 = vst [vmem:[%s1696_s29 + $0x30] sm:$0xff] %v880_v27  ;;  %v936_v55 = vld [vmem:[%s1611_s6 + $0xf0] sm:$0xff]  ;;  %v938_v56 = vld [vmem:[%s1611_s6 + $0xf8] sm:$0xff] }
 0x18e   : > { %883 = vst [vmem:[%s1696_s29 + $0x38] sm:$0xff] %v882_v28 }
 0x18f   : > { %885 = vst [vmem:[%s1696_s29 + $0x60] sm:$0xff] %v884_v29 }
 0x190   : > { %887 = vst [vmem:[%s1696_s29 + $0x68] sm:$0xff] %v886_v30 }
 0x191   : > { %889 = vst [vmem:[%s1696_s29 + $0x90] sm:$0xff] %v888_v31 }
 0x192   : > { %891 = vst [vmem:[%s1696_s29 + $0x98] sm:$0xff] %v890_v32 }
 0x193   : > { %893 = vst [vmem:[%s1696_s29 + $0xc0] sm:$0xff] %v892_v33 }
 0x194   : > { %895 = vst [vmem:[%s1696_s29 + $0xc8] sm:$0xff] %v894_v34 }
 0x195   : > { %897 = vst [vmem:[%s1696_s29 + $0xf0] sm:$0xff] %v896_v35 }
 0x196   : > { %899 = vst [vmem:[%s1696_s29 + $0xf8] sm:$0xff] %v898_v36 }
 0x197   : > { %901 = vst [vmem:[%s1696_s29 + $0x120] sm:$0xff] %v900_v37 }
 0x198   : > { %903 = vst [vmem:[%s1696_s29 + $0x128] sm:$0xff] %v902_v38 }
 0x199   : > { %905 = vst [vmem:[%s1696_s29 + $0x150] sm:$0xff] %v904_v39 }
 0x19a   : > { %907 = vst [vmem:[%s1696_s29 + $0x158] sm:$0xff] %v906_v40 }
 0x19b   : > { %909 = vst [vmem:[%s1696_s29 + $0x180] sm:$0xff] %v908_v41 }
 0x19c   : > { %911 = vst [vmem:[%s1696_s29 + $0x188] sm:$0xff] %v910_v42 }
 0x19d   : > { %913 = vst [vmem:[%s1696_s29 + $0x1b0] sm:$0xff] %v912_v43 }
 0x19e   : > { %915 = vst [vmem:[%s1696_s29 + $0x1b8] sm:$0xff] %v914_v44 }
 0x19f   : > { %917 = vst [vmem:[%s1696_s29 + $0x1e0] sm:$0xff] %v916_v45 }
 0x1a0   : > { %919 = vst [vmem:[%s1696_s29 + $0x1e8] sm:$0xff] %v918_v46 }
 0x1a1   : > { %921 = vst [vmem:[%s1696_s29 + $0x210] sm:$0xff] %v920_v47 }
 0x1a2   : > { %923 = vst [vmem:[%s1696_s29 + $0x218] sm:$0xff] %v922_v48 }
 0x1a3   : > { %925 = vst [vmem:[%s1696_s29 + $0x240] sm:$0xff] %v924_v49 }
 0x1a4   : > { %927 = vst [vmem:[%s1696_s29 + $0x248] sm:$0xff] %v926_v50 }
 0x1a5   : > { %929 = vst [vmem:[%s1696_s29 + $0x270] sm:$0xff] %v928_v51 }
 0x1a6   : > { %931 = vst [vmem:[%s1696_s29 + $0x278] sm:$0xff] %v930_v52 }
 0x1a7   : > { %933 = vst [vmem:[%s1696_s29 + $0x2a0] sm:$0xff] %v932_v53 }
 0x1a8   : > { %935 = vst [vmem:[%s1696_s29 + $0x2a8] sm:$0xff] %v934_v54 }
 0x1a9   : > { %937 = vst [vmem:[%s1696_s29 + $0x2d0] sm:$0xff] %v936_v55 }
 0x1aa   : > { %939 = vst [vmem:[%s1696_s29 + $0x2d8] sm:$0xff] %v938_v56 }
 0x1ab PF: > { %s12_s21 = sadd.s32 1, %s1415_s21   ;;  %s1819_s8 = sld [smem:[#allocation6_spill]] }
 0x1ac   : > { %p1761_p6 = scmp.ge.s32.totalorder %s12_s21, 14   ;;  %s1820_s22 = sld [smem:[#allocation7_spill]] }
 0x1ad   : > { %s1822_s9 = smov %s1371_s10  ;;  %s1823_s10 = smov %s1543_s3 }
 0x1ae   : > { %s1824_s11 = smov %s1379_s12  ;;  %s1825_s12 = smov %s1530_s5 }
 0x1af   : > { %s1826_s13 = smov %s1387_s14  ;;  %s1827_s14 = smov %s1540_s23 }
 0x1b0   : > { %s1828_s15 = smov %s1403_s18  ;;  %s1829_s16 = smov %s1407_s19 }
 0x1b1   : > { %s1830_s17 = smov %s1411_s20  ;;  %s1831_s18 = smov %s1819_s8 }
 0x1b2   : > { %s1832_s19 = smov %s1820_s22  ;;  %s1833_s20 = smov %s1843_s25 }
 0x1b3   :  { %11 = sbr.rel (!%p1761_p6) target bundleno = 9 (0x9), region = 181 }

// kernel: decoder_layer.9
= control target key start
LH: loop header
LB: loop body
LE: loop exit
PB: predicated region body
PF: predicated region fallthrough
CT: control target
= control target key end

     0   :  { %s1615_s24 = smov 0   ;;  %s1617_s25 = smov 0   ;;  %s1980_s0 = inlined_call_operand.vmem [shape: f32[4,128,128], index: 0, kind: input, shape index: {}]   ;;  %s1981_s1 = inlined_call_operand.vmem [shape: f32[4,128,128], index: 1, kind: input, shape index: {}]   ;;  %s1982_s2 = inlined_call_operand.vmem [shape: f32[4,128,128], index: 2, kind: input, shape index: {}]   ;;  %s1983_s3 = inlined_call_operand.vmem [shape: f32[128,128], index: 3, kind: input, shape index: {}, may-alias: {3,5}]   ;;  %s1984_s4 = inlined_call_operand.vmem [shape: f32[128,128], index: 4, kind: input, shape index: {}, may-alias: {4,6}]   ;;  %s1985_s5 = inlined_call_operand.vmem [shape: f32[128,128], index: 5, kind: input, shape index: {}, may-alias: {3,5}]   ;;  %s1986_s6 = inlined_call_operand.vmem [shape: f32[128,128], index: 6, kind: input, shape index: {}, may-alias: {4,6}]   ;;  %s1987_s7 = inlined_call_operand.vmem [shape: bf16[4,128,128], index: 7, kind: output, shape index: {}]  }
   0x1   :  { %1991 = sst [smem:[#allocation11_spill]] %s1983_s3  ;;  %s1619_s26 = smov 0  }
   0x2   :  { %s1621_s27 = smov 0   ;;  %s1623_s28 = smov 0  }
   0x3   :  { %s1625_s29 = smov 0   ;;  %s1627_s30 = smov 0  }
   0x4 LB: > { %1992 = sst [smem:[#allocation5_spill]] %s1556_s27  ;;  %s29_s8 = sadd.s32 1, %s1556_s27  ;;  %s1568_s30 = sphi %s1627_s30, %s17_s30   ;;  %s1564_s29 = sphi %s1625_s29, %s2004_s29   ;;  %s1560_s28 = sphi %s1623_s28, %s2003_s28   ;;  %s1556_s27 = sphi %s1621_s27, %s2002_s27   ;;  %s1552_s26 = sphi %s1619_s26, %s2001_s26   ;;  %s1548_s25 = sphi %s1617_s25, %s2000_s25   ;;  %s1544_s24 = sphi %s1615_s24, %s1999_s24  }
   0x5   : > { %1993 = sst [smem:[#allocation6_spill]] %s1560_s28  ;;  %p30_p0 = scmp.ge.s32.totalorder %s29_s8, 2 }
   0x6   : > { %1994 = sst [smem:[#allocation7_spill]] %s1564_s29  ;;  %s32_s9 = sadd.s32 1, %s1560_s28 }
   0x7   : > { %p1333_p1 = scmp.ge.s32.totalorder %s1568_s30, 1  ;;  %p343_p2 = scmp.lt.s32.totalorder %s1568_s30, 17 }
   0x8   : > { %s2006_s8 = smov (%p30_p0, %s29_s8), 0  ;;  %s2008_s9 = smov (!%p30_p0, %s32_s9), %s1560_s28 }
   0x9   : > { %1995 = sst [smem:[#allocation8_spill]] %s2006_s8  ;;  %p344_p3 = pnand %p1333_p1, %p343_p2 }
   0xa   : > { %p34_p4 = scmp.ge.s32.totalorder %s2008_s9, 2  ;;  %s36_s10 = sadd.s32 1, %s1564_s29 }
   0xb   : > { %s1334_s11 = sshll.u32 (!%p344_p3), %s1548_s25, 3  ;;  %p422_p6 = scmp.lt.s32.totalorder (!%p344_p3), %s1552_s26, 3 }
   0xc   : > { %s2010_s9 = smov (%p34_p4, %s2008_s9), 0  ;;  %s2012_s10 = smov (!%p34_p4, %s36_s10), %s1564_s29 }
   0xd   : > { %1996 = sst [smem:[#allocation9_spill]] %s2010_s9  ;;  %p38_p5 = scmp.ge.s32.totalorder %s2012_s10, 4 }
   0xe   : > { %347 = sbr.rel (%p344_p3) target bundleno = 955 (0x3bb), region = 48  ;;  %p424_p7 = scmp.lt.s32.totalorder (!%p344_p3), %s1334_s11, 15 }
   0xf   : > { %s2014_s10 = smov (%p38_p5, %s2012_s10), 0  ;;  %s1337_s12 = sshll.u32 (!%p344_p3), %s1544_s24, 3 }
  0x10   : > { %1997 = sst [smem:[#allocation10_spill]] %s2014_s10  ;;  %p434_p8 = scmp.lt.s32.totalorder (!%p344_p3), %s1337_s12, 15 }
  0x11   : > { %s1998_s3 = sld [smem:[#allocation11_spill]] (!%p344_p3)  ;;  %p1354_p9 = scmp.ne.s32.totalorder (!%p344_p3), %s1544_s24, 0 }
  0x13   : > { %s2016_s26 = smov (!%p422_p6, %s1552_s26), 3  ;;  %s2018_s11 = smov (!%p424_p7, %s1334_s11), 15 }
  0x14   : > { %s1335_s13 = sshll.u32 %s2016_s26, 4  ;;  %s1344_s15 = sshll.u32 %s2018_s11, 3 }
  0x15   : > { %s427_s14 = sadd.s32 %s1335_s13, %s2018_s11  ;;  %s1676_s9 = scalar_lea.vmem %s1984_s4, %s1344_s15 }
  0x16   : > { %s1336_s16 = sshll.u32 %s427_s14, 3  ;;  %s2020_s12 = smov (!%p434_p8, %s1337_s12), 15 }
  0x17   : > { %s1666_s19 = scalar_lea.vmem %s1998_s3, %s1344_s15  ;;  %s1671_s22 = scalar_lea.vmem %s1980_s0, %s1336_s16 }
  0x18   : > { %s1353_s26 = sshll.u32 %s427_s14, 2  ;;  %s437_s8 = sadd.s32 %s1335_s13, %s2020_s12 }
  0x19   : > { %s1348_s11 = sshll.u32 %s2020_s12, 3  ;;  %s1339_s29 = sshll.u32 %s437_s8, 3 }
  0x1a   : > { %s1681_s17 = scalar_lea.vmem %s1985_s5, %s1348_s11  ;;  %s1686_s16 = scalar_lea.vmem %s1981_s1, %s1339_s29 }
  0x1b   : > { %s1691_s10 = scalar_lea.vmem %s1982_s2, %s1339_s29  ;;  %s1696_s12 = scalar_lea.vmem %s1986_s6, %s1348_s11 }
  0x1c   : > { %s1701_s27 = scalar_lea.vmem %s1987_s7, %s1353_s26  ;;  %489 = sbr.rel (%p1354_p9) target bundleno = 58 (0x3a), region = 52 }
  0x21   : > { %vm490_vm0 = vcmask 7168   ;;  %v1570_v0 = vmov -1e+30   ;;  %v1571_v1 = vmov 0.0  }
  0x22   : > { %491 = vst.msk [vmem:[#allocation2] sm:$0xff] %vm490_vm0, %v1570_v0 }
  0x23   : > { %492 = vst.msk [vmem:[#allocation2 + $0x8] sm:$0xff] %vm490_vm0, %v1570_v0 }
  0x24   : > { %493 = vst.msk [vmem:[#allocation2 + $0x10] sm:$0xff] %vm490_vm0, %v1570_v0 }
  0x25   : > { %494 = vst.msk [vmem:[#allocation2 + $0x18] sm:$0xff] %vm490_vm0, %v1570_v0 }
  0x26   : > { %495 = vst.msk [vmem:[#allocation2 + $0x20] sm:$0xff] %vm490_vm0, %v1570_v0 }
  0x27   : > { %496 = vst.msk [vmem:[#allocation2 + $0x28] sm:$0xff] %vm490_vm0, %v1570_v0 }
  0x28   : > { %497 = vst.msk [vmem:[#allocation2 + $0x30] sm:$0xff] %vm490_vm0, %v1570_v0 }
  0x29   : > { %498 = vst.msk [vmem:[#allocation2 + $0x38] sm:$0xff] %vm490_vm0, %v1570_v0 }
  0x2a   : > { %499 = vst.msk [vmem:[#allocation3] sm:$0xff] %vm490_vm0, %v1571_v1 }
  0x2b   : > { %500 = vst.msk [vmem:[#allocation3 + $0x8] sm:$0xff] %vm490_vm0, %v1571_v1 }
  0x2c   : > { %501 = vst.msk [vmem:[#allocation3 + $0x10] sm:$0xff] %vm490_vm0, %v1571_v1 }
  0x2d   : > { %502 = vst.msk [vmem:[#allocation3 + $0x18] sm:$0xff] %vm490_vm0, %v1571_v1 }
  0x2e   : > { %503 = vst.msk [vmem:[#allocation3 + $0x20] sm:$0xff] %vm490_vm0, %v1571_v1 }
  0x2f   : > { %504 = vst.msk [vmem:[#allocation3 + $0x28] sm:$0xff] %vm490_vm0, %v1571_v1 }
  0x30   : > { %505 = vst.msk [vmem:[#allocation3 + $0x30] sm:$0xff] %vm490_vm0, %v1571_v1 }
  0x31   : > { %506 = vst.msk [vmem:[#allocation3 + $0x38] sm:$0xff] %vm490_vm0, %v1571_v1 }
  0x32   : > { %507 = vst [vmem:[#allocation4 + $0x30] sm:$0xff] %v1571_v1 }
  0x33   : > { %508 = vst [vmem:[#allocation4] sm:$0xff] %v1571_v1 }
  0x34   : > { %509 = vst [vmem:[#allocation4 + $0x18] sm:$0xff] %v1571_v1 }
  0x35   : > { %510 = vst [vmem:[#allocation4 + $0x10] sm:$0xff] %v1571_v1 }
  0x36   : > { %511 = vst [vmem:[#allocation4 + $0x8] sm:$0xff] %v1571_v1 }
  0x37   : > { %512 = vst [vmem:[#allocation4 + $0x20] sm:$0xff] %v1571_v1 }
  0x38   : > { %513 = vst [vmem:[#allocation4 + $0x28] sm:$0xff] %v1571_v1 }
  0x39   : > { %514 = vst [vmem:[#allocation4 + $0x38] sm:$0xff] %v1571_v1 }
  0x3a PF: > { %s1355_s3 = sshll.u32 %s1544_s24, 6  ;;  %s1366_s28 = sshll.u32 %s1548_s25, 6 }
  0x3b   : > { %s1367_s29 = sadd.s32 64, %s1366_s28 }
  0x3c   : > { %p1357_p10 = scmp.ge.s32.totalorder %s1355_s3, %s1367_s29 }
  0x3d   : > { %s1572_s23 = smov (!%p1357_p10), 64  }
  0x3e   : > { %521 = sbr.rel (%p1357_p10) target bundleno = 803 (0x323), region = 56 }
  0x43   : > { %v536_v2 = vld [vmem:[%s1686_s16 + $0x30] sm:$0xff]  ;;  %v534_v3 = vld [vmem:[%s1686_s16 + $0x20] sm:$0xff]  ;;  %v537_v5 = vld [vmem:[%s1686_s16 + $0x38] sm:$0xff]  ;;  %vm742_vm2 = vcmask 523264   ;;  %vm911_vm10 = vcmask 7168  }
  0x44   : > { %622 = vrot.lane.b32.xlu0 %v536_v2, %s1572_s23  ;;  %618 = vrot.lane.b32.xlu1 %v534_v3, %s1572_s23  ;;  %v532_v4 = vld [vmem:[%s1686_s16 + $0x10] sm:$0xff]  ;;  %v535_v6 = vld [vmem:[%s1686_s16 + $0x28] sm:$0xff] }
  0x45   : > { %614 = vrot.lane.b32.xlu2 %v532_v4, %s1572_s23  ;;  %v533_v7 = vld [vmem:[%s1686_s16 + $0x18] sm:$0xff]  ;;  %v1733_v8 = vld [vmem:[%s1686_s16 + $0x8] sm:$0xff]  ;;  %v1736_v9 = vld [vmem:[%s1686_s16] sm:$0xff] }
  0x46   : > { %v1741_v10 = vld [vmem:[%s1671_s22] sm:$0xff]  ;;  %v1744_v11 = vld [vmem:[%s1671_s22 + $0x10] sm:$0xff]  ;;  %v1747_v12 = vld [vmem:[%s1671_s22 + $0x8] sm:$0xff] }
  0x47   : > { %v1753_v13 = vld [vmem:[%s1671_s22 + $0x18] sm:$0xff]  ;;  %v1756_v14 = vld [vmem:[%s1671_s22 + $0x28] sm:$0xff]  ;;  %v1759_v15 = vld [vmem:[%s1671_s22 + $0x20] sm:$0xff] }
  0x48   : > { %v1765_v16 = vld [vmem:[%s1671_s22 + $0x30] sm:$0xff]  ;;  %v1768_v17 = vld [vmem:[%s1671_s22 + $0x38] sm:$0xff]  ;;  %v598_v33 = vld [vmem:[%s1681_s17 + $0x20] sm:$0xff] }
  0x49   : > { %v596_v19 = vld [vmem:[%s1681_s17 + $0x10] sm:$0xff]  ;;  %v597_v21 = vld [vmem:[%s1681_s17 + $0x18] sm:$0xff]  ;;  %v630_v34 = vld [vmem:[%s1696_s12 + $0x20] sm:$0xff]  ;;  %v606_v39 = vmul.f32 %v598_v33, %v534_v3 }
  0x4a   : > { %v628_v20 = vld [vmem:[%s1696_s12 + $0x10] sm:$0xff]  ;;  %v604_v22 = vmul.f32 %v596_v19, %v532_v4  ;;  %v629_v24 = vld [vmem:[%s1696_s12 + $0x18] sm:$0xff]  ;;  %v605_v25 = vmul.f32 %v597_v21, %v533_v7  ;;  %v599_v37 = vld [vmem:[%s1681_s17 + $0x28] sm:$0xff] }
  0x4b   : > { %v600_v35 = vld [vmem:[%s1681_s17 + $0x30] sm:$0xff]  ;;  %v601_v36 = vld [vmem:[%s1681_s17 + $0x38] sm:$0xff]  ;;  %v631_v42 = vld [vmem:[%s1696_s12 + $0x28] sm:$0xff]  ;;  %v607_v45 = vmul.f32 %v599_v37, %v535_v6 }
  0x4c   : > { %624 = vrot.lane.b32.xlu0 %v537_v5, %s1572_s23  ;;  %620 = vrot.lane.b32.xlu1 %v535_v6, %s1572_s23  ;;  %v632_v38 = vld [vmem:[%s1696_s12 + $0x30] sm:$0xff]  ;;  %v633_v41 = vld [vmem:[%s1696_s12 + $0x38] sm:$0xff]  ;;  %v608_v43 = vmul.f32 %v600_v35, %v536_v2  ;;  %v609_v44 = vmul.f32 %v601_v36, %v537_v5 }
  0x4d   : > { %616 = vrot.lane.b32.xlu2 %v533_v7, %s1572_s23  ;;  %v595_v56 = vld [vmem:[%s1681_s17 + $0x8] sm:$0xff]  ;;  %v594_v57 = vld [vmem:[%s1681_s17] sm:$0xff]  ;;  %v541_v5 = vld [vmem:[%s1666_s19 + $0x18] sm:$0xff] }
  0x4e   : > { %v627_v60 = vld [vmem:[%s1696_s12 + $0x8] sm:$0xff]  ;;  %v626_v61 = vld [vmem:[%s1696_s12] sm:$0xff]  ;;  %v603_v62 = vmul.f32 %v595_v56, %v1733_v8  ;;  %v602_v63 = vmul.f32 %v594_v57, %v1736_v9  ;;  %v573_v7 = vld [vmem:[%s1676_s9 + $0x18] sm:$0xff] }
  0x4f   : > { %v538_v2 = vld [vmem:[%s1666_s19] sm:$0xff]  ;;  %v540_v21 = vld [vmem:[%s1666_s19 + $0x10] sm:$0xff]  ;;  %v543_v37 = vld [vmem:[%s1666_s19 + $0x28] sm:$0xff] }
  0x50   : > { %v570_v6 = vld [vmem:[%s1676_s9] sm:$0xff] }
  0x54   : > { %612 = vrot.lane.b32.xlu1 %v1733_v8, %s1572_s23  ;;  %610 = vrot.lane.b32.xlu0 %v1736_v9, %s1572_s23  ;;  %v539_v8 = vld [vmem:[%s1666_s19 + $0x8] sm:$0xff]  ;;  %v549_v9 = vmul.f32 %v541_v5, %v1753_v13 }
  0x55   : > { %554 = vrot.lane.b32.xlu2 %v1741_v10, %s1572_s23 }
  0x5c   : > { %558 = vrot.lane.b32.xlu1 %v1744_v11, %s1572_s23  ;;  %556 = vrot.lane.b32.xlu0 %v1747_v12, %s1572_s23 }
  0x5d   : > { %560 = vrot.lane.b32.xlu2 %v1753_v13, %s1572_s23 }
  0x64   : > { %564 = vrot.lane.b32.xlu1 %v1756_v14, %s1572_s23  ;;  %562 = vrot.lane.b32.xlu0 %v1759_v15, %s1572_s23 }
  0x65   : > { %566 = vrot.lane.b32.xlu2 %v1765_v16, %s1572_s23 }
  0x6c   : > { %568 = vrot.lane.b32.xlu0 %v1768_v17, %s1572_s23 }
  0x9f   : > { %v615_v18 = vpop.permute.xlu2 %614 }
  0xa0   : > { %v636_v23 = vmul.f32 %v628_v20, %v615_v18 }
  0xa2   : > { %v644_v27 = vadd.f32 %v636_v23, %v604_v22  ;;  %v546_v22 = vmul.f32 %v538_v2, %v1741_v10 }
  0xa7   : > { %v617_v26 = vpop.permute.xlu2 %616 }
  0xa8   : > { %v637_v28 = vmul.f32 %v629_v24, %v617_v26  ;;  %v572_v26 = vld [vmem:[%s1676_s9 + $0x10] sm:$0xff] }
  0xaa   : > { %v645_v29 = vadd.f32 %v637_v28, %v605_v25  ;;  %v548_v28 = vmul.f32 %v540_v21, %v1744_v11 }
  0xac   : > { %v1776_v30 = vpack.c.bf16 %v645_v29, %v644_v27  ;;  %v571_v27 = vld [vmem:[%s1676_s9 + $0x8] sm:$0xff]  ;;  %v547_v29 = vmul.f32 %v539_v8, %v1747_v12  ;;  %v574_v12 = vld [vmem:[%s1676_s9 + $0x20] sm:$0xff] }
  0xaf   : > { %v555_v47 = vpop.permute.xlu2 %554 }
  0xb0   : > { %v578_v23 = vmul.f32 %v570_v6, %v555_v47  ;;  %v544_v47 = vld [vmem:[%s1666_s19 + $0x30] sm:$0xff] }
  0xb2   : > { %v586_v10 = vadd.f32 %v578_v23, %v546_v22 }
  0xb6   : > { %v623_v31 = vpop.permute.xlu0 %622  ;;  %v619_v32 = vpop.permute.xlu1 %618 }
  0xb7   : > { %v638_v40 = vmul.f32 %v630_v34, %v619_v32  ;;  %v640_v46 = vmul.f32 %v632_v38, %v623_v31  ;;  %v561_v18 = vpop.permute.xlu2 %560  ;;  %v542_v38 = vld [vmem:[%s1666_s19 + $0x20] sm:$0xff] }
  0xb8   : > { %v581_v24 = vmul.f32 %v573_v7, %v561_v18 }
  0xb9   : > { %v646_v50 = vadd.f32 %v638_v40, %v606_v39  ;;  %v648_v53 = vadd.f32 %v640_v46, %v608_v43  ;;  %v575_v40 = vld [vmem:[%s1676_s9 + $0x28] sm:$0xff] }
  0xba   : > { %v589_v34 = vadd.f32 %v581_v24, %v549_v9 }
  0xbe   : > { %v625_v48 = vpop.permute.xlu0 %624  ;;  %v621_v49 = vpop.permute.xlu1 %620 }
  0xbf   : > { %v641_v51 = vmul.f32 %v633_v41, %v625_v48  ;;  %v639_v52 = vmul.f32 %v631_v42, %v621_v49  ;;  %v551_v41 = vmul.f32 %v543_v37, %v1756_v14  ;;  %v550_v42 = vmul.f32 %v542_v38, %v1759_v15  ;;  %v576_v48 = vld [vmem:[%s1676_s9 + $0x30] sm:$0xff]  ;;  %v567_v49 = vpop.permute.xlu2 %566  ;;  %v577_v15 = vld [vmem:[%s1676_s9 + $0x38] sm:$0xff] }
  0xc1   : > { %v649_v54 = vadd.f32 %v641_v51, %v609_v44  ;;  %v647_v55 = vadd.f32 %v639_v52, %v607_v45  ;;  %v545_v52 = vld [vmem:[%s1666_s19 + $0x38] sm:$0xff] }
  0xc3   : > { %v657_v58 = vpack.c.bf16 %v649_v54, %v648_v53  ;;  %v656_v59 = vpack.c.bf16 %v647_v55, %v646_v50  ;;  %v552_v53 = vmul.f32 %v544_v47, %v1765_v16  ;;  %v584_v54 = vmul.f32 %v576_v48, %v567_v49 }
  0xc4   : > { %v553_v55 = vmul.f32 %v545_v52, %v1768_v17  ;;  %v1573_v52 = vmov 0  }
  0xc5   : > { %662 = vmatpush.bf16.xpose.msra.mxu0 %v657_v58  ;;  %1391 = vmatpush.bf16.xpose.msra.mxu2 %v657_v58  ;;  %v592_v57 = vadd.f32 %v584_v54, %v552_v53  ;;  %v734_v53 = vld [vmem:[#allocation2] sm:$0xff] }
  0xc6   : > { %v613_v0 = vpop.permute.xlu1 %612  ;;  %v611_v1 = vpop.permute.xlu0 %610  ;;  %1462 = vset.pattern.permute.xlu1 %v1573_v52  ;;  %1460 = vset.pattern.permute.xlu2 %v1573_v52 }
  0xc7   : > { %v635_v3 = vmul.f32 %v627_v60, %v613_v0  ;;  %v634_v4 = vmul.f32 %v626_v61, %v611_v1  ;;  %v696_v60 = vlaneseq  ;;  %1461 = vset.pattern.permute.xlu0 %v1573_v52  ;;  %v981_v52 = vld [vmem:[%s1691_s10 + $0x8] sm:$0xff] }
  0xc9   : > { %v643_v19 = vadd.f32 %v635_v3, %v603_v62  ;;  %v642_v20 = vadd.f32 %v634_v4, %v602_v63  ;;  %v697_v16 = vshrl.u32 %v696_v60, 7  ;;  %v715_v61 = vand.u32 127, %v696_v60 }
  0xca   : > { %v705_v62 = vstv %s1366_s28  ;;  %v716_v63 = vstv %s1355_s3 }
  0xcb   : > { %v654_v25 = vpack.c.bf16 %v643_v19, %v642_v20  ;;  %v706_v17 = vadd.s32 %v705_v62, %v697_v16  ;;  %v717_v0 = vadd.s32 %v716_v63, %v715_v61  ;;  %v701_v1 = vadd.s32 32, %v697_v16  ;;  %v737_v63 = vld [vmem:[#allocation2 + $0x18] sm:$0xff] }
  0xcc   : > { %v702_v18 = vadd.s32 40, %v697_v16  ;;  %v699_v21 = vadd.s32 16, %v697_v16  ;;  %v704_v38 = vadd.s32 56, %v697_v16 }
  0xcd   : > { %663 = vmatpush.bf16.xpose.msra.mxu0 %v656_v59  ;;  %1392 = vmatpush.bf16.xpose.msra.mxu2 %v656_v59  ;;  %vm718_vm1 = vcmp.le.s32.totalorder %v717_v0, %v706_v17  ;;  %v710_v4 = vadd.s32 %v705_v62, %v701_v1 }
  0xce   : > { %v559_v31 = vpop.permute.xlu1 %558  ;;  %v557_v32 = vpop.permute.xlu0 %556  ;;  %v711_v9 = vadd.s32 %v705_v62, %v702_v18  ;;  %v708_v23 = vadd.s32 %v705_v62, %v699_v21 }
  0xcf   : > { %v580_v33 = vmul.f32 %v572_v26, %v559_v31  ;;  %v579_v13 = vmul.f32 %v571_v27, %v557_v32  ;;  %vm722_vm3 = vcmp.le.s32.totalorder %v717_v0, %v710_v4 }
  0xd0   : > { %vm723_vm4 = vcmp.le.s32.totalorder %v717_v0, %v711_v9  ;;  %vm720_vm5 = vcmp.le.s32.totalorder %v717_v0, %v708_v23 }
  0xd1   : > { %v588_v35 = vadd.f32 %v580_v33, %v548_v28  ;;  %v587_v36 = vadd.f32 %v579_v13, %v547_v29  ;;  %v700_v28 = vadd.s32 24, %v697_v16 }
  0xd3   : > { %v650_v39 = vpack.c.bf16 %v587_v36, %v586_v10  ;;  %v651_v11 = vpack.c.bf16 %v589_v34, %v588_v35  ;;  %v709_v34 = vadd.s32 %v705_v62, %v700_v28  ;;  %v703_v35 = vadd.s32 48, %v697_v16 }
  0xd5   : > { %664 = vmatpush.bf16.xpose.msra.mxu0 %v1776_v30  ;;  %1393 = vmatpush.bf16.xpose.msra.mxu2 %v1776_v30  ;;  %vm721_vm7 = vcmp.le.s32.totalorder %v717_v0, %v709_v34 }
  0xd6   : > { %v565_v43 = vpop.permute.xlu1 %564  ;;  %v563_v44 = vpop.permute.xlu0 %562 }
  0xd7   : > { %v583_v45 = vmul.f32 %v575_v40, %v565_v43  ;;  %v582_v46 = vmul.f32 %v574_v12, %v563_v44 }
  0xd9   : > { %v591_v50 = vadd.f32 %v583_v45, %v551_v41  ;;  %v590_v51 = vadd.f32 %v582_v46, %v550_v42  ;;  %v713_v41 = vadd.s32 %v705_v62, %v704_v38  ;;  %v987_v38 = vld [vmem:[%s1691_s10 + $0x38] sm:$0xff] }
  0xdb   : > { %v652_v14 = vpack.c.bf16 %v591_v50, %v590_v51  ;;  %vm725_vm9 = vcmp.le.s32.totalorder %v717_v0, %v713_v41  ;;  %v985_v41 = vld [vmem:[%s1691_s10 + $0x28] sm:$0xff] }
  0xdd   : > { %665 = vmatpush.bf16.xpose.msra.mxu0 %v654_v25  ;;  %1394 = vmatpush.bf16.xpose.msra.mxu2 %v654_v25  ;;  %v698_v25 = vadd.s32 8, %v697_v16 }
  0xde   : > { %v569_v30 = vpop.permute.xlu0 %568 }
  0xdf   : > { %v585_v56 = vmul.f32 %v577_v15, %v569_v30  ;;  %v707_v10 = vadd.s32 %v705_v62, %v698_v25  ;;  %v738_v15 = vld [vmem:[#allocation2 + $0x20] sm:$0xff] }
  0xe1   : > { %v593_v58 = vadd.f32 %v585_v56, %v553_v55  ;;  %vm719_vm6 = vcmp.le.s32.totalorder %v717_v0, %v707_v10  ;;  %v1856_v56 = vld [vmem:[#allocation2 + $0x28] sm:$0xff] }
  0xe3   : > { %v653_v59 = vpack.c.bf16 %v593_v58, %v592_v57  ;;  %v736_v58 = vld [vmem:[#allocation2 + $0x10] sm:$0xff] }
  0xe4   : > { %666 = vmatmul.bf16.vlgmr.msra.gmra.mxu0 %v650_v39  ;;  %676 = vmatmul.bf16.vlgmr.msra.gmra.mxu2 %v652_v14 }
  0xf4   : > { %671 = vmatmul.bf16.gmra.mxu0 %v651_v11  ;;  %681 = vmatmul.bf16.gmra.mxu2 %v653_v59  ;;  %v712_v11 = vadd.s32 %v705_v62, %v703_v35  ;;  %v735_v62 = vld [vmem:[#allocation2 + $0x8] sm:$0xff] }
  0xf6   : > { %vm724_vm8 = vcmp.le.s32.totalorder %v717_v0, %v712_v11 }
 0x161   : > { %v667_v2 = vpop.f32.mrf.mxu0 }
 0x162   : > { %v687_v3 = vmul.f32 0.088388346, %v667_v2 }
 0x164   : > { %v1822_v5 = vsel %vm718_vm1, %v687_v3, -1e+30 }
 0x165   : > { %v743_v6 = vsel %vm742_vm2, %v1822_v5, -inf }
 0x166   : > { %744 = vmax.xlane.f32.xlu0 %v743_v6  ;;  %v1869_v6 = vld [vmem:[#allocation2 + $0x30] sm:$0xff] }
 0x167   : > { %v677_v7 = vpop.f32.mrf.mxu2 }
 0x168   : > { %v691_v19 = vmul.f32 0.088388346, %v677_v7  ;;  %v1871_v7 = vld [vmem:[#allocation2 + $0x38] sm:$0xff] }
 0x169   : > { %v669_v20 = vpop.f32.mrf.mxu0 }
 0x16a   : > { %v1826_v8 = vsel %vm722_vm3, %v691_v19, -1e+30  ;;  %v688_v36 = vmul.f32 0.088388346, %v669_v20 }
 0x16b   : > { %v755_v22 = vsel %vm742_vm2, %v1826_v8, -inf }
 0x16c   : > { %v1838_v12 = vsel %vm719_vm6, %v688_v36, -1e+30 }
 0x16d   : > { %v746_v44 = vsel %vm742_vm2, %v1838_v12, -inf }
 0x16e   : > { %756 = vmax.xlane.f32.xlu0 %v755_v22 }
 0x16f   : > { %v679_v24 = vpop.f32.mrf.mxu2 }
 0x170   : > { %v692_v26 = vmul.f32 0.088388346, %v679_v24 }
 0x171   : > { %v672_v27 = vpop.f32.mrf.mxu0 }
 0x172   : > { %v689_v29 = vmul.f32 0.088388346, %v672_v27  ;;  %v1830_v31 = vsel %vm723_vm4, %v692_v26, -1e+30 }
 0x173   : > { %v758_v32 = vsel %vm742_vm2, %v1830_v31, -inf }
 0x174   : > { %759 = vmax.xlane.f32.xlu2 %v758_v32  ;;  %v1834_v33 = vsel %vm720_vm5, %v689_v29, -1e+30 }
 0x175   : > { %v749_v13 = vsel %vm742_vm2, %v1834_v33, -inf }
 0x176   : > { %750 = vmax.xlane.f32.xlu1 %v749_v13 }
 0x177   : > { %v682_v37 = vpop.f32.mrf.mxu2 }
 0x178   : > { %v693_v42 = vmul.f32 0.088388346, %v682_v37  ;;  %v986_v37 = vld [vmem:[%s1691_s10 + $0x30] sm:$0xff] }
 0x179   : > { %v674_v39 = vpop.f32.mrf.mxu0 }
 0x17a   : > { %v690_v40 = vmul.f32 0.088388346, %v674_v39  ;;  %v1846_v48 = vsel %vm724_vm8, %v693_v42, -1e+30  ;;  %v991_v39 = vpack.c.bf16 %v987_v38, %v986_v37 }
 0x17b   : > { %v761_v50 = vsel %vm742_vm2, %v1846_v48, -inf }
 0x17c   : > { %v1840_v43 = vsel %vm721_vm7, %v690_v40, -1e+30  ;;  %1395 = vmatpush.bf16.msra.mxu3 %v991_v39  ;;  %1008 = vmatpush.bf16.msra.mxu1 %v991_v39  ;;  %v984_v40 = vld [vmem:[%s1691_s10 + $0x20] sm:$0xff] }
 0x17d   : > { %v752_v45 = vsel %vm742_vm2, %v1840_v43, -inf  ;;  %v990_v42 = vpack.c.bf16 %v985_v41, %v984_v40 }
 0x17e   : > { %747 = vmax.xlane.f32.xlu1 %v746_v44  ;;  %753 = vmax.xlane.f32.xlu2 %v752_v45  ;;  %v982_v44 = vld [vmem:[%s1691_s10 + $0x10] sm:$0xff]  ;;  %v983_v45 = vld [vmem:[%s1691_s10 + $0x18] sm:$0xff] }
 0x17f   : > { %v684_v46 = vpop.f32.mrf.mxu2 }
 0x180   : > { %v694_v47 = vmul.f32 0.088388346, %v684_v46  ;;  %1396 = vmatpush.bf16.msra.mxu3 %v990_v42  ;;  %1009 = vmatpush.bf16.msra.mxu1 %v990_v42  ;;  %v989_v46 = vpack.c.bf16 %v983_v45, %v982_v44  ;;  %v868_v45 = vld [vmem:[#allocation3 + $0x28] sm:$0xff] }
 0x182   : > { %v1848_v49 = vsel %vm725_vm9, %v694_v47, -1e+30 }
 0x183   : > { %v764_v51 = vsel %vm742_vm2, %v1848_v49, -inf }
 0x184   : > { %1397 = vmatpush.bf16.msra.mxu3 %v989_v46  ;;  %1010 = vmatpush.bf16.msra.mxu1 %v989_v46 }
 0x186   : > { %762 = vmax.xlane.f32.xlu1 %v761_v50  ;;  %765 = vmax.xlane.f32.xlu2 %v764_v51  ;;  %v980_v51 = vld [vmem:[%s1691_s10] sm:$0xff] }
 0x1d9   : > { %v745_v14 = vpop.xlane.xlu0 %744 }
 0x1da   : > { %v767_v54 = vmax.f32 %v734_v53, %v745_v14 }
 0x1dc   : > { %1049 = vst.msk [vmem:[#allocation2] sm:$0xff] %vm911_vm10, %v767_v54  ;;  %v775_v9 = vsub.f32 %v734_v53, %v767_v54  ;;  %v988_v53 = vpack.c.bf16 %v981_v52, %v980_v51  ;;  %v867_v52 = vld [vmem:[#allocation3 + $0x20] sm:$0xff] }
 0x1de   : > { %v783_v28 = vmul.f32 1.442695, %v775_v9  ;;  %1398 = vmatpush.bf16.msra.mxu3 %v988_v53  ;;  %1011 = vmatpush.bf16.msra.mxu1 %v988_v53  ;;  %v865_v53 = vld [vmem:[#allocation3 + $0x10] sm:$0xff] }
 0x1e1   : > { %v757_v55 = vpop.xlane.xlu0 %756 }
 0x1e2   : > { %v771_v30 = vmax.f32 %v738_v15, %v757_v55 }
 0x1e4   : > { %1053 = vst.msk [vmem:[#allocation2 + $0x20] sm:$0xff] %vm911_vm10, %v771_v30  ;;  %821 = vperm.xlu1 %1462, %v771_v30   ;;  %v779_v32 = vsub.f32 %v738_v15, %v771_v30 }
 0x1e6   : > { %v791_v13 = vmul.f32 1.442695, %v779_v32 }
 0x1e7   : > { %v760_v57 = vpop.xlane.xlu2 %759 }
 0x1e8   : > { %v1859_v59 = vmax.f32 %v1856_v56, %v760_v57 }
 0x1e9   : > { %v751_v60 = vpop.xlane.xlu1 %750 }
 0x1ea   : > { %v780_v16 = vsub.f32 %v1856_v56, %v1859_v59  ;;  %1054 = vst.msk [vmem:[#allocation2 + $0x28] sm:$0xff] %vm911_vm10, %v1859_v59  ;;  %v769_v61 = vmax.f32 %v736_v58, %v751_v60 }
 0x1ec   : > { %1051 = vst.msk [vmem:[#allocation2 + $0x10] sm:$0xff] %vm911_vm10, %v769_v61  ;;  %811 = vperm.xlu2 %1460, %v769_v61   ;;  %v777_v26 = vsub.f32 %v736_v58, %v769_v61 }
 0x1ee   : > { %v787_v29 = vmul.f32 1.442695, %v777_v26 }
 0x1f1   : > { %v748_v17 = vpop.xlane.xlu1 %747  ;;  %v754_v0 = vpop.xlane.xlu2 %753 }
 0x1f2   : > { %v768_v1 = vmax.f32 %v735_v62, %v748_v17  ;;  %v770_v2 = vmax.f32 %v737_v63, %v754_v0 }
 0x1f4   : > { %v776_v3 = vsub.f32 %v735_v62, %v768_v1  ;;  %1050 = vst.msk [vmem:[#allocation2 + $0x8] sm:$0xff] %vm911_vm10, %v768_v1  ;;  %826 = vperm.xlu2 %1460, %v1859_v59   ;;  %816 = vperm.xlu0 %1461, %v770_v2   ;;  %v778_v18 = vsub.f32 %v737_v63, %v770_v2 }
 0x1f5   : > { %1052 = vst.msk [vmem:[#allocation2 + $0x18] sm:$0xff] %vm911_vm10, %v770_v2 }
 0x1f6   : > { %v785_v4 = vmul.f32 1.442695, %v776_v3  ;;  %v789_v23 = vmul.f32 1.442695, %v778_v18 }
 0x1f8   : > { %1463 = vpow2.f32 %v785_v4 }
 0x1f9   : > { %v763_v19 = vpop.xlane.xlu1 %762  ;;  %v766_v20 = vpop.xlane.xlu2 %765  ;;  %1465 = vpow2.f32 %v789_v23 }
 0x1fa   : > { %v1874_v21 = vmax.f32 %v1869_v6, %v763_v19  ;;  %v1877_v22 = vmax.f32 %v1871_v7, %v766_v20  ;;  %1467 = vpow2.f32 %v783_v28 }
 0x1fb   : > { %1469 = vpow2.f32 %v787_v29 }
 0x1fc   : > { %v781_v24 = vsub.f32 %v1869_v6, %v1874_v21  ;;  %1055 = vst.msk [vmem:[#allocation2 + $0x30] sm:$0xff] %vm911_vm10, %v1874_v21  ;;  %v782_v25 = vsub.f32 %v1871_v7, %v1877_v22  ;;  %831 = vperm.xlu1 %1462, %v1874_v21   ;;  %836 = vperm.xlu2 %1460, %v1877_v22   ;;  %1471 = vpow2.f32 %v791_v13 }
 0x1fd   : > { %1056 = vst.msk [vmem:[#allocation2 + $0x38] sm:$0xff] %vm911_vm10, %v1877_v22  ;;  %v793_v22 = vmul.f32 1.442695, %v780_v16 }
 0x1fe   : > { %v1889_v27 = vpop.eup %1463  ;;  %v797_v9 = vmul.f32 1.442695, %v782_v25  ;;  %v795_v16 = vmul.f32 1.442695, %v781_v24 }
 0x1ff   : > { %935 = vperm.xlu0 %1461, %v1889_v27   ;;  %v1892_v10 = vpop.eup %1465 }
 0x200   : > { %v1895_v34 = vpop.eup %1467 }
 0x201   : > { %v1897_v35 = vpop.eup %1469 }
 0x202   : > { %v1901_v36 = vpop.eup %1471 }
 0x204   : > { %801 = vperm.xlu1 %1462, %v767_v54   ;;  %806 = vperm.xlu2 %1460, %v768_v1  }
 0x207   : > { %945 = vperm.xlu0 %1461, %v1892_v10  }
 0x20c   : > { %940 = vperm.xlu1 %1462, %v1897_v35   ;;  %930 = vperm.xlu2 %1460, %v1895_v34  }
 0x214   : > { %950 = vperm.xlu2 %1460, %v1901_v36  }
 0x246   : > { %v812_v11 = vpop.permute.xlu2 %811 }
 0x247   : > { %v841_v14 = vsub.f32 %v1834_v33, %v812_v11 }
 0x249   : > { %v851_v15 = vmul.f32 1.442695, %v841_v14  ;;  %v875_v14 = vmul.f32 %v1901_v36, %v867_v52 }
 0x24e   : > { %v827_v47 = vpop.permute.xlu2 %826 }
 0x24f   : > { %v844_v50 = vsub.f32 %v1830_v31, %v827_v47 }
 0x251   : > { %v857_v54 = vmul.f32 1.442695, %v844_v50 }
 0x253   : > { %1473 = vpow2.f32 %v857_v54  ;;  %v873_v54 = vmul.f32 %v1897_v35, %v865_v53 }
 0x254   : > { %1475 = vpow2.f32 %v851_v15 }
 0x256   : > { %v822_v55 = vpop.permute.xlu1 %821  ;;  %v837_v30 = vpop.permute.xlu2 %836 }
 0x257   : > { %v843_v57 = vsub.f32 %v1826_v8, %v822_v55  ;;  %v846_v17 = vsub.f32 %v1848_v49, %v837_v30  ;;  %v864_v55 = vld [vmem:[#allocation3 + $0x8] sm:$0xff] }
 0x258   : > { %v872_v30 = vmul.f32 %v1889_v27, %v864_v55 }
 0x259   : > { %v1474_v58 = vpop.eup %1473  ;;  %v855_v60 = vmul.f32 1.442695, %v843_v57  ;;  %v861_v8 = vmul.f32 1.442695, %v846_v17 }
 0x25a   : > { %v894_v61 = vsel %vm742_vm2, %v1474_v58, 0.0  ;;  %v1476_v62 = vpop.eup %1475 }
 0x25b   : > { %1477 = vpow2.f32 %v855_v60  ;;  %895 = vadd.xlane.f32.xlu2 %v894_v61  ;;  %v885_v2 = vsel %vm742_vm2, %v1476_v62, 0.0  ;;  %v870_v60 = vld [vmem:[#allocation3 + $0x38] sm:$0xff] }
 0x25e   : > { %v807_v31 = vpop.permute.xlu2 %806 }
 0x25f   : > { %v840_v33 = vsub.f32 %v1838_v12, %v807_v31 }
 0x261   : > { %v1478_v63 = vpop.eup %1477  ;;  %v849_v0 = vmul.f32 1.442695, %v840_v33  ;;  %v863_v33 = vld [vmem:[#allocation3] sm:$0xff] }
 0x262   : > { %v891_v1 = vsel %vm742_vm2, %v1478_v63, 0.0  ;;  %v978_v11 = vpack.c.bf16 %v1474_v58, %v1478_v63  ;;  %v922_v63 = vld [vmem:[#allocation4 + $0x18] sm:$0xff]  ;;  %v871_v17 = vmul.f32 %v1895_v34, %v863_v33 }
 0x263   : > { %1479 = vpow2.f32 %v849_v0  ;;  %892 = vadd.xlane.f32.xlu1 %v891_v1  ;;  %886 = vadd.xlane.f32.xlu2 %v885_v2 }
 0x264   : > { %1481 = vpow2.f32 %v861_v8 }
 0x266   : > { %v817_v3 = vpop.permute.xlu0 %816  ;;  %v931_v42 = vpop.permute.xlu2 %930 }
 0x267   : > { %v842_v4 = vsub.f32 %v1840_v43, %v817_v3  ;;  %v869_v3 = vld [vmem:[#allocation3 + $0x30] sm:$0xff] }
 0x269   : > { %v1480_v18 = vpop.eup %1479  ;;  %v853_v19 = vmul.f32 1.442695, %v842_v4  ;;  %v923_v4 = vld [vmem:[#allocation4 + $0x10] sm:$0xff] }
 0x26a   : > { %v882_v12 = vsel %vm742_vm2, %v1480_v18, 0.0  ;;  %v1482_v20 = vpop.eup %1481 }
 0x26b   : > { %1483 = vpow2.f32 %v853_v19  ;;  %883 = vadd.xlane.f32.xlu1 %v882_v12  ;;  %v900_v26 = vsel %vm742_vm2, %v1482_v20, 0.0 }
 0x26c   : > { %1485 = vpow2.f32 %v797_v9 }
 0x26e   : > { %v832_v49 = vpop.permute.xlu1 %831  ;;  %v951_v44 = vpop.permute.xlu2 %950 }
 0x26f   : > { %v845_v32 = vsub.f32 %v1846_v48, %v832_v49 }
 0x271   : > { %v1484_v23 = vpop.eup %1483  ;;  %v859_v38 = vmul.f32 1.442695, %v845_v32  ;;  %v936_v61 = vpop.permute.xlu0 %935  ;;  %v921_v32 = vld [vmem:[#allocation4] sm:$0xff] }
 0x272   : > { %v977_v28 = vpack.c.bf16 %v1484_v23, %v1476_v62  ;;  %v1486_v37 = vpop.eup %1485  ;;  %v888_v56 = vsel %vm742_vm2, %v1484_v23, 0.0 }
 0x273   : > { %901 = vadd.xlane.f32.xlu1 %v900_v26  ;;  %v878_v36 = vmul.f32 %v1486_v37, %v870_v60 }
 0x274   : > { %1360 = vmatmul.msk.bf16.vlgmr.msra.gmra.mxu3 %vm742_vm2, %v977_v28 }
 0x276   : > { %v802_v43 = vpop.permute.xlu1 %801 }
 0x277   : > { %v839_v29 = vsub.f32 %v1822_v5, %v802_v43  ;;  %v866_v43 = vld [vmem:[#allocation3 + $0x18] sm:$0xff] }
 0x279   : > { %v847_v13 = vmul.f32 1.442695, %v839_v29  ;;  %v946_v62 = vpop.permute.xlu0 %945  ;;  %v924_v29 = vld [vmem:[#allocation4 + $0x8] sm:$0xff] }
 0x27a   : > { %v971_v12 = vmul.f32 %v946_v62, %v923_v4 }
 0x27b   : > { %1487 = vpow2.f32 %v847_v13  ;;  %965 = vperm.xlu2 %1460, %v1486_v37   ;;  %v874_v13 = vmul.f32 %v1892_v10, %v866_v43  ;;  %v972_v37 = vmul.f32 %v951_v44, %v924_v29  ;;  %v926_v10 = vld [vmem:[#allocation4 + $0x28] sm:$0xff] }
 0x27c   : > { %1489 = vpow2.f32 %v859_v38 }
 0x27d   : > { %1491 = vpow2.f32 %v793_v22 }
 0x27e   : > { %1493 = vpow2.f32 %v795_v16  ;;  %v941_v47 = vpop.permute.xlu1 %940 }
 0x27f   : > { %v970_v0 = vmul.f32 %v941_v47, %v922_v63 }
 0x281   : > { %v1488_v7 = vpop.eup %1487 }
 0x282   : > { %v879_v25 = vsel %vm742_vm2, %v1488_v7, 0.0  ;;  %v976_v39 = vpack.c.bf16 %v1480_v18, %v1488_v7  ;;  %v1490_v5 = vpop.eup %1489  ;;  %v920_v18 = vld [vmem:[#allocation4 + $0x30] sm:$0xff] }
 0x283   : > { %880 = vadd.xlane.f32.xlu0 %v879_v25  ;;  %v897_v48 = vsel %vm742_vm2, %v1490_v5, 0.0  ;;  %v1492_v40 = vpop.eup %1491  ;;  %v979_v59 = vpack.c.bf16 %v1482_v20, %v1490_v5  ;;  %v968_v23 = vmul.f32 %v931_v42, %v920_v18  ;;  %v969_v25 = vmul.f32 %v936_v61, %v921_v32 }
 0x284   : > { %1359 = vmatmul.msk.bf16.vlgmr.msra.gmra.mxu1 %vm742_vm2, %v976_v39  ;;  %1361 = vmatmul.msk.bf16.gmra.mxu3 %vm742_vm2, %v978_v11  ;;  %v1494_v41 = vpop.eup %1493  ;;  %v876_v46 = vmul.f32 %v1492_v40, %v868_v45  ;;  %v927_v45 = vld [vmem:[#allocation4 + $0x38] sm:$0xff] }
 0x285   : > { %v877_v19 = vmul.f32 %v1494_v41, %v869_v3 }
 0x28b   : > { %898 = vadd.xlane.f32.xlu0 %v897_v48  ;;  %v925_v48 = vld [vmem:[#allocation4 + $0x20] sm:$0xff] }
 0x28c   : > { %955 = vperm.xlu1 %1462, %v1492_v40  }
 0x293   : > { %889 = vadd.xlane.f32.xlu0 %v888_v56 }
 0x294   : > { %1362 = vmatmul.msk.bf16.gmra.mxu3 %vm742_vm2, %v979_v59 }
 0x2a7   : > { %960 = vperm.xlu0 %1461, %v1494_v41  }
 0x2ce   : > { %v896_v50 = vpop.xlane.xlu2 %895 }
 0x2cf   : > { %v908_v51 = vadd.f32 %v896_v50, %v876_v46 }
 0x2d1   : > { %917 = vst.msk [vmem:[#allocation3 + $0x28] sm:$0xff] %vm911_vm10, %v908_v51 }
 0x2d6   : > { %v893_v6 = vpop.xlane.xlu1 %892  ;;  %v887_v21 = vpop.xlane.xlu2 %886 }
 0x2d7   : > { %v907_v24 = vadd.f32 %v893_v6, %v875_v14  ;;  %v905_v15 = vadd.f32 %v887_v21, %v873_v54 }
 0x2d9   : > { %916 = vst.msk [vmem:[#allocation3 + $0x20] sm:$0xff] %vm911_vm10, %v907_v24 }
 0x2da   : > { %914 = vst.msk [vmem:[#allocation3 + $0x10] sm:$0xff] %vm911_vm10, %v905_v15 }
 0x2de   : > { %v884_v57 = vpop.xlane.xlu1 %883  ;;  %v966_v46 = vpop.permute.xlu2 %965 }
 0x2df   : > { %v904_v58 = vadd.f32 %v884_v57, %v872_v30  ;;  %v975_v50 = vmul.f32 %v966_v46, %v927_v45 }
 0x2e1   : > { %913 = vst.msk [vmem:[#allocation3 + $0x8] sm:$0xff] %vm911_vm10, %v904_v58 }
 0x2e6   : > { %v902_v31 = vpop.xlane.xlu1 %901 }
 0x2e7   : > { %v910_v35 = vadd.f32 %v902_v31, %v878_v36 }
 0x2e9   : > { %919 = vst.msk [vmem:[#allocation3 + $0x38] sm:$0xff] %vm911_vm10, %v910_v35 }
 0x2f6   : > { %v881_v1 = vpop.xlane.xlu0 %880 }
 0x2f7   : > { %v903_v2 = vadd.f32 %v881_v1, %v871_v17  ;;  %v1018_v27 = vpop.f32.mrf.mxu3 }
 0x2f8   : > { %v1035_v8 = vadd.f32 %v1018_v27, %v970_v0 }
 0x2f9   : > { %912 = vst.msk [vmem:[#allocation3] sm:$0xff] %vm911_vm10, %v903_v2 }
 0x2fa   : > { %1043 = vst [vmem:[#allocation4 + $0x18] sm:$0xff] %v1035_v8 }
 0x2fe   : > { %v899_v49 = vpop.xlane.xlu0 %898  ;;  %v956_v40 = vpop.permute.xlu1 %955 }
 0x2ff   : > { %v909_v20 = vadd.f32 %v899_v49, %v877_v19  ;;  %v1020_v9 = vpop.f32.mrf.mxu3  ;;  %v973_v56 = vmul.f32 %v956_v40, %v925_v48 }
 0x300   : > { %v1036_v26 = vadd.f32 %v1020_v9, %v971_v12 }
 0x301   : > { %918 = vst.msk [vmem:[#allocation3 + $0x30] sm:$0xff] %vm911_vm10, %v909_v20  ;;  %v1013_v34 = vpop.f32.mrf.mxu1 }
 0x302   : > { %1044 = vst [vmem:[#allocation4 + $0x10] sm:$0xff] %v1036_v26  ;;  %v1033_v28 = vadd.f32 %v1013_v34, %v968_v23 }
 0x304   : > { %1041 = vst [vmem:[#allocation4 + $0x30] sm:$0xff] %v1033_v28 }
 0x306   : > { %v890_v38 = vpop.xlane.xlu0 %889 }
 0x307   : > { %v906_v7 = vadd.f32 %v890_v38, %v874_v13  ;;  %v1023_v22 = vpop.f32.mrf.mxu3 }
 0x308   : > { %v1037_v39 = vadd.f32 %v1023_v22, %v972_v37 }
 0x309   : > { %915 = vst.msk [vmem:[#allocation3 + $0x18] sm:$0xff] %vm911_vm10, %v906_v7  ;;  %v1015_v11 = vpop.f32.mrf.mxu1 }
 0x30a   : > { %1045 = vst [vmem:[#allocation4 + $0x8] sm:$0xff] %v1037_v39  ;;  %v1034_v5 = vadd.f32 %v1015_v11, %v969_v25 }
 0x30c   : > { %1042 = vst [vmem:[#allocation4] sm:$0xff] %v1034_v5 }
 0x30f   : > { %v1025_v59 = vpop.f32.mrf.mxu3 }
 0x310   : > { %v1038_v16 = vadd.f32 %v1025_v59, %v973_v56 }
 0x312   : > { %1046 = vst [vmem:[#allocation4 + $0x20] sm:$0xff] %v1038_v16 }
 0x317   : > { %v1028_v41 = vpop.f32.mrf.mxu3 }
 0x319   : > { %v961_v42 = vpop.permute.xlu0 %960 }
 0x31a   : > { %v974_v44 = vmul.f32 %v961_v42, %v926_v10 }
 0x31c   : > { %v1039_v47 = vadd.f32 %v1028_v41, %v974_v44 }
 0x31e   : > { %1047 = vst [vmem:[#allocation4 + $0x28] sm:$0xff] %v1039_v47 }
 0x31f   : > { %v1030_v51 = vpop.f32.mrf.mxu3 }
 0x320   : > { %v1040_v52 = vadd.f32 %v1030_v51, %v975_v50 }
 0x322   : > { %1048 = vst [vmem:[#allocation4 + $0x38] sm:$0xff] %v1040_v52 }
 0x323 PF: > { %p1363_p11 = scmp.ne.s32.totalorder %s1544_s24, 1 }
 0x325   : > { %1060 = sbr.rel (%p1363_p11) target bundleno = 955 (0x3bb), region = 60 }
 0x32a   : > { %v1071_v53 = vld [vmem:[#allocation3 + $0x10] sm:$0xff]  ;;  %v1069_v14 = vld [vmem:[#allocation3] sm:$0xff]  ;;  %v1574_v54 = vmov 0   ;;  %v1072_v6 = vld [vmem:[#allocation3 + $0x18] sm:$0xff] }
 0x32b   : > { %1496 = vset.pattern.permute.xlu1 %v1574_v54  ;;  %1495 = vset.pattern.permute.xlu0 %v1574_v54  ;;  %1498 = vrcp.f32 %v1071_v53  ;;  %v1073_v21 = vld [vmem:[#allocation3 + $0x20] sm:$0xff]  ;;  %v1070_v24 = vld [vmem:[#allocation3 + $0x8] sm:$0xff]  ;;  %v1076_v58 = vld [vmem:[#allocation3 + $0x38] sm:$0xff] }
 0x32c   : > { %1500 = vrcp.f32 %v1069_v14  ;;  %1497 = vset.pattern.permute.xlu2 %v1574_v54  ;;  %v1074_v30 = vld [vmem:[#allocation3 + $0x28] sm:$0xff]  ;;  %v1075_v61 = vld [vmem:[#allocation3 + $0x30] sm:$0xff]  ;;  %v1066_v17 = vld [vmem:[#allocation4 + $0x20] sm:$0xff] }
 0x32d   : > { %1502 = vrcp.f32 %v1072_v6  ;;  %v1065_v63 = vld [vmem:[#allocation4 + $0x8] sm:$0xff]  ;;  %v1063_v4 = vld [vmem:[#allocation4 + $0x18] sm:$0xff]  ;;  %v1064_v18 = vld [vmem:[#allocation4 + $0x10] sm:$0xff] }
 0x32e   : > { %1504 = vrcp.f32 %v1073_v21  ;;  %v1061_v19 = vld [vmem:[#allocation4 + $0x30] sm:$0xff]  ;;  %v1062_v12 = vld [vmem:[#allocation4] sm:$0xff]  ;;  %v1068_v29 = vld [vmem:[#allocation4 + $0x38] sm:$0xff] }
 0x32f   : > { %1506 = vrcp.f32 %v1070_v24  ;;  %v1067_v32 = vld [vmem:[#allocation4 + $0x28] sm:$0xff] }
 0x330   : > { %1508 = vrcp.f32 %v1074_v30 }
 0x331   : > { %v1499_v15 = vpop.eup %1498  ;;  %1510 = vrcp.f32 %v1076_v58 }
 0x332   : > { %v1501_v55 = vpop.eup %1500  ;;  %1097 = vperm.xlu1 %1496, %v1499_v15   ;;  %1512 = vrcp.f32 %v1075_v61 }
 0x333   : > { %1087 = vperm.xlu0 %1495, %v1501_v55   ;;  %v1503_v57 = vpop.eup %1502 }
 0x334   : > { %v1505_v60 = vpop.eup %1504 }
 0x335   : > { %v1507_v36 = vpop.eup %1506  ;;  %1107 = vperm.xlu2 %1497, %v1505_v60  }
 0x336   : > { %v1509_v31 = vpop.eup %1508 }
 0x337   : > { %v1511_v35 = vpop.eup %1510 }
 0x338   : > { %v1513_v62 = vpop.eup %1512 }
 0x33a   : > { %1102 = vperm.xlu1 %1496, %v1503_v57  }
 0x33b   : > { %1092 = vperm.xlu0 %1495, %v1507_v36  }
 0x33d   : > { %1112 = vperm.xlu2 %1497, %v1509_v31  }
 0x342   : > { %1122 = vperm.xlu1 %1496, %v1511_v35  }
 0x343   : > { %1117 = vperm.xlu0 %1495, %v1513_v62  }
 0x38f   : > { %v1108_v33 = vpop.permute.xlu2 %1107 }
 0x390   : > { %v1129_v0 = vmul.f32 %v1108_v33, %v1065_v63 }
 0x397   : > { %v1113_v1 = vpop.permute.xlu2 %1112 }
 0x398   : > { %v1130_v2 = vmul.f32 %v1113_v1, %v1066_v17 }
 0x39a   : > { %v1381_v27 = vpack.c.bf16 %v1130_v2, %v1129_v0 }
 0x39c   : > { %1389 = vst [vmem:[%s1701_s27 + $0x10] sm:$0xff] %v1381_v27  }
 0x3a4   : > { %v1098_v8 = vpop.permute.xlu1 %1097 }
 0x3a5   : > { %v1088_v3 = vpop.permute.xlu0 %1087  ;;  %v1127_v20 = vmul.f32 %v1098_v8, %v1063_v4 }
 0x3a6   : > { %v1125_v26 = vmul.f32 %v1088_v3, %v1061_v19 }
 0x3ac   : > { %v1103_v49 = vpop.permute.xlu1 %1102 }
 0x3ad   : > { %v1128_v9 = vmul.f32 %v1103_v49, %v1064_v18  ;;  %v1093_v23 = vpop.permute.xlu0 %1092 }
 0x3ae   : > { %v1126_v34 = vmul.f32 %v1093_v23, %v1062_v12 }
 0x3af   : > { %v1376_v28 = vpack.c.bf16 %v1128_v9, %v1127_v20 }
 0x3b0   : > { %v1371_v43 = vpack.c.bf16 %v1126_v34, %v1125_v26 }
 0x3b1   : > { %1388 = vst [vmem:[%s1701_s27 + $0x8] sm:$0xff] %v1376_v28  }
 0x3b2   : > { %1372 = vst [vmem:[%s1701_s27] sm:$0xff] %v1371_v43  }
 0x3b4   : > { %v1123_v13 = vpop.permute.xlu1 %1122 }
 0x3b5   : > { %v1132_v37 = vmul.f32 %v1123_v13, %v1068_v29  ;;  %v1118_v38 = vpop.permute.xlu0 %1117 }
 0x3b6   : > { %v1131_v7 = vmul.f32 %v1118_v38, %v1067_v32 }
 0x3b8   : > { %v1386_v22 = vpack.c.bf16 %v1132_v37, %v1131_v7 }
 0x3ba   : > { %1390 = vst [vmem:[%s1701_s27 + $0x18] sm:$0xff] %v1386_v22  }
 0x3bb PF: > { %s17_s30 = sadd.s32 1, %s1568_s30   ;;  %s1999_s24 = sld [smem:[#allocation5_spill]] }
 0x3bc   : > { %p14_p12 = scmp.ge.s32.totalorder %s17_s30, 18   ;;  %s2000_s25 = sld [smem:[#allocation6_spill]] }
 0x3bd   : > { %s2001_s26 = sld [smem:[#allocation7_spill]] }
 0x3be   : > { %s2002_s27 = sld [smem:[#allocation8_spill]]  ;;  %16 = sbr.rel (!%p14_p12) target bundleno = 4 (0x4), region = 108 }
 0x3bf   : > { %s2003_s28 = sld [smem:[#allocation9_spill]] }
 0x3c0   : > { %s2004_s29 = sld [smem:[#allocation10_spill]] }

// kernel: decoder_layer.10
= control target key start
LH: loop header
LB: loop body
LE: loop exit
PB: predicated region body
PF: predicated region fallthrough
CT: control target
= control target key end

     0   :  { %s1348_s12 = smov 0   ;;  %s1350_s13 = smov 0   ;;  %s1575_s0 = inlined_call_operand.vmem [shape: bf16[256,256], index: 0, kind: input, shape index: {}]   ;;  %s1576_s1 = inlined_call_operand.vmem [shape: bf16[256,256], index: 1, kind: input, shape index: {}]   ;;  %s1577_s2 = inlined_call_operand.vmem [shape: f32[256,256], index: 2, kind: input, shape index: {}]   ;;  %s1578_s3 = inlined_call_operand.vmem [shape: f32[256,256], index: 3, kind: output, shape index: {}]  }
   0x1   :  { %s1352_s14 = smov 0   ;;  %s1354_s15 = smov 0  }
   0x2   :  { %s1356_s16 = smov 0   ;;  %s1358_s17 = smov 0  }
   0x3   :  { %s1360_s18 = smov 0  }
   0x4 LB: > { %s25_s19 = sadd.s32 1, %s1317_s16  ;;  %s32_s20 = sadd.s32 1, %s1321_s17  ;;  %s1325_s18 = sphi %s1360_s18, %s13_s18   ;;  %s1321_s17 = sphi %s1358_s17, %s1584_s17   ;;  %s1317_s16 = sphi %s1356_s16, %s1583_s16   ;;  %s1313_s15 = sphi %s1354_s15, %s1582_s15   ;;  %s1309_s14 = sphi %s1352_s14, %s1581_s14   ;;  %s1305_s13 = sphi %s1350_s13, %s1580_s13   ;;  %s1301_s12 = sphi %s1348_s12, %s1579_s12  }
   0x5   : > { %p26_p0 = scmp.ge.s32.totalorder %s25_s19, 2  ;;  %p48_p1 = scmp.ne.s32.totalorder %s1305_s13, %s1301_s12 }
   0x6   : > { %p49_p2 = scmp.eq.s32.totalorder %s1325_s18, 0  ;;  %s41_s24 = sadd.s32 1, %s1305_s13 }
   0x7   : > { %s1586_s19 = smov (%p26_p0, %s25_s19), 0  ;;  %s1588_s20 = smov (!%p26_p0, %s32_s20), %s1321_s17 }
   0x8   : > { %p50_p3 = por %p49_p2, %p48_p1  ;;  %p34_p4 = scmp.ge.s32.totalorder %s1588_s20, 2 }
   0x9   : > { %s37_s21 = ssub.s32 %s1317_s16, %s1586_s19  ;;  %p1054_p6 = scmp.ge.s32.totalorder %s1325_s18, 4 }
   0xa   : > { %s1590_s20 = smov (%p34_p4, %s1588_s20), 0 }
   0xb   : > { %s36_s22 = ssub.s32 %s1321_s17, %s1590_s20  ;;  %158 = sbr.rel (%p1054_p6) target bundleno = 38 (0x26), region = 16 }
   0xc   : > { %s38_s23 = sor.u32 %s37_s21, %s36_s22 }
   0xd   : > { %p39_p5 = scmp.eq.s32.totalorder %s38_s23, 0 }
   0xf   : > { %s1399_s25 = scalar_select %p39_p5, %s1305_s13, %s41_s24  }
  0x10   : > { %161 = sbr.rel (!%p50_p3) target bundleno = 38 (0x26), region = 20  ;;  %s163_s26 = sand.u32 (%p50_p3), 1, %s1305_s13  }
  0x11   : > { %s1170_s27 = sshll.u32 (%p50_p3), %s1321_s17, 5  ;;  %s1055_s28 = sshll.u32 (%p50_p3), %s163_s26, 6 }
  0x12   : > { %s168_s29 = sadd.s32 (%p50_p3), %s1317_s16, %s1170_s27  ;;  %s165_s7 = scalar_lea.vmem (%p50_p3), [#allocation3], %s1055_s28 }
  0x13   : > { %s1058_s30 = sshll.u32 (%p50_p3), %s168_s29, 2 }
  0x14   : > { %s1408_s6 = scalar_lea.vmem (%p50_p3), %s1575_s0, %s1058_s30 }
  0x15   : > { %v187_v0 = vld [vmem:[%s1408_s6] sm:$0xf]  ;;  %v189_v1 = vld [vmem:[%s1408_s6 + $0x8] sm:$0xf]  ;;  %v191_v2 = vld [vmem:[%s1408_s6 + $0x10] sm:$0xf] }
  0x16   : > { %188 = vst [vmem:[%s165_s7] sm:$0xf] %v187_v0  ;;  %v193_v3 = vld [vmem:[%s1408_s6 + $0x18] sm:$0xf]  ;;  %v195_v4 = vld [vmem:[%s1408_s6 + $0x20] sm:$0xf] }
  0x17   : > { %190 = vst [vmem:[%s165_s7 + $0x4] sm:$0xf] %v189_v1  ;;  %v197_v5 = vld [vmem:[%s1408_s6 + $0x28] sm:$0xf]  ;;  %v199_v6 = vld [vmem:[%s1408_s6 + $0x30] sm:$0xf] }
  0x18   : > { %192 = vst [vmem:[%s165_s7 + $0x8] sm:$0xf] %v191_v2  ;;  %v201_v7 = vld [vmem:[%s1408_s6 + $0x38] sm:$0xf]  ;;  %v203_v8 = vld [vmem:[%s1408_s6 + $0x40] sm:$0xf] }
  0x19   : > { %194 = vst [vmem:[%s165_s7 + $0xc] sm:$0xf] %v193_v3  ;;  %v205_v9 = vld [vmem:[%s1408_s6 + $0x48] sm:$0xf]  ;;  %v207_v10 = vld [vmem:[%s1408_s6 + $0x50] sm:$0xf] }
  0x1a   : > { %196 = vst [vmem:[%s165_s7 + $0x10] sm:$0xf] %v195_v4  ;;  %v209_v11 = vld [vmem:[%s1408_s6 + $0x58] sm:$0xf]  ;;  %v211_v12 = vld [vmem:[%s1408_s6 + $0x60] sm:$0xf] }
  0x1b   : > { %198 = vst [vmem:[%s165_s7 + $0x14] sm:$0xf] %v197_v5  ;;  %v213_v13 = vld [vmem:[%s1408_s6 + $0x68] sm:$0xf]  ;;  %v215_v14 = vld [vmem:[%s1408_s6 + $0x70] sm:$0xf] }
  0x1c   : > { %200 = vst [vmem:[%s165_s7 + $0x18] sm:$0xf] %v199_v6  ;;  %v217_v15 = vld [vmem:[%s1408_s6 + $0x78] sm:$0xf] }
  0x1d   : > { %202 = vst [vmem:[%s165_s7 + $0x1c] sm:$0xf] %v201_v7 }
  0x1e   : > { %204 = vst [vmem:[%s165_s7 + $0x20] sm:$0xf] %v203_v8 }
  0x1f   : > { %206 = vst [vmem:[%s165_s7 + $0x24] sm:$0xf] %v205_v9 }
  0x20   : > { %208 = vst [vmem:[%s165_s7 + $0x28] sm:$0xf] %v207_v10 }
  0x21   : > { %210 = vst [vmem:[%s165_s7 + $0x2c] sm:$0xf] %v209_v11 }
  0x22   : > { %212 = vst [vmem:[%s165_s7 + $0x30] sm:$0xf] %v211_v12 }
  0x23   : > { %214 = vst [vmem:[%s165_s7 + $0x34] sm:$0xf] %v213_v13 }
  0x24   : > { %216 = vst [vmem:[%s165_s7 + $0x38] sm:$0xf] %v215_v14 }
  0x25   : > { %218 = vst [vmem:[%s165_s7 + $0x3c] sm:$0xf] %v217_v15 }
  0x26 PF: > { %p1059_p7 = scmp.ge.s32.totalorder %s1325_s18, 1  ;;  %p303_p8 = scmp.lt.s32.totalorder %s1325_s18, 5 }
  0x28   : > { %p304_p9 = pnand %p1059_p7, %p303_p8 }
  0x29   : > { %s310_s8 = sand.u32 (!%p304_p9), 1, %s1301_s12   ;;  %s1061_s9 = sshll.u32 (!%p304_p9), %s1309_s14, 4 }
  0x2a   : > { %307 = sbr.rel (%p304_p9) target bundleno = 349 (0x15d), region = 69  ;;  %s1060_s10 = sshll.u32 (!%p304_p9), %s310_s8, 6 }
  0x2b   : > { %p361_p10 = scmp.lt.s32.totalorder (!%p304_p9), %s1061_s9, 31  ;;  %s1064_s11 = sshll.u32 (!%p304_p9), %s1313_s15, 4 }
  0x2c   : > { %p373_p11 = scmp.lt.s32.totalorder (!%p304_p9), %s1064_s11, 31  ;;  %s1446_s15 = scalar_lea.vmem (!%p304_p9), [#allocation3], %s1060_s10 }
  0x2d   : > { %p1070_p12 = scmp.ne.s32.totalorder (!%p304_p9), %s1309_s14, 0 }
  0x2f   : > { %s1592_s9 = smov (!%p361_p10, %s1061_s9), 31  ;;  %s1594_s11 = smov (!%p373_p11, %s1064_s11), 31 }
  0x30   : > { %s1171_s21 = sshll.u32 %s1592_s9, 3  ;;  %s1172_s26 = sshll.u32 %s1594_s11, 4 }
  0x31   : > { %s1434_s24 = scalar_lea.vmem %s1576_s1, %s1171_s21  ;;  %s1439_s29 = scalar_lea.vmem %s1577_s2, %s1172_s26 }
  0x32   : > { %s1444_s4 = scalar_lea.vmem %s1578_s3, %s1172_s26  ;;  %398 = sbr.rel (%p1070_p12) target bundleno = 88 (0x58), region = 77 }
  0x37   : > { %v1327_v16 = vmov 0.0  }
  0x38   : > { %399 = vst [vmem:[#allocation2 + $0xb0] sm:$0xff] %v1327_v16 }
  0x39   : > { %400 = vst [vmem:[#allocation2] sm:$0xff] %v1327_v16 }
  0x3a   : > { %401 = vst [vmem:[#allocation2 + $0xd8] sm:$0xff] %v1327_v16 }
  0x3b   : > { %402 = vst [vmem:[#allocation2 + $0x18] sm:$0xff] %v1327_v16 }
  0x3c   : > { %403 = vst [vmem:[#allocation2 + $0x50] sm:$0xff] %v1327_v16 }
  0x3d   : > { %404 = vst [vmem:[#allocation2 + $0x68] sm:$0xff] %v1327_v16 }
  0x3e   : > { %405 = vst [vmem:[#allocation2 + $0x30] sm:$0xff] %v1327_v16 }
  0x3f   : > { %406 = vst [vmem:[#allocation2 + $0x48] sm:$0xff] %v1327_v16 }
  0x40   : > { %407 = vst [vmem:[#allocation2 + $0x80] sm:$0xff] %v1327_v16 }
  0x41   : > { %408 = vst [vmem:[#allocation2 + $0x88] sm:$0xff] %v1327_v16 }
  0x42   : > { %409 = vst [vmem:[#allocation2 + $0xe8] sm:$0xff] %v1327_v16 }
  0x43   : > { %410 = vst [vmem:[#allocation2 + $0xb8] sm:$0xff] %v1327_v16 }
  0x44   : > { %411 = vst [vmem:[#allocation2 + $0x60] sm:$0xff] %v1327_v16 }
  0x45   : > { %412 = vst [vmem:[#allocation2 + $0xf0] sm:$0xff] %v1327_v16 }
  0x46   : > { %413 = vst [vmem:[#allocation2 + $0x8] sm:$0xff] %v1327_v16 }
  0x47   : > { %414 = vst [vmem:[#allocation2 + $0x78] sm:$0xff] %v1327_v16 }
  0x48   : > { %415 = vst [vmem:[#allocation2 + $0x38] sm:$0xff] %v1327_v16 }
  0x49   : > { %416 = vst [vmem:[#allocation2 + $0x58] sm:$0xff] %v1327_v16 }
  0x4a   : > { %417 = vst [vmem:[#allocation2 + $0x40] sm:$0xff] %v1327_v16 }
  0x4b   : > { %418 = vst [vmem:[#allocation2 + $0xc8] sm:$0xff] %v1327_v16 }
  0x4c   : > { %419 = vst [vmem:[#allocation2 + $0xe0] sm:$0xff] %v1327_v16 }
  0x4d   : > { %420 = vst [vmem:[#allocation2 + $0x90] sm:$0xff] %v1327_v16 }
  0x4e   : > { %421 = vst [vmem:[#allocation2 + $0x70] sm:$0xff] %v1327_v16 }
  0x4f   : > { %422 = vst [vmem:[#allocation2 + $0xc0] sm:$0xff] %v1327_v16 }
  0x50   : > { %423 = vst [vmem:[#allocation2 + $0xa8] sm:$0xff] %v1327_v16 }
  0x51   : > { %424 = vst [vmem:[#allocation2 + $0xd0] sm:$0xff] %v1327_v16 }
  0x52   : > { %425 = vst [vmem:[#allocation2 + $0x10] sm:$0xff] %v1327_v16 }
  0x53   : > { %426 = vst [vmem:[#allocation2 + $0x28] sm:$0xff] %v1327_v16 }
  0x54   : > { %427 = vst [vmem:[#allocation2 + $0xa0] sm:$0xff] %v1327_v16 }
  0x55   : > { %428 = vst [vmem:[#allocation2 + $0xf8] sm:$0xff] %v1327_v16 }
  0x56   : > { %429 = vst [vmem:[#allocation2 + $0x20] sm:$0xff] %v1327_v16 }
  0x57   : > { %430 = vst [vmem:[#allocation2 + $0x98] sm:$0xff] %v1327_v16 }
  0x58 PF: > { %v1161_v17 = vld [vmem:[%s1434_s24 + $0x70] sm:$0xf]  ;;  %v1197_v18 = vld [vmem:[%s1434_s24 + $0x74] sm:$0xf0]  ;;  %v1196_v19 = vld [vmem:[%s1434_s24 + $0x74] sm:$0xf] }
  0x59   : > { %v1162_v20 = vor.u32 %v1197_v18, %v1161_v17  ;;  %v1163_v21 = vld [vmem:[%s1434_s24 + $0x78] sm:$0xf0]  ;;  %v1153_v22 = vld [vmem:[%s1434_s24 + $0x60] sm:$0xf]  ;;  %v1195_v23 = vld [vmem:[%s1434_s24 + $0x64] sm:$0xf0] }
  0x5a   : > { %v1166_v24 = vor.u32 %v1196_v19, %v1163_v21  ;;  %v1194_v25 = vld [vmem:[%s1434_s24 + $0x64] sm:$0xf]  ;;  %v1155_v26 = vld [vmem:[%s1434_s24 + $0x68] sm:$0xf0]  ;;  %v1154_v27 = vor.u32 %v1195_v23, %v1153_v22  ;;  %v1145_v29 = vld [vmem:[%s1434_s24 + $0x50] sm:$0xf] }
  0x5b   : > { %623 = vmatpush.bf16.msra.mxu0 %v1162_v20  ;;  %1198 = vmatpush.bf16.msra.mxu2 %v1162_v20  ;;  %v1158_v28 = vor.u32 %v1194_v25, %v1155_v26  ;;  %v1193_v30 = vld [vmem:[%s1434_s24 + $0x54] sm:$0xf0]  ;;  %v1192_v31 = vld [vmem:[%s1434_s24 + $0x54] sm:$0xf]  ;;  %v1147_v32 = vld [vmem:[%s1434_s24 + $0x58] sm:$0xf0] }
  0x5c   : > { %672 = vmatpush.bf16.msra.mxu1 %v1166_v24  ;;  %1206 = vmatpush.bf16.msra.mxu3 %v1166_v24  ;;  %v1146_v33 = vor.u32 %v1193_v30, %v1145_v29  ;;  %v1150_v34 = vor.u32 %v1192_v31, %v1147_v32  ;;  %v1137_v35 = vld [vmem:[%s1434_s24 + $0x40] sm:$0xf]  ;;  %v1191_v36 = vld [vmem:[%s1434_s24 + $0x44] sm:$0xf0]  ;;  %v1190_v37 = vld [vmem:[%s1434_s24 + $0x44] sm:$0xf] }
  0x5d   : > { %v1139_v38 = vld [vmem:[%s1434_s24 + $0x48] sm:$0xf0]  ;;  %v1138_v39 = vor.u32 %v1191_v36, %v1137_v35  ;;  %v1129_v41 = vld [vmem:[%s1434_s24 + $0x30] sm:$0xf]  ;;  %v1189_v42 = vld [vmem:[%s1434_s24 + $0x34] sm:$0xf0] }
  0x5e   : > { %v1142_v40 = vor.u32 %v1190_v37, %v1139_v38  ;;  %v1188_v43 = vld [vmem:[%s1434_s24 + $0x34] sm:$0xf]  ;;  %v1131_v44 = vld [vmem:[%s1434_s24 + $0x38] sm:$0xf0]  ;;  %v1130_v45 = vor.u32 %v1189_v42, %v1129_v41  ;;  %v1121_v47 = vld [vmem:[%s1434_s24 + $0x20] sm:$0xf] }
  0x5f   : > { %624 = vmatpush.bf16.msra.mxu0 %v1154_v27  ;;  %1199 = vmatpush.bf16.msra.mxu2 %v1154_v27  ;;  %v1134_v46 = vor.u32 %v1188_v43, %v1131_v44  ;;  %v1187_v48 = vld [vmem:[%s1434_s24 + $0x24] sm:$0xf0]  ;;  %v1186_v49 = vld [vmem:[%s1434_s24 + $0x24] sm:$0xf]  ;;  %v1123_v50 = vld [vmem:[%s1434_s24 + $0x28] sm:$0xf0] }
  0x60   : > { %673 = vmatpush.bf16.msra.mxu1 %v1158_v28  ;;  %1207 = vmatpush.bf16.msra.mxu3 %v1158_v28  ;;  %v1122_v51 = vor.u32 %v1187_v48, %v1121_v47  ;;  %v1126_v52 = vor.u32 %v1186_v49, %v1123_v50  ;;  %v1113_v53 = vld [vmem:[%s1434_s24 + $0x10] sm:$0xf]  ;;  %v1185_v54 = vld [vmem:[%s1434_s24 + $0x14] sm:$0xf0]  ;;  %v1184_v55 = vld [vmem:[%s1434_s24 + $0x14] sm:$0xf] }
  0x61   : > { %v1115_v56 = vld [vmem:[%s1434_s24 + $0x18] sm:$0xf0]  ;;  %v1114_v57 = vor.u32 %v1185_v54, %v1113_v53  ;;  %v1105_v59 = vld [vmem:[%s1434_s24] sm:$0xf]  ;;  %v1183_v60 = vld [vmem:[%s1434_s24 + $0x4] sm:$0xf0] }
  0x62   : > { %v1118_v58 = vor.u32 %v1184_v55, %v1115_v56  ;;  %v1182_v61 = vld [vmem:[%s1434_s24 + $0x4] sm:$0xf]  ;;  %v1107_v62 = vld [vmem:[%s1434_s24 + $0x8] sm:$0xf0]  ;;  %v1106_v63 = vor.u32 %v1183_v60, %v1105_v59  ;;  %v1176_v5 = vld [vmem:[%s1446_s15 + $0x10] sm:$0xff]  ;;  %p1167_p13 = scmp.ne.s32.totalorder %s1309_s14, 1 }
  0x63   : > { %625 = vmatpush.bf16.msra.mxu0 %v1146_v33  ;;  %1200 = vmatpush.bf16.msra.mxu2 %v1146_v33  ;;  %v1110_v0 = vor.u32 %v1182_v61, %v1107_v62  ;;  %v1174_v1 = vld [vmem:[%s1446_s15] sm:$0xff]  ;;  %v1175_v3 = vld [vmem:[%s1446_s15 + $0x8] sm:$0xff]  ;;  %v1180_v6 = vld [vmem:[%s1446_s15 + $0x30] sm:$0xff] }
  0x64   : > { %674 = vmatpush.bf16.msra.mxu1 %v1150_v34  ;;  %1208 = vmatpush.bf16.msra.mxu3 %v1150_v34  ;;  %v1178_v2 = vld [vmem:[%s1446_s15 + $0x20] sm:$0xff]  ;;  %v1179_v4 = vld [vmem:[%s1446_s15 + $0x28] sm:$0xff]  ;;  %v1177_v7 = vld [vmem:[%s1446_s15 + $0x18] sm:$0xff] }
  0x65   : > { %v1181_v8 = vld [vmem:[%s1446_s15 + $0x38] sm:$0xff]  ;;  %v431_v9 = vld [vmem:[#allocation2 + $0xb0] sm:$0xff]  ;;  %v432_v10 = vld [vmem:[#allocation2] sm:$0xff] }
  0x66   : > { %v447_v15 = vld [vmem:[#allocation2 + $0x38] sm:$0xff]  ;;  %v449_v27 = vld [vmem:[#allocation2 + $0x40] sm:$0xff]  ;;  %v450_v28 = vld [vmem:[#allocation2 + $0xc8] sm:$0xff] }
  0x67   : > { %626 = vmatpush.bf16.msra.mxu0 %v1138_v39  ;;  %1201 = vmatpush.bf16.msra.mxu2 %v1138_v39  ;;  %v448_v16 = vld [vmem:[#allocation2 + $0x58] sm:$0xff]  ;;  %v435_v30 = vld [vmem:[#allocation2 + $0x50] sm:$0xff]  ;;  %v436_v33 = vld [vmem:[#allocation2 + $0x68] sm:$0xff] }
  0x68   : > { %675 = vmatpush.bf16.msra.mxu1 %v1142_v40  ;;  %1209 = vmatpush.bf16.msra.mxu3 %v1142_v40  ;;  %v433_v18 = vld [vmem:[#allocation2 + $0xd8] sm:$0xff]  ;;  %v451_v39 = vld [vmem:[#allocation2 + $0xe0] sm:$0xff]  ;;  %v452_v40 = vld [vmem:[#allocation2 + $0x90] sm:$0xff] }
  0x69   : > { %v434_v21 = vld [vmem:[#allocation2 + $0x18] sm:$0xff]  ;;  %v437_v42 = vld [vmem:[#allocation2 + $0x30] sm:$0xff]  ;;  %v439_v54 = vld [vmem:[#allocation2 + $0x80] sm:$0xff] }
  0x6b   : > { %627 = vmatpush.bf16.msra.mxu0 %v1130_v45  ;;  %1202 = vmatpush.bf16.msra.mxu2 %v1130_v45  ;;  %v438_v45 = vld [vmem:[#allocation2 + $0x48] sm:$0xff] }
  0x6c   : > { %676 = vmatpush.bf16.msra.mxu1 %v1134_v46  ;;  %1210 = vmatpush.bf16.msra.mxu3 %v1134_v46 }
  0x6f   : > { %628 = vmatpush.bf16.msra.mxu0 %v1122_v51  ;;  %1203 = vmatpush.bf16.msra.mxu2 %v1122_v51  ;;  %v453_v51 = vld [vmem:[#allocation2 + $0x70] sm:$0xff] }
  0x70   : > { %677 = vmatpush.bf16.msra.mxu1 %v1126_v52  ;;  %1211 = vmatpush.bf16.msra.mxu3 %v1126_v52  ;;  %v454_v52 = vld [vmem:[#allocation2 + $0xc0] sm:$0xff] }
  0x73   : > { %629 = vmatpush.bf16.msra.mxu0 %v1114_v57  ;;  %1204 = vmatpush.bf16.msra.mxu2 %v1114_v57  ;;  %v440_v57 = vld [vmem:[#allocation2 + $0x88] sm:$0xff] }
  0x74   : > { %678 = vmatpush.bf16.msra.mxu1 %v1118_v58  ;;  %1212 = vmatpush.bf16.msra.mxu3 %v1118_v58 }
  0x77   : > { %630 = vmatpush.bf16.msra.mxu0 %v1106_v63  ;;  %1205 = vmatpush.bf16.msra.mxu2 %v1106_v63  ;;  %v455_v63 = vld [vmem:[#allocation2 + $0xa8] sm:$0xff] }
  0x78   : > { %679 = vmatpush.bf16.msra.mxu1 %v1110_v0  ;;  %1213 = vmatpush.bf16.msra.mxu3 %v1110_v0  ;;  %v456_v0 = vld [vmem:[#allocation2 + $0xd0] sm:$0xff] }
  0x7a   : > { %631 = vmatmul.bf16.vlgmr.msra.gmra.mxu0 %v1174_v1  ;;  %651 = vmatmul.bf16.vlgmr.msra.gmra.mxu2 %v1178_v2 }
  0x7b   : > { %680 = vmatmul.bf16.vlgmr.msra.gmra.mxu1 %v1174_v1  ;;  %700 = vmatmul.bf16.vlgmr.msra.gmra.mxu3 %v1178_v2  ;;  %v441_v2 = vld [vmem:[#allocation2 + $0xe8] sm:$0xff] }
  0x8a   : > { %636 = vmatmul.bf16.gmra.mxu0 %v1175_v3  ;;  %656 = vmatmul.bf16.gmra.mxu2 %v1179_v4 }
  0x8b   : > { %685 = vmatmul.bf16.gmra.mxu1 %v1175_v3  ;;  %705 = vmatmul.bf16.gmra.mxu3 %v1179_v4 }
  0x9a   : > { %641 = vmatmul.bf16.gmra.mxu0 %v1176_v5  ;;  %661 = vmatmul.bf16.gmra.mxu2 %v1180_v6 }
  0x9b   : > { %690 = vmatmul.bf16.gmra.mxu1 %v1176_v5  ;;  %710 = vmatmul.bf16.gmra.mxu3 %v1180_v6  ;;  %v442_v5 = vld [vmem:[#allocation2 + $0xb8] sm:$0xff] }
  0xaa   : > { %646 = vmatmul.bf16.gmra.mxu0 %v1177_v7  ;;  %666 = vmatmul.bf16.gmra.mxu2 %v1181_v8 }
  0xab   : > { %695 = vmatmul.bf16.gmra.mxu1 %v1177_v7  ;;  %715 = vmatmul.bf16.gmra.mxu3 %v1181_v8 }
  0xf7   : > { %v632_v11 = vpop.f32.mrf.mxu0 }
  0xf8   : > { %v721_v12 = vadd.f32 %v632_v11, %v431_v9  ;;  %v681_v13 = vpop.f32.mrf.mxu1  ;;  %v457_v11 = vld [vmem:[#allocation2 + $0x10] sm:$0xff] }
  0xf9   : > { %v722_v14 = vadd.f32 %v681_v13, %v432_v10 }
  0xfa   : > { %753 = vst [vmem:[#allocation2 + $0xb0] sm:$0xff] %v721_v12  ;;  %v458_v12 = vld [vmem:[#allocation2 + $0x28] sm:$0xff] }
  0xfb   : > { %754 = vst [vmem:[#allocation2] sm:$0xff] %v722_v14  ;;  %v443_v14 = vld [vmem:[#allocation2 + $0x60] sm:$0xff] }
  0xfd   : > { %v652_v17 = vpop.f32.mrf.mxu2 }
  0xfe   : > { %v737_v19 = vadd.f32 %v652_v17, %v447_v15  ;;  %v701_v20 = vpop.f32.mrf.mxu3  ;;  %v444_v17 = vld [vmem:[#allocation2 + $0xf0] sm:$0xff] }
  0xff   : > { %v738_v22 = vadd.f32 %v701_v20, %v448_v16  ;;  %v634_v23 = vpop.f32.mrf.mxu0 }
 0x100   : > { %769 = vst [vmem:[#allocation2 + $0x38] sm:$0xff] %v737_v19  ;;  %v723_v24 = vadd.f32 %v634_v23, %v433_v18  ;;  %v683_v25 = vpop.f32.mrf.mxu1  ;;  %v459_v23 = vld [vmem:[#allocation2 + $0xa0] sm:$0xff] }
 0x101   : > { %770 = vst [vmem:[#allocation2 + $0x58] sm:$0xff] %v738_v22  ;;  %v724_v26 = vadd.f32 %v683_v25, %v434_v21 }
 0x102   : > { %755 = vst [vmem:[#allocation2 + $0xd8] sm:$0xff] %v723_v24  ;;  %v460_v24 = vld [vmem:[#allocation2 + $0xf8] sm:$0xff] }
 0x103   : > { %756 = vst [vmem:[#allocation2 + $0x18] sm:$0xff] %v724_v26  ;;  %v445_v26 = vld [vmem:[#allocation2 + $0x8] sm:$0xff] }
 0x105   : > { %v654_v29 = vpop.f32.mrf.mxu2 }
 0x106   : > { %v739_v31 = vadd.f32 %v654_v29, %v449_v27  ;;  %v703_v32 = vpop.f32.mrf.mxu3  ;;  %v446_v29 = vld [vmem:[#allocation2 + $0x78] sm:$0xff] }
 0x107   : > { %v740_v34 = vadd.f32 %v703_v32, %v450_v28  ;;  %v637_v35 = vpop.f32.mrf.mxu0 }
 0x108   : > { %771 = vst [vmem:[#allocation2 + $0x40] sm:$0xff] %v739_v31  ;;  %v725_v36 = vadd.f32 %v637_v35, %v435_v30  ;;  %v686_v37 = vpop.f32.mrf.mxu1  ;;  %v461_v35 = vld [vmem:[#allocation2 + $0x20] sm:$0xff] }
 0x109   : > { %772 = vst [vmem:[#allocation2 + $0xc8] sm:$0xff] %v740_v34  ;;  %v726_v38 = vadd.f32 %v686_v37, %v436_v33 }
 0x10a   : > { %757 = vst [vmem:[#allocation2 + $0x50] sm:$0xff] %v725_v36  ;;  %v462_v36 = vld [vmem:[#allocation2 + $0x98] sm:$0xff] }
 0x10b   : > { %758 = vst [vmem:[#allocation2 + $0x68] sm:$0xff] %v726_v38 }
 0x10d   : > { %v657_v41 = vpop.f32.mrf.mxu2 }
 0x10e   : > { %v741_v43 = vadd.f32 %v657_v41, %v451_v39  ;;  %v706_v44 = vpop.f32.mrf.mxu3 }
 0x10f   : > { %v742_v46 = vadd.f32 %v706_v44, %v452_v40  ;;  %v639_v47 = vpop.f32.mrf.mxu0 }
 0x110   : > { %773 = vst [vmem:[#allocation2 + $0xe0] sm:$0xff] %v741_v43  ;;  %v727_v48 = vadd.f32 %v639_v47, %v437_v42  ;;  %v688_v49 = vpop.f32.mrf.mxu1 }
 0x111   : > { %774 = vst [vmem:[#allocation2 + $0x90] sm:$0xff] %v742_v46  ;;  %v728_v50 = vadd.f32 %v688_v49, %v438_v45 }
 0x112   : > { %759 = vst [vmem:[#allocation2 + $0x30] sm:$0xff] %v727_v48 }
 0x113   : > { %760 = vst [vmem:[#allocation2 + $0x48] sm:$0xff] %v728_v50 }
 0x115   : > { %v659_v53 = vpop.f32.mrf.mxu2 }
 0x116   : > { %v743_v55 = vadd.f32 %v659_v53, %v453_v51  ;;  %v708_v56 = vpop.f32.mrf.mxu3 }
 0x117   : > { %v744_v58 = vadd.f32 %v708_v56, %v454_v52  ;;  %v642_v59 = vpop.f32.mrf.mxu0 }
 0x118   : > { %775 = vst [vmem:[#allocation2 + $0x70] sm:$0xff] %v743_v55  ;;  %v729_v60 = vadd.f32 %v642_v59, %v439_v54  ;;  %v691_v61 = vpop.f32.mrf.mxu1 }
 0x119   : > { %776 = vst [vmem:[#allocation2 + $0xc0] sm:$0xff] %v744_v58  ;;  %v730_v62 = vadd.f32 %v691_v61, %v440_v57 }
 0x11a   : > { %761 = vst [vmem:[#allocation2 + $0x80] sm:$0xff] %v729_v60 }
 0x11b   : > { %762 = vst [vmem:[#allocation2 + $0x88] sm:$0xff] %v730_v62 }
 0x11d   : > { %v662_v1 = vpop.f32.mrf.mxu2 }
 0x11e   : > { %v745_v3 = vadd.f32 %v662_v1, %v455_v63  ;;  %v711_v4 = vpop.f32.mrf.mxu3 }
 0x11f   : > { %v746_v6 = vadd.f32 %v711_v4, %v456_v0  ;;  %v644_v7 = vpop.f32.mrf.mxu0 }
 0x120   : > { %777 = vst [vmem:[#allocation2 + $0xa8] sm:$0xff] %v745_v3  ;;  %v731_v8 = vadd.f32 %v644_v7, %v441_v2  ;;  %v693_v9 = vpop.f32.mrf.mxu1 }
 0x121   : > { %778 = vst [vmem:[#allocation2 + $0xd0] sm:$0xff] %v746_v6  ;;  %v732_v10 = vadd.f32 %v693_v9, %v442_v5 }
 0x122   : > { %763 = vst [vmem:[#allocation2 + $0xe8] sm:$0xff] %v731_v8 }
 0x123   : > { %764 = vst [vmem:[#allocation2 + $0xb8] sm:$0xff] %v732_v10 }
 0x125   : > { %v664_v13 = vpop.f32.mrf.mxu2 }
 0x126   : > { %v747_v15 = vadd.f32 %v664_v13, %v457_v11  ;;  %v713_v16 = vpop.f32.mrf.mxu3 }
 0x127   : > { %v748_v18 = vadd.f32 %v713_v16, %v458_v12  ;;  %v647_v19 = vpop.f32.mrf.mxu0 }
 0x128   : > { %779 = vst [vmem:[#allocation2 + $0x10] sm:$0xff] %v747_v15  ;;  %v733_v20 = vadd.f32 %v647_v19, %v443_v14  ;;  %v696_v21 = vpop.f32.mrf.mxu1 }
 0x129   : > { %780 = vst [vmem:[#allocation2 + $0x28] sm:$0xff] %v748_v18  ;;  %v734_v22 = vadd.f32 %v696_v21, %v444_v17 }
 0x12a   : > { %765 = vst [vmem:[#allocation2 + $0x60] sm:$0xff] %v733_v20 }
 0x12b   : > { %766 = vst [vmem:[#allocation2 + $0xf0] sm:$0xff] %v734_v22 }
 0x12d   : > { %v667_v25 = vpop.f32.mrf.mxu2 }
 0x12e   : > { %v749_v27 = vadd.f32 %v667_v25, %v459_v23  ;;  %v716_v28 = vpop.f32.mrf.mxu3 }
 0x12f   : > { %v750_v30 = vadd.f32 %v716_v28, %v460_v24  ;;  %v649_v31 = vpop.f32.mrf.mxu0 }
 0x130   : > { %781 = vst [vmem:[#allocation2 + $0xa0] sm:$0xff] %v749_v27  ;;  %v735_v32 = vadd.f32 %v649_v31, %v445_v26  ;;  %v698_v33 = vpop.f32.mrf.mxu1 }
 0x131   : > { %782 = vst [vmem:[#allocation2 + $0xf8] sm:$0xff] %v750_v30  ;;  %v736_v34 = vadd.f32 %v698_v33, %v446_v29 }
 0x132   : > { %767 = vst [vmem:[#allocation2 + $0x8] sm:$0xff] %v735_v32 }
 0x133   : > { %768 = vst [vmem:[#allocation2 + $0x78] sm:$0xff] %v736_v34 }
 0x135   : > { %v669_v37 = vpop.f32.mrf.mxu2  ;;  %788 = sbr.rel (%p1167_p13) target bundleno = 349 (0x15d), region = 81 }
 0x136   : > { %v751_v38 = vadd.f32 %v669_v37, %v461_v35  ;;  %v718_v39 = vpop.f32.mrf.mxu3 }
 0x137   : > { %v752_v40 = vadd.f32 %v718_v39, %v462_v36 }
 0x138   : > { %783 = vst [vmem:[#allocation2 + $0x20] sm:$0xff] %v751_v38 }
 0x139   : > { %784 = vst [vmem:[#allocation2 + $0x98] sm:$0xff] %v752_v40 }
 0x13a   : > { %v789_v41 = vld [vmem:[#allocation2 + $0xb0] sm:$0xff]  ;;  %v821_v42 = vld [vmem:[%s1439_s29] sm:$0xff]  ;;  %v822_v45 = vld [vmem:[%s1439_s29 + $0x8] sm:$0xff] }
 0x13b   : > { %v790_v43 = vld [vmem:[#allocation2] sm:$0xff]  ;;  %v853_v44 = vadd.f32 %v821_v42, %v789_v41  ;;  %v791_v46 = vld [vmem:[#allocation2 + $0xd8] sm:$0xff]  ;;  %v823_v47 = vld [vmem:[%s1439_s29 + $0x10] sm:$0xff] }
 0x13c   : > { %v854_v48 = vadd.f32 %v822_v45, %v790_v43  ;;  %v855_v49 = vadd.f32 %v823_v47, %v791_v46  ;;  %v792_v50 = vld [vmem:[#allocation2 + $0x18] sm:$0xff]  ;;  %v793_v52 = vld [vmem:[#allocation2 + $0x50] sm:$0xff]  ;;  %v825_v54 = vld [vmem:[%s1439_s29 + $0x20] sm:$0xff] }
 0x13d   : > { %v824_v51 = vld [vmem:[%s1439_s29 + $0x18] sm:$0xff]  ;;  %885 = vst [vmem:[%s1444_s4] sm:$0xff] %v853_v44  ;;  %v794_v55 = vld [vmem:[#allocation2 + $0x68] sm:$0xff]  ;;  %v857_v57 = vadd.f32 %v825_v54, %v793_v52  ;;  %v795_v59 = vld [vmem:[#allocation2 + $0x30] sm:$0xff] }
 0x13e   : > { %v856_v53 = vadd.f32 %v824_v51, %v792_v50  ;;  %v826_v56 = vld [vmem:[%s1439_s29 + $0x28] sm:$0xff]  ;;  %886 = vst [vmem:[%s1444_s4 + $0x8] sm:$0xff] %v854_v48  ;;  %v827_v60 = vld [vmem:[%s1439_s29 + $0x30] sm:$0xff]  ;;  %v828_v63 = vld [vmem:[%s1439_s29 + $0x38] sm:$0xff] }
 0x13f   : > { %v858_v58 = vadd.f32 %v826_v56, %v794_v55  ;;  %v796_v61 = vld [vmem:[#allocation2 + $0x48] sm:$0xff]  ;;  %887 = vst [vmem:[%s1444_s4 + $0x10] sm:$0xff] %v855_v49  ;;  %v859_v62 = vadd.f32 %v827_v60, %v795_v59  ;;  %v797_v0 = vld [vmem:[#allocation2 + $0x80] sm:$0xff]  ;;  %v831_v7 = vld [vmem:[%s1439_s29 + $0x50] sm:$0xff] }
 0x140   : > { %v829_v1 = vld [vmem:[%s1439_s29 + $0x40] sm:$0xff]  ;;  %888 = vst [vmem:[%s1444_s4 + $0x18] sm:$0xff] %v856_v53  ;;  %v860_v2 = vadd.f32 %v828_v63, %v796_v61  ;;  %v798_v3 = vld [vmem:[#allocation2 + $0x88] sm:$0xff]  ;;  %v800_v8 = vld [vmem:[#allocation2 + $0xb8] sm:$0xff] }
 0x141   : > { %v830_v4 = vld [vmem:[%s1439_s29 + $0x48] sm:$0xff]  ;;  %889 = vst [vmem:[%s1444_s4 + $0x20] sm:$0xff] %v857_v57  ;;  %v861_v6 = vadd.f32 %v829_v1, %v797_v0  ;;  %v832_v9 = vld [vmem:[%s1439_s29 + $0x58] sm:$0xff]  ;;  %v801_v11 = vld [vmem:[#allocation2 + $0x60] sm:$0xff] }
 0x142   : > { %v799_v5 = vld [vmem:[#allocation2 + $0xe8] sm:$0xff]  ;;  %890 = vst [vmem:[%s1444_s4 + $0x28] sm:$0xff] %v858_v58  ;;  %v862_v10 = vadd.f32 %v830_v4, %v798_v3  ;;  %v833_v12 = vld [vmem:[%s1439_s29 + $0x60] sm:$0xff]  ;;  %v802_v14 = vld [vmem:[#allocation2 + $0xf0] sm:$0xff]  ;;  %v864_v16 = vadd.f32 %v832_v9, %v800_v8 }
 0x143   : > { %891 = vst [vmem:[%s1444_s4 + $0x30] sm:$0xff] %v859_v62  ;;  %v863_v13 = vadd.f32 %v831_v7, %v799_v5  ;;  %v834_v15 = vld [vmem:[%s1439_s29 + $0x68] sm:$0xff]  ;;  %v835_v18 = vld [vmem:[%s1439_s29 + $0x70] sm:$0xff]  ;;  %v865_v19 = vadd.f32 %v833_v12, %v801_v11  ;;  %v804_v20 = vld [vmem:[#allocation2 + $0x78] sm:$0xff] }
 0x144   : > { %892 = vst [vmem:[%s1444_s4 + $0x38] sm:$0xff] %v860_v2  ;;  %v803_v17 = vld [vmem:[#allocation2 + $0x8] sm:$0xff]  ;;  %v836_v21 = vld [vmem:[%s1439_s29 + $0x78] sm:$0xff]  ;;  %v866_v22 = vadd.f32 %v834_v15, %v802_v14  ;;  %v837_v24 = vld [vmem:[%s1439_s29 + $0x80] sm:$0xff] }
 0x145   : > { %893 = vst [vmem:[%s1444_s4 + $0x40] sm:$0xff] %v861_v6  ;;  %v805_v23 = vld [vmem:[#allocation2 + $0x38] sm:$0xff]  ;;  %v867_v25 = vadd.f32 %v835_v18, %v803_v17  ;;  %v838_v27 = vld [vmem:[%s1439_s29 + $0x88] sm:$0xff]  ;;  %v868_v28 = vadd.f32 %v836_v21, %v804_v20  ;;  %v807_v29 = vld [vmem:[#allocation2 + $0x40] sm:$0xff] }
 0x146   : > { %894 = vst [vmem:[%s1444_s4 + $0x48] sm:$0xff] %v862_v10  ;;  %v806_v26 = vld [vmem:[#allocation2 + $0x58] sm:$0xff]  ;;  %v839_v30 = vld [vmem:[%s1439_s29 + $0x90] sm:$0xff]  ;;  %v869_v31 = vadd.f32 %v837_v24, %v805_v23  ;;  %v808_v32 = vld [vmem:[#allocation2 + $0xc8] sm:$0xff] }
 0x147   : > { %895 = vst [vmem:[%s1444_s4 + $0x50] sm:$0xff] %v863_v13  ;;  %v840_v33 = vld [vmem:[%s1439_s29 + $0x98] sm:$0xff]  ;;  %v870_v34 = vadd.f32 %v838_v27, %v806_v26  ;;  %v809_v35 = vld [vmem:[#allocation2 + $0xe0] sm:$0xff]  ;;  %v871_v37 = vadd.f32 %v839_v30, %v807_v29  ;;  %v810_v38 = vld [vmem:[#allocation2 + $0x90] sm:$0xff] }
 0x148   : > { %896 = vst [vmem:[%s1444_s4 + $0x58] sm:$0xff] %v864_v16  ;;  %v841_v36 = vld [vmem:[%s1439_s29 + $0xa0] sm:$0xff]  ;;  %v842_v39 = vld [vmem:[%s1439_s29 + $0xa8] sm:$0xff]  ;;  %v872_v40 = vadd.f32 %v840_v33, %v808_v32  ;;  %v811_v41 = vld [vmem:[#allocation2 + $0x70] sm:$0xff] }
 0x149   : > { %897 = vst [vmem:[%s1444_s4 + $0x60] sm:$0xff] %v865_v19  ;;  %v843_v42 = vld [vmem:[%s1439_s29 + $0xb0] sm:$0xff]  ;;  %v873_v43 = vadd.f32 %v841_v36, %v809_v35  ;;  %v812_v44 = vld [vmem:[#allocation2 + $0xc0] sm:$0xff]  ;;  %v844_v45 = vld [vmem:[%s1439_s29 + $0xb8] sm:$0xff]  ;;  %v874_v46 = vadd.f32 %v842_v39, %v810_v38 }
 0x14a   : > { %898 = vst [vmem:[%s1444_s4 + $0x68] sm:$0xff] %v866_v22  ;;  %v813_v47 = vld [vmem:[#allocation2 + $0xa8] sm:$0xff]  ;;  %v845_v48 = vld [vmem:[%s1439_s29 + $0xc0] sm:$0xff]  ;;  %v875_v49 = vadd.f32 %v843_v42, %v811_v41  ;;  %v814_v50 = vld [vmem:[#allocation2 + $0xd0] sm:$0xff]  ;;  %v876_v52 = vadd.f32 %v844_v45, %v812_v44 }
 0x14b   : > { %899 = vst [vmem:[%s1444_s4 + $0x70] sm:$0xff] %v867_v25  ;;  %v846_v51 = vld [vmem:[%s1439_s29 + $0xc8] sm:$0xff]  ;;  %v815_v53 = vld [vmem:[#allocation2 + $0x10] sm:$0xff]  ;;  %v877_v55 = vadd.f32 %v845_v48, %v813_v47  ;;  %v848_v57 = vld [vmem:[%s1439_s29 + $0xd8] sm:$0xff] }
 0x14c   : > { %900 = vst [vmem:[%s1444_s4 + $0x78] sm:$0xff] %v868_v28  ;;  %v847_v54 = vld [vmem:[%s1439_s29 + $0xd0] sm:$0xff]  ;;  %v816_v56 = vld [vmem:[#allocation2 + $0x28] sm:$0xff]  ;;  %v878_v58 = vadd.f32 %v846_v51, %v814_v50  ;;  %v817_v59 = vld [vmem:[#allocation2 + $0xa0] sm:$0xff] }
 0x14d   : > { %901 = vst [vmem:[%s1444_s4 + $0x80] sm:$0xff] %v869_v31  ;;  %v849_v60 = vld [vmem:[%s1439_s29 + $0xe0] sm:$0xff]  ;;  %v879_v61 = vadd.f32 %v847_v54, %v815_v53  ;;  %v818_v62 = vld [vmem:[#allocation2 + $0xf8] sm:$0xff]  ;;  %v850_v63 = vld [vmem:[%s1439_s29 + $0xe8] sm:$0xff]  ;;  %v880_v0 = vadd.f32 %v848_v57, %v816_v56 }
 0x14e   : > { %902 = vst [vmem:[%s1444_s4 + $0x88] sm:$0xff] %v870_v34  ;;  %v819_v1 = vld [vmem:[#allocation2 + $0x20] sm:$0xff]  ;;  %v851_v2 = vld [vmem:[%s1439_s29 + $0xf0] sm:$0xff]  ;;  %v881_v3 = vadd.f32 %v849_v60, %v817_v59  ;;  %v820_v4 = vld [vmem:[#allocation2 + $0x98] sm:$0xff]  ;;  %v882_v6 = vadd.f32 %v850_v63, %v818_v62 }
 0x14f   : > { %903 = vst [vmem:[%s1444_s4 + $0x90] sm:$0xff] %v871_v37  ;;  %v852_v5 = vld [vmem:[%s1439_s29 + $0xf8] sm:$0xff]  ;;  %v883_v7 = vadd.f32 %v851_v2, %v819_v1 }
 0x150   : > { %904 = vst [vmem:[%s1444_s4 + $0x98] sm:$0xff] %v872_v40  ;;  %v884_v8 = vadd.f32 %v852_v5, %v820_v4 }
 0x151   : > { %905 = vst [vmem:[%s1444_s4 + $0xa0] sm:$0xff] %v873_v43 }
 0x152   : > { %906 = vst [vmem:[%s1444_s4 + $0xa8] sm:$0xff] %v874_v46 }
 0x153   : > { %907 = vst [vmem:[%s1444_s4 + $0xb0] sm:$0xff] %v875_v49 }
 0x154   : > { %908 = vst [vmem:[%s1444_s4 + $0xb8] sm:$0xff] %v876_v52 }
 0x155   : > { %909 = vst [vmem:[%s1444_s4 + $0xc0] sm:$0xff] %v877_v55 }
 0x156   : > { %910 = vst [vmem:[%s1444_s4 + $0xc8] sm:$0xff] %v878_v58 }
 0x157   : > { %911 = vst [vmem:[%s1444_s4 + $0xd0] sm:$0xff] %v879_v61 }
 0x158   : > { %912 = vst [vmem:[%s1444_s4 + $0xd8] sm:$0xff] %v880_v0 }
 0x159   : > { %913 = vst [vmem:[%s1444_s4 + $0xe0] sm:$0xff] %v881_v3 }
 0x15a   : > { %914 = vst [vmem:[%s1444_s4 + $0xe8] sm:$0xff] %v882_v6 }
 0x15b   : > { %915 = vst [vmem:[%s1444_s4 + $0xf0] sm:$0xff] %v883_v7 }
 0x15c   : > { %916 = vst [vmem:[%s1444_s4 + $0xf8] sm:$0xff] %v884_v8 }
 0x15d PF: > { %s13_s18 = sadd.s32 1, %s1325_s18   ;;  %s1579_s12 = smov %s1305_s13 }
 0x15e   : > { %p10_p0 = scmp.ge.s32.totalorder %s13_s18, 6   ;;  %s1580_s13 = smov %s1399_s25 }
 0x15f   : > { %s1581_s14 = smov %s1317_s16  ;;  %s1582_s15 = smov %s1321_s17 }
 0x160   : > { %s1583_s16 = smov %s1586_s19  ;;  %s1584_s17 = smov %s1590_s20 }
 0x161   :  { %12 = sbr.rel (!%p10_p0) target bundleno = 4 (0x4), region = 122 }

// kernel: decoder_layer.11
= control target key start
LH: loop header
LB: loop body
LE: loop exit
PB: predicated region body
PF: predicated region fallthrough
CT: control target
= control target key end

     0   :  { %s705_s9 = smov 0   ;;  %s1144_s0 = inlined_call_operand.vmem [shape: f32[256,256], index: 0, kind: input, shape index: {}]   ;;  %s1145_s1 = inlined_call_operand.vmem [shape: f32[1,256], index: 1, kind: input, shape index: {}]   ;;  %s1146_s2 = inlined_call_operand.vmem [shape: bf16[256,256], index: 2, kind: output, shape index: {}]  }
   0x1 LB: > { %s623_s10 = sadd.s32 4294967295, %s687_s9   ;;  %p627_p0 = scmp.ge.s32.totalorder %s687_s9, 1  ;;  %s687_s9 = sphi %s705_s9, %s12_s9  }
   0x2   : > { %p114_p1 = scmp.lt.s32.totalorder %s687_s9, 3 }
   0x4   : > { %p115_p2 = pnand %p627_p0, %p114_p1 }
   0x5   : > { %s628_s11 = sshll.u32 (!%p115_p2), %s623_s10, 4 }
   0x6   : > { %118 = sbr.rel (%p115_p2) target bundleno = 222 (0xde), region = 28  ;;  %p139_p3 = scmp.lt.s32.totalorder (!%p115_p2), %s628_s11, 31 }
   0xb   : > { %s1148_s11 = smov (!%p139_p3, %s628_s11), 31 }
   0xc   : > { %s636_s12 = sshll.u32 %s1148_s11, 4  ;;  %s637_s18 = sshll.u32 %s1148_s11, 3 }
   0xd   : > { %s719_s15 = scalar_lea.vmem %s1144_s0, %s636_s12  ;;  %s947_s21 = scalar_lea.vmem %s1146_s2, %s637_s18 }
   0xe   : > { %v722_v0 = vld [vmem:[%s719_s15 + $0x40] sm:$0xff]  ;;  %v725_v1 = vld [vmem:[%s719_s15 + $0x48] sm:$0xff]  ;;  %v752_v12 = vld [vmem:[%s719_s15 + $0x50] sm:$0xff] }
   0xf   : > { %v728_v2 = vld [vmem:[%s719_s15 + $0x20] sm:$0xff]  ;;  %v192_v3 = vmul.f32 %v722_v0, %v722_v0  ;;  %v193_v4 = vmul.f32 %v725_v1, %v725_v1  ;;  %v735_v5 = vld [vmem:[%s719_s15 + $0x28] sm:$0xff]  ;;  %v755_v13 = vld [vmem:[%s719_s15 + $0x58] sm:$0xff]  ;;  %v194_v21 = vmul.f32 %v752_v12, %v752_v12 }
  0x10   : > { %v188_v6 = vmul.f32 %v728_v2, %v728_v2  ;;  %v740_v7 = vld [vmem:[%s719_s15] sm:$0xff]  ;;  %v743_v8 = vld [vmem:[%s719_s15 + $0x8] sm:$0xff]  ;;  %v189_v9 = vmul.f32 %v735_v5, %v735_v5  ;;  %v758_v14 = vld [vmem:[%s719_s15 + $0x30] sm:$0xff]  ;;  %v195_v22 = vmul.f32 %v755_v13, %v755_v13 }
  0x11   : > { %v184_v10 = vmul.f32 %v740_v7, %v740_v7  ;;  %v185_v11 = vmul.f32 %v743_v8, %v743_v8  ;;  %v228_v15 = vadd.f32 %v193_v4, %v192_v3  ;;  %v761_v16 = vld [vmem:[%s719_s15 + $0x38] sm:$0xff]  ;;  %v764_v17 = vld [vmem:[%s719_s15 + $0x10] sm:$0xff]  ;;  %v190_v23 = vmul.f32 %v758_v14, %v758_v14  ;;  %v782_v30 = vld [vmem:[%s719_s15 + $0x80] sm:$0xff] }
  0x12   : > { %v767_v18 = vld [vmem:[%s719_s15 + $0x18] sm:$0xff]  ;;  %v222_v19 = vadd.f32 %v189_v9, %v188_v6  ;;  %v191_v24 = vmul.f32 %v761_v16, %v761_v16  ;;  %v186_v25 = vmul.f32 %v764_v17, %v764_v17  ;;  %v231_v27 = vadd.f32 %v195_v22, %v194_v21  ;;  %v785_v31 = vld [vmem:[%s719_s15 + $0x88] sm:$0xff]  ;;  %v788_v32 = vld [vmem:[%s719_s15 + $0x70] sm:$0xff] }
  0x13   : > { %v216_v20 = vadd.f32 %v185_v11, %v184_v10  ;;  %229 = vadd.xlane.f32.xlu2 %v228_v15  ;;  %v187_v26 = vmul.f32 %v767_v18, %v767_v18  ;;  %v791_v33 = vld [vmem:[%s719_s15 + $0x78] sm:$0xff]  ;;  %v794_v34 = vld [vmem:[%s719_s15 + $0x60] sm:$0xff]  ;;  %v797_v35 = vld [vmem:[%s719_s15 + $0x68] sm:$0xff]  ;;  %v200_v36 = vmul.f32 %v782_v30, %v782_v30  ;;  %v201_v37 = vmul.f32 %v785_v31, %v785_v31 }
  0x14   : > { %223 = vadd.xlane.f32.xlu1 %v222_v19  ;;  %v225_v28 = vadd.f32 %v191_v24, %v190_v23  ;;  %v198_v38 = vmul.f32 %v788_v32, %v788_v32  ;;  %v199_v39 = vmul.f32 %v791_v33, %v791_v33  ;;  %v196_v40 = vmul.f32 %v794_v34, %v794_v34  ;;  %v812_v45 = vld [vmem:[%s719_s15 + $0xb0] sm:$0xff]  ;;  %v815_v46 = vld [vmem:[%s719_s15 + $0xb8] sm:$0xff]  ;;  %v818_v47 = vld [vmem:[%s719_s15 + $0xa0] sm:$0xff] }
  0x15   : > { %217 = vadd.xlane.f32.xlu0 %v216_v20  ;;  %v219_v29 = vadd.f32 %v187_v26, %v186_v25  ;;  %v197_v41 = vmul.f32 %v797_v35, %v797_v35  ;;  %v240_v42 = vadd.f32 %v201_v37, %v200_v36  ;;  %v821_v48 = vld [vmem:[%s719_s15 + $0xa8] sm:$0xff]  ;;  %v824_v49 = vld [vmem:[%s719_s15 + $0x90] sm:$0xff]  ;;  %v827_v50 = vld [vmem:[%s719_s15 + $0x98] sm:$0xff]  ;;  %v206_v51 = vmul.f32 %v812_v45, %v812_v45 }
  0x16   : > { %v237_v43 = vadd.f32 %v199_v39, %v198_v38  ;;  %v207_v52 = vmul.f32 %v815_v46, %v815_v46  ;;  %v204_v53 = vmul.f32 %v818_v47, %v818_v47  ;;  %v205_v54 = vmul.f32 %v821_v48, %v821_v48  ;;  %v842_v60 = vld [vmem:[%s719_s15 + $0xe0] sm:$0xff]  ;;  %v845_v61 = vld [vmem:[%s719_s15 + $0xe8] sm:$0xff]  ;;  %v848_v62 = vld [vmem:[%s719_s15 + $0xd0] sm:$0xff] }
  0x17   : > { %v234_v44 = vadd.f32 %v197_v41, %v196_v40  ;;  %v202_v55 = vmul.f32 %v824_v49, %v824_v49  ;;  %v203_v56 = vmul.f32 %v827_v50, %v827_v50  ;;  %v851_v63 = vld [vmem:[%s719_s15 + $0xd8] sm:$0xff]  ;;  %v854_v3 = vld [vmem:[%s719_s15 + $0xc0] sm:$0xff]  ;;  %v857_v4 = vld [vmem:[%s719_s15 + $0xc8] sm:$0xff]  ;;  %v212_v6 = vmul.f32 %v842_v60, %v842_v60 }
  0x18   : > { %v249_v57 = vadd.f32 %v207_v52, %v206_v51  ;;  %v246_v58 = vadd.f32 %v205_v54, %v204_v53  ;;  %v213_v9 = vmul.f32 %v845_v61, %v845_v61  ;;  %v210_v10 = vmul.f32 %v848_v62, %v848_v62  ;;  %v872_v23 = vld [vmem:[%s719_s15 + $0xf0] sm:$0xff]  ;;  %v875_v24 = vld [vmem:[%s719_s15 + $0xf8] sm:$0xff] }
  0x19   : > { %v243_v59 = vadd.f32 %v203_v56, %v202_v55  ;;  %v211_v11 = vmul.f32 %v851_v63, %v851_v63  ;;  %v208_v15 = vmul.f32 %v854_v3, %v854_v3  ;;  %v209_v19 = vmul.f32 %v857_v4, %v857_v4 }
  0x1a   : > { %v258_v20 = vadd.f32 %v213_v9, %v212_v6  ;;  %v214_v25 = vmul.f32 %v872_v23, %v872_v23  ;;  %v215_v26 = vmul.f32 %v875_v24, %v875_v24 }
  0x1b   : > { %232 = vadd.xlane.f32.xlu2 %v231_v27  ;;  %v255_v21 = vadd.f32 %v211_v11, %v210_v10  ;;  %v252_v22 = vadd.f32 %v209_v19, %v208_v15  ;;  %v495_v19 = vld [vmem:[%s1145_s1] sm:$0x3] }
  0x1c   : > { %226 = vadd.xlane.f32.xlu1 %v225_v28  ;;  %v261_v27 = vadd.f32 %v215_v26, %v214_v25  ;;  %v689_v28 = vmov 256.0  }
  0x1d   : > { %220 = vadd.xlane.f32.xlu0 %v219_v29  ;;  %647 = vrcp.f32 %v689_v28 }
  0x23   : > { %241 = vadd.xlane.f32.xlu2 %v240_v42  ;;  %v648_v29 = vpop.eup %647 }
  0x24   : > { %238 = vadd.xlane.f32.xlu1 %v237_v43  ;;  %v265_v36 = vmul.f32 256.0, %v648_v29  ;;  %vm269_vm0 = vweird.f32 %v648_v29 }
  0x25   : > { %235 = vadd.xlane.f32.xlu0 %v234_v44 }
  0x26   : > { %v266_v37 = vsub.f32 1.0, %v265_v36  ;;  %v906_v36 = vperm.slane %v495_v19, 1 }
  0x28   : > { %v267_v38 = vmul.f32 %v648_v29, %v266_v37 }
  0x2a   : > { %v268_v39 = vadd.f32 %v648_v29, %v267_v38 }
  0x2b   : > { %250 = vadd.xlane.f32.xlu2 %v249_v57 }
  0x2c   : > { %247 = vadd.xlane.f32.xlu1 %v246_v58  ;;  %v881_v40 = vsel %vm269_vm0, %v648_v29, %v268_v39  ;;  %v904_v29 = vperm.slane %v495_v19, 0 }
  0x2d   : > { %244 = vadd.xlane.f32.xlu0 %v243_v59 }
  0x33   : > { %259 = vadd.xlane.f32.xlu2 %v258_v20 }
  0x34   : > { %256 = vadd.xlane.f32.xlu1 %v255_v21 }
  0x35   : > { %253 = vadd.xlane.f32.xlu0 %v252_v22 }
  0x3d   : > { %262 = vadd.xlane.f32.xlu0 %v261_v27 }
  0x86   : > { %v230_v41 = vpop.xlane.xlu2 %229 }
  0x87   : > { %v275_v42 = vmul.f32 %v881_v40, %v230_v41  ;;  %v224_v43 = vpop.xlane.xlu1 %223 }
  0x88   : > { %v218_v44 = vpop.xlane.xlu0 %217  ;;  %v273_v51 = vmul.f32 %v881_v40, %v224_v43 }
  0x89   : > { %v271_v52 = vmul.f32 %v881_v40, %v218_v44  ;;  %v291_v53 = vadd.f32 1e-06, %v275_v42 }
  0x8a   : > { %v289_v54 = vadd.f32 1e-06, %v273_v51 }
  0x8b   : > { %v886_v55 = vadd.f32 1e-06, %v271_v52  ;;  %649 = vrsqrt.f32 %v291_v53  ;;  %vm349_vm1 = vweird.f32 %v291_v53 }
  0x8c   : > { %651 = vrsqrt.f32 %v289_v54  ;;  %vm329_vm2 = vweird.f32 %v289_v54 }
  0x8d   : > { %653 = vrsqrt.f32 %v886_v55  ;;  %vm309_vm4 = vweird.f32 %v886_v55 }
  0x8e   : > { %v233_v56 = vpop.xlane.xlu2 %232 }
  0x8f   : > { %v276_v57 = vmul.f32 %v881_v40, %v233_v56  ;;  %v227_v58 = vpop.xlane.xlu1 %226 }
  0x90   : > { %v221_v59 = vpop.xlane.xlu0 %220  ;;  %v274_v6 = vmul.f32 %v881_v40, %v227_v58 }
  0x91   : > { %v272_v9 = vmul.f32 %v881_v40, %v221_v59  ;;  %v650_v10 = vpop.eup %649  ;;  %v892_v11 = vadd.f32 1e-06, %v276_v57 }
  0x92   : > { %v652_v15 = vpop.eup %651  ;;  %v344_v20 = vmul.f32 %v650_v10, %v291_v53  ;;  %v897_v21 = vadd.f32 1e-06, %v274_v6  ;;  %vm350_vm3 = vweird.f32 %v650_v10 }
  0x93   : > { %v899_v22 = vadd.f32 1e-06, %v272_v9  ;;  %v654_v25 = vpop.eup %653  ;;  %v324_v26 = vmul.f32 %v652_v15, %v289_v54  ;;  %655 = vrsqrt.f32 %v892_v11  ;;  %vm330_vm5 = vweird.f32 %v652_v15  ;;  %vm351_vm9 = vmor %vm349_vm1, %vm350_vm3 }
  0x94   : > { %v345_v27 = vmul.f32 %v650_v10, %v344_v20  ;;  %v304_v28 = vmul.f32 %v654_v25, %v886_v55  ;;  %657 = vrsqrt.f32 %v897_v21  ;;  %vm359_vm6 = vweird.f32 %v892_v11  ;;  %vm331_vm11 = vmor %vm329_vm2, %vm330_vm5 }
  0x95   : > { %v325_v37 = vmul.f32 %v652_v15, %v324_v26  ;;  %659 = vrsqrt.f32 %v899_v22  ;;  %vm310_vm7 = vweird.f32 %v654_v25  ;;  %vm339_vm8 = vweird.f32 %v897_v21 }
  0x96   : > { %v346_v38 = vmul.f32 0.5, %v345_v27  ;;  %v305_v39 = vmul.f32 %v654_v25, %v304_v28  ;;  %v242_v41 = vpop.xlane.xlu2 %241  ;;  %vm311_vm12 = vmor %vm309_vm4, %vm310_vm7  ;;  %vm319_vm15 = vweird.f32 %v899_v22 }
  0x97   : > { %v326_v42 = vmul.f32 0.5, %v325_v37  ;;  %v279_v43 = vmul.f32 %v881_v40, %v242_v41  ;;  %v239_v44 = vpop.xlane.xlu1 %238 }
  0x98   : > { %v236_v51 = vpop.xlane.xlu0 %235  ;;  %v347_v52 = vsub.f32 1.5, %v346_v38  ;;  %v306_v56 = vmul.f32 0.5, %v305_v39  ;;  %v278_v6 = vmul.f32 %v881_v40, %v239_v44 }
  0x99   : > { %v656_v57 = vpop.eup %655  ;;  %v327_v58 = vsub.f32 1.5, %v326_v42  ;;  %v912_v59 = vadd.f32 1e-06, %v279_v43  ;;  %v277_v27 = vmul.f32 %v881_v40, %v236_v51 }
  0x9a   : > { %v915_v9 = vpop.eup %657  ;;  %v348_v19 = vmul.f32 %v650_v10, %v347_v52  ;;  %v307_v20 = vsub.f32 1.5, %v306_v56  ;;  %v354_v26 = vmul.f32 %v656_v57, %v892_v11  ;;  %vm360_vm10 = vweird.f32 %v656_v57 }
  0x9b   : > { %v920_v28 = vpop.eup %659  ;;  %v328_v37 = vmul.f32 %v652_v15, %v327_v58  ;;  %v334_v38 = vmul.f32 %v915_v9, %v897_v21  ;;  %661 = vrsqrt.f32 %v912_v59  ;;  %vm340_vm13 = vweird.f32 %v915_v9  ;;  %vm361_vm14 = vmor %vm359_vm6, %vm360_vm10 }
  0x9c   : > { %v352_v39 = vsel %vm351_vm9, %v650_v10, %v348_v19  ;;  %v308_v41 = vmul.f32 %v654_v25, %v307_v20  ;;  %v355_v42 = vmul.f32 %v656_v57, %v354_v26  ;;  %v314_v43 = vmul.f32 %v920_v28, %v899_v22  ;;  %vm341_vm1 = vmor %vm339_vm8, %vm340_vm13 }
  0x9d   : > { %v471_v53 = vmul.f32 %v352_v39, %v722_v0  ;;  %v472_v44 = vmul.f32 %v352_v39, %v725_v1  ;;  %v332_v51 = vsel %vm331_vm11, %v652_v15, %v328_v37  ;;  %v335_v10 = vmul.f32 %v915_v9, %v334_v38 }
  0x9e   : > { %v467_v54 = vmul.f32 %v332_v51, %v728_v2  ;;  %v468_v52 = vmul.f32 %v332_v51, %v735_v5  ;;  %v312_v56 = vsel %vm311_vm12, %v654_v25, %v308_v41  ;;  %v356_v58 = vmul.f32 0.5, %v355_v42  ;;  %v251_v39 = vpop.xlane.xlu2 %250 }
  0x9f   : > { %v509_v19 = vmul.f32 %v904_v29, %v471_v53  ;;  %v510_v20 = vmul.f32 %v906_v36, %v472_v44  ;;  %v463_v0 = vmul.f32 %v312_v56, %v740_v7  ;;  %v464_v1 = vmul.f32 %v312_v56, %v743_v8 }
  0xa0   : > { %v245_v15 = vpop.xlane.xlu0 %244  ;;  %v505_v2 = vmul.f32 %v904_v29, %v467_v54  ;;  %v506_v5 = vmul.f32 %v906_v36, %v468_v52  ;;  %v357_v55 = vsub.f32 1.5, %v356_v58  ;;  %v336_v25 = vmul.f32 0.5, %v335_v10 }
  0xa1   : > { %v951_v26 = vpop.eup %661  ;;  %v537_v37 = vpack.c.bf16 %v510_v20, %v509_v19  ;;  %v501_v7 = vmul.f32 %v904_v29, %v463_v0  ;;  %v502_v8 = vmul.f32 %v906_v36, %v464_v1  ;;  %v315_v38 = vmul.f32 %v920_v28, %v314_v43 }
  0xa2   : > { %v535_v41 = vpack.c.bf16 %v506_v5, %v505_v2  ;;  %v358_v42 = vmul.f32 %v656_v57, %v357_v55  ;;  %v337_v53 = vsub.f32 1.5, %v336_v25  ;;  %v384_v10 = vmul.f32 %v951_v26, %v912_v59 }
  0xa3   : > { %553 = vst [vmem:[%s947_s21 + $0x20] sm:$0xff] %v537_v37  ;;  %v533_v44 = vpack.c.bf16 %v502_v8, %v501_v7  ;;  %v316_v51 = vmul.f32 0.5, %v315_v38  ;;  %vm320_vm0 = vweird.f32 %v920_v28  ;;  %v967_v52 = vadd.f32 1e-06, %v278_v6 }
  0xa4   : > { %551 = vst [vmem:[%s947_s21 + $0x10] sm:$0xff] %v535_v41  ;;  %v362_v43 = vsel %vm361_vm14, %v656_v57, %v358_v42  ;;  %v338_v54 = vmul.f32 %v915_v9, %v337_v53  ;;  %v385_v19 = vmul.f32 %v951_v26, %v384_v10  ;;  %v248_v57 = vpop.xlane.xlu1 %247  ;;  %vm389_vm2 = vweird.f32 %v912_v59  ;;  %vm321_vm4 = vmor %vm319_vm15, %vm320_vm0 }
  0xa5   : > { %549 = vst [vmem:[%s947_s21] sm:$0xff] %v533_v44  ;;  %v473_v56 = vmul.f32 %v362_v43, %v752_v12  ;;  %v474_v11 = vmul.f32 %v362_v43, %v755_v13  ;;  %v317_v58 = vsub.f32 1.5, %v316_v51  ;;  %663 = vrsqrt.f32 %v967_v52 }
  0xa6   : > { %v342_v20 = vsel %vm341_vm1, %v915_v9, %v338_v54  ;;  %v980_v6 = vadd.f32 1e-06, %v277_v27  ;;  %v386_v2 = vmul.f32 0.5, %v385_v19  ;;  %vm390_vm3 = vweird.f32 %v951_v26  ;;  %v260_v22 = vpop.xlane.xlu2 %259 }
  0xa7   : > { %v511_v12 = vmul.f32 %v904_v29, %v473_v56  ;;  %v512_v13 = vmul.f32 %v906_v36, %v474_v11  ;;  %v469_v0 = vmul.f32 %v342_v20, %v758_v14  ;;  %v470_v21 = vmul.f32 %v342_v20, %v761_v16  ;;  %vm391_vm5 = vmor %vm389_vm2, %vm390_vm3 }
  0xa8   : > { %v318_v1 = vmul.f32 %v920_v28, %v317_v58  ;;  %665 = vrsqrt.f32 %v980_v6  ;;  %v254_v9 = vpop.xlane.xlu0 %253  ;;  %v282_v14 = vmul.f32 %v881_v40, %v251_v39  ;;  %v387_v25 = vsub.f32 1.5, %v386_v2 }
  0xa9   : > { %v538_v5 = vpack.c.bf16 %v512_v13, %v511_v12  ;;  %v507_v27 = vmul.f32 %v904_v29, %v469_v0  ;;  %v508_v55 = vmul.f32 %v906_v36, %v470_v21  ;;  %v281_v37 = vmul.f32 %v881_v40, %v248_v57 }
  0xaa   : > { %v322_v16 = vsel %vm321_vm4, %v920_v28, %v318_v1  ;;  %v280_v7 = vmul.f32 %v881_v40, %v245_v15  ;;  %v1002_v42 = vadd.f32 1e-06, %v282_v14  ;;  %v388_v44 = vmul.f32 %v951_v26, %v387_v25 }
  0xab   : > { %554 = vst [vmem:[%s947_s21 + $0x28] sm:$0xff] %v538_v5  ;;  %v536_v8 = vpack.c.bf16 %v508_v55, %v507_v27  ;;  %v465_v38 = vmul.f32 %v322_v16, %v764_v17  ;;  %v466_v41 = vmul.f32 %v322_v16, %v767_v18  ;;  %v664_v53 = vpop.eup %663  ;;  %v1005_v39 = vadd.f32 1e-06, %v281_v37 }
  0xac   : > { %v374_v17 = vmul.f32 %v664_v53, %v967_v52  ;;  %v1015_v18 = vadd.f32 1e-06, %v280_v7  ;;  %v392_v10 = vsel %vm391_vm5, %v951_v26, %v388_v44  ;;  %667 = vrsqrt.f32 %v1002_v42  ;;  %v257_v59 = vpop.xlane.xlu1 %256 }
  0xad   : > { %552 = vst [vmem:[%s947_s21 + $0x18] sm:$0xff] %v536_v8  ;;  %v503_v28 = vmul.f32 %v904_v29, %v465_v38  ;;  %v504_v51 = vmul.f32 %v906_v36, %v466_v41  ;;  %v285_v43 = vmul.f32 %v881_v40, %v260_v22  ;;  %v479_v56 = vmul.f32 %v392_v10, %v782_v30 }
  0xae   : > { %v666_v15 = vpop.eup %665  ;;  %v480_v11 = vmul.f32 %v392_v10, %v785_v31  ;;  %v375_v58 = vmul.f32 %v664_v53, %v374_v17  ;;  %vm379_vm6 = vweird.f32 %v967_v52  ;;  %669 = vrsqrt.f32 %v1005_v39 }
  0xaf   : > { %v534_v54 = vpack.c.bf16 %v504_v51, %v503_v28  ;;  %v364_v19 = vmul.f32 %v666_v15, %v980_v6  ;;  %v517_v26 = vmul.f32 %v904_v29, %v479_v56  ;;  %671 = vrsqrt.f32 %v1015_v18 }
  0xb0   : > { %v518_v57 = vmul.f32 %v906_v36, %v480_v11  ;;  %v376_v20 = vmul.f32 0.5, %v375_v58  ;;  %v1029_v12 = vadd.f32 1e-06, %v285_v43  ;;  %v284_v31 = vmul.f32 %v881_v40, %v257_v59  ;;  %v263_v0 = vpop.xlane.xlu0 %262 }
  0xb1   : > { %550 = vst [vmem:[%s947_s21 + $0x8] sm:$0xff] %v534_v54  ;;  %v365_v30 = vmul.f32 %v666_v15, %v364_v19  ;;  %v283_v13 = vmul.f32 %v881_v40, %v254_v9  ;;  %vm380_vm7 = vweird.f32 %v664_v53  ;;  %vm369_vm8 = vweird.f32 %v980_v6 }
  0xb2   : > { %v541_v21 = vpack.c.bf16 %v518_v57, %v517_v26  ;;  %v377_v1 = vsub.f32 1.5, %v376_v20  ;;  %v668_v2 = vpop.eup %667  ;;  %vm419_vm9 = vweird.f32 %v1002_v42  ;;  %673 = vrsqrt.f32 %v1029_v12  ;;  %vm381_vm10 = vmor %vm379_vm6, %vm380_vm7 }
  0xb3   : > { %v366_v5 = vmul.f32 0.5, %v365_v30  ;;  %v1036_v27 = vadd.f32 1e-06, %v284_v31  ;;  %v414_v14 = vmul.f32 %v668_v2, %v1002_v42  ;;  %v1040_v16 = vadd.f32 1e-06, %v283_v13 }
  0xb4   : > { %557 = vst [vmem:[%s947_s21 + $0x40] sm:$0xff] %v541_v21  ;;  %v378_v55 = vmul.f32 %v664_v53, %v377_v1  ;;  %v286_v9 = vmul.f32 %v881_v40, %v263_v0  ;;  %v670_v25 = vpop.eup %669  ;;  %vm370_vm11 = vweird.f32 %v666_v15  ;;  %vm409_vm12 = vweird.f32 %v1005_v39 }
  0xb5   : > { %v367_v37 = vsub.f32 1.5, %v366_v5  ;;  %675 = vrsqrt.f32 %v1036_v27  ;;  %v672_v7 = vpop.eup %671  ;;  %v415_v38 = vmul.f32 %v668_v2, %v414_v14  ;;  %vm420_vm13 = vweird.f32 %v668_v2  ;;  %vm371_vm14 = vmor %vm369_vm8, %vm370_vm11 }
  0xb6   : > { %v382_v8 = vsel %vm381_vm10, %v664_v53, %v378_v55  ;;  %v404_v41 = vmul.f32 %v670_v25, %v1005_v39  ;;  %v394_v52 = vmul.f32 %v672_v7, %v1015_v18  ;;  %vm399_vm15 = vweird.f32 %v1015_v18  ;;  %vm421_vm3 = vmor %vm419_vm9, %vm420_vm13 }
  0xb7   : > { %v477_v22 = vmul.f32 %v382_v8, %v788_v32  ;;  %v478_v40 = vmul.f32 %v382_v8, %v791_v33  ;;  %v368_v44 = vmul.f32 %v666_v15, %v367_v37  ;;  %v416_v28 = vmul.f32 0.5, %v415_v38 }
  0xb8   : > { %v405_v51 = vmul.f32 %v670_v25, %v404_v41  ;;  %677 = vrsqrt.f32 %v1040_v16  ;;  %v1055_v53 = vadd.f32 1e-06, %v286_v9  ;;  %v1057_v17 = vpop.eup %673  ;;  %v395_v43 = vmul.f32 %v672_v7, %v394_v52 }
  0xb9   : > { %v515_v32 = vmul.f32 %v904_v29, %v477_v22  ;;  %v516_v33 = vmul.f32 %v906_v36, %v478_v40  ;;  %v372_v10 = vsel %vm371_vm14, %v666_v15, %v368_v44  ;;  %v417_v56 = vsub.f32 1.5, %v416_v28 }
  0xba   : > { %v475_v6 = vmul.f32 %v372_v10, %v794_v34  ;;  %v476_v54 = vmul.f32 %v372_v10, %v797_v35  ;;  %v406_v11 = vmul.f32 0.5, %v405_v51  ;;  %vm449_vm0 = vweird.f32 %v1029_v12 }
  0xbb   : > { %v1064_v58 = vpop.eup %675  ;;  %v540_v59 = vpack.c.bf16 %v516_v33, %v515_v32  ;;  %vm410_vm1 = vweird.f32 %v670_v25  ;;  %v396_v19 = vmul.f32 0.5, %v395_v43  ;;  %v444_v26 = vmul.f32 %v1057_v17, %v1029_v12 }
  0xbc   : > { %v513_v15 = vmul.f32 %v904_v29, %v475_v6  ;;  %v514_v57 = vmul.f32 %v906_v36, %v476_v54  ;;  %v418_v20 = vmul.f32 %v668_v2, %v417_v56  ;;  %v407_v34 = vsub.f32 1.5, %v406_v11  ;;  %vm411_vm6 = vmor %vm409_vm12, %vm410_vm1 }
  0xbd   : > { %vm439_vm2 = vweird.f32 %v1036_v27  ;;  %556 = vst [vmem:[%s947_s21 + $0x38] sm:$0xff] %v540_v59  ;;  %v397_v35 = vsub.f32 1.5, %v396_v19  ;;  %vm400_vm4 = vweird.f32 %v672_v7  ;;  %v445_v30 = vmul.f32 %v1057_v17, %v444_v26 }
  0xbe   : > { %v434_v31 = vmul.f32 %v1064_v58, %v1036_v27  ;;  %v678_v13 = vpop.eup %677  ;;  %v539_v0 = vpack.c.bf16 %v514_v57, %v513_v15  ;;  %v422_v21 = vsel %vm421_vm3, %v668_v2, %v418_v20  ;;  %v408_v1 = vmul.f32 %v670_v25, %v407_v34  ;;  %vm401_vm8 = vmor %vm399_vm15, %vm400_vm4 }
  0xbf   : > { %vm450_vm5 = vweird.f32 %v1057_v17  ;;  %v485_v5 = vmul.f32 %v422_v21, %v812_v45  ;;  %v486_v55 = vmul.f32 %v422_v21, %v815_v46  ;;  %v398_v42 = vmul.f32 %v672_v7, %v397_v35 }
  0xc0   : > { %v446_v14 = vmul.f32 0.5, %v445_v30  ;;  %555 = vst [vmem:[%s947_s21 + $0x30] sm:$0xff] %v539_v0  ;;  %v412_v9 = vsel %vm411_vm6, %v670_v25, %v408_v1  ;;  %v435_v37 = vmul.f32 %v1064_v58, %v434_v31  ;;  %vm440_vm7 = vweird.f32 %v1064_v58  ;;  %vm451_vm9 = vmor %vm449_vm0, %vm450_vm5 }
  0xc1   : > { %v424_v2 = vmul.f32 %v678_v13, %v1040_v16  ;;  %v523_v8 = vmul.f32 %v904_v29, %v485_v5  ;;  %v524_v45 = vmul.f32 %v906_v36, %v486_v55  ;;  %v483_v46 = vmul.f32 %v412_v9, %v818_v47  ;;  %vm441_vm11 = vmor %vm439_vm2, %vm440_vm7 }
  0xc2   : > { %v484_v39 = vmul.f32 %v412_v9, %v821_v48  ;;  %v402_v25 = vsel %vm401_vm8, %v672_v7, %v398_v42  ;;  %v447_v38 = vsub.f32 1.5, %v446_v14  ;;  %v436_v41 = vmul.f32 0.5, %v435_v37 }
  0xc3   : > { %v425_v22 = vmul.f32 %v678_v13, %v424_v2  ;;  %v544_v40 = vpack.c.bf16 %v524_v45, %v523_v8  ;;  %v521_v44 = vmul.f32 %v904_v29, %v483_v46  ;;  %v481_v28 = vmul.f32 %v402_v25, %v824_v49 }
  0xc4   : > { %v522_v52 = vmul.f32 %v906_v36, %v484_v39  ;;  %v482_v47 = vmul.f32 %v402_v25, %v827_v50  ;;  %v448_v48 = vmul.f32 %v1057_v17, %v447_v38  ;;  %v437_v51 = vsub.f32 1.5, %v436_v41 }
  0xc5   : > { %v426_v32 = vmul.f32 0.5, %v425_v22  ;;  %560 = vst [vmem:[%s947_s21 + $0x58] sm:$0xff] %v544_v40  ;;  %v519_v7 = vmul.f32 %v904_v29, %v481_v28  ;;  %vm430_vm10 = vweird.f32 %v678_v13  ;;  %679 = vrsqrt.f32 %v1055_v53 }
  0xc6   : > { %v543_v18 = vpack.c.bf16 %v522_v52, %v521_v44  ;;  %v520_v49 = vmul.f32 %v906_v36, %v482_v47  ;;  %v452_v50 = vsel %vm451_vm9, %v1057_v17, %v448_v48  ;;  %v438_v33 = vmul.f32 %v1064_v58, %v437_v51 }
  0xc7   : > { %v427_v10 = vsub.f32 1.5, %v426_v32  ;;  %v491_v43 = vmul.f32 %v452_v50, %v842_v60  ;;  %v492_v6 = vmul.f32 %v452_v50, %v845_v61  ;;  %vm429_vm12 = vweird.f32 %v1040_v16 }
  0xc8   : > { %559 = vst [vmem:[%s947_s21 + $0x50] sm:$0xff] %v543_v18  ;;  %v542_v12 = vpack.c.bf16 %v520_v49, %v519_v7  ;;  %v442_v54 = vsel %vm441_vm11, %v1064_v58, %v438_v33  ;;  %vm431_vm13 = vmor %vm429_vm12, %vm430_vm10  ;;  %vm459_vm15 = vweird.f32 %v1055_v53 }
  0xc9   : > { %v428_v56 = vmul.f32 %v678_v13, %v427_v10  ;;  %v529_v17 = vmul.f32 %v904_v29, %v491_v43  ;;  %v530_v11 = vmul.f32 %v906_v36, %v492_v6  ;;  %v489_v60 = vmul.f32 %v442_v54, %v848_v62 }
  0xca   : > { %v490_v61 = vmul.f32 %v442_v54, %v851_v63  ;;  %558 = vst [vmem:[%s947_s21 + $0x48] sm:$0xff] %v542_v12 }
  0xcb   : > { %v432_v27 = vsel %vm431_vm13, %v678_v13, %v428_v56  ;;  %v680_v59 = vpop.eup %679  ;;  %v547_v58 = vpack.c.bf16 %v530_v11, %v529_v17  ;;  %v527_v19 = vmul.f32 %v904_v29, %v489_v60 }
  0xcc   : > { %v528_v16 = vmul.f32 %v906_v36, %v490_v61  ;;  %v487_v26 = vmul.f32 %v432_v27, %v854_v3  ;;  %v488_v15 = vmul.f32 %v432_v27, %v857_v4  ;;  %v454_v62 = vmul.f32 %v680_v59, %v1055_v53 }
  0xcd   : > { %563 = vst [vmem:[%s947_s21 + $0x70] sm:$0xff] %v547_v58  ;;  %vm460_vm14 = vweird.f32 %v680_v59 }
  0xce   : > { %v546_v63 = vpack.c.bf16 %v528_v16, %v527_v19  ;;  %v525_v57 = vmul.f32 %v904_v29, %v487_v26  ;;  %v526_v20 = vmul.f32 %v906_v36, %v488_v15  ;;  %v455_v34 = vmul.f32 %v680_v59, %v454_v62  ;;  %vm461_vm0 = vmor %vm459_vm15, %vm460_vm14 }
  0xd0   : > { %562 = vst [vmem:[%s947_s21 + $0x68] sm:$0xff] %v546_v63  ;;  %v545_v35 = vpack.c.bf16 %v526_v20, %v525_v57  ;;  %v456_v30 = vmul.f32 0.5, %v455_v34 }
  0xd2   : > { %561 = vst [vmem:[%s947_s21 + $0x60] sm:$0xff] %v545_v35  ;;  %v457_v31 = vsub.f32 1.5, %v456_v30 }
  0xd4   : > { %v458_v13 = vmul.f32 %v680_v59, %v457_v31 }
  0xd6   : > { %v462_v3 = vsel %vm461_vm0, %v680_v59, %v458_v13 }
  0xd7   : > { %v493_v4 = vmul.f32 %v462_v3, %v872_v23  ;;  %v494_v0 = vmul.f32 %v462_v3, %v875_v24 }
  0xd9   : > { %v531_v21 = vmul.f32 %v904_v29, %v493_v4  ;;  %v532_v1 = vmul.f32 %v906_v36, %v494_v0 }
  0xdb   : > { %v548_v5 = vpack.c.bf16 %v532_v1, %v531_v21 }
  0xdd   : > { %564 = vst [vmem:[%s947_s21 + $0x78] sm:$0xff] %v548_v5 }
  0xde PF: > { %s12_s9 = sadd.s32 1, %s687_s9  }
  0xdf   : > { %p9_p4 = scmp.ge.s32.totalorder %s12_s9, 4  }
  0xe1   :  { %11 = sbr.rel (!%p9_p4) target bundleno = 1 (0x1), region = 58 }

// kernel: decoder_layer.12
= control target key start
LH: loop header
LB: loop body
LE: loop exit
PB: predicated region body
PF: predicated region fallthrough
CT: control target
= control target key end

     0   :  { %s4103_s0 = inlined_call_operand.vmem [shape: bf16[256,256], index: 0, kind: input, shape index: {}]   ;;  %s4104_s1 = inlined_call_operand.vmem [shape: bf16[256,512], index: 1, kind: input, shape index: {}]   ;;  %s4105_s2 = inlined_call_operand.vmem [shape: bf16[256,512], index: 2, kind: input, shape index: {}]   ;;  %s4106_s3 = inlined_call_operand.vmem [shape: bf16[256,512], index: 3, kind: output, shape index: {}]  }
   0x1   :  { %4109 = sst [smem:[#allocation11_spill]] %s4106_s3 }
   0x2   :  { %s2880_s12 = smov 0   ;;  %s2882_s13 = smov 0  }
   0x3   :  { %s2884_s14 = smov 0   ;;  %s2886_s15 = smov 0  }
   0x4   :  { %s2888_s16 = smov 0   ;;  %s2890_s17 = smov 0  }
   0x5   :  { %s2892_s18 = smov 0   ;;  %s2894_s19 = smov 0  }
   0x6   :  { %s2896_s20 = smov 0   ;;  %s2898_s21 = smov 0  }
   0x7   :  { %s2900_s22 = smov 0   ;;  %s2902_s23 = smov 0  }
   0x8   :  { %s2904_s24 = smov 0  }
   0x9 LB: > { %4110 = sst [smem:[#allocation8_spill]] %s2841_s20  ;;  %s25_s26 = sadd.s32 1, %s2845_s21  ;;  %s2857_s24 = sphi %s2904_s24, %s13_s24   ;;  %s2853_s23 = sphi %s2902_s23, %s4253_s23   ;;  %s2849_s22 = sphi %s2900_s22, %s4252_s22   ;;  %s2845_s21 = sphi %s2898_s21, %s4251_s21   ;;  %s2841_s20 = sphi %s2896_s20, %s4250_s20   ;;  %s2837_s19 = sphi %s2894_s19, %s4249_s19   ;;  %s2833_s18 = sphi %s2892_s18, %s4248_s18   ;;  %s2829_s17 = sphi %s2890_s17, %s4247_s17   ;;  %s2825_s16 = sphi %s2888_s16, %s4246_s16   ;;  %s2821_s15 = sphi %s2886_s15, %s4245_s15   ;;  %s2817_s14 = sphi %s2884_s14, %s4244_s14   ;;  %s2813_s13 = sphi %s2882_s13, %s4243_s13   ;;  %s2809_s12 = sphi %s2880_s12, %s4242_s12  }
   0xa   : > { %p26_p0 = scmp.ge.s32.totalorder %s25_s26, 2  ;;  %s28_s27 = sadd.s32 1, %s2849_s22 }
   0xb   : > { %s32_s28 = sadd.s32 1, %s2853_s23  ;;  %s41_s29 = sadd.s32 1, %s2829_s17 }
   0xc   : > { %s4255_s26 = smov (%p26_p0, %s25_s26), 0  ;;  %s4257_s27 = smov (!%p26_p0, %s28_s27), %s2849_s22 }
   0xd   : > { %4111 = sst [smem:[#allocation9_spill]] %s4255_s26  ;;  %s37_s30 = ssub.s32 %s2845_s21, %s4255_s26 }
   0xe   : > { %p48_p1 = scmp.ne.s32.totalorder %s2829_s17, %s2825_s16  ;;  %p30_p2 = scmp.ge.s32.totalorder %s4257_s27, 2 }
   0xf   : > { %p49_p3 = scmp.eq.s32.totalorder %s2857_s24, 0  ;;  %s69_s4 = sadd.s32 1, %s2821_s15 }
  0x10   : > { %p76_p4 = scmp.ne.s32.totalorder %s2821_s15, %s2817_s14  ;;  %s4259_s27 = smov (%p30_p2, %s4257_s27), 0 }
  0x11   : > { %4112 = sst [smem:[#allocation10_spill]] %s4259_s27  ;;  %s4261_s28 = smov (!%p30_p2, %s32_s28), %s2853_s23 }
  0x12   : > { %p2964_p5 = por %p49_p3, %p48_p1  ;;  %s65_s6 = ssub.s32 %s2849_s22, %s4259_s27 }
  0x13   : > { %p34_p6 = scmp.ge.s32.totalorder %s4261_s28, 2  ;;  %s66_s7 = sor.u32 %s65_s6, %s37_s30 }
  0x14   : > { %p67_p7 = scmp.eq.s32.totalorder %s66_s7, 0  ;;  %p2970_p8 = por %p76_p4, %p49_p3 }
  0x15   : > { %s4263_s28 = smov (%p34_p6, %s4261_s28), 0  ;;  %s125_s11 = sadd.s32 1, %s2813_s13 }
  0x16   : > { %s2977_s9 = scalar_select %p67_p7, %s2821_s15, %s69_s4  }
  0x17   : > { %s36_s10 = ssub.s32 %s2853_s23, %s4263_s28  ;;  %p135_p11 = scmp.ne.s32.totalorder %s2813_s13, %s2809_s12 }
  0x18   : > { %s38_s25 = sor.u32 %s37_s30, %s36_s10  ;;  %s122_s26 = sor.u32 %s65_s6, %s36_s10 }
  0x19   : > { %p39_p9 = scmp.eq.s32.totalorder %s38_s25, 0  ;;  %p123_p10 = scmp.eq.s32.totalorder %s122_s26, 0 }
  0x1a   : > { %s4115_s27 = sadd.s32 4294967295, %s2857_s24   ;;  %p2257_p0 = scmp.ge.s32.totalorder %s2857_s24, 8 }
  0x1b   : > { %p136_p12 = scmp.eq.s32.totalorder %s4115_s27, 7 }
  0x1c   : > { %s2987_s3 = scalar_select %p39_p9, %s2829_s17, %s41_s29  }
  0x1d   : > { %s2990_s7 = scalar_select %p123_p10, %s2813_s13, %s125_s11  }
  0x1e   : > { %p2992_p13 = por %p136_p12, %p135_p11  ;;  %158 = sbr.rel (%p2257_p0) target bundleno = 103 (0x67), region = 16 }
  0x23   : > { %161 = sbr.rel (!%p2964_p5) target bundleno = 57 (0x39), region = 20  ;;  %s163_s25 = sand.u32 (%p2964_p5), 1, %s2829_s17  }
  0x24   : > { %s2478_s26 = sshll.u32 (%p2964_p5), %s2853_s23, 5  ;;  %s2258_s27 = sshll.u32 (%p2964_p5), %s163_s25, 6 }
  0x25   : > { %s168_s29 = sadd.s32 (%p2964_p5), %s2845_s21, %s2478_s26  ;;  %s165_s5 = scalar_lea.vmem (%p2964_p5), [#allocation4], %s2258_s27 }
  0x26   : > { %s2261_s30 = sshll.u32 (%p2964_p5), %s168_s29, 2 }
  0x27   : > { %s3005_s10 = scalar_lea.vmem (%p2964_p5), %s4103_s0, %s2261_s30 }
  0x28   : > { %v187_v0 = vld [vmem:[%s3005_s10] sm:$0xf]  ;;  %v189_v1 = vld [vmem:[%s3005_s10 + $0x8] sm:$0xf]  ;;  %v191_v2 = vld [vmem:[%s3005_s10 + $0x10] sm:$0xf] }
  0x29   : > { %188 = vst [vmem:[%s165_s5] sm:$0xf] %v187_v0  ;;  %v193_v3 = vld [vmem:[%s3005_s10 + $0x18] sm:$0xf]  ;;  %v195_v4 = vld [vmem:[%s3005_s10 + $0x20] sm:$0xf] }
  0x2a   : > { %190 = vst [vmem:[%s165_s5 + $0x4] sm:$0xf] %v189_v1  ;;  %v197_v5 = vld [vmem:[%s3005_s10 + $0x28] sm:$0xf]  ;;  %v199_v6 = vld [vmem:[%s3005_s10 + $0x30] sm:$0xf] }
  0x2b   : > { %192 = vst [vmem:[%s165_s5 + $0x8] sm:$0xf] %v191_v2  ;;  %v201_v7 = vld [vmem:[%s3005_s10 + $0x38] sm:$0xf]  ;;  %v203_v8 = vld [vmem:[%s3005_s10 + $0x40] sm:$0xf] }
  0x2c   : > { %194 = vst [vmem:[%s165_s5 + $0xc] sm:$0xf] %v193_v3  ;;  %v205_v9 = vld [vmem:[%s3005_s10 + $0x48] sm:$0xf]  ;;  %v207_v10 = vld [vmem:[%s3005_s10 + $0x50] sm:$0xf] }
  0x2d   : > { %196 = vst [vmem:[%s165_s5 + $0x10] sm:$0xf] %v195_v4  ;;  %v209_v11 = vld [vmem:[%s3005_s10 + $0x58] sm:$0xf]  ;;  %v211_v12 = vld [vmem:[%s3005_s10 + $0x60] sm:$0xf] }
  0x2e   : > { %198 = vst [vmem:[%s165_s5 + $0x14] sm:$0xf] %v197_v5  ;;  %v213_v13 = vld [vmem:[%s3005_s10 + $0x68] sm:$0xf]  ;;  %v215_v14 = vld [vmem:[%s3005_s10 + $0x70] sm:$0xf] }
  0x2f   : > { %200 = vst [vmem:[%s165_s5 + $0x18] sm:$0xf] %v199_v6  ;;  %v217_v15 = vld [vmem:[%s3005_s10 + $0x78] sm:$0xf] }
  0x30   : > { %202 = vst [vmem:[%s165_s5 + $0x1c] sm:$0xf] %v201_v7 }
  0x31   : > { %204 = vst [vmem:[%s165_s5 + $0x20] sm:$0xf] %v203_v8 }
  0x32   : > { %206 = vst [vmem:[%s165_s5 + $0x24] sm:$0xf] %v205_v9 }
  0x33   : > { %208 = vst [vmem:[%s165_s5 + $0x28] sm:$0xf] %v207_v10 }
  0x34   : > { %210 = vst [vmem:[%s165_s5 + $0x2c] sm:$0xf] %v209_v11 }
  0x35   : > { %212 = vst [vmem:[%s165_s5 + $0x30] sm:$0xf] %v211_v12 }
  0x36   : > { %214 = vst [vmem:[%s165_s5 + $0x34] sm:$0xf] %v213_v13 }
  0x37   : > { %216 = vst [vmem:[%s165_s5 + $0x38] sm:$0xf] %v215_v14 }
  0x38   : > { %218 = vst [vmem:[%s165_s5 + $0x3c] sm:$0xf] %v217_v15 }
  0x39 PF: > { %274 = sbr.rel (!%p2970_p8) target bundleno = 80 (0x50), region = 61  ;;  %s276_s11 = sand.u32 (%p2970_p8), 1, %s2821_s15  }
  0x3a   : > { %s2264_s25 = sshll.u32 (%p2970_p8), %s2849_s22, 1  ;;  %s2262_s26 = sshll.u32 (%p2970_p8), %s276_s11, 7 }
  0x3b   : > { %s2479_s27 = sshll.u32 (%p2970_p8), %s2845_s21, 6  ;;  %s278_s5 = scalar_lea.vmem (%p2970_p8), [#allocation5], %s2262_s26 }
  0x3c   : > { %s282_s29 = sadd.s32 (%p2970_p8), %s2479_s27, %s2264_s25 }
  0x3d   : > { %s2266_s30 = sshll.u32 (%p2970_p8), %s282_s29, 2 }
  0x3e   : > { %s3031_s10 = scalar_lea.vmem %s4104_s1, %s2266_s30 }
  0x3f   : > { %v343_v16 = vld [vmem:[%s3031_s10] sm:$0xff]  ;;  %v345_v17 = vld [vmem:[%s3031_s10 + $0x10] sm:$0xff] }
  0x40   : > { %v347_v18 = vld [vmem:[%s3031_s10 + $0x20] sm:$0xff]  ;;  %344 = vst [vmem:[%s278_s5] sm:$0xff] %v343_v16  ;;  %v349_v19 = vld [vmem:[%s3031_s10 + $0x30] sm:$0xff] }
  0x41   : > { %346 = vst [vmem:[%s278_s5 + $0x8] sm:$0xff] %v345_v17  ;;  %v351_v20 = vld [vmem:[%s3031_s10 + $0x40] sm:$0xff]  ;;  %v353_v21 = vld [vmem:[%s3031_s10 + $0x50] sm:$0xff] }
  0x42   : > { %348 = vst [vmem:[%s278_s5 + $0x10] sm:$0xff] %v347_v18  ;;  %v355_v22 = vld [vmem:[%s3031_s10 + $0x60] sm:$0xff]  ;;  %v357_v23 = vld [vmem:[%s3031_s10 + $0x70] sm:$0xff] }
  0x43   : > { %350 = vst [vmem:[%s278_s5 + $0x18] sm:$0xff] %v349_v19  ;;  %v359_v24 = vld [vmem:[%s3031_s10 + $0x80] sm:$0xff]  ;;  %v361_v25 = vld [vmem:[%s3031_s10 + $0x90] sm:$0xff] }
  0x44   : > { %352 = vst [vmem:[%s278_s5 + $0x20] sm:$0xff] %v351_v20  ;;  %v363_v26 = vld [vmem:[%s3031_s10 + $0xa0] sm:$0xff]  ;;  %v365_v27 = vld [vmem:[%s3031_s10 + $0xb0] sm:$0xff] }
  0x45   : > { %354 = vst [vmem:[%s278_s5 + $0x28] sm:$0xff] %v353_v21  ;;  %v367_v28 = vld [vmem:[%s3031_s10 + $0xc0] sm:$0xff]  ;;  %v369_v29 = vld [vmem:[%s3031_s10 + $0xd0] sm:$0xff] }
  0x46   : > { %356 = vst [vmem:[%s278_s5 + $0x30] sm:$0xff] %v355_v22  ;;  %v371_v30 = vld [vmem:[%s3031_s10 + $0xe0] sm:$0xff]  ;;  %v373_v31 = vld [vmem:[%s3031_s10 + $0xf0] sm:$0xff] }
  0x47   : > { %358 = vst [vmem:[%s278_s5 + $0x38] sm:$0xff] %v357_v23 }
  0x48   : > { %360 = vst [vmem:[%s278_s5 + $0x40] sm:$0xff] %v359_v24 }
  0x49   : > { %362 = vst [vmem:[%s278_s5 + $0x48] sm:$0xff] %v361_v25 }
  0x4a   : > { %364 = vst [vmem:[%s278_s5 + $0x50] sm:$0xff] %v363_v26 }
  0x4b   : > { %366 = vst [vmem:[%s278_s5 + $0x58] sm:$0xff] %v365_v27 }
  0x4c   : > { %368 = vst [vmem:[%s278_s5 + $0x60] sm:$0xff] %v367_v28 }
  0x4d   : > { %370 = vst [vmem:[%s278_s5 + $0x68] sm:$0xff] %v369_v29 }
  0x4e   : > { %372 = vst [vmem:[%s278_s5 + $0x70] sm:$0xff] %v371_v30 }
  0x4f   : > { %374 = vst [vmem:[%s278_s5 + $0x78] sm:$0xff] %v373_v31 }
  0x50 PF: > { %380 = sbr.rel (!%p2970_p8) target bundleno = 103 (0x67), region = 99  ;;  %s382_s11 = sand.u32 (%p2970_p8), 1, %s2821_s15  }
  0x51   : > { %s2269_s25 = sshll.u32 (%p2970_p8), %s2849_s22, 1  ;;  %s2267_s26 = sshll.u32 (%p2970_p8), %s382_s11, 7 }
  0x52   : > { %s2480_s27 = sshll.u32 (%p2970_p8), %s2845_s21, 6  ;;  %s384_s8 = scalar_lea.vmem (%p2970_p8), [#allocation6], %s2267_s26 }
  0x53   : > { %s388_s29 = sadd.s32 (%p2970_p8), %s2480_s27, %s2269_s25 }
  0x54   : > { %s2271_s30 = sshll.u32 (%p2970_p8), %s388_s29, 2 }
  0x55   : > { %s3057_s10 = scalar_lea.vmem %s4105_s2, %s2271_s30 }
  0x56   : > { %v449_v32 = vld [vmem:[%s3057_s10] sm:$0xff]  ;;  %v451_v33 = vld [vmem:[%s3057_s10 + $0x10] sm:$0xff] }
  0x57   : > { %v453_v34 = vld [vmem:[%s3057_s10 + $0x20] sm:$0xff]  ;;  %450 = vst [vmem:[%s384_s8] sm:$0xff] %v449_v32  ;;  %v455_v35 = vld [vmem:[%s3057_s10 + $0x30] sm:$0xff] }
  0x58   : > { %452 = vst [vmem:[%s384_s8 + $0x8] sm:$0xff] %v451_v33  ;;  %v457_v36 = vld [vmem:[%s3057_s10 + $0x40] sm:$0xff]  ;;  %v459_v37 = vld [vmem:[%s3057_s10 + $0x50] sm:$0xff] }
  0x59   : > { %454 = vst [vmem:[%s384_s8 + $0x10] sm:$0xff] %v453_v34  ;;  %v461_v38 = vld [vmem:[%s3057_s10 + $0x60] sm:$0xff]  ;;  %v463_v39 = vld [vmem:[%s3057_s10 + $0x70] sm:$0xff] }
  0x5a   : > { %456 = vst [vmem:[%s384_s8 + $0x18] sm:$0xff] %v455_v35  ;;  %v465_v40 = vld [vmem:[%s3057_s10 + $0x80] sm:$0xff]  ;;  %v467_v41 = vld [vmem:[%s3057_s10 + $0x90] sm:$0xff] }
  0x5b   : > { %458 = vst [vmem:[%s384_s8 + $0x20] sm:$0xff] %v457_v36  ;;  %v469_v42 = vld [vmem:[%s3057_s10 + $0xa0] sm:$0xff]  ;;  %v471_v43 = vld [vmem:[%s3057_s10 + $0xb0] sm:$0xff] }
  0x5c   : > { %460 = vst [vmem:[%s384_s8 + $0x28] sm:$0xff] %v459_v37  ;;  %v473_v44 = vld [vmem:[%s3057_s10 + $0xc0] sm:$0xff]  ;;  %v475_v45 = vld [vmem:[%s3057_s10 + $0xd0] sm:$0xff] }
  0x5d   : > { %462 = vst [vmem:[%s384_s8 + $0x30] sm:$0xff] %v461_v38  ;;  %v477_v46 = vld [vmem:[%s3057_s10 + $0xe0] sm:$0xff]  ;;  %v479_v47 = vld [vmem:[%s3057_s10 + $0xf0] sm:$0xff] }
  0x5e   : > { %464 = vst [vmem:[%s384_s8 + $0x38] sm:$0xff] %v463_v39 }
  0x5f   : > { %466 = vst [vmem:[%s384_s8 + $0x40] sm:$0xff] %v465_v40 }
  0x60   : > { %468 = vst [vmem:[%s384_s8 + $0x48] sm:$0xff] %v467_v41 }
  0x61   : > { %470 = vst [vmem:[%s384_s8 + $0x50] sm:$0xff] %v469_v42 }
  0x62   : > { %472 = vst [vmem:[%s384_s8 + $0x58] sm:$0xff] %v471_v43 }
  0x63   : > { %474 = vst [vmem:[%s384_s8 + $0x60] sm:$0xff] %v473_v44 }
  0x64   : > { %476 = vst [vmem:[%s384_s8 + $0x68] sm:$0xff] %v475_v45 }
  0x65   : > { %478 = vst [vmem:[%s384_s8 + $0x70] sm:$0xff] %v477_v46 }
  0x66   : > { %480 = vst [vmem:[%s384_s8 + $0x78] sm:$0xff] %v479_v47 }
  0x67 PF: > { %p2272_p1 = scmp.ge.s32.totalorder %s2857_s24, 1  ;;  %p485_p2 = scmp.lt.s32.totalorder %s2857_s24, 9 }
  0x69   : > { %p486_p3 = pnand %p2272_p1, %p485_p2 }
  0x6a   : > { %s492_s5 = sand.u32 (!%p486_p3), 1, %s2825_s16   ;;  %s499_s11 = sand.u32 (!%p486_p3), 1, %s2817_s14  }
  0x6b   : > { %489 = sbr.rel (%p486_p3) target bundleno = 667 (0x29b), region = 137  ;;  %s2273_s25 = sshll.u32 (!%p486_p3), %s492_s5, 6 }
  0x6c   : > { %s2274_s26 = sshll.u32 (!%p486_p3), %s499_s11, 7  ;;  %s533_s27 = sand.u32 (!%p486_p3), 1, %s2809_s12  }
  0x6d   : > { %s2276_s29 = sshll.u32 (!%p486_p3), %s533_s27, 7  ;;  %s3080_s30 = scalar_lea.vmem (!%p486_p3), [#allocation4], %s2273_s25 }
  0x6e   : > { %s3082_s4 = scalar_lea.vmem (!%p486_p3), [#allocation5], %s2274_s26  ;;  %s3084_s6 = scalar_lea.vmem (!%p486_p3), [#allocation6], %s2274_s26 }
  0x6f   : > { %s3086_s10 = scalar_lea.vmem (!%p486_p3), [#allocation7], %s2276_s29  ;;  %p2277_p4 = scmp.ne.s32.totalorder (!%p486_p3), %s2833_s18, 0 }
  0x71   : > { %546 = sbr.rel (%p2277_p4) target bundleno = 183 (0xb7), region = 153 }
  0x76   : > { %v2859_v48 = vmov 0.0  }
  0x77   : > { %547 = vst [vmem:[#allocation2 + $0xb0] sm:$0xff] %v2859_v48 }
  0x78   : > { %548 = vst [vmem:[#allocation2] sm:$0xff] %v2859_v48 }
  0x79   : > { %549 = vst [vmem:[#allocation2 + $0xd8] sm:$0xff] %v2859_v48 }
  0x7a   : > { %550 = vst [vmem:[#allocation2 + $0x18] sm:$0xff] %v2859_v48 }
  0x7b   : > { %551 = vst [vmem:[#allocation2 + $0x50] sm:$0xff] %v2859_v48 }
  0x7c   : > { %552 = vst [vmem:[#allocation2 + $0x68] sm:$0xff] %v2859_v48 }
  0x7d   : > { %553 = vst [vmem:[#allocation2 + $0x30] sm:$0xff] %v2859_v48 }
  0x7e   : > { %554 = vst [vmem:[#allocation2 + $0x48] sm:$0xff] %v2859_v48 }
  0x7f   : > { %555 = vst [vmem:[#allocation2 + $0x80] sm:$0xff] %v2859_v48 }
  0x80   : > { %556 = vst [vmem:[#allocation2 + $0x88] sm:$0xff] %v2859_v48 }
  0x81   : > { %557 = vst [vmem:[#allocation2 + $0xe8] sm:$0xff] %v2859_v48 }
  0x82   : > { %558 = vst [vmem:[#allocation2 + $0xb8] sm:$0xff] %v2859_v48 }
  0x83   : > { %559 = vst [vmem:[#allocation2 + $0x60] sm:$0xff] %v2859_v48 }
  0x84   : > { %560 = vst [vmem:[#allocation2 + $0xf0] sm:$0xff] %v2859_v48 }
  0x85   : > { %561 = vst [vmem:[#allocation2 + $0x8] sm:$0xff] %v2859_v48 }
  0x86   : > { %562 = vst [vmem:[#allocation2 + $0x78] sm:$0xff] %v2859_v48 }
  0x87   : > { %563 = vst [vmem:[#allocation2 + $0x38] sm:$0xff] %v2859_v48 }
  0x88   : > { %564 = vst [vmem:[#allocation2 + $0x58] sm:$0xff] %v2859_v48 }
  0x89   : > { %565 = vst [vmem:[#allocation2 + $0x40] sm:$0xff] %v2859_v48 }
  0x8a   : > { %566 = vst [vmem:[#allocation2 + $0xc8] sm:$0xff] %v2859_v48 }
  0x8b   : > { %567 = vst [vmem:[#allocation2 + $0xe0] sm:$0xff] %v2859_v48 }
  0x8c   : > { %568 = vst [vmem:[#allocation2 + $0x90] sm:$0xff] %v2859_v48 }
  0x8d   : > { %569 = vst [vmem:[#allocation2 + $0x70] sm:$0xff] %v2859_v48 }
  0x8e   : > { %570 = vst [vmem:[#allocation2 + $0xc0] sm:$0xff] %v2859_v48 }
  0x8f   : > { %571 = vst [vmem:[#allocation2 + $0xa8] sm:$0xff] %v2859_v48 }
  0x90   : > { %572 = vst [vmem:[#allocation2 + $0xd0] sm:$0xff] %v2859_v48 }
  0x91   : > { %573 = vst [vmem:[#allocation2 + $0x10] sm:$0xff] %v2859_v48 }
  0x92   : > { %574 = vst [vmem:[#allocation2 + $0x28] sm:$0xff] %v2859_v48 }
  0x93   : > { %575 = vst [vmem:[#allocation2 + $0xa0] sm:$0xff] %v2859_v48 }
  0x94   : > { %576 = vst [vmem:[#allocation2 + $0xf8] sm:$0xff] %v2859_v48 }
  0x95   : > { %577 = vst [vmem:[#allocation2 + $0x20] sm:$0xff] %v2859_v48 }
  0x96   : > { %578 = vst [vmem:[#allocation2 + $0x98] sm:$0xff] %v2859_v48 }
  0x97   : > { %579 = vst [vmem:[#allocation3 + $0x80] sm:$0xff] %v2859_v48 }
  0x98   : > { %580 = vst [vmem:[#allocation3 + $0xc8] sm:$0xff] %v2859_v48 }
  0x99   : > { %581 = vst [vmem:[#allocation3 + $0xe8] sm:$0xff] %v2859_v48 }
  0x9a   : > { %582 = vst [vmem:[#allocation3 + $0x78] sm:$0xff] %v2859_v48 }
  0x9b   : > { %583 = vst [vmem:[#allocation3 + $0x8] sm:$0xff] %v2859_v48 }
  0x9c   : > { %584 = vst [vmem:[#allocation3 + $0x90] sm:$0xff] %v2859_v48 }
  0x9d   : > { %585 = vst [vmem:[#allocation3 + $0x58] sm:$0xff] %v2859_v48 }
  0x9e   : > { %586 = vst [vmem:[#allocation3 + $0xa8] sm:$0xff] %v2859_v48 }
  0x9f   : > { %587 = vst [vmem:[#allocation3 + $0xd0] sm:$0xff] %v2859_v48 }
  0xa0   : > { %588 = vst [vmem:[#allocation3 + $0xb0] sm:$0xff] %v2859_v48 }
  0xa1   : > { %589 = vst [vmem:[#allocation3 + $0x38] sm:$0xff] %v2859_v48 }
  0xa2   : > { %590 = vst [vmem:[#allocation3 + $0x40] sm:$0xff] %v2859_v48 }
  0xa3   : > { %591 = vst [vmem:[#allocation3 + $0xe0] sm:$0xff] %v2859_v48 }
  0xa4   : > { %592 = vst [vmem:[#allocation3 + $0x60] sm:$0xff] %v2859_v48 }
  0xa5   : > { %593 = vst [vmem:[#allocation3 + $0x18] sm:$0xff] %v2859_v48 }
  0xa6   : > { %594 = vst [vmem:[#allocation3 + $0x68] sm:$0xff] %v2859_v48 }
  0xa7   : > { %595 = vst [vmem:[#allocation3 + $0x10] sm:$0xff] %v2859_v48 }
  0xa8   : > { %596 = vst [vmem:[#allocation3 + $0x70] sm:$0xff] %v2859_v48 }
  0xa9   : > { %597 = vst [vmem:[#allocation3 + $0x50] sm:$0xff] %v2859_v48 }
  0xaa   : > { %598 = vst [vmem:[#allocation3 + $0xa0] sm:$0xff] %v2859_v48 }
  0xab   : > { %599 = vst [vmem:[#allocation3 + $0xd8] sm:$0xff] %v2859_v48 }
  0xac   : > { %600 = vst [vmem:[#allocation3 + $0x30] sm:$0xff] %v2859_v48 }
  0xad   : > { %601 = vst [vmem:[#allocation3 + $0x20] sm:$0xff] %v2859_v48 }
  0xae   : > { %602 = vst [vmem:[#allocation3 + $0xf0] sm:$0xff] %v2859_v48 }
  0xaf   : > { %603 = vst [vmem:[#allocation3 + $0x88] sm:$0xff] %v2859_v48 }
  0xb0   : > { %604 = vst [vmem:[#allocation3 + $0x48] sm:$0xff] %v2859_v48 }
  0xb1   : > { %605 = vst [vmem:[#allocation3 + $0xf8] sm:$0xff] %v2859_v48 }
  0xb2   : > { %606 = vst [vmem:[#allocation3 + $0xc0] sm:$0xff] %v2859_v48 }
  0xb3   : > { %607 = vst [vmem:[#allocation3 + $0xb8] sm:$0xff] %v2859_v48 }
  0xb4   : > { %608 = vst [vmem:[#allocation3] sm:$0xff] %v2859_v48 }
  0xb5   : > { %609 = vst [vmem:[#allocation3 + $0x28] sm:$0xff] %v2859_v48 }
  0xb6   : > { %610 = vst [vmem:[#allocation3 + $0x98] sm:$0xff] %v2859_v48 }
  0xb7 PF: > { %v2368_v49 = vld [vmem:[%s3082_s4 + $0x70] sm:$0xf]  ;;  %v2504_v50 = vld [vmem:[%s3082_s4 + $0x74] sm:$0xf0]  ;;  %v2503_v51 = vld [vmem:[%s3082_s4 + $0x74] sm:$0xf] }
  0xb8   : > { %v2369_v52 = vor.u32 %v2504_v50, %v2368_v49  ;;  %v2370_v53 = vld [vmem:[%s3082_s4 + $0x78] sm:$0xf0]  ;;  %v2432_v54 = vld [vmem:[%s3084_s6 + $0x70] sm:$0xf]  ;;  %v2520_v55 = vld [vmem:[%s3084_s6 + $0x74] sm:$0xf0] }
  0xb9   : > { %v2373_v56 = vor.u32 %v2503_v51, %v2370_v53  ;;  %v2433_v57 = vor.u32 %v2520_v55, %v2432_v54  ;;  %v2519_v58 = vld [vmem:[%s3084_s6 + $0x74] sm:$0xf]  ;;  %v2434_v59 = vld [vmem:[%s3084_s6 + $0x78] sm:$0xf0]  ;;  %v2360_v60 = vld [vmem:[%s3082_s4 + $0x60] sm:$0xf] }
  0xba   : > { %803 = vmatpush.bf16.msra.mxu0 %v2369_v52  ;;  %v2437_v61 = vor.u32 %v2519_v58, %v2434_v59  ;;  %v2502_v62 = vld [vmem:[%s3082_s4 + $0x64] sm:$0xf0]  ;;  %v2501_v63 = vld [vmem:[%s3082_s4 + $0x64] sm:$0xf]  ;;  %v2362_v0 = vld [vmem:[%s3082_s4 + $0x68] sm:$0xf0] }
  0xbb   : > { %852 = vmatpush.bf16.msra.mxu1 %v2373_v56  ;;  %1093 = vmatpush.bf16.msra.mxu2 %v2433_v57  ;;  %v2361_v1 = vor.u32 %v2502_v62, %v2360_v60  ;;  %v2365_v2 = vor.u32 %v2501_v63, %v2362_v0  ;;  %v2424_v3 = vld [vmem:[%s3084_s6 + $0x60] sm:$0xf]  ;;  %v2518_v4 = vld [vmem:[%s3084_s6 + $0x64] sm:$0xf0]  ;;  %v2517_v5 = vld [vmem:[%s3084_s6 + $0x64] sm:$0xf] }
  0xbc   : > { %1142 = vmatpush.bf16.msra.mxu3 %v2437_v61  ;;  %v2425_v6 = vor.u32 %v2518_v4, %v2424_v3  ;;  %v2426_v7 = vld [vmem:[%s3084_s6 + $0x68] sm:$0xf0]  ;;  %v2352_v8 = vld [vmem:[%s3082_s4 + $0x50] sm:$0xf]  ;;  %v2500_v9 = vld [vmem:[%s3082_s4 + $0x54] sm:$0xf0] }
  0xbd   : > { %v2429_v10 = vor.u32 %v2517_v5, %v2426_v7  ;;  %v2499_v11 = vld [vmem:[%s3082_s4 + $0x54] sm:$0xf]  ;;  %v2354_v12 = vld [vmem:[%s3082_s4 + $0x58] sm:$0xf0]  ;;  %v2416_v13 = vld [vmem:[%s3084_s6 + $0x50] sm:$0xf]  ;;  %v2353_v14 = vor.u32 %v2500_v9, %v2352_v8 }
  0xbe   : > { %804 = vmatpush.bf16.msra.mxu0 %v2361_v1  ;;  %v2516_v15 = vld [vmem:[%s3084_s6 + $0x54] sm:$0xf0]  ;;  %v2515_v16 = vld [vmem:[%s3084_s6 + $0x54] sm:$0xf]  ;;  %v2418_v17 = vld [vmem:[%s3084_s6 + $0x58] sm:$0xf0]  ;;  %v2357_v18 = vor.u32 %v2499_v11, %v2354_v12 }
  0xbf   : > { %853 = vmatpush.bf16.msra.mxu1 %v2365_v2  ;;  %1094 = vmatpush.bf16.msra.mxu2 %v2425_v6  ;;  %v2417_v19 = vor.u32 %v2516_v15, %v2416_v13  ;;  %v2344_v20 = vld [vmem:[%s3082_s4 + $0x40] sm:$0xf]  ;;  %v2498_v21 = vld [vmem:[%s3082_s4 + $0x44] sm:$0xf0]  ;;  %v2497_v22 = vld [vmem:[%s3082_s4 + $0x44] sm:$0xf]  ;;  %v2421_v23 = vor.u32 %v2515_v16, %v2418_v17 }
  0xc0   : > { %1143 = vmatpush.bf16.msra.mxu3 %v2429_v10  ;;  %v2346_v24 = vld [vmem:[%s3082_s4 + $0x48] sm:$0xf0]  ;;  %v2408_v25 = vld [vmem:[%s3084_s6 + $0x40] sm:$0xf]  ;;  %v2514_v26 = vld [vmem:[%s3084_s6 + $0x44] sm:$0xf0]  ;;  %v2345_v29 = vor.u32 %v2498_v21, %v2344_v20 }
  0xc1   : > { %v2513_v27 = vld [vmem:[%s3084_s6 + $0x44] sm:$0xf]  ;;  %v2410_v28 = vld [vmem:[%s3084_s6 + $0x48] sm:$0xf0]  ;;  %v2349_v30 = vor.u32 %v2497_v22, %v2346_v24  ;;  %v2409_v31 = vor.u32 %v2514_v26, %v2408_v25  ;;  %v2336_v32 = vld [vmem:[%s3082_s4 + $0x30] sm:$0xf] }
  0xc2   : > { %805 = vmatpush.bf16.msra.mxu0 %v2353_v14  ;;  %v2496_v33 = vld [vmem:[%s3082_s4 + $0x34] sm:$0xf0]  ;;  %v2495_v34 = vld [vmem:[%s3082_s4 + $0x34] sm:$0xf]  ;;  %v2413_v35 = vor.u32 %v2513_v27, %v2410_v28  ;;  %v2338_v36 = vld [vmem:[%s3082_s4 + $0x38] sm:$0xf0] }
  0xc3   : > { %854 = vmatpush.bf16.msra.mxu1 %v2357_v18  ;;  %1095 = vmatpush.bf16.msra.mxu2 %v2417_v19  ;;  %v2400_v37 = vld [vmem:[%s3084_s6 + $0x30] sm:$0xf]  ;;  %v2512_v38 = vld [vmem:[%s3084_s6 + $0x34] sm:$0xf0]  ;;  %v2511_v39 = vld [vmem:[%s3084_s6 + $0x34] sm:$0xf]  ;;  %v2337_v41 = vor.u32 %v2496_v33, %v2336_v32  ;;  %v2341_v42 = vor.u32 %v2495_v34, %v2338_v36 }
  0xc4   : > { %1144 = vmatpush.bf16.msra.mxu3 %v2421_v23  ;;  %v2402_v40 = vld [vmem:[%s3084_s6 + $0x38] sm:$0xf0]  ;;  %v2401_v43 = vor.u32 %v2512_v38, %v2400_v37  ;;  %v2328_v44 = vld [vmem:[%s3082_s4 + $0x20] sm:$0xf]  ;;  %v2494_v45 = vld [vmem:[%s3082_s4 + $0x24] sm:$0xf0] }
  0xc5   : > { %v2493_v46 = vld [vmem:[%s3082_s4 + $0x24] sm:$0xf]  ;;  %v2405_v47 = vor.u32 %v2511_v39, %v2402_v40  ;;  %v2330_v48 = vld [vmem:[%s3082_s4 + $0x28] sm:$0xf0]  ;;  %v2392_v49 = vld [vmem:[%s3084_s6 + $0x20] sm:$0xf]  ;;  %v2329_v53 = vor.u32 %v2494_v45, %v2328_v44 }
  0xc6   : > { %806 = vmatpush.bf16.msra.mxu0 %v2345_v29  ;;  %v2510_v50 = vld [vmem:[%s3084_s6 + $0x24] sm:$0xf0]  ;;  %v2509_v51 = vld [vmem:[%s3084_s6 + $0x24] sm:$0xf]  ;;  %v2394_v52 = vld [vmem:[%s3084_s6 + $0x28] sm:$0xf0]  ;;  %v2333_v54 = vor.u32 %v2493_v46, %v2330_v48 }
  0xc7   : > { %855 = vmatpush.bf16.msra.mxu1 %v2349_v30  ;;  %1096 = vmatpush.bf16.msra.mxu2 %v2409_v31  ;;  %v2393_v55 = vor.u32 %v2510_v50, %v2392_v49  ;;  %v2320_v56 = vld [vmem:[%s3082_s4 + $0x10] sm:$0xf]  ;;  %v2492_v57 = vld [vmem:[%s3082_s4 + $0x14] sm:$0xf0]  ;;  %v2491_v58 = vld [vmem:[%s3082_s4 + $0x14] sm:$0xf]  ;;  %v2397_v59 = vor.u32 %v2509_v51, %v2394_v52 }
  0xc8   : > { %1145 = vmatpush.bf16.msra.mxu3 %v2413_v35  ;;  %v2322_v60 = vld [vmem:[%s3082_s4 + $0x18] sm:$0xf0]  ;;  %v2384_v61 = vld [vmem:[%s3084_s6 + $0x10] sm:$0xf]  ;;  %v2508_v62 = vld [vmem:[%s3084_s6 + $0x14] sm:$0xf0]  ;;  %v2321_v1 = vor.u32 %v2492_v57, %v2320_v56 }
  0xc9   : > { %v2507_v63 = vld [vmem:[%s3084_s6 + $0x14] sm:$0xf]  ;;  %v2386_v0 = vld [vmem:[%s3084_s6 + $0x18] sm:$0xf0]  ;;  %v2325_v2 = vor.u32 %v2491_v58, %v2322_v60  ;;  %v2385_v3 = vor.u32 %v2508_v62, %v2384_v61  ;;  %v2312_v4 = vld [vmem:[%s3082_s4] sm:$0xf] }
  0xca   : > { %807 = vmatpush.bf16.msra.mxu0 %v2337_v41  ;;  %v2490_v5 = vld [vmem:[%s3082_s4 + $0x4] sm:$0xf0]  ;;  %v2489_v6 = vld [vmem:[%s3082_s4 + $0x4] sm:$0xf]  ;;  %v2389_v7 = vor.u32 %v2507_v63, %v2386_v0  ;;  %v2314_v8 = vld [vmem:[%s3082_s4 + $0x8] sm:$0xf0] }
  0xcb   : > { %856 = vmatpush.bf16.msra.mxu1 %v2341_v42  ;;  %1097 = vmatpush.bf16.msra.mxu2 %v2401_v43  ;;  %v2376_v9 = vld [vmem:[%s3084_s6] sm:$0xf]  ;;  %v2506_v10 = vld [vmem:[%s3084_s6 + $0x4] sm:$0xf0]  ;;  %v2505_v11 = vld [vmem:[%s3084_s6 + $0x4] sm:$0xf]  ;;  %v2313_v13 = vor.u32 %v2490_v5, %v2312_v4  ;;  %v2317_v14 = vor.u32 %v2489_v6, %v2314_v8 }
  0xcc   : > { %1146 = vmatpush.bf16.msra.mxu3 %v2405_v47  ;;  %v2378_v12 = vld [vmem:[%s3084_s6 + $0x8] sm:$0xf0]  ;;  %v2377_v15 = vor.u32 %v2506_v10, %v2376_v9  ;;  %v2481_v17 = vld [vmem:[%s3080_s30] sm:$0xff]  ;;  %v2483_v19 = vld [vmem:[%s3080_s30 + $0x10] sm:$0xff]  ;;  %p2438_p5 = scmp.ne.s32.totalorder %s2833_s18, 1 }
  0xcd   : > { %v2381_v16 = vor.u32 %v2505_v11, %v2378_v12  ;;  %v2482_v18 = vld [vmem:[%s3080_s30 + $0x8] sm:$0xff]  ;;  %v2484_v20 = vld [vmem:[%s3080_s30 + $0x18] sm:$0xff]  ;;  %v2485_v21 = vld [vmem:[%s3080_s30 + $0x20] sm:$0xff] }
  0xce   : > { %808 = vmatpush.bf16.msra.mxu0 %v2329_v53  ;;  %v2486_v22 = vld [vmem:[%s3080_s30 + $0x28] sm:$0xff]  ;;  %v2487_v23 = vld [vmem:[%s3080_s30 + $0x30] sm:$0xff]  ;;  %v2488_v24 = vld [vmem:[%s3080_s30 + $0x38] sm:$0xff] }
  0xcf   : > { %857 = vmatpush.bf16.msra.mxu1 %v2333_v54  ;;  %1098 = vmatpush.bf16.msra.mxu2 %v2393_v55  ;;  %v627_v25 = vld [vmem:[#allocation2 + $0xb0] sm:$0xff]  ;;  %v628_v26 = vld [vmem:[#allocation2] sm:$0xff]  ;;  %v966_v32 = vld [vmem:[#allocation3 + $0xc8] sm:$0xff] }
  0xd0   : > { %1147 = vmatpush.bf16.msra.mxu3 %v2397_v59  ;;  %v965_v31 = vld [vmem:[#allocation3 + $0x80] sm:$0xff]  ;;  %v629_v33 = vld [vmem:[#allocation2 + $0xd8] sm:$0xff]  ;;  %v967_v43 = vld [vmem:[#allocation3 + $0xe8] sm:$0xff] }
  0xd1   : > { %v630_v35 = vld [vmem:[#allocation2 + $0x18] sm:$0xff]  ;;  %v631_v45 = vld [vmem:[#allocation2 + $0x50] sm:$0xff]  ;;  %v632_v47 = vld [vmem:[#allocation2 + $0x68] sm:$0xff] }
  0xd2   : > { %809 = vmatpush.bf16.msra.mxu0 %v2321_v1  ;;  %v968_v44 = vld [vmem:[#allocation3 + $0x78] sm:$0xff]  ;;  %v969_v55 = vld [vmem:[#allocation3 + $0x8] sm:$0xff]  ;;  %v970_v56 = vld [vmem:[#allocation3 + $0x90] sm:$0xff] }
  0xd3   : > { %858 = vmatpush.bf16.msra.mxu1 %v2325_v2  ;;  %1099 = vmatpush.bf16.msra.mxu2 %v2385_v3  ;;  %v633_v57 = vld [vmem:[#allocation2 + $0x30] sm:$0xff]  ;;  %v634_v59 = vld [vmem:[#allocation2 + $0x48] sm:$0xff]  ;;  %v971_v3 = vld [vmem:[#allocation3 + $0x58] sm:$0xff] }
  0xd4   : > { %1148 = vmatpush.bf16.msra.mxu3 %v2389_v7  ;;  %v972_v4 = vld [vmem:[#allocation3 + $0xa8] sm:$0xff]  ;;  %v635_v5 = vld [vmem:[#allocation2 + $0x80] sm:$0xff] }
  0xd5   : > { %v636_v7 = vld [vmem:[#allocation2 + $0x88] sm:$0xff] }
  0xd6   : > { %810 = vmatpush.bf16.msra.mxu0 %v2313_v13 }
  0xd7   : > { %859 = vmatpush.bf16.msra.mxu1 %v2317_v14  ;;  %1100 = vmatpush.bf16.msra.mxu2 %v2377_v15  ;;  %v973_v15 = vld [vmem:[#allocation3 + $0xd0] sm:$0xff] }
  0xd8   : > { %1149 = vmatpush.bf16.msra.mxu3 %v2381_v16  ;;  %v974_v16 = vld [vmem:[#allocation3 + $0xb0] sm:$0xff] }
  0xd9   : > { %811 = vmatmul.bf16.vlgmr.msra.gmra.mxu0 %v2481_v17 }
  0xda   : > { %860 = vmatmul.bf16.vlgmr.msra.gmra.mxu1 %v2481_v17  ;;  %1101 = vmatmul.bf16.vlgmr.msra.gmra.mxu2 %v2481_v17 }
  0xdb   : > { %1150 = vmatmul.bf16.vlgmr.msra.gmra.mxu3 %v2481_v17  ;;  %v637_v17 = vld [vmem:[#allocation2 + $0xe8] sm:$0xff] }
  0xe9   : > { %816 = vmatmul.bf16.gmra.mxu0 %v2482_v18 }
  0xea   : > { %865 = vmatmul.bf16.gmra.mxu1 %v2482_v18  ;;  %1106 = vmatmul.bf16.gmra.mxu2 %v2482_v18 }
  0xeb   : > { %1155 = vmatmul.bf16.gmra.mxu3 %v2482_v18 }
  0xf9   : > { %821 = vmatmul.bf16.gmra.mxu0 %v2483_v19 }
  0xfa   : > { %870 = vmatmul.bf16.gmra.mxu1 %v2483_v19  ;;  %1111 = vmatmul.bf16.gmra.mxu2 %v2483_v19 }
  0xfb   : > { %1160 = vmatmul.bf16.gmra.mxu3 %v2483_v19  ;;  %v638_v19 = vld [vmem:[#allocation2 + $0xb8] sm:$0xff] }
 0x109   : > { %826 = vmatmul.bf16.gmra.mxu0 %v2484_v20 }
 0x10a   : > { %875 = vmatmul.bf16.gmra.mxu1 %v2484_v20  ;;  %1116 = vmatmul.bf16.gmra.mxu2 %v2484_v20 }
 0x10b   : > { %1165 = vmatmul.bf16.gmra.mxu3 %v2484_v20 }
 0x119   : > { %831 = vmatmul.bf16.gmra.mxu0 %v2485_v21 }
 0x11a   : > { %880 = vmatmul.bf16.gmra.mxu1 %v2485_v21  ;;  %1121 = vmatmul.bf16.gmra.mxu2 %v2485_v21 }
 0x11b   : > { %1170 = vmatmul.bf16.gmra.mxu3 %v2485_v21 }
 0x129   : > { %836 = vmatmul.bf16.gmra.mxu0 %v2486_v22 }
 0x12a   : > { %885 = vmatmul.bf16.gmra.mxu1 %v2486_v22  ;;  %1126 = vmatmul.bf16.gmra.mxu2 %v2486_v22 }
 0x12b   : > { %1175 = vmatmul.bf16.gmra.mxu3 %v2486_v22 }
 0x139   : > { %841 = vmatmul.bf16.gmra.mxu0 %v2487_v23 }
 0x13a   : > { %890 = vmatmul.bf16.gmra.mxu1 %v2487_v23  ;;  %1131 = vmatmul.bf16.gmra.mxu2 %v2487_v23 }
 0x13b   : > { %1180 = vmatmul.bf16.gmra.mxu3 %v2487_v23 }
 0x149   : > { %846 = vmatmul.bf16.gmra.mxu0 %v2488_v24 }
 0x14a   : > { %895 = vmatmul.bf16.gmra.mxu1 %v2488_v24  ;;  %1136 = vmatmul.bf16.gmra.mxu2 %v2488_v24 }
 0x14b   : > { %1185 = vmatmul.bf16.gmra.mxu3 %v2488_v24 }
 0x156   : > { %v812_v27 = vpop.f32.mrf.mxu0 }
 0x157   : > { %v901_v28 = vadd.f32 %v812_v27, %v627_v25  ;;  %v861_v29 = vpop.f32.mrf.mxu1  ;;  %v975_v27 = vld [vmem:[#allocation3 + $0x38] sm:$0xff] }
 0x158   : > { %v902_v30 = vadd.f32 %v861_v29, %v628_v26  ;;  %v639_v29 = vld [vmem:[#allocation2 + $0x60] sm:$0xff] }
 0x159   : > { %933 = vst [vmem:[#allocation2 + $0xb0] sm:$0xff] %v901_v28  ;;  %v976_v28 = vld [vmem:[#allocation3 + $0x40] sm:$0xff] }
 0x15a   : > { %934 = vst [vmem:[#allocation2] sm:$0xff] %v902_v30 }
 0x15d   : > { %v1102_v34 = vpop.f32.mrf.mxu2 }
 0x15e   : > { %v1191_v36 = vadd.f32 %v1102_v34, %v965_v31  ;;  %v1151_v37 = vpop.f32.mrf.mxu3  ;;  %v814_v38 = vpop.f32.mrf.mxu0  ;;  %v640_v31 = vld [vmem:[#allocation2 + $0xf0] sm:$0xff] }
 0x15f   : > { %v1192_v39 = vadd.f32 %v1151_v37, %v966_v32  ;;  %v903_v40 = vadd.f32 %v814_v38, %v629_v33  ;;  %v863_v41 = vpop.f32.mrf.mxu1 }
 0x160   : > { %1223 = vst [vmem:[#allocation3 + $0x80] sm:$0xff] %v1191_v36  ;;  %v904_v42 = vadd.f32 %v863_v41, %v630_v35  ;;  %v641_v41 = vld [vmem:[#allocation2 + $0x8] sm:$0xff] }
 0x161   : > { %1224 = vst [vmem:[#allocation3 + $0xc8] sm:$0xff] %v1192_v39  ;;  %v977_v39 = vld [vmem:[#allocation3 + $0xe0] sm:$0xff] }
 0x162   : > { %935 = vst [vmem:[#allocation2 + $0xd8] sm:$0xff] %v903_v40  ;;  %v978_v40 = vld [vmem:[#allocation3 + $0x60] sm:$0xff] }
 0x163   : > { %936 = vst [vmem:[#allocation2 + $0x18] sm:$0xff] %v904_v42 }
 0x165   : > { %v1104_v46 = vpop.f32.mrf.mxu2 }
 0x166   : > { %v1193_v48 = vadd.f32 %v1104_v46, %v967_v43  ;;  %v1153_v49 = vpop.f32.mrf.mxu3  ;;  %v817_v50 = vpop.f32.mrf.mxu0  ;;  %v642_v43 = vld [vmem:[#allocation2 + $0x78] sm:$0xff] }
 0x167   : > { %v1194_v51 = vadd.f32 %v1153_v49, %v968_v44  ;;  %v905_v52 = vadd.f32 %v817_v50, %v631_v45  ;;  %v866_v53 = vpop.f32.mrf.mxu1 }
 0x168   : > { %1225 = vst [vmem:[#allocation3 + $0xe8] sm:$0xff] %v1193_v48  ;;  %v906_v54 = vadd.f32 %v866_v53, %v632_v47  ;;  %v643_v53 = vld [vmem:[#allocation2 + $0x38] sm:$0xff] }
 0x169   : > { %1226 = vst [vmem:[#allocation3 + $0x78] sm:$0xff] %v1194_v51  ;;  %v979_v51 = vld [vmem:[#allocation3 + $0x18] sm:$0xff] }
 0x16a   : > { %937 = vst [vmem:[#allocation2 + $0x50] sm:$0xff] %v905_v52  ;;  %v980_v52 = vld [vmem:[#allocation3 + $0x68] sm:$0xff] }
 0x16b   : > { %938 = vst [vmem:[#allocation2 + $0x68] sm:$0xff] %v906_v54 }
 0x16d   : > { %v1107_v58 = vpop.f32.mrf.mxu2 }
 0x16e   : > { %v1195_v60 = vadd.f32 %v1107_v58, %v969_v55  ;;  %v1156_v61 = vpop.f32.mrf.mxu3  ;;  %v819_v62 = vpop.f32.mrf.mxu0  ;;  %v644_v55 = vld [vmem:[#allocation2 + $0x58] sm:$0xff] }
 0x16f   : > { %v1196_v63 = vadd.f32 %v1156_v61, %v970_v56  ;;  %v907_v0 = vadd.f32 %v819_v62, %v633_v57  ;;  %v868_v1 = vpop.f32.mrf.mxu1 }
 0x170   : > { %1227 = vst [vmem:[#allocation3 + $0x8] sm:$0xff] %v1195_v60  ;;  %v908_v2 = vadd.f32 %v868_v1, %v634_v59  ;;  %v645_v1 = vld [vmem:[#allocation2 + $0x40] sm:$0xff] }
 0x171   : > { %1228 = vst [vmem:[#allocation3 + $0x90] sm:$0xff] %v1196_v63  ;;  %v981_v63 = vld [vmem:[#allocation3 + $0x10] sm:$0xff] }
 0x172   : > { %939 = vst [vmem:[#allocation2 + $0x30] sm:$0xff] %v907_v0  ;;  %v982_v0 = vld [vmem:[#allocation3 + $0x70] sm:$0xff] }
 0x173   : > { %940 = vst [vmem:[#allocation2 + $0x48] sm:$0xff] %v908_v2 }
 0x175   : > { %v1109_v6 = vpop.f32.mrf.mxu2 }
 0x176   : > { %v1197_v8 = vadd.f32 %v1109_v6, %v971_v3  ;;  %v1158_v9 = vpop.f32.mrf.mxu3  ;;  %v822_v10 = vpop.f32.mrf.mxu0  ;;  %v646_v3 = vld [vmem:[#allocation2 + $0xc8] sm:$0xff] }
 0x177   : > { %v1198_v11 = vadd.f32 %v1158_v9, %v972_v4  ;;  %v909_v12 = vadd.f32 %v822_v10, %v635_v5  ;;  %v871_v13 = vpop.f32.mrf.mxu1 }
 0x178   : > { %1229 = vst [vmem:[#allocation3 + $0x58] sm:$0xff] %v1197_v8  ;;  %v910_v14 = vadd.f32 %v871_v13, %v636_v7  ;;  %v647_v13 = vld [vmem:[#allocation2 + $0xe0] sm:$0xff] }
 0x179   : > { %1230 = vst [vmem:[#allocation3 + $0xa8] sm:$0xff] %v1198_v11  ;;  %v983_v11 = vld [vmem:[#allocation3 + $0x50] sm:$0xff] }
 0x17a   : > { %941 = vst [vmem:[#allocation2 + $0x80] sm:$0xff] %v909_v12  ;;  %v984_v12 = vld [vmem:[#allocation3 + $0xa0] sm:$0xff] }
 0x17b   : > { %942 = vst [vmem:[#allocation2 + $0x88] sm:$0xff] %v910_v14 }
 0x17d   : > { %v1112_v18 = vpop.f32.mrf.mxu2 }
 0x17e   : > { %v1199_v20 = vadd.f32 %v1112_v18, %v973_v15  ;;  %v1161_v21 = vpop.f32.mrf.mxu3  ;;  %v824_v22 = vpop.f32.mrf.mxu0  ;;  %v648_v15 = vld [vmem:[#allocation2 + $0x90] sm:$0xff] }
 0x17f   : > { %v1200_v23 = vadd.f32 %v1161_v21, %v974_v16  ;;  %v911_v24 = vadd.f32 %v824_v22, %v637_v17  ;;  %v873_v25 = vpop.f32.mrf.mxu1 }
 0x180   : > { %1231 = vst [vmem:[#allocation3 + $0xd0] sm:$0xff] %v1199_v20  ;;  %v912_v26 = vadd.f32 %v873_v25, %v638_v19  ;;  %v649_v25 = vld [vmem:[#allocation2 + $0x70] sm:$0xff] }
 0x181   : > { %1232 = vst [vmem:[#allocation3 + $0xb0] sm:$0xff] %v1200_v23  ;;  %v985_v23 = vld [vmem:[#allocation3 + $0xd8] sm:$0xff] }
 0x182   : > { %943 = vst [vmem:[#allocation2 + $0xe8] sm:$0xff] %v911_v24  ;;  %v986_v24 = vld [vmem:[#allocation3 + $0x30] sm:$0xff] }
 0x183   : > { %944 = vst [vmem:[#allocation2 + $0xb8] sm:$0xff] %v912_v26 }
 0x185   : > { %v1114_v30 = vpop.f32.mrf.mxu2 }
 0x186   : > { %v1201_v32 = vadd.f32 %v1114_v30, %v975_v27  ;;  %v1163_v33 = vpop.f32.mrf.mxu3  ;;  %v827_v34 = vpop.f32.mrf.mxu0  ;;  %v650_v27 = vld [vmem:[#allocation2 + $0xc0] sm:$0xff] }
 0x187   : > { %v1202_v35 = vadd.f32 %v1163_v33, %v976_v28  ;;  %v913_v36 = vadd.f32 %v827_v34, %v639_v29  ;;  %v876_v37 = vpop.f32.mrf.mxu1 }
 0x188   : > { %1233 = vst [vmem:[#allocation3 + $0x38] sm:$0xff] %v1201_v32  ;;  %v914_v38 = vadd.f32 %v876_v37, %v640_v31  ;;  %v651_v37 = vld [vmem:[#allocation2 + $0xa8] sm:$0xff] }
 0x189   : > { %1234 = vst [vmem:[#allocation3 + $0x40] sm:$0xff] %v1202_v35  ;;  %v987_v35 = vld [vmem:[#allocation3 + $0x20] sm:$0xff] }
 0x18a   : > { %945 = vst [vmem:[#allocation2 + $0x60] sm:$0xff] %v913_v36  ;;  %v988_v36 = vld [vmem:[#allocation3 + $0xf0] sm:$0xff] }
 0x18b   : > { %946 = vst [vmem:[#allocation2 + $0xf0] sm:$0xff] %v914_v38 }
 0x18d   : > { %v1117_v42 = vpop.f32.mrf.mxu2 }
 0x18e   : > { %v1203_v44 = vadd.f32 %v1117_v42, %v977_v39  ;;  %v1166_v45 = vpop.f32.mrf.mxu3  ;;  %v829_v46 = vpop.f32.mrf.mxu0  ;;  %v652_v39 = vld [vmem:[#allocation2 + $0xd0] sm:$0xff] }
 0x18f   : > { %v1204_v47 = vadd.f32 %v1166_v45, %v978_v40  ;;  %v915_v48 = vadd.f32 %v829_v46, %v641_v41  ;;  %v878_v49 = vpop.f32.mrf.mxu1 }
 0x190   : > { %1235 = vst [vmem:[#allocation3 + $0xe0] sm:$0xff] %v1203_v44  ;;  %v916_v50 = vadd.f32 %v878_v49, %v642_v43  ;;  %v653_v49 = vld [vmem:[#allocation2 + $0x10] sm:$0xff] }
 0x191   : > { %1236 = vst [vmem:[#allocation3 + $0x60] sm:$0xff] %v1204_v47  ;;  %v989_v47 = vld [vmem:[#allocation3 + $0x88] sm:$0xff] }
 0x192   : > { %947 = vst [vmem:[#allocation2 + $0x8] sm:$0xff] %v915_v48  ;;  %v990_v48 = vld [vmem:[#allocation3 + $0x48] sm:$0xff] }
 0x193   : > { %948 = vst [vmem:[#allocation2 + $0x78] sm:$0xff] %v916_v50 }
 0x195   : > { %v1119_v54 = vpop.f32.mrf.mxu2 }
 0x196   : > { %v1205_v56 = vadd.f32 %v1119_v54, %v979_v51  ;;  %v1168_v57 = vpop.f32.mrf.mxu3  ;;  %v832_v58 = vpop.f32.mrf.mxu0  ;;  %v654_v51 = vld [vmem:[#allocation2 + $0x28] sm:$0xff] }
 0x197   : > { %v1206_v59 = vadd.f32 %v1168_v57, %v980_v52  ;;  %v917_v60 = vadd.f32 %v832_v58, %v643_v53  ;;  %v881_v61 = vpop.f32.mrf.mxu1 }
 0x198   : > { %1237 = vst [vmem:[#allocation3 + $0x18] sm:$0xff] %v1205_v56  ;;  %v918_v62 = vadd.f32 %v881_v61, %v644_v55  ;;  %v655_v61 = vld [vmem:[#allocation2 + $0xa0] sm:$0xff] }
 0x199   : > { %1238 = vst [vmem:[#allocation3 + $0x68] sm:$0xff] %v1206_v59  ;;  %v991_v59 = vld [vmem:[#allocation3 + $0xf8] sm:$0xff] }
 0x19a   : > { %949 = vst [vmem:[#allocation2 + $0x38] sm:$0xff] %v917_v60  ;;  %v992_v60 = vld [vmem:[#allocation3 + $0xc0] sm:$0xff] }
 0x19b   : > { %950 = vst [vmem:[#allocation2 + $0x58] sm:$0xff] %v918_v62 }
 0x19d   : > { %v1122_v2 = vpop.f32.mrf.mxu2 }
 0x19e   : > { %v1207_v4 = vadd.f32 %v1122_v2, %v981_v63  ;;  %v1171_v5 = vpop.f32.mrf.mxu3  ;;  %v834_v6 = vpop.f32.mrf.mxu0  ;;  %v656_v63 = vld [vmem:[#allocation2 + $0xf8] sm:$0xff] }
 0x19f   : > { %v1208_v7 = vadd.f32 %v1171_v5, %v982_v0  ;;  %v919_v8 = vadd.f32 %v834_v6, %v645_v1  ;;  %v883_v9 = vpop.f32.mrf.mxu1 }
 0x1a0   : > { %1239 = vst [vmem:[#allocation3 + $0x10] sm:$0xff] %v1207_v4  ;;  %v920_v10 = vadd.f32 %v883_v9, %v646_v3  ;;  %v657_v9 = vld [vmem:[#allocation2 + $0x20] sm:$0xff] }
 0x1a1   : > { %1240 = vst [vmem:[#allocation3 + $0x70] sm:$0xff] %v1208_v7  ;;  %v993_v7 = vld [vmem:[#allocation3 + $0xb8] sm:$0xff] }
 0x1a2   : > { %951 = vst [vmem:[#allocation2 + $0x40] sm:$0xff] %v919_v8  ;;  %v994_v8 = vld [vmem:[#allocation3] sm:$0xff] }
 0x1a3   : > { %952 = vst [vmem:[#allocation2 + $0xc8] sm:$0xff] %v920_v10 }
 0x1a5   : > { %v1124_v14 = vpop.f32.mrf.mxu2 }
 0x1a6   : > { %v1209_v16 = vadd.f32 %v1124_v14, %v983_v11  ;;  %v1173_v17 = vpop.f32.mrf.mxu3  ;;  %v837_v18 = vpop.f32.mrf.mxu0  ;;  %v658_v11 = vld [vmem:[#allocation2 + $0x98] sm:$0xff] }
 0x1a7   : > { %v1210_v19 = vadd.f32 %v1173_v17, %v984_v12  ;;  %v921_v20 = vadd.f32 %v837_v18, %v647_v13  ;;  %v886_v21 = vpop.f32.mrf.mxu1 }
 0x1a8   : > { %1241 = vst [vmem:[#allocation3 + $0x50] sm:$0xff] %v1209_v16  ;;  %v922_v22 = vadd.f32 %v886_v21, %v648_v15 }
 0x1a9   : > { %1242 = vst [vmem:[#allocation3 + $0xa0] sm:$0xff] %v1210_v19  ;;  %v995_v19 = vld [vmem:[#allocation3 + $0x28] sm:$0xff] }
 0x1aa   : > { %953 = vst [vmem:[#allocation2 + $0xe0] sm:$0xff] %v921_v20  ;;  %v996_v20 = vld [vmem:[#allocation3 + $0x98] sm:$0xff] }
 0x1ab   : > { %954 = vst [vmem:[#allocation2 + $0x90] sm:$0xff] %v922_v22 }
 0x1ad   : > { %v1127_v26 = vpop.f32.mrf.mxu2 }
 0x1ae   : > { %v1211_v28 = vadd.f32 %v1127_v26, %v985_v23  ;;  %v1176_v29 = vpop.f32.mrf.mxu3  ;;  %v839_v30 = vpop.f32.mrf.mxu0 }
 0x1af   : > { %v1212_v31 = vadd.f32 %v1176_v29, %v986_v24  ;;  %v923_v32 = vadd.f32 %v839_v30, %v649_v25  ;;  %v888_v33 = vpop.f32.mrf.mxu1 }
 0x1b0   : > { %1243 = vst [vmem:[#allocation3 + $0xd8] sm:$0xff] %v1211_v28  ;;  %v924_v34 = vadd.f32 %v888_v33, %v650_v27 }
 0x1b1   : > { %1244 = vst [vmem:[#allocation3 + $0x30] sm:$0xff] %v1212_v31 }
 0x1b2   : > { %955 = vst [vmem:[#allocation2 + $0x70] sm:$0xff] %v923_v32 }
 0x1b3   : > { %956 = vst [vmem:[#allocation2 + $0xc0] sm:$0xff] %v924_v34 }
 0x1b5   : > { %v1129_v38 = vpop.f32.mrf.mxu2 }
 0x1b6   : > { %v1213_v40 = vadd.f32 %v1129_v38, %v987_v35  ;;  %v1178_v41 = vpop.f32.mrf.mxu3  ;;  %v842_v42 = vpop.f32.mrf.mxu0 }
 0x1b7   : > { %v1214_v43 = vadd.f32 %v1178_v41, %v988_v36  ;;  %v925_v44 = vadd.f32 %v842_v42, %v651_v37  ;;  %v891_v45 = vpop.f32.mrf.mxu1 }
 0x1b8   : > { %1245 = vst [vmem:[#allocation3 + $0x20] sm:$0xff] %v1213_v40  ;;  %v926_v46 = vadd.f32 %v891_v45, %v652_v39 }
 0x1b9   : > { %1246 = vst [vmem:[#allocation3 + $0xf0] sm:$0xff] %v1214_v43 }
 0x1ba   : > { %957 = vst [vmem:[#allocation2 + $0xa8] sm:$0xff] %v925_v44 }
 0x1bb   : > { %958 = vst [vmem:[#allocation2 + $0xd0] sm:$0xff] %v926_v46 }
 0x1bd   : > { %v1132_v50 = vpop.f32.mrf.mxu2 }
 0x1be   : > { %v1215_v52 = vadd.f32 %v1132_v50, %v989_v47  ;;  %v1181_v53 = vpop.f32.mrf.mxu3  ;;  %v844_v54 = vpop.f32.mrf.mxu0 }
 0x1bf   : > { %v1216_v55 = vadd.f32 %v1181_v53, %v990_v48  ;;  %v927_v56 = vadd.f32 %v844_v54, %v653_v49  ;;  %v893_v57 = vpop.f32.mrf.mxu1 }
 0x1c0   : > { %1247 = vst [vmem:[#allocation3 + $0x88] sm:$0xff] %v1215_v52  ;;  %v928_v58 = vadd.f32 %v893_v57, %v654_v51 }
 0x1c1   : > { %1248 = vst [vmem:[#allocation3 + $0x48] sm:$0xff] %v1216_v55 }
 0x1c2   : > { %959 = vst [vmem:[#allocation2 + $0x10] sm:$0xff] %v927_v56 }
 0x1c3   : > { %960 = vst [vmem:[#allocation2 + $0x28] sm:$0xff] %v928_v58 }
 0x1c5   : > { %v1134_v62 = vpop.f32.mrf.mxu2 }
 0x1c6   : > { %v1217_v0 = vadd.f32 %v1134_v62, %v991_v59  ;;  %v1183_v1 = vpop.f32.mrf.mxu3  ;;  %v847_v2 = vpop.f32.mrf.mxu0 }
 0x1c7   : > { %v1218_v3 = vadd.f32 %v1183_v1, %v992_v60  ;;  %v929_v4 = vadd.f32 %v847_v2, %v655_v61  ;;  %v896_v5 = vpop.f32.mrf.mxu1 }
 0x1c8   : > { %1249 = vst [vmem:[#allocation3 + $0xf8] sm:$0xff] %v1217_v0  ;;  %v930_v6 = vadd.f32 %v896_v5, %v656_v63 }
 0x1c9   : > { %1250 = vst [vmem:[#allocation3 + $0xc0] sm:$0xff] %v1218_v3 }
 0x1ca   : > { %961 = vst [vmem:[#allocation2 + $0xa0] sm:$0xff] %v929_v4 }
 0x1cb   : > { %962 = vst [vmem:[#allocation2 + $0xf8] sm:$0xff] %v930_v6 }
 0x1cd   : > { %v1137_v10 = vpop.f32.mrf.mxu2 }
 0x1ce   : > { %v1219_v12 = vadd.f32 %v1137_v10, %v993_v7  ;;  %v1186_v13 = vpop.f32.mrf.mxu3  ;;  %v849_v14 = vpop.f32.mrf.mxu0 }
 0x1cf   : > { %v1220_v15 = vadd.f32 %v1186_v13, %v994_v8  ;;  %v931_v16 = vadd.f32 %v849_v14, %v657_v9  ;;  %v898_v17 = vpop.f32.mrf.mxu1 }
 0x1d0   : > { %1251 = vst [vmem:[#allocation3 + $0xb8] sm:$0xff] %v1219_v12  ;;  %v932_v18 = vadd.f32 %v898_v17, %v658_v11 }
 0x1d1   : > { %1252 = vst [vmem:[#allocation3] sm:$0xff] %v1220_v15 }
 0x1d2   : > { %963 = vst [vmem:[#allocation2 + $0x20] sm:$0xff] %v931_v16 }
 0x1d3   : > { %964 = vst [vmem:[#allocation2 + $0x98] sm:$0xff] %v932_v18 }
 0x1d5   : > { %v1139_v21 = vpop.f32.mrf.mxu2  ;;  %1258 = sbr.rel (%p2438_p5) target bundleno = 641 (0x281), region = 157 }
 0x1d6   : > { %v1221_v22 = vadd.f32 %v1139_v21, %v995_v19  ;;  %v1188_v23 = vpop.f32.mrf.mxu3 }
 0x1d7   : > { %v1222_v24 = vadd.f32 %v1188_v23, %v996_v20 }
 0x1d8   : > { %1253 = vst [vmem:[#allocation3 + $0x28] sm:$0xff] %v1221_v22 }
 0x1d9   : > { %1254 = vst [vmem:[#allocation3 + $0x98] sm:$0xff] %v1222_v24 }
 0x1da   : > { %v3226_v25 = vld [vmem:[#allocation2 + $0xb0] sm:$0xff]  ;;  %v3228_v26 = vld [vmem:[#allocation2] sm:$0xff]  ;;  %v3232_v29 = vld [vmem:[#allocation2 + $0xd8] sm:$0xff] }
 0x1db   : > { %v2439_v27 = vmul.f32 -1.442695, %v3226_v25  ;;  %v2440_v28 = vmul.f32 -1.442695, %v3228_v26  ;;  %v3234_v30 = vld [vmem:[#allocation2 + $0x18] sm:$0xff]  ;;  %v3238_v33 = vld [vmem:[#allocation2 + $0x50] sm:$0xff] }
 0x1dc   : > { %v2441_v31 = vmul.f32 -1.442695, %v3232_v29  ;;  %v2442_v32 = vmul.f32 -1.442695, %v3234_v30  ;;  %v3240_v34 = vld [vmem:[#allocation2 + $0x68] sm:$0xff]  ;;  %v3244_v37 = vld [vmem:[#allocation2 + $0x30] sm:$0xff] }
 0x1dd   : > { %2627 = vpow2.f32 %v2439_v27  ;;  %v2443_v35 = vmul.f32 -1.442695, %v3238_v33  ;;  %v2444_v36 = vmul.f32 -1.442695, %v3240_v34  ;;  %v3246_v38 = vld [vmem:[#allocation2 + $0x48] sm:$0xff]  ;;  %v3250_v41 = vld [vmem:[#allocation2 + $0x80] sm:$0xff] }
 0x1de   : > { %2629 = vpow2.f32 %v2440_v28  ;;  %v2445_v39 = vmul.f32 -1.442695, %v3244_v37  ;;  %v2446_v40 = vmul.f32 -1.442695, %v3246_v38  ;;  %v2447_v47 = vmul.f32 -1.442695, %v3250_v41 }
 0x1df   : > { %2631 = vpow2.f32 %v2441_v31  ;;  %v3259_v50 = vld [vmem:[#allocation2 + $0x88] sm:$0xff]  ;;  %v1296_v27 = vld [vmem:[#allocation3 + $0x90] sm:$0xff] }
 0x1e0   : > { %2633 = vpow2.f32 %v2442_v32  ;;  %v3273_v59 = vmul.f32 -1.442695, %v3259_v50 }
 0x1e1   : > { %2635 = vpow2.f32 %v2443_v35 }
 0x1e2   : > { %2637 = vpow2.f32 %v2444_v36 }
 0x1e3   : > { %v2628_v42 = vpop.eup %2627  ;;  %2639 = vpow2.f32 %v2445_v39 }
 0x1e4   : > { %v2630_v43 = vpop.eup %2629  ;;  %v3252_v44 = vadd.f32 1.0, %v2628_v42  ;;  %2641 = vpow2.f32 %v2446_v40 }
 0x1e5   : > { %v2632_v45 = vpop.eup %2631  ;;  %v3254_v46 = vadd.f32 1.0, %v2630_v43 }
 0x1e6   : > { %v2634_v48 = vpop.eup %2633  ;;  %2643 = vrcp.f32 %v3252_v44  ;;  %v1462_v49 = vand.u32 2147483648, %v3252_v44  ;;  %v1460_v52 = vand.u32 2147483647, %v3252_v44  ;;  %v3265_v56 = vadd.f32 1.0, %v2632_v45 }
 0x1e7   : > { %v2636_v51 = vpop.eup %2635  ;;  %2645 = vrcp.f32 %v3254_v46  ;;  %v1475_v54 = vand.u32 2147483647, %v3254_v46  ;;  %v1477_v55 = vand.u32 2147483648, %v3254_v46  ;;  %v3267_v57 = vadd.f32 1.0, %v2634_v48 }
 0x1e8   : > { %v2638_v53 = vpop.eup %2637  ;;  %vm1456_vm0 = vweird.f32 %v3252_v44  ;;  %v3270_v58 = vadd.f32 1.0, %v2636_v51  ;;  %2647 = vpow2.f32 %v2447_v47  ;;  %v3275_v61 = vor.u32 1.1754944e-38, %v1462_v49 }
 0x1e9   : > { %v2640_v60 = vpop.eup %2639  ;;  %vm1471_vm1 = vweird.f32 %v3254_v46  ;;  %2649 = vrcp.f32 %v3265_v56  ;;  %v1492_v62 = vand.u32 2147483648, %v3265_v56  ;;  %vm3280_vm2 = vcmp.eq.f32.partialorder %v1460_v52, 8.507059e+37 }
 0x1ea   : > { %v2642_v63 = vpop.eup %2641  ;;  %v1490_v1 = vand.u32 2147483647, %v3265_v56  ;;  %2651 = vrcp.f32 %v3267_v57  ;;  %v1507_v2 = vand.u32 2147483648, %v3267_v57  ;;  %v3287_v3 = vadd.f32 1.0, %v2638_v53 }
 0x1eb   : > { %vm3289_vm3 = vcmp.eq.f32.partialorder %v1475_v54, 8.507059e+37  ;;  %v1478_v6 = vor.u32 1.1754944e-38, %v1477_v55  ;;  %v1505_v7 = vand.u32 2147483647, %v3267_v57  ;;  %2653 = vrcp.f32 %v3270_v58  ;;  %v1291_v55 = vld [vmem:[#allocation3 + $0x80] sm:$0xff] }
 0x1ec   : > { %v2644_v4 = vpop.eup %2643  ;;  %vm1486_vm4 = vweird.f32 %v3265_v56  ;;  %v3297_v10 = vor.u32 1.1754944e-38, %v1492_v62  ;;  %vm1501_vm5 = vweird.f32 %v3267_v57  ;;  %vm1516_vm6 = vweird.f32 %v3270_v58 }
 0x1ed   : > { %v2646_v8 = vpop.eup %2645  ;;  %v1452_v9 = vmul.f32 %v2644_v4, %v3252_v44  ;;  %v1520_v12 = vand.u32 2147483647, %v3270_v58  ;;  %v1522_v13 = vand.u32 2147483648, %v3270_v58  ;;  %vm1457_vm7 = vweird.f32 %v2644_v4 }
 0x1ee   : > { %v1467_v11 = vmul.f32 %v2646_v8, %v3254_v46  ;;  %v3304_v14 = vpop.eup %2647  ;;  %vm3306_vm8 = vcmp.eq.f32.partialorder %v1490_v1, 8.507059e+37  ;;  %v3310_v17 = vor.u32 1.1754944e-38, %v1507_v2  ;;  %2655 = vrcp.f32 %v3287_v3  ;;  %vm3328_vm13 = vmor %vm1456_vm0, %vm1457_vm7 }
 0x1ef   : > { %v1453_v15 = vsub.f32 1.0, %v1452_v9  ;;  %v2650_v18 = vpop.eup %2649  ;;  %vm1472_vm9 = vweird.f32 %v2646_v8  ;;  %vm3313_vm10 = vcmp.eq.f32.partialorder %v1505_v7, 8.507059e+37  ;;  %v1535_v21 = vand.u32 2147483647, %v3287_v3 }
 0x1f0   : > { %v1468_v19 = vsub.f32 1.0, %v1467_v11  ;;  %v2652_v22 = vpop.eup %2651  ;;  %v1482_v24 = vmul.f32 %v2650_v18, %v3265_v56  ;;  %vm3320_vm12 = vcmp.eq.f32.partialorder %v1520_v12, 8.507059e+37  ;;  %v1523_v28 = vor.u32 1.1754944e-38, %v1522_v13  ;;  %vm3336_vm11 = vmor %vm1471_vm1, %vm1472_vm9  ;;  %v1293_v13 = vld [vmem:[#allocation3 + $0xe8] sm:$0xff] }
 0x1f1   : > { %v1454_v23 = vmul.f32 %v2644_v4, %v1453_v15  ;;  %v1537_v31 = vand.u32 2147483648, %v3287_v3  ;;  %v2654_v32 = vpop.eup %2653  ;;  %vm1487_vm14 = vweird.f32 %v2650_v18  ;;  %v1497_v39 = vmul.f32 %v2652_v22, %v3267_v57 }
 0x1f2   : > { %v1469_v36 = vmul.f32 %v2646_v8, %v1468_v19  ;;  %vm1502_vm15 = vweird.f32 %v2652_v22  ;;  %v1483_v43 = vsub.f32 1.0, %v1482_v24  ;;  %v1512_v44 = vmul.f32 %v2654_v32, %v3270_v58  ;;  %vm3360_vm1 = vmor %vm1486_vm4, %vm1487_vm14  ;;  %v3391_v19 = vld [vmem:[#allocation2 + $0xe8] sm:$0xff] }
 0x1f3   : > { %v1455_v40 = vadd.f32 %v2644_v4, %v1454_v23  ;;  %vm1517_vm0 = vweird.f32 %v2654_v32  ;;  %v1498_v47 = vsub.f32 1.0, %v1497_v39  ;;  %vm3341_vm7 = vcmp.eq.f32.partialorder %v1535_v21, 8.507059e+37  ;;  %v1294_v23 = vld [vmem:[#allocation3 + $0x78] sm:$0xff] }
 0x1f4   : > { %v1470_v45 = vadd.f32 %v2646_v8, %v1469_v36  ;;  %v3345_v49 = vadd.f32 1.0, %v2640_v60  ;;  %v3347_v51 = vadd.f32 1.0, %v2642_v63  ;;  %v2656_v52 = vpop.eup %2655  ;;  %v1484_v53 = vmul.f32 %v2650_v18, %v1483_v43  ;;  %vm3379_vm4 = vmor %vm1516_vm6, %vm1517_vm0 }
 0x1f5   : > { %v1459_v46 = vsel %vm3328_vm13, %v2644_v4, %v1455_v40  ;;  %v1513_v54 = vsub.f32 1.0, %v1512_v44  ;;  %2657 = vpow2.f32 %v3273_v59  ;;  %v1499_v63 = vmul.f32 %v2652_v22, %v1498_v47  ;;  %v1292_v4 = vld [vmem:[#allocation3 + $0xc8] sm:$0xff] }
 0x1f6   : > { %v1464_v62 = vsel %vm3280_vm2, %v3275_v61, %v1459_v46  ;;  %v1474_v1 = vsel %vm3336_vm11, %v2646_v8, %v1470_v45  ;;  %v1527_v2 = vmul.f32 %v2656_v52, %v3287_v3  ;;  %v1485_v61 = vadd.f32 %v2650_v18, %v1484_v53  ;;  %vm3371_vm2 = vmor %vm1501_vm5, %vm1502_vm15  ;;  %v1295_v40 = vld [vmem:[#allocation3 + $0x8] sm:$0xff]  ;;  %v3425_v53 = vld [vmem:[#allocation2 + $0x60] sm:$0xff] }
 0x1f7   : > { %v1479_v59 = vsel %vm3289_vm3, %v1478_v6, %v1474_v1  ;;  %v1931_v0 = vmul.f32 %v1464_v62, %v3226_v25  ;;  %v1514_v56 = vmul.f32 %v2654_v32, %v1513_v54  ;;  %v1500_v9 = vadd.f32 %v2652_v22, %v1499_v63 }
 0x1f8   : > { %v1932_v8 = vmul.f32 %v1479_v59, %v3228_v26  ;;  %v1528_v25 = vsub.f32 1.0, %v1527_v2  ;;  %vm1532_vm3 = vweird.f32 %v2656_v52  ;;  %v1489_v57 = vsel %vm3360_vm1, %v2650_v18, %v1485_v61 }
 0x1f9   : > { %v1963_v6 = vmul.f32 %v1931_v0, %v1291_v55  ;;  %v1515_v11 = vadd.f32 %v2654_v32, %v1514_v56  ;;  %2659 = vrcp.f32 %v3345_v49  ;;  %v1494_v26 = vsel %vm3306_vm8, %v3297_v10, %v1489_v57 }
 0x1fa   : > { %v1964_v12 = vmul.f32 %v1932_v8, %v1292_v4  ;;  %v1504_v58 = vsel %vm3371_vm2, %v2652_v22, %v1500_v9  ;;  %v1529_v15 = vmul.f32 %v2656_v52, %v1528_v25  ;;  %v1933_v24 = vmul.f32 %v1494_v26, %v3232_v29  ;;  %v3406_v22 = vld [vmem:[#allocation2 + $0xb8] sm:$0xff] }
 0x1fb   : > { %v2658_v21 = vpop.eup %2657  ;;  %v1509_v18 = vsel %vm3313_vm10, %v3310_v17, %v1504_v58  ;;  %v1519_v35 = vsel %vm3379_vm4, %v2654_v32, %v1515_v11  ;;  %vm4139_vm5 = vweird.f32 %v3287_v3  ;;  %v1538_v16 = vor.u32 1.1754944e-38, %v1537_v31  ;;  %v3463_v11 = vld [vmem:[#allocation2 + $0x8] sm:$0xff] }
 0x1fc   : > { %vm3402_vm6 = vmor %vm4139_vm5, %vm1532_vm3  ;;  %v1995_v36 = vpack.c.bf16 %v1964_v12, %v1963_v6  ;;  %v1934_v39 = vmul.f32 %v1509_v18, %v3234_v30  ;;  %v1524_v17 = vsel %vm3320_vm12, %v1523_v28, %v1519_v35  ;;  %v1530_v29 = vadd.f32 %v2656_v52, %v1529_v15 }
 0x1fd   : > { %v1965_v20 = vmul.f32 %v1933_v24, %v1293_v13  ;;  %v1935_v32 = vmul.f32 %v1524_v17, %v3238_v33  ;;  %v2449_v3 = vmul.f32 -1.442695, %v3391_v19  ;;  %2661 = vrcp.f32 %v3347_v51 }
 0x1fe   : > { %2011 = vst [vmem:[%s3086_s10] sm:$0xff] %v1995_v36  ;;  %v1966_v42 = vmul.f32 %v1934_v39, %v1294_v23  ;;  %v1534_v31 = vsel %vm3402_vm6, %v2656_v52, %v1530_v29  ;;  %v2450_v43 = vmul.f32 -1.442695, %v3406_v22  ;;  %vm1546_vm8 = vweird.f32 %v3345_v49 }
 0x1ff   : > { %v2660_v30 = vpop.eup %2659  ;;  %v1539_v28 = vsel %vm3341_vm7, %v1538_v16, %v1534_v31  ;;  %v1550_v33 = vand.u32 2147483647, %v3345_v49  ;;  %v1552_v44 = vand.u32 2147483648, %v3345_v49  ;;  %v1967_v52 = vmul.f32 %v1935_v32, %v1295_v40  ;;  %v3484_v16 = vld [vmem:[#allocation2 + $0x78] sm:$0xff] }
 0x200   : > { %v1996_v45 = vpack.c.bf16 %v1966_v42, %v1965_v20  ;;  %v1936_v47 = vmul.f32 %v1539_v28, %v3240_v34  ;;  %v1542_v46 = vmul.f32 %v2660_v30, %v3345_v49  ;;  %vm1547_vm9 = vweird.f32 %v2660_v30  ;;  %v3435_v34 = vld [vmem:[#allocation2 + $0xf0] sm:$0xff] }
 0x201   : > { %v1565_v54 = vand.u32 2147483647, %v3347_v51  ;;  %v3429_v48 = vadd.f32 1.0, %v3304_v14  ;;  %v3431_v55 = vadd.f32 1.0, %v2658_v21  ;;  %v1567_v60 = vand.u32 2147483648, %v3347_v51  ;;  %vm3448_vm12 = vmor %vm1546_vm8, %vm1547_vm9 }
 0x202   : > { %2012 = vst [vmem:[%s3086_s10 + $0x8] sm:$0xff] %v1996_v45  ;;  %v1968_v62 = vmul.f32 %v1936_v47, %v1296_v27  ;;  %v1543_v1 = vsub.f32 1.0, %v1542_v46  ;;  %2663 = vpow2.f32 %v2449_v3  ;;  %vm3437_vm10 = vcmp.eq.f32.partialorder %v1550_v33, 8.507059e+37  ;;  %v1298_v27 = vld [vmem:[#allocation3 + $0xa8] sm:$0xff]  ;;  %v1301_v46 = vld [vmem:[#allocation3 + $0x38] sm:$0xff] }
 0x203   : > { %vm1561_vm11 = vweird.f32 %v3347_v51  ;;  %2665 = vrcp.f32 %v3429_v48  ;;  %v2451_v14 = vmul.f32 -1.442695, %v3425_v53  ;;  %v2662_v2 = vpop.eup %2661  ;;  %v1553_v0 = vor.u32 1.1754944e-38, %v1552_v44 }
 0x204   : > { %v1997_v4 = vpack.c.bf16 %v1968_v62, %v1967_v52  ;;  %v1544_v59 = vmul.f32 %v2660_v30, %v1543_v1  ;;  %v1580_v61 = vand.u32 2147483647, %v3429_v48  ;;  %v1557_v56 = vmul.f32 %v2662_v2, %v3347_v51  ;;  %v1297_v51 = vld [vmem:[#allocation3 + $0x58] sm:$0xff] }
 0x205   : > { %vm3453_vm13 = vcmp.eq.f32.partialorder %v1565_v54, 8.507059e+37  ;;  %2667 = vrcp.f32 %v3431_v55  ;;  %v2452_v9 = vmul.f32 -1.442695, %v3435_v34  ;;  %v1568_v25 = vor.u32 1.1754944e-38, %v1567_v60 }
 0x206   : > { %2013 = vst [vmem:[%s3086_s10 + $0x10] sm:$0xff] %v1997_v4  ;;  %v1545_v5 = vadd.f32 %v2660_v30, %v1544_v59  ;;  %vm1576_vm14 = vweird.f32 %v3429_v48  ;;  %v1582_v49 = vand.u32 2147483648, %v3429_v48  ;;  %v1558_v6 = vsub.f32 1.0, %v1557_v56 }
 0x207   : > { %vm1562_vm15 = vweird.f32 %v2662_v2  ;;  %v1595_v57 = vand.u32 2147483647, %v3431_v55  ;;  %2669 = vpow2.f32 %v2450_v43  ;;  %vm3467_vm0 = vcmp.eq.f32.partialorder %v1580_v61, 8.507059e+37 }
 0x208   : > { %v2664_v12 = vpop.eup %2663  ;;  %v1549_v13 = vsel %vm3448_vm12, %v2660_v30, %v1545_v5  ;;  %vm1591_vm7 = vweird.f32 %v3431_v55  ;;  %2671 = vpow2.f32 %v2451_v14  ;;  %v1559_v21 = vmul.f32 %v2662_v2, %v1558_v6  ;;  %vm3479_vm1 = vmor %vm1561_vm11, %vm1562_vm15 }
 0x209   : > { %v2666_v58 = vpop.eup %2665  ;;  %v1554_v15 = vsel %vm3437_vm10, %v1553_v0, %v1549_v13  ;;  %v1597_v23 = vand.u32 2147483648, %v3431_v55  ;;  %v3475_v18 = vadd.f32 1.0, %v2664_v12  ;;  %v1583_v10 = vor.u32 1.1754944e-38, %v1582_v49 }
 0x20a   : > { %v1572_v35 = vmul.f32 %v2666_v58, %v3429_v48  ;;  %2673 = vpow2.f32 %v2452_v9  ;;  %v2453_v36 = vmul.f32 -1.442695, %v3463_v11  ;;  %v1560_v17 = vadd.f32 %v2662_v2, %v1559_v21 }
 0x20b   : > { %v2668_v39 = vpop.eup %2667  ;;  %v1937_v29 = vmul.f32 %v1554_v15, %v3244_v37  ;;  %vm3488_vm2 = vcmp.eq.f32.partialorder %v1595_v57, 8.507059e+37  ;;  %2675 = vrcp.f32 %v3475_v18  ;;  %vm1577_vm4 = vweird.f32 %v2666_v58  ;;  %v1300_v57 = vld [vmem:[#allocation3 + $0xb0] sm:$0xff] }
 0x20c   : > { %v1573_v40 = vsub.f32 1.0, %v1572_v35  ;;  %v1587_v32 = vmul.f32 %v2668_v39, %v3431_v55  ;;  %v1610_v3 = vand.u32 2147483647, %v3475_v18  ;;  %v1564_v31 = vsel %vm3479_vm1, %v2662_v2, %v1560_v17  ;;  %vm3506_vm5 = vmor %vm1576_vm14, %vm1577_vm4  ;;  %v1299_v55 = vld [vmem:[#allocation3 + $0xd0] sm:$0xff] }
 0x20d   : > { %v2670_v42 = vpop.eup %2669  ;;  %vm1592_vm3 = vweird.f32 %v2668_v39  ;;  %v1598_v43 = vor.u32 1.1754944e-38, %v1597_v23  ;;  %v2454_v37 = vmul.f32 -1.442695, %v3484_v16  ;;  %v1569_v28 = vsel %vm3453_vm13, %v1568_v25, %v1564_v31 }
 0x20e   : > { %v2672_v30 = vpop.eup %2671  ;;  %v1574_v33 = vmul.f32 %v2666_v58, %v1573_v40  ;;  %v1588_v44 = vsub.f32 1.0, %v1587_v32  ;;  %v3500_v45 = vadd.f32 1.0, %v2670_v42  ;;  %v1938_v47 = vmul.f32 %v1569_v28, %v3246_v38  ;;  %vm3521_vm9 = vmor %vm1591_vm7, %vm1592_vm3  ;;  %v3575_v28 = vld [vmem:[#allocation2 + $0x38] sm:$0xff] }
 0x20f   : > { %v1969_v52 = vmul.f32 %v1937_v29, %v1297_v51  ;;  %vm1606_vm6 = vweird.f32 %v3475_v18  ;;  %2677 = vpow2.f32 %v2453_v36  ;;  %vm3511_vm8 = vcmp.eq.f32.partialorder %v1610_v3, 8.507059e+37 }
 0x210   : > { %v2674_v54 = vpop.eup %2673  ;;  %v1575_v62 = vadd.f32 %v2666_v58, %v1574_v33  ;;  %v1589_v1 = vmul.f32 %v2668_v39, %v1588_v44  ;;  %2679 = vrcp.f32 %v3500_v45  ;;  %v3516_v38 = vadd.f32 1.0, %v2672_v30 }
 0x211   : > { %v2676_v63 = vpop.eup %2675  ;;  %v1970_v48 = vmul.f32 %v1938_v47, %v1298_v27  ;;  %v1612_v2 = vand.u32 2147483648, %v3475_v18  ;;  %v1625_v4 = vand.u32 2147483647, %v3500_v45  ;;  %2681 = vpow2.f32 %v2454_v37 }
 0x212   : > { %v1579_v59 = vsel %vm3506_vm5, %v2666_v58, %v1575_v62  ;;  %v1590_v0 = vadd.f32 %v2668_v39, %v1589_v1  ;;  %v1602_v61 = vmul.f32 %v2676_v63, %v3475_v18  ;;  %v3530_v7 = vadd.f32 1.0, %v2674_v54 }
 0x213   : > { %v1998_v56 = vpack.c.bf16 %v1970_v48, %v1969_v52  ;;  %v1584_v8 = vsel %vm3467_vm0, %v1583_v10, %v1579_v59  ;;  %vm1607_vm10 = vweird.f32 %v2676_v63  ;;  %v1627_v9 = vand.u32 2147483648, %v3500_v45  ;;  %v1302_v59 = vld [vmem:[#allocation3 + $0x40] sm:$0xff] }
 0x214   : > { %v1594_v5 = vsel %vm3521_vm9, %v2668_v39, %v1590_v0  ;;  %v1939_v25 = vmul.f32 %v1584_v8, %v3250_v41  ;;  %v1603_v49 = vsub.f32 1.0, %v1602_v61  ;;  %2683 = vrcp.f32 %v3516_v38  ;;  %vm3549_vm12 = vmor %vm1606_vm6, %vm1607_vm10 }
 0x215   : > { %v2678_v6 = vpop.eup %2677  ;;  %2014 = vst [vmem:[%s3086_s10 + $0x18] sm:$0xff] %v1998_v56  ;;  %v1599_v12 = vsel %vm3488_vm2, %v1598_v43, %v1594_v5  ;;  %v1613_v13 = vor.u32 1.1754944e-38, %v1612_v2  ;;  %vm1621_vm11 = vweird.f32 %v3500_v45  ;;  %v1640_v26 = vand.u32 2147483647, %v3516_v38  ;;  %v3598_v2 = vld [vmem:[#allocation2 + $0x58] sm:$0xff] }
 0x216   : > { %v2680_v58 = vpop.eup %2679  ;;  %v1940_v15 = vmul.f32 %v1599_v12, %v3259_v50  ;;  %v1971_v21 = vmul.f32 %v1939_v25, %v1299_v55  ;;  %v1604_v23 = vmul.f32 %v2676_v63, %v1603_v49  ;;  %2685 = vrcp.f32 %v3530_v7 }
 0x217   : > { %v2682_v41 = vpop.eup %2681  ;;  %v1617_v35 = vmul.f32 %v2680_v58, %v3500_v45  ;;  %vm3554_vm13 = vcmp.eq.f32.partialorder %v1625_v4, 8.507059e+37  ;;  %v1628_v36 = vor.u32 1.1754944e-38, %v1627_v9  ;;  %v1642_v50 = vand.u32 2147483648, %v3516_v38  ;;  %v3600_v4 = vld [vmem:[#allocation2 + $0x40] sm:$0xff] }
 0x218   : > { %v1972_v39 = vmul.f32 %v1940_v15, %v1300_v57  ;;  %v1605_v17 = vadd.f32 %v2676_v63, %v1604_v23  ;;  %vm1636_vm14 = vweird.f32 %v3516_v38  ;;  %v1655_v29 = vand.u32 2147483647, %v3530_v7  ;;  %v3632_v23 = vld [vmem:[#allocation2 + $0xc8] sm:$0xff] }
 0x219   : > { %v1618_v18 = vsub.f32 1.0, %v1617_v35  ;;  %vm1622_vm15 = vweird.f32 %v2680_v58  ;;  %vm3561_vm0 = vcmp.eq.f32.partialorder %v1640_v26, 8.507059e+37  ;;  %v3565_v51 = vadd.f32 1.0, %v2678_v6 }
 0x21a   : > { %v2684_v40 = vpop.eup %2683  ;;  %v1999_v32 = vpack.c.bf16 %v1972_v39, %v1971_v21  ;;  %v1609_v3 = vsel %vm3549_vm12, %v2676_v63, %v1605_v17  ;;  %v1657_v42 = vand.u32 2147483648, %v3530_v7  ;;  %v3570_v31 = vadd.f32 1.0, %v2682_v41  ;;  %vm3581_vm7 = vmor %vm1621_vm11, %vm1622_vm15 }
 0x21b   : > { %v1614_v43 = vsel %vm3511_vm8, %v1613_v13, %v1609_v3  ;;  %v1619_v37 = vmul.f32 %v2680_v58, %v1618_v18  ;;  %v1632_v30 = vmul.f32 %v2684_v40, %v3516_v38  ;;  %v1643_v27 = vor.u32 1.1754944e-38, %v1642_v50  ;;  %v1304_v50 = vld [vmem:[#allocation3 + $0x60] sm:$0xff] }
 0x21c   : > { %v2686_v33 = vpop.eup %2685  ;;  %2015 = vst [vmem:[%s3086_s10 + $0x20] sm:$0xff] %v1999_v32  ;;  %v1941_v47 = vmul.f32 %v1614_v43, %v3391_v19  ;;  %vm1651_vm1 = vweird.f32 %v3530_v7  ;;  %vm3587_vm2 = vcmp.eq.f32.partialorder %v1655_v29, 8.507059e+37  ;;  %2687 = vrcp.f32 %v3565_v51 }
 0x21d   : > { %v1620_v54 = vadd.f32 %v2680_v58, %v1619_v37  ;;  %v1633_v62 = vsub.f32 1.0, %v1632_v30  ;;  %vm1637_vm4 = vweird.f32 %v2684_v40  ;;  %v1647_v45 = vmul.f32 %v2686_v33, %v3530_v7 }
 0x21e   : > { %v1658_v1 = vor.u32 1.1754944e-38, %v1657_v42  ;;  %v1670_v60 = vand.u32 2147483647, %v3565_v51  ;;  %2689 = vrcp.f32 %v3570_v31  ;;  %v2455_v19 = vmul.f32 -1.442695, %v3575_v28  ;;  %vm3607_vm5 = vmor %vm1636_vm14, %vm1637_vm4 }
 0x21f   : > { %v1624_v63 = vsel %vm3581_vm7, %v2680_v58, %v1620_v54  ;;  %v1634_v48 = vmul.f32 %v2684_v40, %v1633_v62  ;;  %v1648_v14 = vsub.f32 1.0, %v1647_v45  ;;  %vm1652_vm3 = vweird.f32 %v2686_v33  ;;  %v1303_v58 = vld [vmem:[#allocation3 + $0xe0] sm:$0xff]  ;;  %v3668_v62 = vld [vmem:[#allocation2 + $0x90] sm:$0xff] }
 0x220   : > { %v1629_v0 = vsel %vm3554_vm13, %v1628_v36, %v1624_v63  ;;  %v1973_v61 = vmul.f32 %v1941_v47, %v1301_v46  ;;  %vm1666_vm6 = vweird.f32 %v3565_v51  ;;  %v1672_v55 = vand.u32 2147483648, %v3565_v51  ;;  %vm3617_vm9 = vmor %vm1651_vm1, %vm1652_vm3  ;;  %v3637_v36 = vld [vmem:[#allocation2 + $0xe0] sm:$0xff]  ;;  %v3670_v45 = vld [vmem:[#allocation2 + $0x70] sm:$0xff] }
 0x221   : > { %v1942_v8 = vmul.f32 %v1629_v0, %v3406_v22  ;;  %v1635_v9 = vadd.f32 %v2684_v40, %v1634_v48  ;;  %v1649_v5 = vmul.f32 %v2686_v33, %v1648_v14  ;;  %vm1681_vm8 = vweird.f32 %v3570_v31  ;;  %v3678_v14 = vld [vmem:[#allocation2 + $0xc0] sm:$0xff] }
 0x222   : > { %v2688_v25 = vpop.eup %2687  ;;  %vm3621_vm10 = vcmp.eq.f32.partialorder %v1670_v60, 8.507059e+37  ;;  %2691 = vpow2.f32 %v2455_v19  ;;  %v2456_v6 = vmul.f32 -1.442695, %v3598_v2  ;;  %v2457_v22 = vmul.f32 -1.442695, %v3600_v4 }
 0x223   : > { %v1974_v57 = vmul.f32 %v1942_v8, %v1302_v59  ;;  %v1639_v12 = vsel %vm3607_vm5, %v2684_v40, %v1635_v9  ;;  %v1650_v13 = vadd.f32 %v2686_v33, %v1649_v5  ;;  %v1662_v7 = vmul.f32 %v2688_v25, %v3565_v51  ;;  %v1306_v8 = vld [vmem:[#allocation3 + $0x68] sm:$0xff] }
 0x224   : > { %v2690_v26 = vpop.eup %2689  ;;  %v1644_v15 = vsel %vm3561_vm0, %v1643_v27, %v1639_v12  ;;  %vm1667_vm11 = vweird.f32 %v2688_v25  ;;  %v1673_v21 = vor.u32 1.1754944e-38, %v1672_v55  ;;  %2693 = vpow2.f32 %v2456_v6 }
 0x225   : > { %v2000_v41 = vpack.c.bf16 %v1974_v57, %v1973_v61  ;;  %v1654_v24 = vsel %vm3617_vm9, %v2686_v33, %v1650_v13  ;;  %v1943_v35 = vmul.f32 %v1644_v15, %v3425_v53  ;;  %v1663_v10 = vsub.f32 1.0, %v1662_v7  ;;  %vm3649_vm12 = vmor %vm1666_vm6, %vm1667_vm11 }
 0x226   : > { %v1659_v39 = vsel %vm3587_vm2, %v1658_v1, %v1654_v24  ;;  %v1677_v17 = vmul.f32 %v2690_v26, %v3570_v31  ;;  %v1687_v29 = vand.u32 2147483648, %v3570_v31  ;;  %2695 = vpow2.f32 %v2457_v22 }
 0x227   : > { %2016 = vst [vmem:[%s3086_s10 + $0x28] sm:$0xff] %v2000_v41  ;;  %v1944_v18 = vmul.f32 %v1659_v39, %v3435_v34  ;;  %v1975_v20 = vmul.f32 %v1943_v35, %v1303_v58  ;;  %v1664_v40 = vmul.f32 %v2688_v25, %v1663_v10  ;;  %v2458_v32 = vmul.f32 -1.442695, %v3632_v23 }
 0x228   : > { %v2692_v53 = vpop.eup %2691  ;;  %v1678_v42 = vsub.f32 1.0, %v1677_v17  ;;  %vm1682_vm13 = vweird.f32 %v2690_v26  ;;  %v1685_v43 = vand.u32 2147483647, %v3570_v31  ;;  %v2459_v37 = vmul.f32 -1.442695, %v3637_v36  ;;  %v1305_v31 = vld [vmem:[#allocation3 + $0x18] sm:$0xff] }
 0x229   : > { %v1976_v30 = vmul.f32 %v1944_v18, %v1304_v50  ;;  %v1665_v34 = vadd.f32 %v2688_v25, %v1664_v40  ;;  %v3655_v27 = vadd.f32 1.0, %v2692_v53  ;;  %2697 = vpow2.f32 %v2458_v32  ;;  %vm3661_vm14 = vmor %vm1681_vm8, %vm1682_vm13 }
 0x22a   : > { %v2694_v33 = vpop.eup %2693  ;;  %v1679_v44 = vmul.f32 %v2690_v26, %v1678_v42  ;;  %v1688_v47 = vor.u32 1.1754944e-38, %v1687_v29  ;;  %vm1686_vm15 = vcmp.eq.f32.partialorder %v1685_v43, 8.507059e+37  ;;  %v2460_v61 = vmul.f32 -1.442695, %v3668_v62 }
 0x22b   : > { %v2001_v51 = vpack.c.bf16 %v1976_v30, %v1975_v20  ;;  %v1669_v52 = vsel %vm3649_vm12, %v2688_v25, %v1665_v34  ;;  %v3665_v54 = vadd.f32 1.0, %v2694_v33  ;;  %2699 = vrcp.f32 %v3655_v27  ;;  %v3714_v20 = vld [vmem:[#allocation2 + $0xa8] sm:$0xff] }
 0x22c   : > { %v2696_v1 = vpop.eup %2695  ;;  %v1674_v60 = vsel %vm3621_vm10, %v1673_v21, %v1669_v52  ;;  %v1680_v19 = vadd.f32 %v2690_v26, %v1679_v44  ;;  %2701 = vpow2.f32 %v2459_v37  ;;  %v1700_v48 = vand.u32 2147483647, %v3655_v27 }
 0x22d   : > { %2017 = vst [vmem:[%s3086_s10 + $0x30] sm:$0xff] %v2001_v51  ;;  %v1945_v63 = vmul.f32 %v1674_v60, %v3463_v11  ;;  %2703 = vrcp.f32 %v3665_v54  ;;  %v1702_v0 = vand.u32 2147483648, %v3655_v27  ;;  %v2461_v56 = vmul.f32 -1.442695, %v3670_v45 }
 0x22e   : > { %v1684_v59 = vsel %vm3661_vm14, %v2690_v26, %v1680_v19  ;;  %v1715_v11 = vand.u32 2147483647, %v3665_v54  ;;  %v1717_v5 = vand.u32 2147483648, %v3665_v54  ;;  %v3687_v25 = vadd.f32 1.0, %v2696_v1  ;;  %v1307_v1 = vld [vmem:[#allocation3 + $0x10] sm:$0xff] }
 0x22f   : > { %v2698_v55 = vpop.eup %2697  ;;  %v1689_v9 = vsel %vm1686_vm15, %v1688_v47, %v1684_v59  ;;  %v1977_v38 = vmul.f32 %v1945_v63, %v1305_v31  ;;  %v2462_v22 = vmul.f32 -1.442695, %v3678_v14  ;;  %vm1696_vm0 = vweird.f32 %v3655_v27 }
 0x230   : > { %v1946_v49 = vmul.f32 %v1689_v9, %v3484_v16  ;;  %v3690_v6 = vadd.f32 1.0, %v2698_v55  ;;  %vm3694_vm7 = vcmp.eq.f32.partialorder %v1700_v48, 8.507059e+37  ;;  %vm1711_vm1 = vweird.f32 %v3665_v54  ;;  %v1308_v55 = vld [vmem:[#allocation3 + $0x70] sm:$0xff]  ;;  %v3835_v9 = vld [vmem:[#allocation2 + $0xa0] sm:$0xff] }
 0x231   : > { %v2700_v57 = vpop.eup %2699  ;;  %2705 = vrcp.f32 %v3687_v25  ;;  %v1703_v26 = vor.u32 1.1754944e-38, %v1702_v0  ;;  %vm3702_vm2 = vcmp.eq.f32.partialorder %v1715_v11, 8.507059e+37  ;;  %v1718_v21 = vor.u32 1.1754944e-38, %v1717_v5 }
 0x232   : > { %v2702_v13 = vpop.eup %2701  ;;  %v1978_v7 = vmul.f32 %v1946_v49, %v1306_v8  ;;  %v1692_v16 = vmul.f32 %v2700_v57, %v3655_v27  ;;  %2707 = vrcp.f32 %v3690_v6  ;;  %v1730_v41 = vand.u32 2147483647, %v3687_v25  ;;  %v3805_v27 = vld [vmem:[#allocation2 + $0x10] sm:$0xff] }
 0x233   : > { %v2704_v58 = vpop.eup %2703  ;;  %v1732_v24 = vand.u32 2147483648, %v3687_v25  ;;  %vm1697_vm4 = vweird.f32 %v2700_v57  ;;  %vm1726_vm3 = vweird.f32 %v3687_v25  ;;  %v1745_v39 = vand.u32 2147483647, %v3690_v6 }
 0x234   : > { %v2002_v35 = vpack.c.bf16 %v1978_v7, %v1977_v38  ;;  %v1693_v10 = vsub.f32 1.0, %v1692_v16  ;;  %v1707_v50 = vmul.f32 %v2704_v58, %v3665_v54  ;;  %2709 = vpow2.f32 %v2460_v61  ;;  %vm3718_vm6 = vmor %vm1696_vm0, %vm1697_vm4 }
 0x235   : > { %v3711_v17 = vadd.f32 1.0, %v2702_v13  ;;  %vm1712_vm5 = vweird.f32 %v2704_v58  ;;  %2711 = vpow2.f32 %v2461_v56  ;;  %vm3722_vm8 = vcmp.eq.f32.partialorder %v1730_v41, 8.507059e+37  ;;  %v3783_v41 = vld [vmem:[#allocation2 + $0xd0] sm:$0xff] }
 0x236   : > { %2018 = vst [vmem:[%s3086_s10 + $0x38] sm:$0xff] %v2002_v35  ;;  %v1694_v29 = vmul.f32 %v2700_v57, %v1693_v10  ;;  %v1708_v18 = vsub.f32 1.0, %v1707_v50  ;;  %v1733_v3 = vor.u32 1.1754944e-38, %v1732_v24  ;;  %v1747_v42 = vand.u32 2147483648, %v3690_v6  ;;  %vm3732_vm10 = vmor %vm1711_vm1, %vm1712_vm5  ;;  %v1310_v35 = vld [vmem:[#allocation3 + $0xa0] sm:$0xff] }
 0x237   : > { %v2706_v40 = vpop.eup %2705  ;;  %2713 = vrcp.f32 %v3711_v17  ;;  %vm1741_vm9 = vweird.f32 %v3690_v6  ;;  %vm3737_vm12 = vcmp.eq.f32.partialorder %v1745_v39, 8.507059e+37  ;;  %v2463_v47 = vmul.f32 -1.442695, %v3714_v20 }
 0x238   : > { %v2708_v43 = vpop.eup %2707  ;;  %v1695_v37 = vadd.f32 %v2700_v57, %v1694_v29  ;;  %v1709_v30 = vmul.f32 %v2704_v58, %v1708_v18  ;;  %v1722_v34 = vmul.f32 %v2706_v40, %v3687_v25  ;;  %vm1727_vm11 = vweird.f32 %v2706_v40 }
 0x239   : > { %v1737_v33 = vmul.f32 %v2708_v43, %v3690_v6  ;;  %2715 = vpow2.f32 %v2462_v22  ;;  %vm1742_vm13 = vweird.f32 %v2708_v43  ;;  %v1748_v31 = vor.u32 1.1754944e-38, %v1747_v42  ;;  %vm3756_vm14 = vmor %vm1726_vm3, %vm1727_vm11  ;;  %v1309_v6 = vld [vmem:[#allocation3 + $0x50] sm:$0xff] }
 0x23a   : > { %v1699_v51 = vsel %vm3718_vm6, %v2700_v57, %v1695_v37  ;;  %v1710_v52 = vadd.f32 %v2704_v58, %v1709_v30  ;;  %v1723_v46 = vsub.f32 1.0, %v1722_v34  ;;  %v2710_v54 = vpop.eup %2709  ;;  %vm1756_vm15 = vweird.f32 %v3711_v17  ;;  %vm3765_vm0 = vmor %vm1741_vm9, %vm1742_vm13 }
 0x23b   : > { %v1704_v60 = vsel %vm3694_vm7, %v1703_v26, %v1699_v51  ;;  %v1738_v19 = vsub.f32 1.0, %v1737_v33  ;;  %v2712_v63 = vpop.eup %2711  ;;  %v3749_v61 = vadd.f32 1.0, %v2710_v54  ;;  %2717 = vpow2.f32 %v2463_v47 }
 0x23c   : > { %v1714_v48 = vsel %vm3732_vm10, %v2704_v58, %v1710_v52  ;;  %v1947_v59 = vmul.f32 %v1704_v60, %v3575_v28  ;;  %v1724_v0 = vmul.f32 %v2706_v40, %v1723_v46  ;;  %v1762_v57 = vand.u32 2147483648, %v3711_v17 }
 0x23d   : > { %v2714_v56 = vpop.eup %2713  ;;  %v1719_v8 = vsel %vm3702_vm2, %v1718_v21, %v1714_v48  ;;  %v1739_v11 = vmul.f32 %v2708_v43, %v1738_v19  ;;  %2719 = vrcp.f32 %v3749_v61  ;;  %v3772_v12 = vadd.f32 1.0, %v2712_v63  ;;  %v3824_v48 = vld [vmem:[#allocation2 + $0x28] sm:$0xff] }
 0x23e   : > { %v1948_v28 = vmul.f32 %v1719_v8, %v3598_v2  ;;  %v1979_v5 = vmul.f32 %v1947_v59, %v1307_v1  ;;  %v1725_v49 = vadd.f32 %v2706_v40, %v1724_v0  ;;  %v1752_v25 = vmul.f32 %v2714_v56, %v3711_v17 }
 0x23f   : > { %v1740_v22 = vadd.f32 %v2708_v43, %v1739_v11  ;;  %v2716_v13 = vpop.eup %2715  ;;  %vm1757_vm7 = vweird.f32 %v2714_v56  ;;  %v1760_v15 = vand.u32 2147483647, %v3711_v17  ;;  %v1775_v32 = vand.u32 2147483647, %v3749_v61  ;;  %v1311_v11 = vld [vmem:[#allocation3 + $0xd8] sm:$0xff] }
 0x240   : > { %v1980_v2 = vmul.f32 %v1948_v28, %v1308_v55  ;;  %v1729_v7 = vsel %vm3756_vm14, %v2706_v40, %v1725_v49  ;;  %v1753_v16 = vsub.f32 1.0, %v1752_v25  ;;  %v3781_v21 = vadd.f32 1.0, %v2716_v13  ;;  %vm3791_vm1 = vmor %vm1756_vm15, %vm1757_vm7 }
 0x241   : > { %v1734_v26 = vsel %vm3722_vm8, %v1733_v3, %v1729_v7  ;;  %v1744_v58 = vsel %vm3765_vm0, %v2708_v43, %v1740_v22  ;;  %v2718_v29 = vpop.eup %2717  ;;  %2721 = vrcp.f32 %v3772_v12  ;;  %v1763_v42 = vor.u32 1.1754944e-38, %v1762_v57 }
 0x242   : > { %v2003_v24 = vpack.c.bf16 %v1980_v2, %v1979_v5  ;;  %v1749_v10 = vsel %vm3737_vm12, %v1748_v31, %v1744_v58  ;;  %v1949_v50 = vmul.f32 %v1734_v26, %v3600_v4  ;;  %v1754_v39 = vmul.f32 %v2714_v56, %v1753_v16  ;;  %v1312_v2 = vld [vmem:[#allocation3 + $0x30] sm:$0xff] }
 0x243   : > { %v1950_v18 = vmul.f32 %v1749_v10, %v3632_v23  ;;  %v2464_v4 = vmul.f32 -1.442695, %v3783_v41  ;;  %v2720_v43 = vpop.eup %2719  ;;  %vm1761_vm2 = vcmp.eq.f32.partialorder %v1760_v15, 8.507059e+37  ;;  %v1777_v23 = vand.u32 2147483648, %v3749_v61 }
 0x244   : > { %2019 = vst [vmem:[%s3086_s10 + $0x40] sm:$0xff] %v2003_v24  ;;  %v1981_v53 = vmul.f32 %v1949_v50, %v1309_v6  ;;  %v1755_v3 = vadd.f32 %v2714_v56, %v1754_v39  ;;  %2723 = vrcp.f32 %v3781_v21  ;;  %v1767_v30 = vmul.f32 %v2720_v43, %v3749_v61 }
 0x245   : > { %v1982_v37 = vmul.f32 %v1950_v18, %v1310_v35  ;;  %v1790_v34 = vand.u32 2147483647, %v3772_v12  ;;  %vm1771_vm4 = vweird.f32 %v3749_v61  ;;  %vm3808_vm3 = vcmp.eq.f32.partialorder %v1775_v32, 8.507059e+37  ;;  %v1313_v32 = vld [vmem:[#allocation3 + $0x20] sm:$0xff] }
 0x246   : > { %v1759_v17 = vsel %vm3791_vm1, %v2714_v56, %v1755_v3  ;;  %v1792_v47 = vand.u32 2147483648, %v3772_v12  ;;  %v1768_v52 = vsub.f32 1.0, %v1767_v30  ;;  %vm1772_vm5 = vweird.f32 %v2720_v43  ;;  %v1314_v30 = vld [vmem:[#allocation3 + $0xf0] sm:$0xff] }
 0x247   : > { %v2004_v33 = vpack.c.bf16 %v1982_v37, %v1981_v53  ;;  %v1764_v51 = vsel %vm1761_vm2, %v1763_v42, %v1759_v17  ;;  %2725 = vpow2.f32 %v2464_v4  ;;  %v2722_v46 = vpop.eup %2721  ;;  %v1778_v54 = vor.u32 1.1754944e-38, %v1777_v23  ;;  %vm3828_vm10 = vmor %vm1771_vm4, %vm1772_vm5  ;;  %v3877_v23 = vld [vmem:[#allocation2 + $0xf8] sm:$0xff] }
 0x248   : > { %vm1786_vm6 = vweird.f32 %v3772_v12  ;;  %v3815_v1 = vadd.f32 1.0, %v2718_v29  ;;  %v2465_v60 = vmul.f32 -1.442695, %v3805_v27  ;;  %v1769_v19 = vmul.f32 %v2720_v43, %v1768_v52 }
 0x249   : > { %2020 = vst [vmem:[%s3086_s10 + $0x48] sm:$0xff] %v2004_v33  ;;  %v1782_v31 = vmul.f32 %v2722_v46, %v3772_v12  ;;  %vm3819_vm8 = vcmp.eq.f32.partialorder %v1790_v34, 8.507059e+37  ;;  %vm1801_vm9 = vweird.f32 %v3781_v21  ;;  %v1951_v56 = vmul.f32 %v1764_v51, %v3637_v36 }
 0x24a   : > { %v2724_v59 = vpop.eup %2723  ;;  %v1793_v55 = vor.u32 1.1754944e-38, %v1792_v47  ;;  %v1805_v8 = vand.u32 2147483647, %v3781_v21  ;;  %2727 = vrcp.f32 %v3815_v1  ;;  %v1770_v28 = vadd.f32 %v2720_v43, %v1769_v19  ;;  %v3887_v47 = vld [vmem:[#allocation2 + $0x20] sm:$0xff] }
 0x24b   : > { %v1783_v5 = vsub.f32 1.0, %v1782_v31  ;;  %vm1787_vm11 = vweird.f32 %v2722_v46  ;;  %v1797_v49 = vmul.f32 %v2724_v59, %v3781_v21  ;;  %vm1802_vm12 = vweird.f32 %v2724_v59 }
 0x24c   : > { %v1807_v61 = vand.u32 2147483648, %v3781_v21  ;;  %2729 = vpow2.f32 %v2465_v60  ;;  %v2466_v38 = vmul.f32 -1.442695, %v3824_v48  ;;  %v1774_v25 = vsel %vm3828_vm10, %v2720_v43, %v1770_v28  ;;  %vm3847_vm13 = vmor %vm1786_vm6, %vm1787_vm11 }
 0x24d   : > { %v2726_v36 = vpop.eup %2725  ;;  %v1784_v22 = vmul.f32 %v2722_v46, %v1783_v5  ;;  %v1798_v57 = vsub.f32 1.0, %v1797_v49  ;;  %v2467_v13 = vmul.f32 -1.442695, %v3835_v9  ;;  %v1779_v7 = vsel %vm3808_vm3, %v1778_v54, %v1774_v25  ;;  %vm3857_vm14 = vmor %vm1801_vm9, %vm1802_vm12 }
 0x24e   : > { %v1983_v16 = vmul.f32 %v1951_v56, %v1311_v11  ;;  %v3851_v26 = vadd.f32 1.0, %v2726_v36  ;;  %2731 = vpow2.f32 %v2466_v38  ;;  %v1952_v58 = vmul.f32 %v1779_v7, %v3668_v62  ;;  %v3919_v36 = vld [vmem:[#allocation2 + $0x98] sm:$0xff] }
 0x24f   : > { %v1785_v15 = vadd.f32 %v2722_v46, %v1784_v22  ;;  %v1799_v24 = vmul.f32 %v2724_v59, %v1798_v57  ;;  %2733 = vpow2.f32 %v2467_v13  ;;  %vm3861_vm15 = vcmp.eq.f32.partialorder %v1805_v8, 8.507059e+37 }
 0x250   : > { %v2728_v35 = vpop.eup %2727  ;;  %v1808_v50 = vor.u32 1.1754944e-38, %v1807_v61  ;;  %v1820_v39 = vand.u32 2147483647, %v3815_v1  ;;  %2735 = vrcp.f32 %v3851_v26  ;;  %v1984_v62 = vmul.f32 %v1952_v58, %v1312_v2  ;;  %v1315_v2 = vld [vmem:[#allocation3 + $0x88] sm:$0xff] }
 0x251   : > { %v1789_v29 = vsel %vm3847_vm13, %v2722_v46, %v1785_v15  ;;  %v1800_v18 = vadd.f32 %v2724_v59, %v1799_v24  ;;  %v1812_v21 = vmul.f32 %v2728_v35, %v3815_v1  ;;  %vm1816_vm0 = vweird.f32 %v3815_v1 }
 0x252   : > { %v2730_v40 = vpop.eup %2729  ;;  %v1794_v53 = vsel %vm3819_vm8, %v1793_v55, %v1789_v29  ;;  %vm1817_vm7 = vweird.f32 %v2728_v35  ;;  %v1822_v3 = vand.u32 2147483648, %v3815_v1  ;;  %v2005_v42 = vpack.c.bf16 %v1984_v62, %v1983_v16 }
 0x253   : > { %v1804_v4 = vsel %vm3857_vm14, %v2724_v59, %v1800_v18  ;;  %v1953_v43 = vmul.f32 %v1794_v53, %v3670_v45  ;;  %v1813_v37 = vsub.f32 1.0, %v1812_v21  ;;  %vm3881_vm1 = vcmp.eq.f32.partialorder %v1820_v39, 8.507059e+37  ;;  %vm3896_vm2 = vmor %vm1816_vm0, %vm1817_vm7  ;;  %v1316_v39 = vld [vmem:[#allocation3 + $0x48] sm:$0xff] }
 0x254   : > { %v2732_v17 = vpop.eup %2731  ;;  %v1809_v34 = vsel %vm3861_vm15, %v1808_v50, %v1804_v4  ;;  %v3885_v44 = vadd.f32 1.0, %v2730_v40  ;;  %2021 = vst [vmem:[%s3086_s10 + $0x50] sm:$0xff] %v2005_v42  ;;  %v1823_v31 = vor.u32 1.1754944e-38, %v1822_v3  ;;  %v1835_v63 = vand.u32 2147483647, %v3851_v26 }
 0x255   : > { %v2734_v51 = vpop.eup %2733  ;;  %v1954_v45 = vmul.f32 %v1809_v34, %v3678_v14  ;;  %v1985_v52 = vmul.f32 %v1953_v43, %v1313_v32  ;;  %v1814_v46 = vmul.f32 %v2728_v35, %v1813_v37  ;;  %v3891_v54 = vadd.f32 1.0, %v2732_v17  ;;  %v1320_v37 = vld [vmem:[#allocation3] sm:$0xff] }
 0x256   : > { %v2736_v60 = vpop.eup %2735  ;;  %2737 = vrcp.f32 %v3885_v44  ;;  %v2468_v14 = vmul.f32 -1.442695, %v3877_v23  ;;  %v2469_v55 = vmul.f32 -1.442695, %v3887_v47  ;;  %vm1831_vm4 = vweird.f32 %v3851_v26 }
 0x257   : > { %v1986_v59 = vmul.f32 %v1954_v45, %v1314_v30  ;;  %v1815_v0 = vadd.f32 %v2728_v35, %v1814_v46  ;;  %v1827_v56 = vmul.f32 %v2736_v60, %v3851_v26  ;;  %v1837_v1 = vand.u32 2147483648, %v3851_v26 }
 0x258   : > { %2739 = vrcp.f32 %v3891_v54  ;;  %vm1832_vm3 = vweird.f32 %v2736_v60  ;;  %v3912_v49 = vadd.f32 1.0, %v2734_v51  ;;  %vm3915_vm5 = vcmp.eq.f32.partialorder %v1835_v63, 8.507059e+37 }
 0x259   : > { %v2006_v8 = vpack.c.bf16 %v1986_v59, %v1985_v52  ;;  %v1819_v11 = vsel %vm3896_vm2, %v2728_v35, %v1815_v0  ;;  %v1828_v28 = vsub.f32 1.0, %v1827_v56  ;;  %2741 = vpow2.f32 %v2468_v14  ;;  %vm3923_vm6 = vmor %vm1831_vm4, %vm1832_vm3 }
 0x25a   : > { %v1824_v5 = vsel %vm3881_vm1, %v1823_v31, %v1819_v11  ;;  %2743 = vpow2.f32 %v2469_v55  ;;  %v1838_v57 = vor.u32 1.1754944e-38, %v1837_v1  ;;  %vm1846_vm8 = vweird.f32 %v3885_v44  ;;  %v1317_v31 = vld [vmem:[#allocation3 + $0xf8] sm:$0xff]  ;;  %v1318_v1 = vld [vmem:[#allocation3 + $0xc0] sm:$0xff] }
 0x25b   : > { %2022 = vst [vmem:[%s3086_s10 + $0x58] sm:$0xff] %v2006_v8  ;;  %v1829_v61 = vmul.f32 %v2736_v60, %v1828_v28  ;;  %v1955_v13 = vmul.f32 %v1824_v5, %v3714_v20  ;;  %2745 = vrcp.f32 %v3912_v49  ;;  %v1850_v6 = vand.u32 2147483647, %v3885_v44 }
 0x25c   : > { %v2738_v25 = vpop.eup %2737  ;;  %v1852_v58 = vand.u32 2147483648, %v3885_v44  ;;  %vm1861_vm9 = vweird.f32 %v3891_v54  ;;  %v1865_v15 = vand.u32 2147483647, %v3891_v54  ;;  %v1867_v24 = vand.u32 2147483648, %v3891_v54 }
 0x25d   : > { %v1830_v7 = vadd.f32 %v2736_v60, %v1829_v61  ;;  %v1842_v16 = vmul.f32 %v2738_v25, %v3885_v44  ;;  %v2470_v20 = vmul.f32 -1.442695, %v3919_v36  ;;  %vm1847_vm10 = vweird.f32 %v2738_v25 }
 0x25e   : > { %v2740_v26 = vpop.eup %2739  ;;  %v1987_v29 = vmul.f32 %v1955_v13, %v1315_v2  ;;  %vm3947_vm12 = vmor %vm1846_vm8, %vm1847_vm10  ;;  %vm3951_vm13 = vcmp.eq.f32.partialorder %v1850_v6, 8.507059e+37  ;;  %v1853_v43 = vor.u32 1.1754944e-38, %v1852_v58  ;;  %vm3955_vm14 = vcmp.eq.f32.partialorder %v1865_v15, 8.507059e+37 }
 0x25f   : > { %v1834_v35 = vsel %vm3923_vm6, %v2736_v60, %v1830_v7  ;;  %v1843_v10 = vsub.f32 1.0, %v1842_v16  ;;  %v1857_v12 = vmul.f32 %v2740_v26, %v3891_v54  ;;  %v2742_v50 = vpop.eup %2741  ;;  %vm1862_vm11 = vweird.f32 %v2740_v26 }
 0x260   : > { %v1839_v62 = vsel %vm3915_vm5, %v1838_v57, %v1834_v35  ;;  %2747 = vpow2.f32 %v2470_v20  ;;  %v2744_v18 = vpop.eup %2743  ;;  %v3943_v53 = vadd.f32 1.0, %v2742_v50  ;;  %vm3965_vm15 = vmor %vm1861_vm9, %vm1862_vm11  ;;  %v1868_v51 = vor.u32 1.1754944e-38, %v1867_v24 }
 0x261   : > { %v1956_v21 = vmul.f32 %v1839_v62, %v3783_v41  ;;  %v1844_v40 = vmul.f32 %v2738_v25, %v1843_v10  ;;  %v1858_v32 = vsub.f32 1.0, %v1857_v12  ;;  %v2746_v3 = vpop.eup %2745  ;;  %v3959_v41 = vadd.f32 1.0, %v2744_v18 }
 0x262   : > { %v1872_v33 = vmul.f32 %v2746_v3, %v3912_v49  ;;  %vm1876_vm0 = vweird.f32 %v3912_v49  ;;  %vm1877_vm7 = vweird.f32 %v2746_v3  ;;  %2749 = vrcp.f32 %v3943_v53 }
 0x263   : > { %v1988_v17 = vmul.f32 %v1956_v21, %v1316_v39  ;;  %v1845_v30 = vadd.f32 %v2738_v25, %v1844_v40  ;;  %v1859_v34 = vmul.f32 %v2740_v26, %v1858_v32  ;;  %v1880_v63 = vand.u32 2147483647, %v3912_v49  ;;  %vm3987_vm1 = vmor %vm1876_vm0, %vm1877_vm7  ;;  %v1319_v21 = vld [vmem:[#allocation3 + $0xb8] sm:$0xff] }
 0x264   : > { %v1873_v60 = vsub.f32 1.0, %v1872_v33  ;;  %v1882_v14 = vand.u32 2147483648, %v3912_v49  ;;  %2751 = vrcp.f32 %v3959_v41  ;;  %vm1891_vm4 = vweird.f32 %v3943_v53 }
 0x265   : > { %v2007_v45 = vpack.c.bf16 %v1988_v17, %v1987_v29  ;;  %v1849_v52 = vsel %vm3947_vm12, %v2738_v25, %v1845_v30  ;;  %v1860_v46 = vadd.f32 %v2740_v26, %v1859_v34  ;;  %vm1881_vm2 = vcmp.eq.f32.partialorder %v1880_v63, 8.507059e+37 }
 0x266   : > { %v2748_v19 = vpop.eup %2747  ;;  %v1854_v54 = vsel %vm3951_vm13, %v1853_v43, %v1849_v52  ;;  %v1874_v56 = vmul.f32 %v2746_v3, %v1873_v60  ;;  %v1883_v25 = vor.u32 1.1754944e-38, %v1882_v14  ;;  %v1895_v13 = vand.u32 2147483647, %v3943_v53 }
 0x267   : > { %2023 = vst [vmem:[%s3086_s10 + $0x60] sm:$0xff] %v2007_v45  ;;  %v1864_v59 = vsel %vm3965_vm15, %v2740_v26, %v1860_v46  ;;  %v1957_v0 = vmul.f32 %v1854_v54, %v3805_v27  ;;  %v1450_v55 = vadd.f32 1.0, %v2748_v19  ;;  %v1910_v2 = vand.u32 2147483647, %v3959_v41  ;;  %v1321_v46 = vld [vmem:[#allocation3 + $0x28] sm:$0xff]  ;;  %v1322_v19 = vld [vmem:[#allocation3 + $0x98] sm:$0xff] }
 0x268   : > { %v1869_v8 = vsel %vm3955_vm14, %v1868_v51, %v1864_v59  ;;  %v1875_v61 = vadd.f32 %v2746_v3, %v1874_v56  ;;  %v2750_v38 = vpop.eup %2749  ;;  %v1912_v26 = vand.u32 2147483648, %v3959_v41  ;;  %vm1906_vm5 = vweird.f32 %v3959_v41 }
 0x269   : > { %v1958_v28 = vmul.f32 %v1869_v8, %v3824_v48  ;;  %v1989_v5 = vmul.f32 %v1957_v0, %v1317_v31  ;;  %2753 = vrcp.f32 %v1450_v55  ;;  %v1887_v57 = vmul.f32 %v2750_v38, %v3943_v53 }
 0x26a   : > { %v1879_v22 = vsel %vm3987_vm1, %v2746_v3, %v1875_v61  ;;  %v2752_v49 = vpop.eup %2751  ;;  %v1897_v48 = vand.u32 2147483648, %v3943_v53  ;;  %vm1892_vm3 = vweird.f32 %v2750_v38  ;;  %vm4009_vm9 = vcmp.eq.f32.partialorder %v1895_v13, 8.507059e+37 }
 0x26b   : > { %v1990_v27 = vmul.f32 %v1958_v28, %v1318_v1  ;;  %v1888_v16 = vsub.f32 1.0, %v1887_v57  ;;  %v1902_v6 = vmul.f32 %v2752_v49, %v3959_v41  ;;  %v1884_v58 = vsel %vm1881_vm2, %v1883_v25, %v1879_v22  ;;  %vm4005_vm8 = vmor %vm1891_vm4, %vm1892_vm3 }
 0x26c   : > { %vm1907_vm6 = vweird.f32 %v2752_v49  ;;  %v1898_v12 = vor.u32 1.1754944e-38, %v1897_v48  ;;  %vm4013_vm10 = vcmp.eq.f32.partialorder %v1910_v2, 8.507059e+37  ;;  %v1959_v62 = vmul.f32 %v1884_v58, %v3835_v9 }
 0x26d   : > { %v2008_v7 = vpack.c.bf16 %v1990_v27, %v1989_v5  ;;  %v1889_v15 = vmul.f32 %v2750_v38, %v1888_v16  ;;  %v1903_v24 = vsub.f32 1.0, %v1902_v6  ;;  %vm4018_vm11 = vmor %vm1906_vm5, %vm1907_vm6  ;;  %v1913_v32 = vor.u32 1.1754944e-38, %v1912_v26 }
 0x26e   : > { %vm1921_vm12 = vweird.f32 %v1450_v55  ;;  %v1925_v53 = vand.u32 2147483647, %v1450_v55  ;;  %v1927_v3 = vand.u32 2147483648, %v1450_v55  ;;  %v1991_v17 = vmul.f32 %v1959_v62, %v1319_v21 }
 0x26f   : > { %2024 = vst [vmem:[%s3086_s10 + $0x68] sm:$0xff] %v2008_v7  ;;  %v2754_v20 = vpop.eup %2753  ;;  %v1890_v39 = vadd.f32 %v2750_v38, %v1889_v15  ;;  %v1904_v29 = vmul.f32 %v2752_v49, %v1903_v24 }
 0x270   : > { %v1917_v18 = vmul.f32 %v2754_v20, %v1450_v55  ;;  %vm1922_vm13 = vweird.f32 %v2754_v20  ;;  %v1928_v44 = vor.u32 1.1754944e-38, %v1927_v3  ;;  %vm1926_vm15 = vcmp.eq.f32.partialorder %v1925_v53, 8.507059e+37 }
 0x271   : > { %v1894_v42 = vsel %vm4005_vm8, %v2750_v38, %v1890_v39  ;;  %v1905_v4 = vadd.f32 %v2752_v49, %v1904_v29  ;;  %vm1923_vm14 = vmor %vm1921_vm12, %vm1922_vm13 }
 0x272   : > { %v1918_v43 = vsub.f32 1.0, %v1917_v18  ;;  %v1899_v9 = vsel %vm4009_vm9, %v1898_v12, %v1894_v42 }
 0x273   : > { %v1960_v41 = vmul.f32 %v1899_v9, %v3877_v23  ;;  %v1909_v30 = vsel %vm4018_vm11, %v2752_v49, %v1905_v4 }
 0x274   : > { %v1919_v34 = vmul.f32 %v2754_v20, %v1918_v43  ;;  %v1914_v33 = vsel %vm4013_vm10, %v1913_v32, %v1909_v30 }
 0x275   : > { %v1992_v51 = vmul.f32 %v1960_v41, %v1320_v37  ;;  %v1961_v52 = vmul.f32 %v1914_v33, %v3887_v47 }
 0x276   : > { %v1920_v45 = vadd.f32 %v2754_v20, %v1919_v34 }
 0x277   : > { %v2009_v60 = vpack.c.bf16 %v1992_v51, %v1991_v17  ;;  %v1993_v63 = vmul.f32 %v1961_v52, %v1321_v46 }
 0x278   : > { %v1924_v23 = vsel %vm1923_vm14, %v2754_v20, %v1920_v45 }
 0x279   : > { %v1929_v31 = vsel %vm1926_vm15, %v1928_v44, %v1924_v23  ;;  %2025 = vst [vmem:[%s3086_s10 + $0x70] sm:$0xff] %v2009_v60 }
 0x27a   : > { %v1962_v54 = vmul.f32 %v1929_v31, %v3919_v36 }
 0x27c   : > { %v1994_v14 = vmul.f32 %v1962_v54, %v1322_v19 }
 0x27e   : > { %v2010_v59 = vpack.c.bf16 %v1994_v14, %v1993_v63 }
 0x280   : > { %2026 = vst [vmem:[%s3086_s10 + $0x78] sm:$0xff] %v2010_v59 }
 0x281 PF: > { %2033 = sbr.rel (!%p2992_p13) target bundleno = 667 (0x29b), region = 161  ;;  %s4236_s12 = sld [smem:[#allocation8_spill]] (%p2992_p13)  ;;  %v2098_v47 = vld [vmem:[%s3086_s10] sm:$0xff] (%p2992_p13)  ;;  %v2100_v36 = vld [vmem:[%s3086_s10 + $0x8] sm:$0xff] (%p2992_p13)  ;;  %v2102_v0 = vld [vmem:[%s3086_s10 + $0x10] sm:$0xff] (%p2992_p13) }
 0x282   : > { %s2473_s14 = sshll.u32 (%p2992_p13), %s2837_s19, 1  ;;  %s4237_s11 = sld [smem:[#allocation11_spill]] (%p2992_p13)  ;;  %v2104_v56 = vld [vmem:[%s3086_s10 + $0x18] sm:$0xff] (%p2992_p13)  ;;  %v2106_v55 = vld [vmem:[%s3086_s10 + $0x20] sm:$0xff] (%p2992_p13)  ;;  %v2108_v1 = vld [vmem:[%s3086_s10 + $0x28] sm:$0xff] (%p2992_p13) }
 0x283   : > { %v2110_v8 = vld [vmem:[%s3086_s10 + $0x30] sm:$0xff] (%p2992_p13)  ;;  %v2112_v11 = vld [vmem:[%s3086_s10 + $0x38] sm:$0xff] (%p2992_p13)  ;;  %v2114_v28 = vld [vmem:[%s3086_s10 + $0x40] sm:$0xff] (%p2992_p13) }
 0x284   : > { %v2116_v5 = vld [vmem:[%s3086_s10 + $0x48] sm:$0xff] (%p2992_p13)  ;;  %v2118_v61 = vld [vmem:[%s3086_s10 + $0x50] sm:$0xff] (%p2992_p13)  ;;  %v2120_v38 = vld [vmem:[%s3086_s10 + $0x58] sm:$0xff] (%p2992_p13) }
 0x285   : > { %v2122_v25 = vld [vmem:[%s3086_s10 + $0x60] sm:$0xff] (%p2992_p13)  ;;  %v2124_v27 = vld [vmem:[%s3086_s10 + $0x68] sm:$0xff] (%p2992_p13)  ;;  %v2126_v22 = vld [vmem:[%s3086_s10 + $0x70] sm:$0xff] (%p2992_p13) }
 0x287   : > { %s2521_s16 = sshll.u32 %s4236_s12, 6  ;;  %v2128_v57 = vld [vmem:[%s3086_s10 + $0x78] sm:$0xff] }
 0x288   : > { %s2037_s18 = sadd.s32 %s2521_s16, %s2473_s14 }
 0x289   : > { %s2475_s8 = sshll.u32 %s2037_s18, 2 }
 0x28a   : > { %s2039_s25 = scalar_lea.vmem %s4237_s11, %s2475_s8 }
 0x28b   : > { %2099 = vst [vmem:[%s2039_s25] sm:$0xff] %v2098_v47 }
 0x28c   : > { %2101 = vst [vmem:[%s2039_s25 + $0x10] sm:$0xff] %v2100_v36 }
 0x28d   : > { %2103 = vst [vmem:[%s2039_s25 + $0x20] sm:$0xff] %v2102_v0 }
 0x28e   : > { %2105 = vst [vmem:[%s2039_s25 + $0x30] sm:$0xff] %v2104_v56 }
 0x28f   : > { %2107 = vst [vmem:[%s2039_s25 + $0x40] sm:$0xff] %v2106_v55 }
 0x290   : > { %2109 = vst [vmem:[%s2039_s25 + $0x50] sm:$0xff] %v2108_v1 }
 0x291   : > { %2111 = vst [vmem:[%s2039_s25 + $0x60] sm:$0xff] %v2110_v8 }
 0x292   : > { %2113 = vst [vmem:[%s2039_s25 + $0x70] sm:$0xff] %v2112_v11 }
 0x293   : > { %2115 = vst [vmem:[%s2039_s25 + $0x80] sm:$0xff] %v2114_v28 }
 0x294   : > { %2117 = vst [vmem:[%s2039_s25 + $0x90] sm:$0xff] %v2116_v5 }
 0x295   : > { %2119 = vst [vmem:[%s2039_s25 + $0xa0] sm:$0xff] %v2118_v61 }
 0x296   : > { %2121 = vst [vmem:[%s2039_s25 + $0xb0] sm:$0xff] %v2120_v38 }
 0x297   : > { %2123 = vst [vmem:[%s2039_s25 + $0xc0] sm:$0xff] %v2122_v25 }
 0x298   : > { %2125 = vst [vmem:[%s2039_s25 + $0xd0] sm:$0xff] %v2124_v27 }
 0x299   : > { %2127 = vst [vmem:[%s2039_s25 + $0xe0] sm:$0xff] %v2126_v22 }
 0x29a   : > { %2129 = vst [vmem:[%s2039_s25 + $0xf0] sm:$0xff] %v2128_v57 }
 0x29b PF: > { %s13_s24 = sadd.s32 1, %s2857_s24   ;;  %s4239_s26 = sld [smem:[#allocation9_spill]] }
 0x29c   : > { %p4059_p6 = scmp.ge.s32.totalorder %s13_s24, 10   ;;  %s4240_s27 = sld [smem:[#allocation10_spill]] }
 0x29d   : > { %s4242_s12 = smov %s2813_s13  ;;  %s4243_s13 = smov %s2990_s7 }
 0x29e   : > { %s4244_s14 = smov %s2821_s15  ;;  %s4245_s15 = smov %s2977_s9 }
 0x29f   : > { %s4246_s16 = smov %s2829_s17  ;;  %s4247_s17 = smov %s2987_s3 }
 0x2a0   : > { %s4248_s18 = smov %s2845_s21  ;;  %s4249_s19 = smov %s2849_s22 }
 0x2a1   : > { %s4250_s20 = smov %s2853_s23  ;;  %s4251_s21 = smov %s4239_s26 }
 0x2a2   : > { %s4252_s22 = smov %s4240_s27  ;;  %s4253_s23 = smov %s4263_s28 }
 0x2a3   :  { %12 = sbr.rel (!%p4059_p6) target bundleno = 9 (0x9), region = 246 }

// kernel: decoder_layer.13
= control target key start
LH: loop header
LB: loop body
LE: loop exit
PB: predicated region body
PF: predicated region fallthrough
CT: control target
= control target key end

     0   :  { %s1734_s0 = inlined_call_operand.vmem [shape: bf16[256,512], index: 0, kind: input, shape index: {}]   ;;  %s1735_s1 = inlined_call_operand.vmem [shape: bf16[512,256], index: 1, kind: input, shape index: {}]   ;;  %s1736_s2 = inlined_call_operand.vmem [shape: f32[256,256], index: 2, kind: input, shape index: {}]   ;;  %s1737_s3 = inlined_call_operand.hbm [shape: f32[256,256], index: 3, kind: output, shape index: {}]  }
   0x1   :  { %1740 = sst [smem:[#allocation8_spill]] %s1734_s0 }
   0x2   :  { %8 = vsyncpa [#allocation5], 0 }
   0x3   :  { %10 = vsyncpa [#allocation5 + $0x1], 0  ;;  %s1438_s12 = smov 0   ;;  %s1440_s13 = smov 0  }
   0x4   :  { %s1442_s14 = smov 0   ;;  %s1444_s15 = smov 0  }
   0x5   :  { %s1446_s16 = smov 0   ;;  %s1448_s17 = smov 0  }
   0x6   :  { %s1450_s18 = smov 0   ;;  %s1452_s19 = smov 0  }
   0x7   :  { %s1454_s20 = smov 0   ;;  %s1456_s21 = smov 0  }
   0x8 LB: > { %s1047_s22 = sadd.s32 4294967295, %s1413_s21   ;;  %s1048_s23 = sadd.s32 4294967294, %s1413_s21   ;;  %s1413_s21 = sphi %s1456_s21, %s16_s21   ;;  %s1409_s20 = sphi %s1454_s20, %s1756_s20   ;;  %s1405_s19 = sphi %s1452_s19, %s1755_s19   ;;  %s1401_s18 = sphi %s1450_s18, %s1754_s18   ;;  %s1397_s17 = sphi %s1448_s17, %s1753_s17   ;;  %s1393_s16 = sphi %s1446_s16, %s1752_s16   ;;  %s1389_s15 = sphi %s1444_s15, %s1751_s15   ;;  %s1385_s14 = sphi %s1442_s14, %s1750_s14   ;;  %s1381_s13 = sphi %s1440_s13, %s1749_s13   ;;  %s1377_s12 = sphi %s1438_s12, %s1748_s12  }
   0x9   : > { %s28_s24 = sadd.s32 1, %s1405_s19  ;;  %s35_s25 = sadd.s32 1, %s1409_s20 }
   0xa   : > { %p29_p0 = scmp.ge.s32.totalorder %s28_s24, 4  ;;  %s44_s26 = sadd.s32 1, %s1393_s16 }
   0xb   : > { %p51_p1 = scmp.ne.s32.totalorder %s1393_s16, %s1389_s15  ;;  %p52_p2 = scmp.eq.s32.totalorder %s1413_s21, 0 }
   0xc   : > { %s1758_s24 = smov (%p29_p0, %s28_s24), 0  ;;  %s1760_s25 = smov (!%p29_p0, %s35_s25), %s1409_s20 }
   0xd   : > { %s40_s27 = ssub.s32 %s1405_s19, %s1758_s24  ;;  %p1501_p3 = por %p52_p2, %p51_p1 }
   0xe   : > { %p37_p4 = scmp.ge.s32.totalorder %s1760_s25, 2  ;;  %s128_s29 = sadd.s32 1, %s1385_s14 }
   0xf   : > { %p138_p5 = scmp.ne.s32.totalorder %s1385_s14, %s1381_s13  ;;  %p139_p6 = scmp.eq.s32.totalorder %s1047_s22, 7 }
  0x10   : > { %s1762_s25 = smov (%p37_p4, %s1760_s25), 0  ;;  %p144_p8 = scmp.ne.s32.totalorder %s1381_s13, %s1377_s12 }
  0x11   : > { %1742 = sst [smem:[#allocation7_spill]] %s1762_s25  ;;  %p1510_p7 = por %p139_p6, %p138_p5 }
  0x12   : > { %s39_s4 = ssub.s32 %s1409_s20, %s1762_s25  ;;  %p145_p9 = scmp.eq.s32.totalorder %s1048_s23, 7 }
  0x13   : > { %s41_s5 = sor.u32 %s40_s27, %s39_s4  ;;  %p126_p10 = scmp.eq.s32.totalorder %s39_s4, 0 }
  0x14   : > { %p42_p11 = scmp.eq.s32.totalorder %s41_s5, 0  ;;  %p1518_p12 = por %p145_p9, %p144_p8 }
  0x15   : > { %s1523_s7 = scalar_select %p126_p10, %s1385_s14, %s128_s29  }
  0x16   : > { %s1526_s8 = scalar_select %p42_p11, %s1393_s16, %s44_s26  }
  0x17   : > { %p1050_p13 = scmp.ge.s32.totalorder %s1413_s21, 8 }
  0x19   : > { %161 = sbr.rel (%p1050_p13) target bundleno = 56 (0x38), region = 16 }
  0x1e   : > { %164 = sbr.rel (!%p1501_p3) target bundleno = 56 (0x38), region = 20  ;;  %s166_s9 = sand.u32 (%p1501_p3), 1, %s1393_s16  }
  0x1f   : > { %s1168_s10 = sshll.u32 (%p1501_p3), %s1409_s20, 6  ;;  %s1051_s11 = sshll.u32 (%p1501_p3), %s166_s9, 6 }
  0x20   : > { %s171_s22 = sadd.s32 (%p1501_p3), %s1405_s19, %s1168_s10  ;;  %s1745_s0 = sld [smem:[#allocation8_spill]] (%p1501_p3) }
  0x21   : > { %s1054_s23 = sshll.u32 (%p1501_p3), %s171_s22, 2  ;;  %s168_s26 = scalar_lea.vmem (%p1501_p3), [#allocation3], %s1051_s11 }
  0x26   : > { %s1537_s29 = scalar_lea.vmem %s1745_s0, %s1054_s23 }
  0x27   : > { %v190_v0 = vld [vmem:[%s1537_s29] sm:$0xf]  ;;  %v192_v1 = vld [vmem:[%s1537_s29 + $0x10] sm:$0xf] }
  0x28   : > { %v194_v2 = vld [vmem:[%s1537_s29 + $0x20] sm:$0xf]  ;;  %191 = vst [vmem:[%s168_s26] sm:$0xf] %v190_v0  ;;  %v196_v3 = vld [vmem:[%s1537_s29 + $0x30] sm:$0xf] }
  0x29   : > { %193 = vst [vmem:[%s168_s26 + $0x4] sm:$0xf] %v192_v1  ;;  %v198_v4 = vld [vmem:[%s1537_s29 + $0x40] sm:$0xf]  ;;  %v200_v5 = vld [vmem:[%s1537_s29 + $0x50] sm:$0xf] }
  0x2a   : > { %195 = vst [vmem:[%s168_s26 + $0x8] sm:$0xf] %v194_v2  ;;  %v202_v6 = vld [vmem:[%s1537_s29 + $0x60] sm:$0xf]  ;;  %v204_v7 = vld [vmem:[%s1537_s29 + $0x70] sm:$0xf] }
  0x2b   : > { %197 = vst [vmem:[%s168_s26 + $0xc] sm:$0xf] %v196_v3  ;;  %v206_v8 = vld [vmem:[%s1537_s29 + $0x80] sm:$0xf]  ;;  %v208_v9 = vld [vmem:[%s1537_s29 + $0x90] sm:$0xf] }
  0x2c   : > { %199 = vst [vmem:[%s168_s26 + $0x10] sm:$0xf] %v198_v4  ;;  %v210_v10 = vld [vmem:[%s1537_s29 + $0xa0] sm:$0xf]  ;;  %v212_v11 = vld [vmem:[%s1537_s29 + $0xb0] sm:$0xf] }
  0x2d   : > { %201 = vst [vmem:[%s168_s26 + $0x14] sm:$0xf] %v200_v5  ;;  %v214_v12 = vld [vmem:[%s1537_s29 + $0xc0] sm:$0xf]  ;;  %v216_v13 = vld [vmem:[%s1537_s29 + $0xd0] sm:$0xf] }
  0x2e   : > { %203 = vst [vmem:[%s168_s26 + $0x18] sm:$0xf] %v202_v6  ;;  %v218_v14 = vld [vmem:[%s1537_s29 + $0xe0] sm:$0xf]  ;;  %v220_v15 = vld [vmem:[%s1537_s29 + $0xf0] sm:$0xf] }
  0x2f   : > { %205 = vst [vmem:[%s168_s26 + $0x1c] sm:$0xf] %v204_v7 }
  0x30   : > { %207 = vst [vmem:[%s168_s26 + $0x20] sm:$0xf] %v206_v8 }
  0x31   : > { %209 = vst [vmem:[%s168_s26 + $0x24] sm:$0xf] %v208_v9 }
  0x32   : > { %211 = vst [vmem:[%s168_s26 + $0x28] sm:$0xf] %v210_v10 }
  0x33   : > { %213 = vst [vmem:[%s168_s26 + $0x2c] sm:$0xf] %v212_v11 }
  0x34   : > { %215 = vst [vmem:[%s168_s26 + $0x30] sm:$0xf] %v214_v12 }
  0x35   : > { %217 = vst [vmem:[%s168_s26 + $0x34] sm:$0xf] %v216_v13 }
  0x36   : > { %219 = vst [vmem:[%s168_s26 + $0x38] sm:$0xf] %v218_v14 }
  0x37   : > { %221 = vst [vmem:[%s168_s26 + $0x3c] sm:$0xf] %v220_v15 }
  0x38 PF: > { %p1055_p0 = scmp.ge.s32.totalorder %s1413_s21, 1  ;;  %p306_p1 = scmp.lt.s32.totalorder %s1413_s21, 9 }
  0x3a   : > { %p307_p2 = pnand %p1055_p0, %p306_p1 }
  0x3b   : > { %s313_s28 = sand.u32 (!%p307_p2), 1, %s1389_s15   ;;  %s1739_s5 = sand.u32 (!%p307_p2), 1, %s1381_s13  }
  0x3c   : > { %310 = sbr.rel (%p307_p2) target bundleno = 383 (0x17f), region = 69  ;;  %s1056_s9 = sshll.u32 (!%p307_p2), %s313_s28, 6 }
  0x3d   : > { %s1057_s10 = sshll.u32 (!%p307_p2), %s1739_s5, 8  ;;  %s1058_s11 = sshll.u32 (!%p307_p2), %s1397_s17, 4 }
  0x3e   : > { %s1061_s22 = sshll.u32 (!%p307_p2), %s1401_s18, 4  ;;  %p359_p3 = scmp.lt.s32.totalorder (!%p307_p2), %s1058_s11, 63 }
  0x3f   : > { %p371_p4 = scmp.lt.s32.totalorder (!%p307_p2), %s1061_s22, 31  ;;  %s1573_s28 = scalar_lea.vmem (!%p307_p2), [#allocation3], %s1056_s9 }
  0x40   : > { %s1575_s5 = scalar_lea.vmem (!%p307_p2), [#allocation4], %s1057_s10  ;;  %p1064_p5 = scmp.ne.s32.totalorder (!%p307_p2), %s1397_s17, 0 }
  0x41   : > { %s1764_s11 = smov (!%p359_p3, %s1058_s11), 63  ;;  %s1766_s22 = smov (!%p371_p4, %s1061_s22), 31 }
  0x42   : > { %s1169_s23 = sshll.u32 %s1764_s11, 3  ;;  %s1170_s26 = sshll.u32 %s1766_s22, 4 }
  0x43   : > { %s1566_s29 = scalar_lea.vmem %s1735_s1, %s1169_s23  ;;  %s1571_s15 = scalar_lea.vmem %s1736_s2, %s1170_s26 }
  0x44   : > { %386 = sbr.rel (%p1064_p5) target bundleno = 106 (0x6a), region = 77 }
  0x49   : > { %v1415_v16 = vmov 0.0  }
  0x4a   : > { %387 = vst [vmem:[#allocation2 + $0xb0] sm:$0xff] %v1415_v16 }
  0x4b   : > { %388 = vst [vmem:[#allocation2] sm:$0xff] %v1415_v16 }
  0x4c   : > { %389 = vst [vmem:[#allocation2 + $0xd8] sm:$0xff] %v1415_v16 }
  0x4d   : > { %390 = vst [vmem:[#allocation2 + $0x18] sm:$0xff] %v1415_v16 }
  0x4e   : > { %391 = vst [vmem:[#allocation2 + $0x50] sm:$0xff] %v1415_v16 }
  0x4f   : > { %392 = vst [vmem:[#allocation2 + $0x68] sm:$0xff] %v1415_v16 }
  0x50   : > { %393 = vst [vmem:[#allocation2 + $0x30] sm:$0xff] %v1415_v16 }
  0x51   : > { %394 = vst [vmem:[#allocation2 + $0x48] sm:$0xff] %v1415_v16 }
  0x52   : > { %395 = vst [vmem:[#allocation2 + $0x80] sm:$0xff] %v1415_v16 }
  0x53   : > { %396 = vst [vmem:[#allocation2 + $0x88] sm:$0xff] %v1415_v16 }
  0x54   : > { %397 = vst [vmem:[#allocation2 + $0xe8] sm:$0xff] %v1415_v16 }
  0x55   : > { %398 = vst [vmem:[#allocation2 + $0xb8] sm:$0xff] %v1415_v16 }
  0x56   : > { %399 = vst [vmem:[#allocation2 + $0x60] sm:$0xff] %v1415_v16 }
  0x57   : > { %400 = vst [vmem:[#allocation2 + $0xf0] sm:$0xff] %v1415_v16 }
  0x58   : > { %401 = vst [vmem:[#allocation2 + $0x8] sm:$0xff] %v1415_v16 }
  0x59   : > { %402 = vst [vmem:[#allocation2 + $0x78] sm:$0xff] %v1415_v16 }
  0x5a   : > { %403 = vst [vmem:[#allocation2 + $0x38] sm:$0xff] %v1415_v16 }
  0x5b   : > { %404 = vst [vmem:[#allocation2 + $0x58] sm:$0xff] %v1415_v16 }
  0x5c   : > { %405 = vst [vmem:[#allocation2 + $0x40] sm:$0xff] %v1415_v16 }
  0x5d   : > { %406 = vst [vmem:[#allocation2 + $0xc8] sm:$0xff] %v1415_v16 }
  0x5e   : > { %407 = vst [vmem:[#allocation2 + $0xe0] sm:$0xff] %v1415_v16 }
  0x5f   : > { %408 = vst [vmem:[#allocation2 + $0x90] sm:$0xff] %v1415_v16 }
  0x60   : > { %409 = vst [vmem:[#allocation2 + $0x70] sm:$0xff] %v1415_v16 }
  0x61   : > { %410 = vst [vmem:[#allocation2 + $0xc0] sm:$0xff] %v1415_v16 }
  0x62   : > { %411 = vst [vmem:[#allocation2 + $0xa8] sm:$0xff] %v1415_v16 }
  0x63   : > { %412 = vst [vmem:[#allocation2 + $0xd0] sm:$0xff] %v1415_v16 }
  0x64   : > { %413 = vst [vmem:[#allocation2 + $0x10] sm:$0xff] %v1415_v16 }
  0x65   : > { %414 = vst [vmem:[#allocation2 + $0x28] sm:$0xff] %v1415_v16 }
  0x66   : > { %415 = vst [vmem:[#allocation2 + $0xa0] sm:$0xff] %v1415_v16 }
  0x67   : > { %416 = vst [vmem:[#allocation2 + $0xf8] sm:$0xff] %v1415_v16 }
  0x68   : > { %417 = vst [vmem:[#allocation2 + $0x20] sm:$0xff] %v1415_v16 }
  0x69   : > { %418 = vst [vmem:[#allocation2 + $0x98] sm:$0xff] %v1415_v16 }
  0x6a PF: > { %v1155_v17 = vld [vmem:[%s1566_s29 + $0x70] sm:$0xf]  ;;  %v1194_v18 = vld [vmem:[%s1566_s29 + $0x74] sm:$0xf0]  ;;  %v1193_v19 = vld [vmem:[%s1566_s29 + $0x74] sm:$0xf] }
  0x6b   : > { %v1156_v20 = vor.u32 %v1194_v18, %v1155_v17  ;;  %v1157_v21 = vld [vmem:[%s1566_s29 + $0x78] sm:$0xf0]  ;;  %v1147_v22 = vld [vmem:[%s1566_s29 + $0x60] sm:$0xf]  ;;  %v1192_v23 = vld [vmem:[%s1566_s29 + $0x64] sm:$0xf0] }
  0x6c   : > { %v1160_v24 = vor.u32 %v1193_v19, %v1157_v21  ;;  %v1191_v25 = vld [vmem:[%s1566_s29 + $0x64] sm:$0xf]  ;;  %v1149_v26 = vld [vmem:[%s1566_s29 + $0x68] sm:$0xf0]  ;;  %v1148_v27 = vor.u32 %v1192_v23, %v1147_v22  ;;  %v1139_v29 = vld [vmem:[%s1566_s29 + $0x50] sm:$0xf] }
  0x6d   : > { %611 = vmatpush.bf16.msra.mxu0 %v1156_v20  ;;  %1197 = vmatpush.bf16.msra.mxu2 %v1156_v20  ;;  %v1152_v28 = vor.u32 %v1191_v25, %v1149_v26  ;;  %v1190_v30 = vld [vmem:[%s1566_s29 + $0x54] sm:$0xf0]  ;;  %v1189_v31 = vld [vmem:[%s1566_s29 + $0x54] sm:$0xf]  ;;  %v1141_v32 = vld [vmem:[%s1566_s29 + $0x58] sm:$0xf0] }
  0x6e   : > { %660 = vmatpush.bf16.msra.mxu1 %v1160_v24  ;;  %1205 = vmatpush.bf16.msra.mxu3 %v1160_v24  ;;  %v1140_v33 = vor.u32 %v1190_v30, %v1139_v29  ;;  %v1144_v34 = vor.u32 %v1189_v31, %v1141_v32  ;;  %v1131_v35 = vld [vmem:[%s1566_s29 + $0x40] sm:$0xf]  ;;  %v1188_v36 = vld [vmem:[%s1566_s29 + $0x44] sm:$0xf0]  ;;  %v1187_v37 = vld [vmem:[%s1566_s29 + $0x44] sm:$0xf] }
  0x6f   : > { %v1133_v38 = vld [vmem:[%s1566_s29 + $0x48] sm:$0xf0]  ;;  %v1132_v39 = vor.u32 %v1188_v36, %v1131_v35  ;;  %v1123_v41 = vld [vmem:[%s1566_s29 + $0x30] sm:$0xf]  ;;  %v1186_v42 = vld [vmem:[%s1566_s29 + $0x34] sm:$0xf0] }
  0x70   : > { %v1136_v40 = vor.u32 %v1187_v37, %v1133_v38  ;;  %v1185_v43 = vld [vmem:[%s1566_s29 + $0x34] sm:$0xf]  ;;  %v1125_v44 = vld [vmem:[%s1566_s29 + $0x38] sm:$0xf0]  ;;  %v1124_v45 = vor.u32 %v1186_v42, %v1123_v41  ;;  %v1115_v47 = vld [vmem:[%s1566_s29 + $0x20] sm:$0xf] }
  0x71   : > { %612 = vmatpush.bf16.msra.mxu0 %v1148_v27  ;;  %1198 = vmatpush.bf16.msra.mxu2 %v1148_v27  ;;  %v1128_v46 = vor.u32 %v1185_v43, %v1125_v44  ;;  %v1184_v48 = vld [vmem:[%s1566_s29 + $0x24] sm:$0xf0]  ;;  %v1183_v49 = vld [vmem:[%s1566_s29 + $0x24] sm:$0xf]  ;;  %v1117_v50 = vld [vmem:[%s1566_s29 + $0x28] sm:$0xf0] }
  0x72   : > { %661 = vmatpush.bf16.msra.mxu1 %v1152_v28  ;;  %1206 = vmatpush.bf16.msra.mxu3 %v1152_v28  ;;  %v1116_v51 = vor.u32 %v1184_v48, %v1115_v47  ;;  %v1120_v52 = vor.u32 %v1183_v49, %v1117_v50  ;;  %v1107_v53 = vld [vmem:[%s1566_s29 + $0x10] sm:$0xf]  ;;  %v1182_v54 = vld [vmem:[%s1566_s29 + $0x14] sm:$0xf0]  ;;  %v1181_v55 = vld [vmem:[%s1566_s29 + $0x14] sm:$0xf] }
  0x73   : > { %v1109_v56 = vld [vmem:[%s1566_s29 + $0x18] sm:$0xf0]  ;;  %v1108_v57 = vor.u32 %v1182_v54, %v1107_v53  ;;  %v1099_v59 = vld [vmem:[%s1566_s29] sm:$0xf]  ;;  %v1180_v60 = vld [vmem:[%s1566_s29 + $0x4] sm:$0xf0] }
  0x74   : > { %v1112_v58 = vor.u32 %v1181_v55, %v1109_v56  ;;  %v1179_v61 = vld [vmem:[%s1566_s29 + $0x4] sm:$0xf]  ;;  %v1101_v62 = vld [vmem:[%s1566_s29 + $0x8] sm:$0xf0]  ;;  %v1100_v63 = vor.u32 %v1180_v60, %v1099_v59  ;;  %v1173_v5 = vld [vmem:[%s1573_s28 + $0x10] sm:$0xff]  ;;  %p1161_p6 = scmp.ne.s32.totalorder %s1397_s17, 3 }
  0x75   : > { %613 = vmatpush.bf16.msra.mxu0 %v1140_v33  ;;  %1199 = vmatpush.bf16.msra.mxu2 %v1140_v33  ;;  %v1104_v0 = vor.u32 %v1179_v61, %v1101_v62  ;;  %v1171_v1 = vld [vmem:[%s1573_s28] sm:$0xff]  ;;  %v1172_v3 = vld [vmem:[%s1573_s28 + $0x8] sm:$0xff]  ;;  %v1177_v6 = vld [vmem:[%s1573_s28 + $0x30] sm:$0xff] }
  0x76   : > { %662 = vmatpush.bf16.msra.mxu1 %v1144_v34  ;;  %1207 = vmatpush.bf16.msra.mxu3 %v1144_v34  ;;  %v1175_v2 = vld [vmem:[%s1573_s28 + $0x20] sm:$0xff]  ;;  %v1176_v4 = vld [vmem:[%s1573_s28 + $0x28] sm:$0xff]  ;;  %v1174_v7 = vld [vmem:[%s1573_s28 + $0x18] sm:$0xff] }
  0x77   : > { %v1178_v8 = vld [vmem:[%s1573_s28 + $0x38] sm:$0xff]  ;;  %v419_v9 = vld [vmem:[#allocation2 + $0xb0] sm:$0xff]  ;;  %v420_v10 = vld [vmem:[#allocation2] sm:$0xff] }
  0x78   : > { %v435_v15 = vld [vmem:[#allocation2 + $0x38] sm:$0xff]  ;;  %v437_v27 = vld [vmem:[#allocation2 + $0x40] sm:$0xff]  ;;  %v438_v28 = vld [vmem:[#allocation2 + $0xc8] sm:$0xff] }
  0x79   : > { %614 = vmatpush.bf16.msra.mxu0 %v1132_v39  ;;  %1200 = vmatpush.bf16.msra.mxu2 %v1132_v39  ;;  %v436_v16 = vld [vmem:[#allocation2 + $0x58] sm:$0xff]  ;;  %v423_v30 = vld [vmem:[#allocation2 + $0x50] sm:$0xff]  ;;  %v424_v33 = vld [vmem:[#allocation2 + $0x68] sm:$0xff] }
  0x7a   : > { %663 = vmatpush.bf16.msra.mxu1 %v1136_v40  ;;  %1208 = vmatpush.bf16.msra.mxu3 %v1136_v40  ;;  %v421_v18 = vld [vmem:[#allocation2 + $0xd8] sm:$0xff]  ;;  %v439_v39 = vld [vmem:[#allocation2 + $0xe0] sm:$0xff]  ;;  %v440_v40 = vld [vmem:[#allocation2 + $0x90] sm:$0xff] }
  0x7b   : > { %v422_v21 = vld [vmem:[#allocation2 + $0x18] sm:$0xff]  ;;  %v425_v42 = vld [vmem:[#allocation2 + $0x30] sm:$0xff]  ;;  %v427_v54 = vld [vmem:[#allocation2 + $0x80] sm:$0xff] }
  0x7d   : > { %615 = vmatpush.bf16.msra.mxu0 %v1124_v45  ;;  %1201 = vmatpush.bf16.msra.mxu2 %v1124_v45  ;;  %v426_v45 = vld [vmem:[#allocation2 + $0x48] sm:$0xff] }
  0x7e   : > { %664 = vmatpush.bf16.msra.mxu1 %v1128_v46  ;;  %1209 = vmatpush.bf16.msra.mxu3 %v1128_v46 }
  0x81   : > { %616 = vmatpush.bf16.msra.mxu0 %v1116_v51  ;;  %1202 = vmatpush.bf16.msra.mxu2 %v1116_v51  ;;  %v441_v51 = vld [vmem:[#allocation2 + $0x70] sm:$0xff] }
  0x82   : > { %665 = vmatpush.bf16.msra.mxu1 %v1120_v52  ;;  %1210 = vmatpush.bf16.msra.mxu3 %v1120_v52  ;;  %v442_v52 = vld [vmem:[#allocation2 + $0xc0] sm:$0xff] }
  0x85   : > { %617 = vmatpush.bf16.msra.mxu0 %v1108_v57  ;;  %1203 = vmatpush.bf16.msra.mxu2 %v1108_v57  ;;  %v428_v57 = vld [vmem:[#allocation2 + $0x88] sm:$0xff] }
  0x86   : > { %666 = vmatpush.bf16.msra.mxu1 %v1112_v58  ;;  %1211 = vmatpush.bf16.msra.mxu3 %v1112_v58 }
  0x89   : > { %618 = vmatpush.bf16.msra.mxu0 %v1100_v63  ;;  %1204 = vmatpush.bf16.msra.mxu2 %v1100_v63  ;;  %v443_v63 = vld [vmem:[#allocation2 + $0xa8] sm:$0xff] }
  0x8a   : > { %667 = vmatpush.bf16.msra.mxu1 %v1104_v0  ;;  %1212 = vmatpush.bf16.msra.mxu3 %v1104_v0  ;;  %v444_v0 = vld [vmem:[#allocation2 + $0xd0] sm:$0xff] }
  0x8c   : > { %619 = vmatmul.bf16.vlgmr.msra.gmra.mxu0 %v1171_v1  ;;  %639 = vmatmul.bf16.vlgmr.msra.gmra.mxu2 %v1175_v2 }
  0x8d   : > { %668 = vmatmul.bf16.vlgmr.msra.gmra.mxu1 %v1171_v1  ;;  %688 = vmatmul.bf16.vlgmr.msra.gmra.mxu3 %v1175_v2  ;;  %v429_v2 = vld [vmem:[#allocation2 + $0xe8] sm:$0xff] }
  0x9c   : > { %624 = vmatmul.bf16.gmra.mxu0 %v1172_v3  ;;  %644 = vmatmul.bf16.gmra.mxu2 %v1176_v4 }
  0x9d   : > { %673 = vmatmul.bf16.gmra.mxu1 %v1172_v3  ;;  %693 = vmatmul.bf16.gmra.mxu3 %v1176_v4 }
  0xac   : > { %629 = vmatmul.bf16.gmra.mxu0 %v1173_v5  ;;  %649 = vmatmul.bf16.gmra.mxu2 %v1177_v6 }
  0xad   : > { %678 = vmatmul.bf16.gmra.mxu1 %v1173_v5  ;;  %698 = vmatmul.bf16.gmra.mxu3 %v1177_v6  ;;  %v430_v5 = vld [vmem:[#allocation2 + $0xb8] sm:$0xff] }
  0xbc   : > { %634 = vmatmul.bf16.gmra.mxu0 %v1174_v7  ;;  %654 = vmatmul.bf16.gmra.mxu2 %v1178_v8 }
  0xbd   : > { %683 = vmatmul.bf16.gmra.mxu1 %v1174_v7  ;;  %703 = vmatmul.bf16.gmra.mxu3 %v1178_v8 }
 0x109   : > { %v620_v11 = vpop.f32.mrf.mxu0 }
 0x10a   : > { %v709_v12 = vadd.f32 %v620_v11, %v419_v9  ;;  %v669_v13 = vpop.f32.mrf.mxu1  ;;  %v445_v11 = vld [vmem:[#allocation2 + $0x10] sm:$0xff] }
 0x10b   : > { %v710_v14 = vadd.f32 %v669_v13, %v420_v10 }
 0x10c   : > { %741 = vst [vmem:[#allocation2 + $0xb0] sm:$0xff] %v709_v12  ;;  %v446_v12 = vld [vmem:[#allocation2 + $0x28] sm:$0xff] }
 0x10d   : > { %742 = vst [vmem:[#allocation2] sm:$0xff] %v710_v14  ;;  %v431_v14 = vld [vmem:[#allocation2 + $0x60] sm:$0xff] }
 0x10f   : > { %v640_v17 = vpop.f32.mrf.mxu2 }
 0x110   : > { %v725_v19 = vadd.f32 %v640_v17, %v435_v15  ;;  %v689_v20 = vpop.f32.mrf.mxu3  ;;  %v432_v17 = vld [vmem:[#allocation2 + $0xf0] sm:$0xff] }
 0x111   : > { %v726_v22 = vadd.f32 %v689_v20, %v436_v16  ;;  %v622_v23 = vpop.f32.mrf.mxu0 }
 0x112   : > { %757 = vst [vmem:[#allocation2 + $0x38] sm:$0xff] %v725_v19  ;;  %v711_v24 = vadd.f32 %v622_v23, %v421_v18  ;;  %v671_v25 = vpop.f32.mrf.mxu1  ;;  %v447_v23 = vld [vmem:[#allocation2 + $0xa0] sm:$0xff] }
 0x113   : > { %758 = vst [vmem:[#allocation2 + $0x58] sm:$0xff] %v726_v22  ;;  %v712_v26 = vadd.f32 %v671_v25, %v422_v21 }
 0x114   : > { %743 = vst [vmem:[#allocation2 + $0xd8] sm:$0xff] %v711_v24  ;;  %v448_v24 = vld [vmem:[#allocation2 + $0xf8] sm:$0xff] }
 0x115   : > { %744 = vst [vmem:[#allocation2 + $0x18] sm:$0xff] %v712_v26  ;;  %v433_v26 = vld [vmem:[#allocation2 + $0x8] sm:$0xff] }
 0x117   : > { %v642_v29 = vpop.f32.mrf.mxu2 }
 0x118   : > { %v727_v31 = vadd.f32 %v642_v29, %v437_v27  ;;  %v691_v32 = vpop.f32.mrf.mxu3  ;;  %v434_v29 = vld [vmem:[#allocation2 + $0x78] sm:$0xff] }
 0x119   : > { %v728_v34 = vadd.f32 %v691_v32, %v438_v28  ;;  %v625_v35 = vpop.f32.mrf.mxu0 }
 0x11a   : > { %759 = vst [vmem:[#allocation2 + $0x40] sm:$0xff] %v727_v31  ;;  %v713_v36 = vadd.f32 %v625_v35, %v423_v30  ;;  %v674_v37 = vpop.f32.mrf.mxu1  ;;  %v449_v35 = vld [vmem:[#allocation2 + $0x20] sm:$0xff] }
 0x11b   : > { %760 = vst [vmem:[#allocation2 + $0xc8] sm:$0xff] %v728_v34  ;;  %v714_v38 = vadd.f32 %v674_v37, %v424_v33 }
 0x11c   : > { %745 = vst [vmem:[#allocation2 + $0x50] sm:$0xff] %v713_v36  ;;  %v450_v36 = vld [vmem:[#allocation2 + $0x98] sm:$0xff] }
 0x11d   : > { %746 = vst [vmem:[#allocation2 + $0x68] sm:$0xff] %v714_v38 }
 0x11f   : > { %v645_v41 = vpop.f32.mrf.mxu2 }
 0x120   : > { %v729_v43 = vadd.f32 %v645_v41, %v439_v39  ;;  %v694_v44 = vpop.f32.mrf.mxu3 }
 0x121   : > { %v730_v46 = vadd.f32 %v694_v44, %v440_v40  ;;  %v627_v47 = vpop.f32.mrf.mxu0 }
 0x122   : > { %761 = vst [vmem:[#allocation2 + $0xe0] sm:$0xff] %v729_v43  ;;  %v715_v48 = vadd.f32 %v627_v47, %v425_v42  ;;  %v676_v49 = vpop.f32.mrf.mxu1 }
 0x123   : > { %762 = vst [vmem:[#allocation2 + $0x90] sm:$0xff] %v730_v46  ;;  %v716_v50 = vadd.f32 %v676_v49, %v426_v45 }
 0x124   : > { %747 = vst [vmem:[#allocation2 + $0x30] sm:$0xff] %v715_v48 }
 0x125   : > { %748 = vst [vmem:[#allocation2 + $0x48] sm:$0xff] %v716_v50 }
 0x127   : > { %v647_v53 = vpop.f32.mrf.mxu2 }
 0x128   : > { %v731_v55 = vadd.f32 %v647_v53, %v441_v51  ;;  %v696_v56 = vpop.f32.mrf.mxu3 }
 0x129   : > { %v732_v58 = vadd.f32 %v696_v56, %v442_v52  ;;  %v630_v59 = vpop.f32.mrf.mxu0 }
 0x12a   : > { %763 = vst [vmem:[#allocation2 + $0x70] sm:$0xff] %v731_v55  ;;  %v717_v60 = vadd.f32 %v630_v59, %v427_v54  ;;  %v679_v61 = vpop.f32.mrf.mxu1 }
 0x12b   : > { %764 = vst [vmem:[#allocation2 + $0xc0] sm:$0xff] %v732_v58  ;;  %v718_v62 = vadd.f32 %v679_v61, %v428_v57 }
 0x12c   : > { %749 = vst [vmem:[#allocation2 + $0x80] sm:$0xff] %v717_v60 }
 0x12d   : > { %750 = vst [vmem:[#allocation2 + $0x88] sm:$0xff] %v718_v62 }
 0x12f   : > { %v650_v1 = vpop.f32.mrf.mxu2 }
 0x130   : > { %v733_v3 = vadd.f32 %v650_v1, %v443_v63  ;;  %v699_v4 = vpop.f32.mrf.mxu3 }
 0x131   : > { %v734_v6 = vadd.f32 %v699_v4, %v444_v0  ;;  %v632_v7 = vpop.f32.mrf.mxu0 }
 0x132   : > { %765 = vst [vmem:[#allocation2 + $0xa8] sm:$0xff] %v733_v3  ;;  %v719_v8 = vadd.f32 %v632_v7, %v429_v2  ;;  %v681_v9 = vpop.f32.mrf.mxu1 }
 0x133   : > { %766 = vst [vmem:[#allocation2 + $0xd0] sm:$0xff] %v734_v6  ;;  %v720_v10 = vadd.f32 %v681_v9, %v430_v5 }
 0x134   : > { %751 = vst [vmem:[#allocation2 + $0xe8] sm:$0xff] %v719_v8 }
 0x135   : > { %752 = vst [vmem:[#allocation2 + $0xb8] sm:$0xff] %v720_v10 }
 0x137   : > { %v652_v13 = vpop.f32.mrf.mxu2 }
 0x138   : > { %v735_v15 = vadd.f32 %v652_v13, %v445_v11  ;;  %v701_v16 = vpop.f32.mrf.mxu3 }
 0x139   : > { %v736_v18 = vadd.f32 %v701_v16, %v446_v12  ;;  %v635_v19 = vpop.f32.mrf.mxu0 }
 0x13a   : > { %767 = vst [vmem:[#allocation2 + $0x10] sm:$0xff] %v735_v15  ;;  %v721_v20 = vadd.f32 %v635_v19, %v431_v14  ;;  %v684_v21 = vpop.f32.mrf.mxu1 }
 0x13b   : > { %768 = vst [vmem:[#allocation2 + $0x28] sm:$0xff] %v736_v18  ;;  %v722_v22 = vadd.f32 %v684_v21, %v432_v17 }
 0x13c   : > { %753 = vst [vmem:[#allocation2 + $0x60] sm:$0xff] %v721_v20 }
 0x13d   : > { %754 = vst [vmem:[#allocation2 + $0xf0] sm:$0xff] %v722_v22 }
 0x13f   : > { %v655_v25 = vpop.f32.mrf.mxu2 }
 0x140   : > { %v737_v27 = vadd.f32 %v655_v25, %v447_v23  ;;  %v704_v28 = vpop.f32.mrf.mxu3 }
 0x141   : > { %v738_v30 = vadd.f32 %v704_v28, %v448_v24  ;;  %v637_v31 = vpop.f32.mrf.mxu0 }
 0x142   : > { %769 = vst [vmem:[#allocation2 + $0xa0] sm:$0xff] %v737_v27  ;;  %v723_v32 = vadd.f32 %v637_v31, %v433_v26  ;;  %v686_v33 = vpop.f32.mrf.mxu1 }
 0x143   : > { %770 = vst [vmem:[#allocation2 + $0xf8] sm:$0xff] %v738_v30  ;;  %v724_v34 = vadd.f32 %v686_v33, %v434_v29 }
 0x144   : > { %755 = vst [vmem:[#allocation2 + $0x8] sm:$0xff] %v723_v32 }
 0x145   : > { %756 = vst [vmem:[#allocation2 + $0x78] sm:$0xff] %v724_v34 }
 0x147   : > { %v657_v37 = vpop.f32.mrf.mxu2  ;;  %776 = sbr.rel (%p1161_p6) target bundleno = 367 (0x16f), region = 81 }
 0x148   : > { %v739_v38 = vadd.f32 %v657_v37, %v449_v35  ;;  %v706_v39 = vpop.f32.mrf.mxu3 }
 0x149   : > { %v740_v40 = vadd.f32 %v706_v39, %v450_v36 }
 0x14a   : > { %771 = vst [vmem:[#allocation2 + $0x20] sm:$0xff] %v739_v38 }
 0x14b   : > { %772 = vst [vmem:[#allocation2 + $0x98] sm:$0xff] %v740_v40 }
 0x14c   : > { %v777_v41 = vld [vmem:[#allocation2 + $0xb0] sm:$0xff]  ;;  %v809_v42 = vld [vmem:[%s1571_s15] sm:$0xff]  ;;  %v810_v45 = vld [vmem:[%s1571_s15 + $0x8] sm:$0xff] }
 0x14d   : > { %v778_v43 = vld [vmem:[#allocation2] sm:$0xff]  ;;  %v841_v44 = vadd.f32 %v809_v42, %v777_v41  ;;  %v779_v46 = vld [vmem:[#allocation2 + $0xd8] sm:$0xff]  ;;  %v811_v47 = vld [vmem:[%s1571_s15 + $0x10] sm:$0xff] }
 0x14e   : > { %v842_v48 = vadd.f32 %v810_v45, %v778_v43  ;;  %v843_v49 = vadd.f32 %v811_v47, %v779_v46  ;;  %v780_v50 = vld [vmem:[#allocation2 + $0x18] sm:$0xff]  ;;  %v781_v52 = vld [vmem:[#allocation2 + $0x50] sm:$0xff]  ;;  %v813_v54 = vld [vmem:[%s1571_s15 + $0x20] sm:$0xff] }
 0x14f   : > { %v812_v51 = vld [vmem:[%s1571_s15 + $0x18] sm:$0xff]  ;;  %873 = vst [vmem:[%s1575_s5] sm:$0xff] %v841_v44  ;;  %v782_v55 = vld [vmem:[#allocation2 + $0x68] sm:$0xff]  ;;  %v845_v57 = vadd.f32 %v813_v54, %v781_v52  ;;  %v783_v59 = vld [vmem:[#allocation2 + $0x30] sm:$0xff] }
 0x150   : > { %v844_v53 = vadd.f32 %v812_v51, %v780_v50  ;;  %v814_v56 = vld [vmem:[%s1571_s15 + $0x28] sm:$0xff]  ;;  %874 = vst [vmem:[%s1575_s5 + $0x8] sm:$0xff] %v842_v48  ;;  %v815_v60 = vld [vmem:[%s1571_s15 + $0x30] sm:$0xff]  ;;  %v816_v63 = vld [vmem:[%s1571_s15 + $0x38] sm:$0xff] }
 0x151   : > { %v846_v58 = vadd.f32 %v814_v56, %v782_v55  ;;  %v784_v61 = vld [vmem:[#allocation2 + $0x48] sm:$0xff]  ;;  %875 = vst [vmem:[%s1575_s5 + $0x10] sm:$0xff] %v843_v49  ;;  %v847_v62 = vadd.f32 %v815_v60, %v783_v59  ;;  %v785_v0 = vld [vmem:[#allocation2 + $0x80] sm:$0xff]  ;;  %v819_v7 = vld [vmem:[%s1571_s15 + $0x50] sm:$0xff] }
 0x152   : > { %v817_v1 = vld [vmem:[%s1571_s15 + $0x40] sm:$0xff]  ;;  %876 = vst [vmem:[%s1575_s5 + $0x18] sm:$0xff] %v844_v53  ;;  %v848_v2 = vadd.f32 %v816_v63, %v784_v61  ;;  %v786_v3 = vld [vmem:[#allocation2 + $0x88] sm:$0xff]  ;;  %v788_v8 = vld [vmem:[#allocation2 + $0xb8] sm:$0xff] }
 0x153   : > { %v818_v4 = vld [vmem:[%s1571_s15 + $0x48] sm:$0xff]  ;;  %877 = vst [vmem:[%s1575_s5 + $0x20] sm:$0xff] %v845_v57  ;;  %v849_v6 = vadd.f32 %v817_v1, %v785_v0  ;;  %v820_v9 = vld [vmem:[%s1571_s15 + $0x58] sm:$0xff]  ;;  %v789_v11 = vld [vmem:[#allocation2 + $0x60] sm:$0xff] }
 0x154   : > { %v787_v5 = vld [vmem:[#allocation2 + $0xe8] sm:$0xff]  ;;  %878 = vst [vmem:[%s1575_s5 + $0x28] sm:$0xff] %v846_v58  ;;  %v850_v10 = vadd.f32 %v818_v4, %v786_v3  ;;  %v821_v12 = vld [vmem:[%s1571_s15 + $0x60] sm:$0xff]  ;;  %v790_v14 = vld [vmem:[#allocation2 + $0xf0] sm:$0xff]  ;;  %v852_v16 = vadd.f32 %v820_v9, %v788_v8 }
 0x155   : > { %879 = vst [vmem:[%s1575_s5 + $0x30] sm:$0xff] %v847_v62  ;;  %v851_v13 = vadd.f32 %v819_v7, %v787_v5  ;;  %v822_v15 = vld [vmem:[%s1571_s15 + $0x68] sm:$0xff]  ;;  %v823_v18 = vld [vmem:[%s1571_s15 + $0x70] sm:$0xff]  ;;  %v853_v19 = vadd.f32 %v821_v12, %v789_v11  ;;  %v792_v20 = vld [vmem:[#allocation2 + $0x78] sm:$0xff] }
 0x156   : > { %880 = vst [vmem:[%s1575_s5 + $0x38] sm:$0xff] %v848_v2  ;;  %v791_v17 = vld [vmem:[#allocation2 + $0x8] sm:$0xff]  ;;  %v824_v21 = vld [vmem:[%s1571_s15 + $0x78] sm:$0xff]  ;;  %v854_v22 = vadd.f32 %v822_v15, %v790_v14  ;;  %v825_v24 = vld [vmem:[%s1571_s15 + $0x80] sm:$0xff] }
 0x157   : > { %881 = vst [vmem:[%s1575_s5 + $0x40] sm:$0xff] %v849_v6  ;;  %v793_v23 = vld [vmem:[#allocation2 + $0x38] sm:$0xff]  ;;  %v855_v25 = vadd.f32 %v823_v18, %v791_v17  ;;  %v826_v27 = vld [vmem:[%s1571_s15 + $0x88] sm:$0xff]  ;;  %v856_v28 = vadd.f32 %v824_v21, %v792_v20  ;;  %v795_v29 = vld [vmem:[#allocation2 + $0x40] sm:$0xff] }
 0x158   : > { %882 = vst [vmem:[%s1575_s5 + $0x48] sm:$0xff] %v850_v10  ;;  %v794_v26 = vld [vmem:[#allocation2 + $0x58] sm:$0xff]  ;;  %v827_v30 = vld [vmem:[%s1571_s15 + $0x90] sm:$0xff]  ;;  %v857_v31 = vadd.f32 %v825_v24, %v793_v23  ;;  %v796_v32 = vld [vmem:[#allocation2 + $0xc8] sm:$0xff] }
 0x159   : > { %883 = vst [vmem:[%s1575_s5 + $0x50] sm:$0xff] %v851_v13  ;;  %v828_v33 = vld [vmem:[%s1571_s15 + $0x98] sm:$0xff]  ;;  %v858_v34 = vadd.f32 %v826_v27, %v794_v26  ;;  %v797_v35 = vld [vmem:[#allocation2 + $0xe0] sm:$0xff]  ;;  %v859_v37 = vadd.f32 %v827_v30, %v795_v29  ;;  %v798_v38 = vld [vmem:[#allocation2 + $0x90] sm:$0xff] }
 0x15a   : > { %884 = vst [vmem:[%s1575_s5 + $0x58] sm:$0xff] %v852_v16  ;;  %v829_v36 = vld [vmem:[%s1571_s15 + $0xa0] sm:$0xff]  ;;  %v830_v39 = vld [vmem:[%s1571_s15 + $0xa8] sm:$0xff]  ;;  %v860_v40 = vadd.f32 %v828_v33, %v796_v32  ;;  %v799_v41 = vld [vmem:[#allocation2 + $0x70] sm:$0xff] }
 0x15b   : > { %885 = vst [vmem:[%s1575_s5 + $0x60] sm:$0xff] %v853_v19  ;;  %v831_v42 = vld [vmem:[%s1571_s15 + $0xb0] sm:$0xff]  ;;  %v861_v43 = vadd.f32 %v829_v36, %v797_v35  ;;  %v800_v44 = vld [vmem:[#allocation2 + $0xc0] sm:$0xff]  ;;  %v832_v45 = vld [vmem:[%s1571_s15 + $0xb8] sm:$0xff]  ;;  %v862_v46 = vadd.f32 %v830_v39, %v798_v38 }
 0x15c   : > { %886 = vst [vmem:[%s1575_s5 + $0x68] sm:$0xff] %v854_v22  ;;  %v801_v47 = vld [vmem:[#allocation2 + $0xa8] sm:$0xff]  ;;  %v833_v48 = vld [vmem:[%s1571_s15 + $0xc0] sm:$0xff]  ;;  %v863_v49 = vadd.f32 %v831_v42, %v799_v41  ;;  %v802_v50 = vld [vmem:[#allocation2 + $0xd0] sm:$0xff]  ;;  %v864_v52 = vadd.f32 %v832_v45, %v800_v44 }
 0x15d   : > { %887 = vst [vmem:[%s1575_s5 + $0x70] sm:$0xff] %v855_v25  ;;  %v834_v51 = vld [vmem:[%s1571_s15 + $0xc8] sm:$0xff]  ;;  %v803_v53 = vld [vmem:[#allocation2 + $0x10] sm:$0xff]  ;;  %v865_v55 = vadd.f32 %v833_v48, %v801_v47  ;;  %v836_v57 = vld [vmem:[%s1571_s15 + $0xd8] sm:$0xff] }
 0x15e   : > { %888 = vst [vmem:[%s1575_s5 + $0x78] sm:$0xff] %v856_v28  ;;  %v835_v54 = vld [vmem:[%s1571_s15 + $0xd0] sm:$0xff]  ;;  %v804_v56 = vld [vmem:[#allocation2 + $0x28] sm:$0xff]  ;;  %v866_v58 = vadd.f32 %v834_v51, %v802_v50  ;;  %v805_v59 = vld [vmem:[#allocation2 + $0xa0] sm:$0xff] }
 0x15f   : > { %889 = vst [vmem:[%s1575_s5 + $0x80] sm:$0xff] %v857_v31  ;;  %v837_v60 = vld [vmem:[%s1571_s15 + $0xe0] sm:$0xff]  ;;  %v867_v61 = vadd.f32 %v835_v54, %v803_v53  ;;  %v806_v62 = vld [vmem:[#allocation2 + $0xf8] sm:$0xff]  ;;  %v838_v63 = vld [vmem:[%s1571_s15 + $0xe8] sm:$0xff]  ;;  %v868_v0 = vadd.f32 %v836_v57, %v804_v56 }
 0x160   : > { %890 = vst [vmem:[%s1575_s5 + $0x88] sm:$0xff] %v858_v34  ;;  %v807_v1 = vld [vmem:[#allocation2 + $0x20] sm:$0xff]  ;;  %v839_v2 = vld [vmem:[%s1571_s15 + $0xf0] sm:$0xff]  ;;  %v869_v3 = vadd.f32 %v837_v60, %v805_v59  ;;  %v808_v4 = vld [vmem:[#allocation2 + $0x98] sm:$0xff]  ;;  %v870_v6 = vadd.f32 %v838_v63, %v806_v62 }
 0x161   : > { %891 = vst [vmem:[%s1575_s5 + $0x90] sm:$0xff] %v859_v37  ;;  %v840_v5 = vld [vmem:[%s1571_s15 + $0xf8] sm:$0xff]  ;;  %v871_v7 = vadd.f32 %v839_v2, %v807_v1 }
 0x162   : > { %892 = vst [vmem:[%s1575_s5 + $0x98] sm:$0xff] %v860_v40  ;;  %v872_v8 = vadd.f32 %v840_v5, %v808_v4 }
 0x163   : > { %893 = vst [vmem:[%s1575_s5 + $0xa0] sm:$0xff] %v861_v43 }
 0x164   : > { %894 = vst [vmem:[%s1575_s5 + $0xa8] sm:$0xff] %v862_v46 }
 0x165   : > { %895 = vst [vmem:[%s1575_s5 + $0xb0] sm:$0xff] %v863_v49 }
 0x166   : > { %896 = vst [vmem:[%s1575_s5 + $0xb8] sm:$0xff] %v864_v52 }
 0x167   : > { %897 = vst [vmem:[%s1575_s5 + $0xc0] sm:$0xff] %v865_v55 }
 0x168   : > { %898 = vst [vmem:[%s1575_s5 + $0xc8] sm:$0xff] %v866_v58 }
 0x169   : > { %899 = vst [vmem:[%s1575_s5 + $0xd0] sm:$0xff] %v867_v61 }
 0x16a   : > { %900 = vst [vmem:[%s1575_s5 + $0xd8] sm:$0xff] %v868_v0 }
 0x16b   : > { %901 = vst [vmem:[%s1575_s5 + $0xe0] sm:$0xff] %v869_v3 }
 0x16c   : > { %902 = vst [vmem:[%s1575_s5 + $0xe8] sm:$0xff] %v870_v6 }
 0x16d   : > { %903 = vst [vmem:[%s1575_s5 + $0xf0] sm:$0xff] %v871_v7 }
 0x16e   : > { %904 = vst [vmem:[%s1575_s5 + $0xf8] sm:$0xff] %v872_v8 }
 0x16f PF: > { %s1196_s0 = sshll.u32 %s1401_s18, 8  ;;  %s921_s10 = sshll.u32 %s1575_s5, 4  ;;  %s922_s10 = int_to_ptr.vmem [resolvable:$true] %s921_s10 }
 0x170   : > { %s920_s9 = scalar_lea.hbm %s1737_s3, %s1196_s0  ;;  %s1746_s22 = sand.u32 1, %s1381_s13  }
 0x171   : > { %s923_s11 = sshll.u32 %s920_s9, 4  ;;  %s906_s23 = scalar_lea.sflag [#allocation5], %s1746_s22  ;;  %s924_s11 = int_to_ptr.hbm [resolvable:$true] %s923_s11 }
 0x172   : > { %s1317_s27 = sshra.s32 %s924_s11, 4  ;;  %s1323_s18 = scalar_lea.hbm %s1737_s3, 512  ;;  %s1318_s27 = int_to_ptr.hbm [resolvable:$true] %s1317_s27 }
 0x173   : > { %s1319_s4 = scalar_lea.hbm %s1318_s27, 256  ;;  %p1324_p11 = scmp.lt.s32.totalorder %s1318_s27, %s1737_s3 }
 0x174   : > { %p1320_p8 = scmp.ne.s32.totalorder %s1318_s27, %s1319_s4  ;;  %p1325_p13 = scmp.lt.s32.totalorder %s1323_s18, %s1319_s4 }
 0x176   : > { %p1321_p9 = pnand %p1320_p8, %p1510_p7  ;;  %p1326_p0 = por %p1325_p13, %p1324_p11 }
 0x178   : > { %p1322_p10 = pneg %p1321_p9 }
 0x17a   : > { %p1327_p1 = pnand %p1326_p0, %p1322_p10 }
 0x17c   : > { %1330 = shalt.err (!%p1327_p1)
}
 0x17d   : > { %s1416_s5 = smov 256   ;;  %s1417_s0 = smov 16  }
 0x17e   : > { %1213 = dma.vmem_to_hbm [thread:$0]  (%p1510_p7), %s922_s10, 4096, %s924_s11, %s906_s23, %s1416_s5, %s1416_s5, %s1417_s0  }
 0x17f PF: > { %p1219_p2 = scmp.ge.s32.totalorder %s1413_s21, 2  ;;  %s938_s17 = sand.u32 1, %s1377_s12  }
 0x180   : > { %s939_s25 = scalar_lea.sflag [#allocation5], %s938_s17 }
 0x181   : > { %p1216_p3 = pnand %p1219_p2, %p1518_p12 }
 0x183   : > { %p1217_p4 = pneg %p1216_p3 }
 0x185   : > { %1372 = dma.done.wait (%p1217_p4), %s939_s25, 4096  }
 0x186   : > { %1374 = vsyncadd (%p1217_p4), %s939_s25, 4294963200  ;;  %s16_s21 = sadd.s32 1, %s1413_s21   ;;  %s1747_s30 = sld [smem:[#allocation7_spill]] }
 0x187   : > { %p13_p5 = scmp.ge.s32.totalorder %s16_s21, 10   ;;  %s1748_s12 = smov %s1381_s13 }
 0x188   : > { %s1749_s13 = smov %s1385_s14  ;;  %s1750_s14 = smov %s1523_s7 }
 0x189   : > { %s1751_s15 = smov %s1393_s16  ;;  %s1752_s16 = smov %s1526_s8 }
 0x18a   : > { %s1753_s17 = smov %s1405_s19  ;;  %s1754_s18 = smov %s1409_s20 }
 0x18b   : > { %s1755_s19 = smov %s1758_s24  ;;  %15 = sbr.rel (!%p13_p5) target bundleno = 8 (0x8), region = 127 }
 0x18c   : > { %s1756_s20 = smov %s1747_s30 }
 0x190   :  { %945 = vsyncpa [#allocation5], 1 }
 0x191   :  { %947 = vsyncpa [#allocation5 + $0x1], 1 }

</bundles_post_ra>
